<compile_context>
chip_gen: v7x
topology: tpu7x:2x2x1
jax: 0.10.0
libtpu: 0.0.40
codegen_flags: <defaults>
</compile_context>

<pallas_src>
import jax
import jax.numpy as jnp
from jax.experimental import pallas as pl
from jax.experimental.pallas import tpu as pltpu


# ------------------------------------------------------------------------------------
# Tile-size helpers (VMEM-budget / sublane-alignment aware).
# ------------------------------------------------------------------------------------
def _pick_fr(n_frames, hw, ck, feat_dim, vmem_budget_bytes=24 * 1024 * 1024):
    """Frames per CNN grid step. Budget keeps the block under v7x's 32 MiB scoped
    default; v5e/v6e (128 MiB VMEM) could go ~2x larger but this is safe everywhere."""
    def vmem_bytes(fr):
        patch = 2 * fr * hw * max(ck, 128) * 2   # double-buffered bf16 patch tile (lane-padded)
        act = fr * hw * feat_dim * 4             # f32 conv activation
        pool = fr * fr * hw * 2                  # bf16 pooling matrix (resident)
        return patch + act + pool
    legal = [fr for fr in range(1, n_frames + 1)
             if n_frames % fr == 0 and (fr % 8 == 0 or fr == n_frames)]
    fits = [fr for fr in legal if vmem_bytes(fr) <= vmem_budget_bytes]
    return max(fits) if fits else min(legal)


def _pick_row_tile(n_rows, max_tile=256):
    legal = [tm for tm in range(1, min(n_rows, max_tile) + 1)
             if n_rows % tm == 0 and (tm % 8 == 0 or tm == n_rows)]
    return max(legal) if legal else n_rows


def _pick_time_tile(seq_len, max_tile=8):
    if seq_len <= max_tile:
        return seq_len
    legal = [tt for tt in range(1, max_tile + 1) if seq_len % tt == 0 and tt % 8 == 0]
    return max(legal) if legal else seq_len


# ------------------------------------------------------------------------------------
# Stage 1: CNN backbone features (parallel over FR-frame blocks).
#   conv3x3 as one (FR*HW, C*9) x (C*9, F) bf16 matmul -> f32 bias + ReLU (VPU)
#   global average pool as a bf16 (FR, FR*HW) x (FR*HW, F) matmul, f32 accumulation
#   emits compact bf16 per-frame features (FR, F).
# ------------------------------------------------------------------------------------
def _cnn_feat_kernel(patch_ref, wconv_ref, bconv_ref, pool_ref, feat_ref):
    act = jnp.dot(patch_ref[...], wconv_ref[...], preferred_element_type=jnp.float32)
    act = jnp.maximum(act + bconv_ref[...], 0.0)                 # conv bias + ReLU (f32)
    feat = jnp.dot(pool_ref[...], act.astype(jnp.bfloat16),      # bf16 MXU pool, f32 acc
                   preferred_element_type=jnp.float32)           # (FR, F)
    feat_ref[...] = feat.astype(feat_ref.dtype)


def cnn_features(patches, w_conv, b_conv, n_frames, hw):
    """patches: (N*HW, C*9) bf16, frame-major rows -> per-frame features (N, F) bf16."""
    feat_dim, c = w_conv.shape[0], w_conv.shape[1]
    ck = c * 9
    fr = _pick_fr(n_frames, hw, ck, feat_dim)

    w_mat = w_conv.reshape(feat_dim, ck).T.astype(jnp.bfloat16)           # (C*9, F)
    b_mat = b_conv.reshape(1, feat_dim).astype(jnp.float32)
    # Segmented-mean pooling matrix in bf16 (1/HW exact in bf16 for HW = 256).
    pool = ((jnp.arange(fr * hw)[None, :] // hw == jnp.arange(fr)[:, None])
            .astype(jnp.float32) / float(hw)).astype(jnp.bfloat16)        # (FR, FR*HW)

    return pl.pallas_call(
        _cnn_feat_kernel,
        out_shape=jax.ShapeDtypeStruct((n_frames, feat_dim), jnp.bfloat16),
        grid_spec=pltpu.PrefetchScalarGridSpec(
            num_scalar_prefetch=0,
            grid=(n_frames // fr,),
            in_specs=[
                pl.BlockSpec((fr * hw, ck), lambda i: (i, 0)),
                pl.BlockSpec((ck, feat_dim), lambda i: (0, 0)),
                pl.BlockSpec((1, feat_dim), lambda i: (0, 0)),
                pl.BlockSpec((fr, fr * hw), lambda i: (0, 0)),
            ],
            out_specs=pl.BlockSpec((fr, feat_dim), lambda i: (i, 0)),
        ),
        compiler_params=pltpu.CompilerParams(
            dimension_semantics=("parallel",),
            vmem_limit_bytes=32 * 1024 * 1024),
    )(patches, w_mat, b_mat, pool)


# ------------------------------------------------------------------------------------
# Stage 2: gate preactivations  gates_x = feats @ W_ih^T + (b_ih + b_hh)
# as a blocked matmul over all N = T*B frames (real M dimension, independent of FR).
# ------------------------------------------------------------------------------------
def _gate_proj_kernel(feat_ref, wih_ref, bias_ref, out_ref):
    out_ref[...] = (jnp.dot(feat_ref[...], wih_ref[...],
                            preferred_element_type=jnp.float32) + bias_ref[...])


def gate_projection(feats, w_ih, b_ih, b_hh):
    """feats: (N, F) bf16 -> gate preactivations (N, 4H) f32."""
    n_rows, feat_dim = feats.shape
    gates = w_ih.shape[0]                                   # 4 * hidden
    tm = _pick_row_tile(n_rows)
    wih_t = w_ih.T.astype(jnp.bfloat16)                     # (F, 4H)
    bias = (b_ih + b_hh).reshape(1, gates).astype(jnp.float32)
    return pl.pallas_call(
        _gate_proj_kernel,
        out_shape=jax.ShapeDtypeStruct((n_rows, gates), jnp.float32),
        grid_spec=pltpu.PrefetchScalarGridSpec(
            num_scalar_prefetch=0,
            grid=(n_rows // tm,),
            in_specs=[
                pl.BlockSpec((tm, feat_dim), lambda i: (i, 0)),
                pl.BlockSpec((feat_dim, gates), lambda i: (0, 0)),
                pl.BlockSpec((1, gates), lambda i: (0, 0)),
            ],
            out_specs=pl.BlockSpec((tm, gates), lambda i: (i, 0)),
        ),
        compiler_params=pltpu.CompilerParams(dimension_semantics=("parallel",)),
    )(feats, wih_t, bias)


# ------------------------------------------------------------------------------------
# Stage 3: LSTM recurrence, time-blocked grid with h/c carried in VMEM scratch.
# PyTorch gate order (i, f, g, o), zero initial state (hx=None).
# Output is written batch-first (B, T, H) directly (no wrapper transpose).
# ------------------------------------------------------------------------------------
def lstm_recurrence(gx, w_hh, hidden):
    """gx: (T, B, 4H) f32 precomputed gate preactivations -> out (B,T,H), h_n, c_n."""
    seq_len, batch, gates = gx.shape
    whh_t = w_hh.T.astype(jnp.bfloat16)                     # (H, 4H)
    t_tile = _pick_time_tile(seq_len)
    # v7x: split the batch across the two TensorCores when each half stays
    # sublane-aligned (>= 8 rows); neutral on single-core v5e / v6e.
    b_blk = batch // 2 if (batch % 16 == 0) else batch
    nb, nt = batch // b_blk, seq_len // t_tile

    def kernel(gx_ref, whh_ref, out_ref, hn_ref, cn_ref, h_scr, c_scr):
        t_blk = pl.program_id(1)

        @pl.when(t_blk == 0)
        def _():
            h_scr[...] = jnp.zeros_like(h_scr)
            c_scr[...] = jnp.zeros_like(c_scr)

        whh = whh_ref[...]                                  # (H, 4H) bf16, resident
        h = h_scr[...]
        c = c_scr[...]
        # Fully unrolled short time tile: static slice stores, and the LLO scheduler can
        # overlap gate slicing / EUP sigmoid+tanh with the next step's recurrent matmul.
        for t in range(t_tile):
            gates_t = gx_ref[t] + jnp.dot(h.astype(jnp.bfloat16), whh,
                                          preferred_element_type=jnp.float32)
            i_g = jax.nn.sigmoid(gates_t[:, 0 * hidden:1 * hidden])
            f_g = jax.nn.sigmoid(gates_t[:, 1 * hidden:2 * hidden])
            g_g = jnp.tanh(gates_t[:, 2 * hidden:3 * hidden])
            o_g = jax.nn.sigmoid(gates_t[:, 3 * hidden:4 * hidden])
            c = f_g * c + i_g * g_g
            h = o_g * jnp.tanh(c)
            out_ref[:, t, :] = h                            # batch-first, lane-dense store
        h_scr[...] = h
        c_scr[...] = c

        @pl.when(t_blk == pl.num_programs(1) - 1)
        def _():
            hn_ref[...] = h
            cn_ref[...] = c

    out, h_n, c_n = pl.pallas_call(
        kernel,
        out_shape=(
            jax.ShapeDtypeStruct((batch, seq_len, hidden), jnp.float32),
            jax.ShapeDtypeStruct((batch, hidden), jnp.float32),
            jax.ShapeDtypeStruct((batch, hidden), jnp.float32),
        ),
        grid_spec=pltpu.PrefetchScalarGridSpec(
            num_scalar_prefetch=0,
            grid=(nb, nt),
            in_specs=[
                pl.BlockSpec((t_tile, b_blk, gates), lambda b, t: (t, b, 0)),
                pl.BlockSpec((hidden, gates), lambda b, t: (0, 0)),
            ],
            out_specs=(
                pl.BlockSpec((b_blk, t_tile, hidden), lambda b, t: (b, t, 0)),
                pl.BlockSpec((b_blk, hidden), lambda b, t: (b, 0)),
                pl.BlockSpec((b_blk, hidden), lambda b, t: (b, 0)),
            ),
            scratch_shapes=[
                pltpu.VMEM((b_blk, hidden), jnp.float32),
                pltpu.VMEM((b_blk, hidden), jnp.float32),
            ],
        ),
        compiler_params=pltpu.CompilerParams(
            dimension_semantics=("parallel", "arbitrary")),
    )(gx, whh_t)
    return out, h_n, c_n


# ------------------------------------------------------------------------------------
# Encoder forward (mirrors the PyTorch module's forward pass).
# ------------------------------------------------------------------------------------
def encoder_forward(x, params):
    """x: (B, C, T, H, W) -> (out (B, T, hidden), (h_n (B, hidden), c_n (B, hidden)))."""
    B, C, T, H, W = x.shape
    hidden = params["w_hh"].shape[1]
    HW = H * W
    N = T * B

    # im2col (3x3, stride 1, pad 1) in frame-major (t, b) order, emitted directly as bf16.
    # Under jit, XLA fuses the transpose + pad + window-stack into the single patches
    # materialization (no separate full-video transpose pass).  See TODO(synk) above for
    # moving this in-kernel at real ResNet channel counts.
    frames = x.transpose(2, 0, 1, 3, 4)                               # (T, B, C, H, W)
    xp = jnp.pad(frames, ((0, 0), (0, 0), (0, 0), (1, 1), (1, 1)))
    cols = [xp[..., di:di + H, dj:dj + W] for di in range(3) for dj in range(3)]
    patches = jnp.stack(cols, axis=3)                                 # (T, B, C, 9, H, W)
    patches = (patches.transpose(0, 1, 4, 5, 2, 3)
               .reshape(N * HW, C * 9).astype(jnp.bfloat16))

    feats = cnn_features(patches, params["w_conv"], params["b_conv"], N, HW)
    gates_x = gate_projection(feats, params["w_ih"], params["b_ih"], params["b_hh"])
    gx = gates_x.reshape(T, B, 4 * hidden)                            # time-major sequence
    out, h_n, c_n = lstm_recurrence(gx, params["w_hh"], hidden)       # out is batch-first
    return out, (h_n, c_n)


# ------------------------------------------------------------------------------------
# Pure-JAX f32 reference of the same forward (for a numerical sanity check).
# ------------------------------------------------------------------------------------
def encoder_reference(x, params):
    B, C, T, H, W = x.shape
    Hd = params["w_hh"].shape[1]
    frames = x.transpose(2, 0, 1, 3, 4).reshape(T * B, C, H, W)
    xp = jnp.pad(frames, ((0, 0), (0, 0), (1, 1), (1, 1)))
    cols = [xp[:, :, di:di + H, dj:dj + W] for di in range(3) for dj in range(3)]
    patches = jnp.stack(cols, axis=2).transpose(0, 3, 4, 1, 2).reshape(T * B, H * W, C * 9)
    w_mat = params["w_conv"].reshape(params["w_conv"].shape[0], C * 9).T
    act = jnp.maximum(patches @ w_mat + params["b_conv"][None, None, :], 0.0)
    feats = act.mean(axis=1)                               # (T*B, F)
    gx = (feats @ params["w_ih"].T + params["b_ih"] + params["b_hh"]).reshape(T, B, 4 * Hd)

    def step(carry, g):
        h, c = carry
        gates = g + h @ params["w_hh"].T
        i = jax.nn.sigmoid(gates[:, 0 * Hd:1 * Hd])
        f = jax.nn.sigmoid(gates[:, 1 * Hd:2 * Hd])
        gg = jnp.tanh(gates[:, 2 * Hd:3 * Hd])
        o = jax.nn.sigmoid(gates[:, 3 * Hd:4 * Hd])
        c2 = f * c + i * gg
        h2 = o * jnp.tanh(c2)
        return (h2, c2), h2

    (hN, cN), outs = jax.lax.scan(step, (jnp.zeros((B, Hd)), jnp.zeros((B, Hd))), gx)
    return outs.transpose(1, 0, 2), (hN, cN)


def init_params(key, in_channels, feat_dim, hidden):
    ks = jax.random.split(key, 6)
    scale = 0.1
    return {
        "w_conv": scale * jax.random.normal(ks[0], (feat_dim, in_channels, 3, 3), jnp.float32),
        "b_conv": scale * jax.random.normal(ks[1], (feat_dim,), jnp.float32),
        # PyTorch nn.LSTM parameter layout: weight_ih (4H, F), weight_hh (4H, H).
        "w_ih": scale * jax.random.normal(ks[2], (4 * hidden, feat_dim), jnp.float32),
        "w_hh": scale * jax.random.normal(ks[3], (4 * hidden, hidden), jnp.float32),
        "b_ih": scale * jax.random.normal(ks[4], (4 * hidden,), jnp.float32),
        "b_hh": scale * jax.random.normal(ks[5], (4 * hidden,), jnp.float32),
    }


if __name__ == "__main__":
    # Small shapes consistent with the module's forward: video (B, C, T, H, W).
    # Feature / hidden dims are multiples of 128 (real model: 512) for lane alignment.
    B, C, T, H, W = 2, 3, 8, 16, 16
    FEAT_DIM = 128   # stand-in for resnet.fc.in_features (512 for resnet18)
    HIDDEN = 128     # stand-in for lstm_hidden_size (512)

    key = jax.random.PRNGKey(0)
    k_x, k_p = jax.random.split(key)
    x = jax.random.normal(k_x, (B, C, T, H, W), jnp.float32)
    params = init_params(k_p, C, FEAT_DIM, HIDDEN)

    out, (h_n, c_n) = jax.jit(encoder_forward)(x, params)
    jax.block_until_ready((out, h_n, c_n))

    assert out.shape == (B, T, HIDDEN)
    assert h_n.shape == (B, HIDDEN) and c_n.shape == (B, HIDDEN)

    # Numerical sanity check vs. pure-JAX f32 reference (bf16 MXU operands -> loose tol).
    out_r, (h_r, c_r) = jax.jit(encoder_reference)(x, params)
    assert bool(jnp.allclose(out, out_r, atol=4e-2, rtol=4e-2))
    assert bool(jnp.allclose(h_n, h_r, atol=4e-2, rtol=4e-2))
    assert bool(jnp.allclose(c_n, c_r, atol=4e-2, rtol=4e-2))

    print("KERNEL_OK")
</pallas_src>

<mosaic_0001>
module attributes {stable_mosaic.version = 11 : i64} {
  func.func @_cnn_feat_kernel(%arg0: i32, %arg1: memref<4096x27xbf16, #tpu.memory_space<vmem>>, %arg2: memref<27x128xbf16, #tpu.memory_space<vmem>>, %arg3: memref<1x128xf32, #tpu.memory_space<vmem>>, %arg4: memref<16x4096xbf16, #tpu.memory_space<vmem>>, %arg5: memref<16x128xbf16, #tpu.memory_space<vmem>>) attributes {dimension_semantics = [#tpu.dimension_semantics<parallel>], iteration_bounds = array<i64: 1>, scalar_prefetch = 0 : i64, scratch_operands = 0 : i64, tpu.core_type = #tpu.core_type<tc>, window_params = [{transform_indices = @transform_0, window_bounds = array<i64: 4096, 27>}, {pipeline_mode = #tpu.pipeline_mode<synchronous>, transform_indices = @transform_1, window_bounds = array<i64: 27, 128>}, {pipeline_mode = #tpu.pipeline_mode<synchronous>, transform_indices = @transform_2, window_bounds = array<i64: 1, 128>}, {pipeline_mode = #tpu.pipeline_mode<synchronous>, transform_indices = @transform_3, window_bounds = array<i64: 16, 4096>}, {transform_indices = @transform_4, window_bounds = array<i64: 16, 128>}]} {
    %c0 = arith.constant 0 : index
    %c0_0 = arith.constant 0 : index
    %0 = vector.load %arg1[%c0, %c0_0] : memref<4096x27xbf16, #tpu.memory_space<vmem>>, vector<4096x27xbf16>
    %c0_1 = arith.constant 0 : index
    %c0_2 = arith.constant 0 : index
    %1 = vector.load %arg2[%c0_1, %c0_2] : memref<27x128xbf16, #tpu.memory_space<vmem>>, vector<27x128xbf16>
    %cst = arith.constant dense<0.000000e+00> : vector<4096x128xf32>
    %2 = tpu.matmul %0, %1, %cst {dimension_numbers = #tpu.dot_dimension_numbers<[1], [0], [0], [1], [0, 0, 1, 1], [], []>} : vector<4096x27xbf16>, vector<27x128xbf16>, vector<4096x128xf32> -> vector<4096x128xf32>
    %c0_3 = arith.constant 0 : index
    %c0_4 = arith.constant 0 : index
    %3 = vector.load %arg3[%c0_3, %c0_4] : memref<1x128xf32, #tpu.memory_space<vmem>>, vector<1x128xf32>
    %4 = vector.broadcast %3 : vector<1x128xf32> to vector<4096x128xf32>
    %5 = arith.addf %2, %4 : vector<4096x128xf32>
    %cst_5 = arith.constant 0.000000e+00 : f32
    %6 = vector.broadcast %cst_5 : f32 to vector<4096x128xf32>
    %7 = arith.maximumf %5, %6 : vector<4096x128xf32>
    %c0_6 = arith.constant 0 : index
    %c0_7 = arith.constant 0 : index
    %8 = vector.load %arg4[%c0_6, %c0_7] : memref<16x4096xbf16, #tpu.memory_space<vmem>>, vector<16x4096xbf16>
    %9 = arith.truncf %7 : vector<4096x128xf32> to vector<4096x128xbf16>
    %cst_8 = arith.constant dense<0.000000e+00> : vector<16x128xf32>
    %10 = tpu.matmul %8, %9, %cst_8 {dimension_numbers = #tpu.dot_dimension_numbers<[1], [0], [0], [1], [0, 0, 1, 1], [], []>} : vector<16x4096xbf16>, vector<4096x128xbf16>, vector<16x128xf32> -> vector<16x128xf32>
    %11 = arith.truncf %10 : vector<16x128xf32> to vector<16x128xbf16>
    %c0_9 = arith.constant 0 : index
    %c0_10 = arith.constant 0 : index
    %12 = vector.load %arg5[%c0_9, %c0_10] : memref<16x128xbf16, #tpu.memory_space<vmem>>, vector<16x128xbf16>
    tpu.vector_store %arg5[%c0_9, %c0_10], %11 {strides = array<i32>} : memref<16x128xbf16, #tpu.memory_space<vmem>>, vector<16x128xbf16>,
    return
  }
  func.func @transform_0(%arg0: i32) -> (i32, i32) {
    %c0_i32 = arith.constant 0 : i32
    %c0_i32_0 = arith.constant 0 : i32
    return %arg0, %c0_i32 : i32, i32
  }
  func.func @transform_1(%arg0: i32) -> (i32, i32) {
    %c0_i32 = arith.constant 0 : i32
    %c0_i32_0 = arith.constant 0 : i32
    %c0_i32_1 = arith.constant 0 : i32
    return %c0_i32, %c0_i32_0 : i32, i32
  }
  func.func @transform_2(%arg0: i32) -> (i32, i32) {
    %c0_i32 = arith.constant 0 : i32
    %c0_i32_0 = arith.constant 0 : i32
    %c0_i32_1 = arith.constant 0 : i32
    return %c0_i32, %c0_i32_0 : i32, i32
  }
  func.func @transform_3(%arg0: i32) -> (i32, i32) {
    %c0_i32 = arith.constant 0 : i32
    %c0_i32_0 = arith.constant 0 : i32
    %c0_i32_1 = arith.constant 0 : i32
    return %c0_i32, %c0_i32_0 : i32, i32
  }
  func.func @transform_4(%arg0: i32) -> (i32, i32) {
    %c0_i32 = arith.constant 0 : i32
    %c0_i32_0 = arith.constant 0 : i32
    return %arg0, %c0_i32 : i32, i32
  }
}

module attributes {stable_mosaic.version = 11 : i64} {
  func.func @_gate_proj_kernel(%arg0: i32, %arg1: memref<16x128xbf16, #tpu.memory_space<vmem>>, %arg2: memref<128x512xbf16, #tpu.memory_space<vmem>>, %arg3: memref<1x512xf32, #tpu.memory_space<vmem>>, %arg4: memref<16x512xf32, #tpu.memory_space<vmem>>) attributes {dimension_semantics = [#tpu.dimension_semantics<parallel>], iteration_bounds = array<i64: 1>, scalar_prefetch = 0 : i64, scratch_operands = 0 : i64, tpu.core_type = #tpu.core_type<tc>, window_params = [{transform_indices = @transform_0, window_bounds = array<i64: 16, 128>}, {pipeline_mode = #tpu.pipeline_mode<synchronous>, transform_indices = @transform_1, window_bounds = array<i64: 128, 512>}, {pipeline_mode = #tpu.pipeline_mode<synchronous>, transform_indices = @transform_2, window_bounds = array<i64: 1, 512>}, {transform_indices = @transform_3, window_bounds = array<i64: 16, 512>}]} {
    %c0 = arith.constant 0 : index
    %c0_0 = arith.constant 0 : index
    %0 = vector.load %arg1[%c0, %c0_0] : memref<16x128xbf16, #tpu.memory_space<vmem>>, vector<16x128xbf16>
    %c0_1 = arith.constant 0 : index
    %c0_2 = arith.constant 0 : index
    %1 = vector.load %arg2[%c0_1, %c0_2] : memref<128x512xbf16, #tpu.memory_space<vmem>>, vector<128x512xbf16>
    %cst = arith.constant dense<0.000000e+00> : vector<16x512xf32>
    %2 = tpu.matmul %0, %1, %cst {dimension_numbers = #tpu.dot_dimension_numbers<[1], [0], [0], [1], [0, 0, 1, 1], [], []>} : vector<16x128xbf16>, vector<128x512xbf16>, vector<16x512xf32> -> vector<16x512xf32>
    %c0_3 = arith.constant 0 : index
    %c0_4 = arith.constant 0 : index
    %3 = vector.load %arg3[%c0_3, %c0_4] : memref<1x512xf32, #tpu.memory_space<vmem>>, vector<1x512xf32>
    %4 = vector.broadcast %3 : vector<1x512xf32> to vector<16x512xf32>
    %5 = arith.addf %2, %4 : vector<16x512xf32>
    %c0_5 = arith.constant 0 : index
    %c0_6 = arith.constant 0 : index
    %6 = vector.load %arg4[%c0_5, %c0_6] : memref<16x512xf32, #tpu.memory_space<vmem>>, vector<16x512xf32>
    tpu.vector_store %arg4[%c0_5, %c0_6], %5 {strides = array<i32>} : memref<16x512xf32, #tpu.memory_space<vmem>>, vector<16x512xf32>,
    return
  }
  func.func @transform_0(%arg0: i32) -> (i32, i32) {
    %c0_i32 = arith.constant 0 : i32
    %c0_i32_0 = arith.constant 0 : i32
    return %arg0, %c0_i32 : i32, i32
  }
  func.func @transform_1(%arg0: i32) -> (i32, i32) {
    %c0_i32 = arith.constant 0 : i32
    %c0_i32_0 = arith.constant 0 : i32
    %c0_i32_1 = arith.constant 0 : i32
    return %c0_i32, %c0_i32_0 : i32, i32
  }
  func.func @transform_2(%arg0: i32) -> (i32, i32) {
    %c0_i32 = arith.constant 0 : i32
    %c0_i32_0 = arith.constant 0 : i32
    %c0_i32_1 = arith.constant 0 : i32
    return %c0_i32, %c0_i32_0 : i32, i32
  }
  func.func @transform_3(%arg0: i32) -> (i32, i32) {
    %c0_i32 = arith.constant 0 : i32
    %c0_i32_0 = arith.constant 0 : i32
    return %arg0, %c0_i32 : i32, i32
  }
}

module attributes {stable_mosaic.version = 11 : i64} {
  func.func @kernel(%arg0: i32, %arg1: i32, %arg2: memref<8x2x512xf32, #tpu.memory_space<vmem>>, %arg3: memref<128x512xbf16, #tpu.memory_space<vmem>>, %arg4: memref<2x8x128xf32, #tpu.memory_space<vmem>>, %arg5: memref<2x128xf32, #tpu.memory_space<vmem>>, %arg6: memref<2x128xf32, #tpu.memory_space<vmem>>, %arg7: memref<2x128xf32, #tpu.memory_space<vmem>>, %arg8: memref<2x128xf32, #tpu.memory_space<vmem>>) attributes {dimension_semantics = [#tpu.dimension_semantics<parallel>, #tpu.dimension_semantics<arbitrary>], iteration_bounds = array<i64: 1, 1>, scalar_prefetch = 0 : i64, scratch_operands = 2 : i64, tpu.core_type = #tpu.core_type<tc>, window_params = [{transform_indices = @transform_0, window_bounds = array<i64: 8, 2, 512>}, {pipeline_mode = #tpu.pipeline_mode<synchronous>, transform_indices = @transform_1, window_bounds = array<i64: 128, 512>}, {transform_indices = @transform_2, window_bounds = array<i64: 2, 8, 128>}, {transform_indices = @transform_3, window_bounds = array<i64: 2, 128>}, {transform_indices = @transform_4, window_bounds = array<i64: 2, 128>}]} {
    %c0_i32 = arith.constant 0 : i32
    %0 = arith.cmpi eq, %arg1, %c0_i32 : i32
    %1 = arith.extui %0 : i1 to i32
    %c0_i32_0 = arith.constant 0 : i32
    %2 = arith.cmpi ne, %1, %c0_i32_0 : i32
    scf.if %2 {
      %cst_84 = arith.constant 0.000000e+00 : f32
      %275 = vector.broadcast %cst_84 : f32 to vector<2x128xf32>
      %c0_85 = arith.constant 0 : index
      %c0_86 = arith.constant 0 : index
      %276 = vector.load %arg7[%c0_85, %c0_86] : memref<2x128xf32, #tpu.memory_space<vmem>>, vector<2x128xf32>
      tpu.vector_store %arg7[%c0_85, %c0_86], %275 {strides = array<i32>} : memref<2x128xf32, #tpu.memory_space<vmem>>, vector<2x128xf32>,
      %cst_87 = arith.constant 0.000000e+00 : f32
      %277 = vector.broadcast %cst_87 : f32 to vector<2x128xf32>
      %c0_88 = arith.constant 0 : index
      %c0_89 = arith.constant 0 : index
      %278 = vector.load %arg8[%c0_88, %c0_89] : memref<2x128xf32, #tpu.memory_space<vmem>>, vector<2x128xf32>
      tpu.vector_store %arg8[%c0_88, %c0_89], %277 {strides = array<i32>} : memref<2x128xf32, #tpu.memory_space<vmem>>, vector<2x128xf32>,
    } else {
    }
    %c0 = arith.constant 0 : index
    %c0_1 = arith.constant 0 : index
    %3 = vector.load %arg3[%c0, %c0_1] : memref<128x512xbf16, #tpu.memory_space<vmem>>, vector<128x512xbf16>
    %c0_2 = arith.constant 0 : index
    %c0_3 = arith.constant 0 : index
    %4 = vector.load %arg7[%c0_2, %c0_3] : memref<2x128xf32, #tpu.memory_space<vmem>>, vector<2x128xf32>
    %c0_4 = arith.constant 0 : index
    %c0_5 = arith.constant 0 : index
    %5 = vector.load %arg8[%c0_4, %c0_5] : memref<2x128xf32, #tpu.memory_space<vmem>>, vector<2x128xf32>
    %c0_6 = arith.constant 0 : index
    %c0_7 = arith.constant 0 : index
    %c0_8 = arith.constant 0 : index
    %6 = vector.load %arg2[%c0_6, %c0_7, %c0_8] : memref<8x2x512xf32, #tpu.memory_space<vmem>>, vector<1x2x512xf32>
    %7 = vector.shape_cast %6 : vector<1x2x512xf32> to vector<2x512xf32>
    %8 = arith.truncf %4 : vector<2x128xf32> to vector<2x128xbf16>
    %cst = arith.constant dense<0.000000e+00> : vector<2x512xf32>
    %9 = tpu.matmul %8, %3, %cst {dimension_numbers = #tpu.dot_dimension_numbers<[1], [0], [0], [1], [0, 0, 1, 1], [], []>} : vector<2x128xbf16>, vector<128x512xbf16>, vector<2x512xf32> -> vector<2x512xf32>
    %10 = arith.addf %7, %9 : vector<2x512xf32>
    %11 = vector.extract_strided_slice %10 {offsets = [0, 0], sizes = [2, 128], strides = [1, 1]} : vector<2x512xf32> to vector<2x128xf32>
    %12 = arith.negf %11 : vector<2x128xf32>
    %13 = math.exp %12 : vector<2x128xf32>
    %cst_9 = arith.constant 1.000000e+00 : f32
    %14 = vector.broadcast %cst_9 : f32 to vector<2x128xf32>
    %15 = arith.addf %14, %13 : vector<2x128xf32>
    %16 = arith.divf %14, %15 : vector<2x128xf32>
    %17 = vector.extract_strided_slice %10 {offsets = [0, 128], sizes = [2, 128], strides = [1, 1]} : vector<2x512xf32> to vector<2x128xf32>
    %18 = arith.negf %17 : vector<2x128xf32>
    %19 = math.exp %18 : vector<2x128xf32>
    %cst_10 = arith.constant 1.000000e+00 : f32
    %20 = vector.broadcast %cst_10 : f32 to vector<2x128xf32>
    %21 = arith.addf %20, %19 : vector<2x128xf32>
    %22 = arith.divf %20, %21 : vector<2x128xf32>
    %23 = vector.extract_strided_slice %10 {offsets = [0, 256], sizes = [2, 128], strides = [1, 1]} : vector<2x512xf32> to vector<2x128xf32>
    %24 = math.tanh %23 : vector<2x128xf32>
    %25 = vector.extract_strided_slice %10 {offsets = [0, 384], sizes = [2, 128], strides = [1, 1]} : vector<2x512xf32> to vector<2x128xf32>
    %26 = arith.negf %25 : vector<2x128xf32>
    %27 = math.exp %26 : vector<2x128xf32>
    %cst_11 = arith.constant 1.000000e+00 : f32
    %28 = vector.broadcast %cst_11 : f32 to vector<2x128xf32>
    %29 = arith.addf %28, %27 : vector<2x128xf32>
    %30 = arith.divf %28, %29 : vector<2x128xf32>
    %31 = arith.mulf %22, %5 : vector<2x128xf32>
    %32 = arith.mulf %16, %24 : vector<2x128xf32>
    %33 = arith.addf %31, %32 : vector<2x128xf32>
    %34 = math.tanh %33 : vector<2x128xf32>
    %35 = arith.mulf %30, %34 : vector<2x128xf32>
    %c0_12 = arith.constant 0 : index
    %c0_13 = arith.constant 0 : index
    %c0_14 = arith.constant 0 : index
    %36 = vector.load %arg4[%c0_12, %c0_13, %c0_14] : memref<2x8x128xf32, #tpu.memory_space<vmem>>, vector<2x1x128xf32>
    %37 = vector.shape_cast %36 : vector<2x1x128xf32> to vector<2x128xf32>
    %38 = vector.shape_cast %35 : vector<2x128xf32> to vector<2x1x128xf32>
    tpu.vector_store %arg4[%c0_12, %c0_13, %c0_14], %38 {strides = array<i32>} : memref<2x8x128xf32, #tpu.memory_space<vmem>>, vector<2x1x128xf32>,
    %c1 = arith.constant 1 : index
    %c0_15 = arith.constant 0 : index
    %c0_16 = arith.constant 0 : index
    %39 = vector.load %arg2[%c1, %c0_15, %c0_16] : memref<8x2x512xf32, #tpu.memory_space<vmem>>, vector<1x2x512xf32>
    %40 = vector.shape_cast %39 : vector<1x2x512xf32> to vector<2x512xf32>
    %41 = arith.truncf %35 : vector<2x128xf32> to vector<2x128xbf16>
    %cst_17 = arith.constant dense<0.000000e+00> : vector<2x512xf32>
    %42 = tpu.matmul %41, %3, %cst_17 {dimension_numbers = #tpu.dot_dimension_numbers<[1], [0], [0], [1], [0, 0, 1, 1], [], []>} : vector<2x128xbf16>, vector<128x512xbf16>, vector<2x512xf32> -> vector<2x512xf32>
    %43 = arith.addf %40, %42 : vector<2x512xf32>
    %44 = vector.extract_strided_slice %43 {offsets = [0, 0], sizes = [2, 128], strides = [1, 1]} : vector<2x512xf32> to vector<2x128xf32>
    %45 = arith.negf %44 : vector<2x128xf32>
    %46 = math.exp %45 : vector<2x128xf32>
    %cst_18 = arith.constant 1.000000e+00 : f32
    %47 = vector.broadcast %cst_18 : f32 to vector<2x128xf32>
    %48 = arith.addf %47, %46 : vector<2x128xf32>
    %49 = arith.divf %47, %48 : vector<2x128xf32>
    %50 = vector.extract_strided_slice %43 {offsets = [0, 128], sizes = [2, 128], strides = [1, 1]} : vector<2x512xf32> to vector<2x128xf32>
    %51 = arith.negf %50 : vector<2x128xf32>
    %52 = math.exp %51 : vector<2x128xf32>
    %cst_19 = arith.constant 1.000000e+00 : f32
    %53 = vector.broadcast %cst_19 : f32 to vector<2x128xf32>
    %54 = arith.addf %53, %52 : vector<2x128xf32>
    %55 = arith.divf %53, %54 : vector<2x128xf32>
    %56 = vector.extract_strided_slice %43 {offsets = [0, 256], sizes = [2, 128], strides = [1, 1]} : vector<2x512xf32> to vector<2x128xf32>
    %57 = math.tanh %56 : vector<2x128xf32>
    %58 = vector.extract_strided_slice %43 {offsets = [0, 384], sizes = [2, 128], strides = [1, 1]} : vector<2x512xf32> to vector<2x128xf32>
    %59 = arith.negf %58 : vector<2x128xf32>
    %60 = math.exp %59 : vector<2x128xf32>
    %cst_20 = arith.constant 1.000000e+00 : f32
    %61 = vector.broadcast %cst_20 : f32 to vector<2x128xf32>
    %62 = arith.addf %61, %60 : vector<2x128xf32>
    %63 = arith.divf %61, %62 : vector<2x128xf32>
    %64 = arith.mulf %55, %33 : vector<2x128xf32>
    %65 = arith.mulf %49, %57 : vector<2x128xf32>
    %66 = arith.addf %64, %65 : vector<2x128xf32>
    %67 = math.tanh %66 : vector<2x128xf32>
    %68 = arith.mulf %63, %67 : vector<2x128xf32>
    %c0_21 = arith.constant 0 : index
    %c1_22 = arith.constant 1 : index
    %c0_23 = arith.constant 0 : index
    %69 = vector.load %arg4[%c0_21, %c1_22, %c0_23] : memref<2x8x128xf32, #tpu.memory_space<vmem>>, vector<2x1x128xf32>
    %70 = vector.shape_cast %69 : vector<2x1x128xf32> to vector<2x128xf32>
    %71 = vector.shape_cast %68 : vector<2x128xf32> to vector<2x1x128xf32>
    tpu.vector_store %arg4[%c0_21, %c1_22, %c0_23], %71 {strides = array<i32>} : memref<2x8x128xf32, #tpu.memory_space<vmem>>, vector<2x1x128xf32>,
    %c2 = arith.constant 2 : index
    %c0_24 = arith.constant 0 : index
    %c0_25 = arith.constant 0 : index
    %72 = vector.load %arg2[%c2, %c0_24, %c0_25] : memref<8x2x512xf32, #tpu.memory_space<vmem>>, vector<1x2x512xf32>
    %73 = vector.shape_cast %72 : vector<1x2x512xf32> to vector<2x512xf32>
    %74 = arith.truncf %68 : vector<2x128xf32> to vector<2x128xbf16>
    %cst_26 = arith.constant dense<0.000000e+00> : vector<2x512xf32>
    %75 = tpu.matmul %74, %3, %cst_26 {dimension_numbers = #tpu.dot_dimension_numbers<[1], [0], [0], [1], [0, 0, 1, 1], [], []>} : vector<2x128xbf16>, vector<128x512xbf16>, vector<2x512xf32> -> vector<2x512xf32>
    %76 = arith.addf %73, %75 : vector<2x512xf32>
    %77 = vector.extract_strided_slice %76 {offsets = [0, 0], sizes = [2, 128], strides = [1, 1]} : vector<2x512xf32> to vector<2x128xf32>
    %78 = arith.negf %77 : vector<2x128xf32>
    %79 = math.exp %78 : vector<2x128xf32>
    %cst_27 = arith.constant 1.000000e+00 : f32
    %80 = vector.broadcast %cst_27 : f32 to vector<2x128xf32>
    %81 = arith.addf %80, %79 : vector<2x128xf32>
    %82 = arith.divf %80, %81 : vector<2x128xf32>
    %83 = vector.extract_strided_slice %76 {offsets = [0, 128], sizes = [2, 128], strides = [1, 1]} : vector<2x512xf32> to vector<2x128xf32>
    %84 = arith.negf %83 : vector<2x128xf32>
    %85 = math.exp %84 : vector<2x128xf32>
    %cst_28 = arith.constant 1.000000e+00 : f32
    %86 = vector.broadcast %cst_28 : f32 to vector<2x128xf32>
    %87 = arith.addf %86, %85 : vector<2x128xf32>
    %88 = arith.divf %86, %87 : vector<2x128xf32>
    %89 = vector.extract_strided_slice %76 {offsets = [0, 256], sizes = [2, 128], strides = [1, 1]} : vector<2x512xf32> to vector<2x128xf32>
    %90 = math.tanh %89 : vector<2x128xf32>
    %91 = vector.extract_strided_slice %76 {offsets = [0, 384], sizes = [2, 128], strides = [1, 1]} : vector<2x512xf32> to vector<2x128xf32>
    %92 = arith.negf %91 : vector<2x128xf32>
    %93 = math.exp %92 : vector<2x128xf32>
    %cst_29 = arith.constant 1.000000e+00 : f32
    %94 = vector.broadcast %cst_29 : f32 to vector<2x128xf32>
    %95 = arith.addf %94, %93 : vector<2x128xf32>
    %96 = arith.divf %94, %95 : vector<2x128xf32>
    %97 = arith.mulf %88, %66 : vector<2x128xf32>
    %98 = arith.mulf %82, %90 : vector<2x128xf32>
    %99 = arith.addf %97, %98 : vector<2x128xf32>
    %100 = math.tanh %99 : vector<2x128xf32>
    %101 = arith.mulf %96, %100 : vector<2x128xf32>
    %c0_30 = arith.constant 0 : index
    %c2_31 = arith.constant 2 : index
    %c0_32 = arith.constant 0 : index
    %102 = vector.load %arg4[%c0_30, %c2_31, %c0_32] : memref<2x8x128xf32, #tpu.memory_space<vmem>>, vector<2x1x128xf32>
    %103 = vector.shape_cast %102 : vector<2x1x128xf32> to vector<2x128xf32>
    %104 = vector.shape_cast %101 : vector<2x128xf32> to vector<2x1x128xf32>
    tpu.vector_store %arg4[%c0_30, %c2_31, %c0_32], %104 {strides = array<i32>} : memref<2x8x128xf32, #tpu.memory_space<vmem>>, vector<2x1x128xf32>,
    %c3 = arith.constant 3 : index
    %c0_33 = arith.constant 0 : index
    %c0_34 = arith.constant 0 : index
    %105 = vector.load %arg2[%c3, %c0_33, %c0_34] : memref<8x2x512xf32, #tpu.memory_space<vmem>>, vector<1x2x512xf32>
    %106 = vector.shape_cast %105 : vector<1x2x512xf32> to vector<2x512xf32>
    %107 = arith.truncf %101 : vector<2x128xf32> to vector<2x128xbf16>
    %cst_35 = arith.constant dense<0.000000e+00> : vector<2x512xf32>
    %108 = tpu.matmul %107, %3, %cst_35 {dimension_numbers = #tpu.dot_dimension_numbers<[1], [0], [0], [1], [0, 0, 1, 1], [], []>} : vector<2x128xbf16>, vector<128x512xbf16>, vector<2x512xf32> -> vector<2x512xf32>
    %109 = arith.addf %106, %108 : vector<2x512xf32>
    %110 = vector.extract_strided_slice %109 {offsets = [0, 0], sizes = [2, 128], strides = [1, 1]} : vector<2x512xf32> to vector<2x128xf32>
    %111 = arith.negf %110 : vector<2x128xf32>
    %112 = math.exp %111 : vector<2x128xf32>
    %cst_36 = arith.constant 1.000000e+00 : f32
    %113 = vector.broadcast %cst_36 : f32 to vector<2x128xf32>
    %114 = arith.addf %113, %112 : vector<2x128xf32>
    %115 = arith.divf %113, %114 : vector<2x128xf32>
    %116 = vector.extract_strided_slice %109 {offsets = [0, 128], sizes = [2, 128], strides = [1, 1]} : vector<2x512xf32> to vector<2x128xf32>
    %117 = arith.negf %116 : vector<2x128xf32>
    %118 = math.exp %117 : vector<2x128xf32>
    %cst_37 = arith.constant 1.000000e+00 : f32
    %119 = vector.broadcast %cst_37 : f32 to vector<2x128xf32>
    %120 = arith.addf %119, %118 : vector<2x128xf32>
    %121 = arith.divf %119, %120 : vector<2x128xf32>
    %122 = vector.extract_strided_slice %109 {offsets = [0, 256], sizes = [2, 128], strides = [1, 1]} : vector<2x512xf32> to vector<2x128xf32>
    %123 = math.tanh %122 : vector<2x128xf32>
    %124 = vector.extract_strided_slice %109 {offsets = [0, 384], sizes = [2, 128], strides = [1, 1]} : vector<2x512xf32> to vector<2x128xf32>
    %125 = arith.negf %124 : vector<2x128xf32>
    %126 = math.exp %125 : vector<2x128xf32>
    %cst_38 = arith.constant 1.000000e+00 : f32
    %127 = vector.broadcast %cst_38 : f32 to vector<2x128xf32>
    %128 = arith.addf %127, %126 : vector<2x128xf32>
    %129 = arith.divf %127, %128 : vector<2x128xf32>
    %130 = arith.mulf %121, %99 : vector<2x128xf32>
    %131 = arith.mulf %115, %123 : vector<2x128xf32>
    %132 = arith.addf %130, %131 : vector<2x128xf32>
    %133 = math.tanh %132 : vector<2x128xf32>
    %134 = arith.mulf %129, %133 : vector<2x128xf32>
    %c0_39 = arith.constant 0 : index
    %c3_40 = arith.constant 3 : index
    %c0_41 = arith.constant 0 : index
    %135 = vector.load %arg4[%c0_39, %c3_40, %c0_41] : memref<2x8x128xf32, #tpu.memory_space<vmem>>, vector<2x1x128xf32>
    %136 = vector.shape_cast %135 : vector<2x1x128xf32> to vector<2x128xf32>
    %137 = vector.shape_cast %134 : vector<2x128xf32> to vector<2x1x128xf32>
    tpu.vector_store %arg4[%c0_39, %c3_40, %c0_41], %137 {strides = array<i32>} : memref<2x8x128xf32, #tpu.memory_space<vmem>>, vector<2x1x128xf32>,
    %c4 = arith.constant 4 : index
    %c0_42 = arith.constant 0 : index
    %c0_43 = arith.constant 0 : index
    %138 = vector.load %arg2[%c4, %c0_42, %c0_43] : memref<8x2x512xf32, #tpu.memory_space<vmem>>, vector<1x2x512xf32>
    %139 = vector.shape_cast %138 : vector<1x2x512xf32> to vector<2x512xf32>
    %140 = arith.truncf %134 : vector<2x128xf32> to vector<2x128xbf16>
    %cst_44 = arith.constant dense<0.000000e+00> : vector<2x512xf32>
    %141 = tpu.matmul %140, %3, %cst_44 {dimension_numbers = #tpu.dot_dimension_numbers<[1], [0], [0], [1], [0, 0, 1, 1], [], []>} : vector<2x128xbf16>, vector<128x512xbf16>, vector<2x512xf32> -> vector<2x512xf32>
    %142 = arith.addf %139, %141 : vector<2x512xf32>
    %143 = vector.extract_strided_slice %142 {offsets = [0, 0], sizes = [2, 128], strides = [1, 1]} : vector<2x512xf32> to vector<2x128xf32>
    %144 = arith.negf %143 : vector<2x128xf32>
    %145 = math.exp %144 : vector<2x128xf32>
    %cst_45 = arith.constant 1.000000e+00 : f32
    %146 = vector.broadcast %cst_45 : f32 to vector<2x128xf32>
    %147 = arith.addf %146, %145 : vector<2x128xf32>
    %148 = arith.divf %146, %147 : vector<2x128xf32>
    %149 = vector.extract_strided_slice %142 {offsets = [0, 128], sizes = [2, 128], strides = [1, 1]} : vector<2x512xf32> to vector<2x128xf32>
    %150 = arith.negf %149 : vector<2x128xf32>
    %151 = math.exp %150 : vector<2x128xf32>
    %cst_46 = arith.constant 1.000000e+00 : f32
    %152 = vector.broadcast %cst_46 : f32 to vector<2x128xf32>
    %153 = arith.addf %152, %151 : vector<2x128xf32>
    %154 = arith.divf %152, %153 : vector<2x128xf32>
    %155 = vector.extract_strided_slice %142 {offsets = [0, 256], sizes = [2, 128], strides = [1, 1]} : vector<2x512xf32> to vector<2x128xf32>
    %156 = math.tanh %155 : vector<2x128xf32>
    %157 = vector.extract_strided_slice %142 {offsets = [0, 384], sizes = [2, 128], strides = [1, 1]} : vector<2x512xf32> to vector<2x128xf32>
    %158 = arith.negf %157 : vector<2x128xf32>
    %159 = math.exp %158 : vector<2x128xf32>
    %cst_47 = arith.constant 1.000000e+00 : f32
    %160 = vector.broadcast %cst_47 : f32 to vector<2x128xf32>
    %161 = arith.addf %160, %159 : vector<2x128xf32>
    %162 = arith.divf %160, %161 : vector<2x128xf32>
    %163 = arith.mulf %154, %132 : vector<2x128xf32>
    %164 = arith.mulf %148, %156 : vector<2x128xf32>
    %165 = arith.addf %163, %164 : vector<2x128xf32>
    %166 = math.tanh %165 : vector<2x128xf32>
    %167 = arith.mulf %162, %166 : vector<2x128xf32>
    %c0_48 = arith.constant 0 : index
    %c4_49 = arith.constant 4 : index
    %c0_50 = arith.constant 0 : index
    %168 = vector.load %arg4[%c0_48, %c4_49, %c0_50] : memref<2x8x128xf32, #tpu.memory_space<vmem>>, vector<2x1x128xf32>
    %169 = vector.shape_cast %168 : vector<2x1x128xf32> to vector<2x128xf32>
    %170 = vector.shape_cast %167 : vector<2x128xf32> to vector<2x1x128xf32>
    tpu.vector_store %arg4[%c0_48, %c4_49, %c0_50], %170 {strides = array<i32>} : memref<2x8x128xf32, #tpu.memory_space<vmem>>, vector<2x1x128xf32>,
    %c5 = arith.constant 5 : index
    %c0_51 = arith.constant 0 : index
    %c0_52 = arith.constant 0 : index
    %171 = vector.load %arg2[%c5, %c0_51, %c0_52] : memref<8x2x512xf32, #tpu.memory_space<vmem>>, vector<1x2x512xf32>
    %172 = vector.shape_cast %171 : vector<1x2x512xf32> to vector<2x512xf32>
    %173 = arith.truncf %167 : vector<2x128xf32> to vector<2x128xbf16>
    %cst_53 = arith.constant dense<0.000000e+00> : vector<2x512xf32>
    %174 = tpu.matmul %173, %3, %cst_53 {dimension_numbers = #tpu.dot_dimension_numbers<[1], [0], [0], [1], [0, 0, 1, 1], [], []>} : vector<2x128xbf16>, vector<128x512xbf16>, vector<2x512xf32> -> vector<2x512xf32>
    %175 = arith.addf %172, %174 : vector<2x512xf32>
    %176 = vector.extract_strided_slice %175 {offsets = [0, 0], sizes = [2, 128], strides = [1, 1]} : vector<2x512xf32> to vector<2x128xf32>
    %177 = arith.negf %176 : vector<2x128xf32>
    %178 = math.exp %177 : vector<2x128xf32>
    %cst_54 = arith.constant 1.000000e+00 : f32
    %179 = vector.broadcast %cst_54 : f32 to vector<2x128xf32>
    %180 = arith.addf %179, %178 : vector<2x128xf32>
    %181 = arith.divf %179, %180 : vector<2x128xf32>
    %182 = vector.extract_strided_slice %175 {offsets = [0, 128], sizes = [2, 128], strides = [1, 1]} : vector<2x512xf32> to vector<2x128xf32>
    %183 = arith.negf %182 : vector<2x128xf32>
    %184 = math.exp %183 : vector<2x128xf32>
    %cst_55 = arith.constant 1.000000e+00 : f32
    %185 = vector.broadcast %cst_55 : f32 to vector<2x128xf32>
    %186 = arith.addf %185, %184 : vector<2x128xf32>
    %187 = arith.divf %185, %186 : vector<2x128xf32>
    %188 = vector.extract_strided_slice %175 {offsets = [0, 256], sizes = [2, 128], strides = [1, 1]} : vector<2x512xf32> to vector<2x128xf32>
    %189 = math.tanh %188 : vector<2x128xf32>
    %190 = vector.extract_strided_slice %175 {offsets = [0, 384], sizes = [2, 128], strides = [1, 1]} : vector<2x512xf32> to vector<2x128xf32>
    %191 = arith.negf %190 : vector<2x128xf32>
    %192 = math.exp %191 : vector<2x128xf32>
    %cst_56 = arith.constant 1.000000e+00 : f32
    %193 = vector.broadcast %cst_56 : f32 to vector<2x128xf32>
    %194 = arith.addf %193, %192 : vector<2x128xf32>
    %195 = arith.divf %193, %194 : vector<2x128xf32>
    %196 = arith.mulf %187, %165 : vector<2x128xf32>
    %197 = arith.mulf %181, %189 : vector<2x128xf32>
    %198 = arith.addf %196, %197 : vector<2x128xf32>
    %199 = math.tanh %198 : vector<2x128xf32>
    %200 = arith.mulf %195, %199 : vector<2x128xf32>
    %c0_57 = arith.constant 0 : index
    %c5_58 = arith.constant 5 : index
    %c0_59 = arith.constant 0 : index
    %201 = vector.load %arg4[%c0_57, %c5_58, %c0_59] : memref<2x8x128xf32, #tpu.memory_space<vmem>>, vector<2x1x128xf32>
    %202 = vector.shape_cast %201 : vector<2x1x128xf32> to vector<2x128xf32>
    %203 = vector.shape_cast %200 : vector<2x128xf32> to vector<2x1x128xf32>
    tpu.vector_store %arg4[%c0_57, %c5_58, %c0_59], %203 {strides = array<i32>} : memref<2x8x128xf32, #tpu.memory_space<vmem>>, vector<2x1x128xf32>,
    %c6 = arith.constant 6 : index
    %c0_60 = arith.constant 0 : index
    %c0_61 = arith.constant 0 : index
    %204 = vector.load %arg2[%c6, %c0_60, %c0_61] : memref<8x2x512xf32, #tpu.memory_space<vmem>>, vector<1x2x512xf32>
    %205 = vector.shape_cast %204 : vector<1x2x512xf32> to vector<2x512xf32>
    %206 = arith.truncf %200 : vector<2x128xf32> to vector<2x128xbf16>
    %cst_62 = arith.constant dense<0.000000e+00> : vector<2x512xf32>
    %207 = tpu.matmul %206, %3, %cst_62 {dimension_numbers = #tpu.dot_dimension_numbers<[1], [0], [0], [1], [0, 0, 1, 1], [], []>} : vector<2x128xbf16>, vector<128x512xbf16>, vector<2x512xf32> -> vector<2x512xf32>
    %208 = arith.addf %205, %207 : vector<2x512xf32>
    %209 = vector.extract_strided_slice %208 {offsets = [0, 0], sizes = [2, 128], strides = [1, 1]} : vector<2x512xf32> to vector<2x128xf32>
    %210 = arith.negf %209 : vector<2x128xf32>
    %211 = math.exp %210 : vector<2x128xf32>
    %cst_63 = arith.constant 1.000000e+00 : f32
    %212 = vector.broadcast %cst_63 : f32 to vector<2x128xf32>
    %213 = arith.addf %212, %211 : vector<2x128xf32>
    %214 = arith.divf %212, %213 : vector<2x128xf32>
    %215 = vector.extract_strided_slice %208 {offsets = [0, 128], sizes = [2, 128], strides = [1, 1]} : vector<2x512xf32> to vector<2x128xf32>
    %216 = arith.negf %215 : vector<2x128xf32>
    %217 = math.exp %216 : vector<2x128xf32>
    %cst_64 = arith.constant 1.000000e+00 : f32
    %218 = vector.broadcast %cst_64 : f32 to vector<2x128xf32>
    %219 = arith.addf %218, %217 : vector<2x128xf32>
    %220 = arith.divf %218, %219 : vector<2x128xf32>
    %221 = vector.extract_strided_slice %208 {offsets = [0, 256], sizes = [2, 128], strides = [1, 1]} : vector<2x512xf32> to vector<2x128xf32>
    %222 = math.tanh %221 : vector<2x128xf32>
    %223 = vector.extract_strided_slice %208 {offsets = [0, 384], sizes = [2, 128], strides = [1, 1]} : vector<2x512xf32> to vector<2x128xf32>
    %224 = arith.negf %223 : vector<2x128xf32>
    %225 = math.exp %224 : vector<2x128xf32>
    %cst_65 = arith.constant 1.000000e+00 : f32
    %226 = vector.broadcast %cst_65 : f32 to vector<2x128xf32>
    %227 = arith.addf %226, %225 : vector<2x128xf32>
    %228 = arith.divf %226, %227 : vector<2x128xf32>
    %229 = arith.mulf %220, %198 : vector<2x128xf32>
    %230 = arith.mulf %214, %222 : vector<2x128xf32>
    %231 = arith.addf %229, %230 : vector<2x128xf32>
    %232 = math.tanh %231 : vector<2x128xf32>
    %233 = arith.mulf %228, %232 : vector<2x128xf32>
    %c0_66 = arith.constant 0 : index
    %c6_67 = arith.constant 6 : index
    %c0_68 = arith.constant 0 : index
    %234 = vector.load %arg4[%c0_66, %c6_67, %c0_68] : memref<2x8x128xf32, #tpu.memory_space<vmem>>, vector<2x1x128xf32>
    %235 = vector.shape_cast %234 : vector<2x1x128xf32> to vector<2x128xf32>
    %236 = vector.shape_cast %233 : vector<2x128xf32> to vector<2x1x128xf32>
    tpu.vector_store %arg4[%c0_66, %c6_67, %c0_68], %236 {strides = array<i32>} : memref<2x8x128xf32, #tpu.memory_space<vmem>>, vector<2x1x128xf32>,
    %c7 = arith.constant 7 : index
    %c0_69 = arith.constant 0 : index
    %c0_70 = arith.constant 0 : index
    %237 = vector.load %arg2[%c7, %c0_69, %c0_70] : memref<8x2x512xf32, #tpu.memory_space<vmem>>, vector<1x2x512xf32>
    %238 = vector.shape_cast %237 : vector<1x2x512xf32> to vector<2x512xf32>
    %239 = arith.truncf %233 : vector<2x128xf32> to vector<2x128xbf16>
    %cst_71 = arith.constant dense<0.000000e+00> : vector<2x512xf32>
    %240 = tpu.matmul %239, %3, %cst_71 {dimension_numbers = #tpu.dot_dimension_numbers<[1], [0], [0], [1], [0, 0, 1, 1], [], []>} : vector<2x128xbf16>, vector<128x512xbf16>, vector<2x512xf32> -> vector<2x512xf32>
    %241 = arith.addf %238, %240 : vector<2x512xf32>
    %242 = vector.extract_strided_slice %241 {offsets = [0, 0], sizes = [2, 128], strides = [1, 1]} : vector<2x512xf32> to vector<2x128xf32>
    %243 = arith.negf %242 : vector<2x128xf32>
    %244 = math.exp %243 : vector<2x128xf32>
    %cst_72 = arith.constant 1.000000e+00 : f32
    %245 = vector.broadcast %cst_72 : f32 to vector<2x128xf32>
    %246 = arith.addf %245, %244 : vector<2x128xf32>
    %247 = arith.divf %245, %246 : vector<2x128xf32>
    %248 = vector.extract_strided_slice %241 {offsets = [0, 128], sizes = [2, 128], strides = [1, 1]} : vector<2x512xf32> to vector<2x128xf32>
    %249 = arith.negf %248 : vector<2x128xf32>
    %250 = math.exp %249 : vector<2x128xf32>
    %cst_73 = arith.constant 1.000000e+00 : f32
    %251 = vector.broadcast %cst_73 : f32 to vector<2x128xf32>
    %252 = arith.addf %251, %250 : vector<2x128xf32>
    %253 = arith.divf %251, %252 : vector<2x128xf32>
    %254 = vector.extract_strided_slice %241 {offsets = [0, 256], sizes = [2, 128], strides = [1, 1]} : vector<2x512xf32> to vector<2x128xf32>
    %255 = math.tanh %254 : vector<2x128xf32>
    %256 = vector.extract_strided_slice %241 {offsets = [0, 384], sizes = [2, 128], strides = [1, 1]} : vector<2x512xf32> to vector<2x128xf32>
    %257 = arith.negf %256 : vector<2x128xf32>
    %258 = math.exp %257 : vector<2x128xf32>
    %cst_74 = arith.constant 1.000000e+00 : f32
    %259 = vector.broadcast %cst_74 : f32 to vector<2x128xf32>
    %260 = arith.addf %259, %258 : vector<2x128xf32>
    %261 = arith.divf %259, %260 : vector<2x128xf32>
    %262 = arith.mulf %253, %231 : vector<2x128xf32>
    %263 = arith.mulf %247, %255 : vector<2x128xf32>
    %264 = arith.addf %262, %263 : vector<2x128xf32>
    %265 = math.tanh %264 : vector<2x128xf32>
    %266 = arith.mulf %261, %265 : vector<2x128xf32>
    %c0_75 = arith.constant 0 : index
    %c7_76 = arith.constant 7 : index
    %c0_77 = arith.constant 0 : index
    %267 = vector.load %arg4[%c0_75, %c7_76, %c0_77] : memref<2x8x128xf32, #tpu.memory_space<vmem>>, vector<2x1x128xf32>
    %268 = vector.shape_cast %267 : vector<2x1x128xf32> to vector<2x128xf32>
    %269 = vector.shape_cast %266 : vector<2x128xf32> to vector<2x1x128xf32>
    tpu.vector_store %arg4[%c0_75, %c7_76, %c0_77], %269 {strides = array<i32>} : memref<2x8x128xf32, #tpu.memory_space<vmem>>, vector<2x1x128xf32>,
    %c0_78 = arith.constant 0 : index
    %c0_79 = arith.constant 0 : index
    %270 = vector.load %arg7[%c0_78, %c0_79] : memref<2x128xf32, #tpu.memory_space<vmem>>, vector<2x128xf32>
    tpu.vector_store %arg7[%c0_78, %c0_79], %266 {strides = array<i32>} : memref<2x128xf32, #tpu.memory_space<vmem>>, vector<2x128xf32>,
    %c0_80 = arith.constant 0 : index
    %c0_81 = arith.constant 0 : index
    %271 = vector.load %arg8[%c0_80, %c0_81] : memref<2x128xf32, #tpu.memory_space<vmem>>, vector<2x128xf32>
    tpu.vector_store %arg8[%c0_80, %c0_81], %264 {strides = array<i32>} : memref<2x128xf32, #tpu.memory_space<vmem>>, vector<2x128xf32>,
    %c0_i32_82 = arith.constant 0 : i32
    %272 = arith.cmpi eq, %arg1, %c0_i32_82 : i32
    %273 = arith.extui %272 : i1 to i32
    %c0_i32_83 = arith.constant 0 : i32
    %274 = arith.cmpi ne, %273, %c0_i32_83 : i32
    scf.if %274 {
      %c0_84 = arith.constant 0 : index
      %c0_85 = arith.constant 0 : index
      %275 = vector.load %arg5[%c0_84, %c0_85] : memref<2x128xf32, #tpu.memory_space<vmem>>, vector<2x128xf32>
      tpu.vector_store %arg5[%c0_84, %c0_85], %266 {strides = array<i32>} : memref<2x128xf32, #tpu.memory_space<vmem>>, vector<2x128xf32>,
      %c0_86 = arith.constant 0 : index
      %c0_87 = arith.constant 0 : index
      %276 = vector.load %arg6[%c0_86, %c0_87] : memref<2x128xf32, #tpu.memory_space<vmem>>, vector<2x128xf32>
      tpu.vector_store %arg6[%c0_86, %c0_87], %264 {strides = array<i32>} : memref<2x128xf32, #tpu.memory_space<vmem>>, vector<2x128xf32>,
    } else {
    }
    return
  }
  func.func @transform_0(%arg0: i32, %arg1: i32) -> (i32, i32, i32) {
    %c0_i32 = arith.constant 0 : i32
    %c0_i32_0 = arith.constant 0 : i32
    return %arg1, %arg0, %c0_i32 : i32, i32, i32
  }
  func.func @transform_1(%arg0: i32, %arg1: i32) -> (i32, i32) {
    %c0_i32 = arith.constant 0 : i32
    %c0_i32_0 = arith.constant 0 : i32
    %c0_i32_1 = arith.constant 0 : i32
    return %c0_i32, %c0_i32_0 : i32, i32
  }
  func.func @transform_2(%arg0: i32, %arg1: i32) -> (i32, i32, i32) {
    %c0_i32 = arith.constant 0 : i32
    %c0_i32_0 = arith.constant 0 : i32
    return %arg0, %arg1, %c0_i32 : i32, i32, i32
  }
  func.func @transform_3(%arg0: i32, %arg1: i32) -> (i32, i32) {
    %c0_i32 = arith.constant 0 : i32
    %c0_i32_0 = arith.constant 0 : i32
    return %arg0, %c0_i32 : i32, i32
  }
  func.func @transform_4(%arg0: i32, %arg1: i32) -> (i32, i32) {
    %c0_i32 = arith.constant 0 : i32
    %c0_i32_0 = arith.constant 0 : i32
    return %arg0, %c0_i32 : i32, i32
  }
}

</mosaic_0001>

<bundles_post_ra>
// kernel: encoder_forward.4
= control target key start
LH: loop header
LB: loop body
LE: loop exit
PB: predicated region body
PF: predicated region fallthrough
CT: control target
= control target key end

     0   :  { %v418_v1 = vmov 0   ;;  %v51_v34 = vlaneseq  ;;  %s565_s1 = inlined_call_operand.vmem [shape: bf16[128,512], index: 1, kind: input, shape index: {}]   ;;  %s566_s0 = inlined_call_operand.vmem [shape: bf16[16,128], index: 0, kind: input, shape index: {}]   ;;  %s567_s2 = inlined_call_operand.vmem [shape: f32[1,512], index: 2, kind: input, shape index: {}]   ;;  %s568_s3 = inlined_call_operand.vmem [shape: f32[16,512], index: 3, kind: output, shape index: {}]  }
   0x1   :  { %v369_v0 = vld [vmem:[%s565_s1 + $0x4] ss:$16 sps:$4 sm:$0xff]   ;;  %269 = vmatprep.mubr.bf16.mxu0 %v418_v1  ;;  %312 = vmatprep.mubr.bf16.mxu1 %v418_v1  ;;  %v371_v2 = vld [vmem:[%s565_s1 + $0xc] ss:$16 sps:$4 sm:$0xff]   ;;  %v373_v3 = vld [vmem:[%s565_s1] ss:$16 sps:$4 sm:$0xff]  }
   0x2   :  { %237 = vmatprep.subr.bf16.mxu0 %v369_v0  ;;  %v374_v4 = vld [vmem:[%s565_s1 + $0x8] ss:$16 sps:$4 sm:$0xff]   ;;  %280 = vmatprep.subr.bf16.mxu1 %v371_v2  ;;  %v375_v5 = vld [vmem:[%s565_s1 + $0x24] ss:$16 sps:$4 sm:$0xff]   ;;  %v377_v6 = vld [vmem:[%s565_s1 + $0x2c] ss:$16 sps:$4 sm:$0xff]  }
   0x3   :  { %238 = vmatpush1.bf16.msra.mxu0 %v373_v3  ;;  %281 = vmatpush1.bf16.msra.mxu1 %v374_v4  ;;  %v379_v7 = vld [vmem:[%s565_s1 + $0x20] ss:$16 sps:$4 sm:$0xff]   ;;  %v380_v8 = vld [vmem:[%s565_s1 + $0x28] ss:$16 sps:$4 sm:$0xff]   ;;  %v381_v9 = vld [vmem:[%s565_s1 + $0x44] ss:$16 sps:$4 sm:$0xff]  }
   0x4   :  { %239 = vmatprep.subr.bf16.mxu0 %v375_v5  ;;  %282 = vmatprep.subr.bf16.mxu1 %v377_v6  ;;  %v383_v10 = vld [vmem:[%s565_s1 + $0x4c] ss:$16 sps:$4 sm:$0xff]   ;;  %v385_v11 = vld [vmem:[%s565_s1 + $0x40] ss:$16 sps:$4 sm:$0xff]   ;;  %v386_v12 = vld [vmem:[%s565_s1 + $0x48] ss:$16 sps:$4 sm:$0xff]  }
   0x5   :  { %v387_v13 = vld [vmem:[%s565_s1 + $0x64] ss:$16 sps:$4 sm:$0xff]   ;;  %v389_v14 = vld [vmem:[%s565_s1 + $0x6c] ss:$16 sps:$4 sm:$0xff]   ;;  %v391_v15 = vld [vmem:[%s565_s1 + $0x60] ss:$16 sps:$4 sm:$0xff]  }
   0x6   :  { %v392_v16 = vld [vmem:[%s565_s1 + $0x68] ss:$16 sps:$4 sm:$0xff]   ;;  %v393_v17 = vld [vmem:[%s565_s1 + $0x84] ss:$16 sps:$4 sm:$0xff]   ;;  %v395_v18 = vld [vmem:[%s565_s1 + $0x8c] ss:$16 sps:$4 sm:$0xff]  }
   0x7   :  { %240 = vmatpush1.bf16.msra.mxu0 %v379_v7  ;;  %283 = vmatpush1.bf16.msra.mxu1 %v380_v8  ;;  %v397_v19 = vld [vmem:[%s565_s1 + $0x80] ss:$16 sps:$4 sm:$0xff]   ;;  %v398_v20 = vld [vmem:[%s565_s1 + $0x88] ss:$16 sps:$4 sm:$0xff]   ;;  %v399_v21 = vld [vmem:[%s565_s1 + $0xa4] ss:$16 sps:$4 sm:$0xff]  }
   0x8   :  { %241 = vmatprep.subr.bf16.mxu0 %v381_v9  ;;  %284 = vmatprep.subr.bf16.mxu1 %v383_v10  ;;  %v401_v22 = vld [vmem:[%s565_s1 + $0xac] ss:$16 sps:$4 sm:$0xff]   ;;  %v403_v23 = vld [vmem:[%s565_s1 + $0xa0] ss:$16 sps:$4 sm:$0xff]   ;;  %v404_v24 = vld [vmem:[%s565_s1 + $0xa8] ss:$16 sps:$4 sm:$0xff]  }
   0x9   :  { %v405_v25 = vld [vmem:[%s565_s1 + $0xc4] ss:$16 sps:$4 sm:$0xff]   ;;  %v407_v26 = vld [vmem:[%s565_s1 + $0xcc] ss:$16 sps:$4 sm:$0xff]   ;;  %v409_v27 = vld [vmem:[%s565_s1 + $0xc0] ss:$16 sps:$4 sm:$0xff]  }
   0xa   :  { %v410_v28 = vld [vmem:[%s565_s1 + $0xc8] ss:$16 sps:$4 sm:$0xff]   ;;  %v411_v29 = vld [vmem:[%s565_s1 + $0xe4] ss:$16 sps:$4 sm:$0xff]   ;;  %v413_v30 = vld [vmem:[%s565_s1 + $0xec] ss:$16 sps:$4 sm:$0xff]  }
   0xb   :  { %242 = vmatpush1.bf16.msra.mxu0 %v385_v11  ;;  %285 = vmatpush1.bf16.msra.mxu1 %v386_v12  ;;  %v415_v31 = vld [vmem:[%s565_s1 + $0xe0] ss:$16 sps:$4 sm:$0xff]   ;;  %v416_v32 = vld [vmem:[%s565_s1 + $0xe8] ss:$16 sps:$4 sm:$0xff]   ;;  %v52_v35 = vshrl.u32 %v51_v34, 7 }
   0xc   :  { %243 = vmatprep.subr.bf16.mxu0 %v387_v13  ;;  %286 = vmatprep.subr.bf16.mxu1 %v389_v14  ;;  %v417_v33 = vld [vmem:[%s566_s0] sm:$0xff]  }
   0xd   :  { %v53_v36 = vsub.s32 0, %v52_v35  ;;  %v61_v37 = vsub.s32 2, %v52_v35  ;;  %v49_v38 = vld [vmem:[%s567_s2] sm:$0xf]  ;;  %v57_v39 = vsub.s32 1, %v52_v35  ;;  %v65_v40 = vsub.s32 3, %v52_v35 }
   0xf   :  { %244 = vmatpush1.bf16.msra.mxu0 %v391_v15  ;;  %287 = vmatpush1.bf16.msra.mxu1 %v392_v16  ;;  %v54_v41 = vrot.slane %v49_v38, %v53_v36  ;;  %v62_v42 = vrot.slane %v49_v38, %v61_v37  ;;  %v58_v43 = vrot.slane %v49_v38, %v57_v39 }
  0x10   :  { %245 = vmatprep.subr.bf16.mxu0 %v393_v17  ;;  %288 = vmatprep.subr.bf16.mxu1 %v395_v18  ;;  %v66_v44 = vrot.slane %v49_v38, %v65_v40 }
  0x13   :  { %246 = vmatpush1.bf16.msra.mxu0 %v397_v19  ;;  %289 = vmatpush1.bf16.msra.mxu1 %v398_v20 }
  0x14   :  { %247 = vmatprep.subr.bf16.mxu0 %v399_v21  ;;  %290 = vmatprep.subr.bf16.mxu1 %v401_v22 }
  0x17   :  { %248 = vmatpush1.bf16.msra.mxu0 %v403_v23  ;;  %291 = vmatpush1.bf16.msra.mxu1 %v404_v24 }
  0x18   :  { %249 = vmatprep.subr.bf16.mxu0 %v405_v25  ;;  %292 = vmatprep.subr.bf16.mxu1 %v407_v26 }
  0x1b   :  { %250 = vmatpush1.bf16.msra.mxu0 %v409_v27  ;;  %293 = vmatpush1.bf16.msra.mxu1 %v410_v28 }
  0x1c   :  { %251 = vmatprep.subr.bf16.mxu0 %v411_v29  ;;  %294 = vmatprep.subr.bf16.mxu1 %v413_v30 }
  0x1f   :  { %252 = vmatpush1.bf16.msra.mxu0 %v415_v31  ;;  %295 = vmatpush1.bf16.msra.mxu1 %v416_v32 }
  0x22   :  { %270 = vmatmul.mubr.bf16.vlgmr.msra.gmra.mrb[0].mxu0 %v417_v33  ;;  %313 = vmatmul.mubr.bf16.vlgmr.msra.gmra.mrb[0].mxu1 %v417_v33 }
  0xf5   :  { %v271_v45 = vpop.f32.mrb[0].mxu0  ;;  %v314_v46 = vpop.f32.mrb[0].mxu1 }
  0xf6   :  { %v272_v47 = vadd.f32 %v271_v45, %v54_v41  ;;  %v315_v48 = vadd.f32 %v314_v46, %v62_v42  ;;  %v273_v49 = vpop.f32.mrb[1].mxu0  ;;  %v316_v50 = vpop.f32.mrb[1].mxu1 }
  0xf7   :  { %v274_v51 = vadd.f32 %v273_v49, %v58_v43  ;;  %v317_v52 = vadd.f32 %v316_v50, %v66_v44  ;;  %v275_v53 = vpop.f32.mrb[2].mxu0  ;;  %v318_v54 = vpop.f32.mrb[2].mxu1 }
  0xf8   :  { %323 = vst [vmem:[%s568_s3] sm:$0xff] %v272_v47  ;;  %325 = vst [vmem:[%s568_s3 + $0x10] sm:$0xff] %v315_v48  ;;  %v276_v55 = vadd.f32 %v275_v53, %v54_v41  ;;  %v319_v56 = vadd.f32 %v318_v54, %v62_v42  ;;  %v277_v57 = vpop.f32.mrb[3].mxu0  ;;  %v320_v58 = vpop.f32.mrb[3].mxu1 }
  0xf9   :  { %324 = vst [vmem:[%s568_s3 + $0x8] sm:$0xff] %v274_v51  ;;  %326 = vst [vmem:[%s568_s3 + $0x18] sm:$0xff] %v317_v52  ;;  %v278_v59 = vadd.f32 %v277_v57, %v58_v43  ;;  %v321_v60 = vadd.f32 %v320_v58, %v66_v44 }
  0xfa   :  { %327 = vst [vmem:[%s568_s3 + $0x20] sm:$0xff] %v276_v55  ;;  %329 = vst [vmem:[%s568_s3 + $0x30] sm:$0xff] %v319_v56 }
  0xfb   :  { %328 = vst [vmem:[%s568_s3 + $0x28] sm:$0xff] %v278_v59  ;;  %330 = vst [vmem:[%s568_s3 + $0x38] sm:$0xff] %v321_v60 }

// kernel: encoder_forward.5
= control target key start
LH: loop header
LB: loop body
LE: loop exit
PB: predicated region body
PF: predicated region fallthrough
CT: control target
= control target key end

     0   :  { %10 = vsyncpa [#allocation5], 0  ;;  %v1840_v2 = vmov 0   ;;  %v1841_v3 = vmov 0.0   ;;  %s2535_s0 = inlined_call_operand.vmem [shape: f32[8,2,512], index: 0, kind: input, shape index: {}]   ;;  %s2536_s1 = inlined_call_operand.vmem [shape: bf16[128,512], index: 1, kind: input, shape index: {}]   ;;  %s2537_s2 = inlined_call_operand.hbm [shape: f32[2,8,128], index: 2, kind: output, shape index: {0}]   ;;  %s2538_s3 = inlined_call_operand.hbm [shape: f32[2,128], index: 3, kind: output, shape index: {1}]   ;;  %s2539_s4 = inlined_call_operand.hbm [shape: f32[2,128], index: 4, kind: output, shape index: {2}]  }
   0x1   :  { %v1877_v0 = vld [vmem:[%s2536_s1 + $0x4] ss:$16 sps:$4 sm:$0xff]   ;;  %v1882_v1 = vld [vmem:[%s2536_s1 + $0xc] ss:$16 sps:$4 sm:$0xff]   ;;  %251 = vmatprep.mubr.bf16.mxu0 %v1840_v2  ;;  %292 = vmatprep.mubr.bf16.mxu1 %v1840_v2  ;;  %21 = vst [vmem:[#allocation2] sm:$0x3] %v1841_v3 }
   0x2   :  { %22 = vst [vmem:[#allocation3] sm:$0x3] %v1841_v3  ;;  %219 = vmatprep.subr.bf16.mxu0 %v1877_v0  ;;  %v1890_v4 = vld [vmem:[%s2536_s1] ss:$16 sps:$4 sm:$0xff]   ;;  %v1895_v5 = vld [vmem:[%s2536_s1 + $0x8] ss:$16 sps:$4 sm:$0xff]   ;;  %260 = vmatprep.subr.bf16.mxu1 %v1882_v1 }
   0x3   :  { %v1901_v6 = vld [vmem:[%s2536_s1 + $0x24] ss:$16 sps:$4 sm:$0xff]   ;;  %220 = vmatpush1.bf16.msra.mxu0 %v1890_v4  ;;  %261 = vmatpush1.bf16.msra.mxu1 %v1895_v5  ;;  %v1908_v7 = vld [vmem:[%s2536_s1 + $0x2c] ss:$16 sps:$4 sm:$0xff]   ;;  %v1913_v8 = vld [vmem:[%s2536_s1 + $0x20] ss:$16 sps:$4 sm:$0xff]  }
   0x4   :  { %221 = vmatprep.subr.bf16.mxu0 %v1901_v6  ;;  %v1919_v9 = vld [vmem:[%s2536_s1 + $0x28] ss:$16 sps:$4 sm:$0xff]   ;;  %262 = vmatprep.subr.bf16.mxu1 %v1908_v7  ;;  %v1925_v10 = vld [vmem:[%s2536_s1 + $0x44] ss:$16 sps:$4 sm:$0xff]   ;;  %v1930_v11 = vld [vmem:[%s2536_s1 + $0x4c] ss:$16 sps:$4 sm:$0xff]  }
   0x5   :  { %v1935_v12 = vld [vmem:[%s2536_s1 + $0x40] ss:$16 sps:$4 sm:$0xff]   ;;  %v1940_v13 = vld [vmem:[%s2536_s1 + $0x48] ss:$16 sps:$4 sm:$0xff]   ;;  %v1947_v14 = vld [vmem:[%s2536_s1 + $0x64] ss:$16 sps:$4 sm:$0xff]  }
   0x6   :  { %v1954_v15 = vld [vmem:[%s2536_s1 + $0x6c] ss:$16 sps:$4 sm:$0xff]   ;;  %v1959_v16 = vld [vmem:[%s2536_s1 + $0x60] ss:$16 sps:$4 sm:$0xff]   ;;  %v1966_v17 = vld [vmem:[%s2536_s1 + $0x68] ss:$16 sps:$4 sm:$0xff]  }
   0x7   :  { %222 = vmatpush1.bf16.msra.mxu0 %v1913_v8  ;;  %263 = vmatpush1.bf16.msra.mxu1 %v1919_v9  ;;  %v1971_v18 = vld [vmem:[%s2536_s1 + $0x84] ss:$16 sps:$4 sm:$0xff]   ;;  %v1978_v19 = vld [vmem:[%s2536_s1 + $0x8c] ss:$16 sps:$4 sm:$0xff]   ;;  %v1983_v20 = vld [vmem:[%s2536_s1 + $0x80] ss:$16 sps:$4 sm:$0xff]  }
   0x8   :  { %223 = vmatprep.subr.bf16.mxu0 %v1925_v10  ;;  %264 = vmatprep.subr.bf16.mxu1 %v1930_v11  ;;  %v1988_v21 = vld [vmem:[%s2536_s1 + $0x88] ss:$16 sps:$4 sm:$0xff]   ;;  %v1995_v22 = vld [vmem:[%s2536_s1 + $0xa4] ss:$16 sps:$4 sm:$0xff]   ;;  %v2002_v23 = vld [vmem:[%s2536_s1 + $0xac] ss:$16 sps:$4 sm:$0xff]  }
   0x9   :  { %v2009_v24 = vld [vmem:[%s2536_s1 + $0xa0] ss:$16 sps:$4 sm:$0xff]   ;;  %v2014_v25 = vld [vmem:[%s2536_s1 + $0xa8] ss:$16 sps:$4 sm:$0xff]   ;;  %v2021_v26 = vld [vmem:[%s2536_s1 + $0xc4] ss:$16 sps:$4 sm:$0xff]  }
   0xa   :  { %v2026_v27 = vld [vmem:[%s2536_s1 + $0xcc] ss:$16 sps:$4 sm:$0xff]  }
   0xb   :  { %224 = vmatpush1.bf16.msra.mxu0 %v1935_v12  ;;  %265 = vmatpush1.bf16.msra.mxu1 %v1940_v13 }
   0xc   :  { %225 = vmatprep.subr.bf16.mxu0 %v1947_v14  ;;  %266 = vmatprep.subr.bf16.mxu1 %v1954_v15 }
   0xf   :  { %226 = vmatpush1.bf16.msra.mxu0 %v1959_v16  ;;  %267 = vmatpush1.bf16.msra.mxu1 %v1966_v17 }
  0x10   :  { %227 = vmatprep.subr.bf16.mxu0 %v1971_v18  ;;  %268 = vmatprep.subr.bf16.mxu1 %v1978_v19 }
  0x13   :  { %228 = vmatpush1.bf16.msra.mxu0 %v1983_v20  ;;  %269 = vmatpush1.bf16.msra.mxu1 %v1988_v21 }
  0x14   :  { %229 = vmatprep.subr.bf16.mxu0 %v1995_v22  ;;  %270 = vmatprep.subr.bf16.mxu1 %v2002_v23 }
  0x15   :  { %11 = vsyncpa [#allocation7], 0  ;;  %v2033_v28 = vld [vmem:[%s2536_s1 + $0xc0] ss:$16 sps:$4 sm:$0xff]   ;;  %v2038_v29 = vld [vmem:[%s2536_s1 + $0xc8] ss:$16 sps:$4 sm:$0xff]   ;;  %v310_v38 = vlaneseq }
  0x16   :  { %v2045_v30 = vld [vmem:[%s2536_s1 + $0xe4] ss:$16 sps:$4 sm:$0xff]   ;;  %v2050_v31 = vld [vmem:[%s2536_s1 + $0xec] ss:$16 sps:$4 sm:$0xff]   ;;  %v2057_v32 = vld [vmem:[%s2536_s1 + $0xe0] ss:$16 sps:$4 sm:$0xff]  }
  0x17   :  { %230 = vmatpush1.bf16.msra.mxu0 %v2009_v24  ;;  %271 = vmatpush1.bf16.msra.mxu1 %v2014_v25  ;;  %v2062_v33 = vld [vmem:[%s2536_s1 + $0xe8] ss:$16 sps:$4 sm:$0xff]   ;;  %v55_v34 = vld [vmem:[#allocation2] sm:$0x3]  ;;  %v1842_v36 = vmov 1983009808  }
  0x18   :  { %231 = vmatprep.subr.bf16.mxu0 %v2021_v26  ;;  %272 = vmatprep.subr.bf16.mxu1 %v2026_v27  ;;  %v58_v35 = vpack.c.bf16 %v55_v34, %v55_v34  ;;  %v308_v37 = vunpack.c.l.s4 %v1842_v36  ;;  %v311_v40 = vshrl.u32 %v310_v38, 7  ;;  %v57_v54 = vld [vmem:[%s2535_s0] sm:$0xff]  ;;  %s1845_s29 = smov [#allocation4]   ;;  %s1846_s5 = smov [#allocation8]  }
  0x19   :  { %v56_v38 = vld [vmem:[#allocation3] sm:$0x3]  ;;  %s1444_s30 = sshll.u32 %s1845_s29, 4  ;;  %s1467_s6 = sshll.u32 %s1846_s5, 4  ;;  %s2484_s30 = int_to_ptr.vmem [resolvable:$true] %s1444_s30  ;;  %s2486_s6 = int_to_ptr.vmem [resolvable:$true] %s1467_s6 }
  0x1a   :  { %v309_v39 = vunpack.c.0.s8 %v308_v37 }
  0x1b   :  { %232 = vmatpush1.bf16.msra.mxu0 %v2033_v28  ;;  %273 = vmatpush1.bf16.msra.mxu1 %v2038_v29 }
  0x1c   :  { %233 = vmatprep.subr.bf16.mxu0 %v2045_v30  ;;  %274 = vmatprep.subr.bf16.mxu1 %v2050_v31  ;;  %v2104_v43 = vsub.s32 %v309_v39, %v311_v40 }
  0x1f   :  { %234 = vmatpush1.bf16.msra.mxu0 %v2057_v32  ;;  %275 = vmatpush1.bf16.msra.mxu1 %v2062_v33 }
  0x20   :  { %371 = vmatprep.subr.bf16.mxu0 %v1877_v0  ;;  %412 = vmatprep.subr.bf16.mxu1 %v1882_v1 }
  0x22   :  { %252 = vmatmul.mubr.bf16.vlgmr.msra.gmra.mrb[0].mxu0 %v58_v35  ;;  %293 = vmatmul.mubr.bf16.vlgmr.msra.gmra.mrb[0].mxu1 %v58_v35 }
  0x23   :  { %372 = vmatpush1.bf16.msra.mxu0 %v1890_v4  ;;  %413 = vmatpush1.bf16.msra.mxu1 %v1895_v5 }
  0x24   :  { %373 = vmatprep.subr.bf16.mxu0 %v1901_v6  ;;  %414 = vmatprep.subr.bf16.mxu1 %v1908_v7 }
  0x25   :  { %403 = vmatprep.mubr.bf16.mxu0 %v1840_v2  ;;  %444 = vmatprep.mubr.bf16.mxu1 %v1840_v2 }
  0x27   :  { %374 = vmatpush1.bf16.msra.mxu0 %v1913_v8  ;;  %415 = vmatpush1.bf16.msra.mxu1 %v1919_v9 }
  0x28   :  { %375 = vmatprep.subr.bf16.mxu0 %v1925_v10  ;;  %416 = vmatprep.subr.bf16.mxu1 %v1930_v11 }
  0x2b   :  { %376 = vmatpush1.bf16.msra.mxu0 %v1935_v12  ;;  %417 = vmatpush1.bf16.msra.mxu1 %v1940_v13 }
  0x2c   :  { %377 = vmatprep.subr.bf16.mxu0 %v1947_v14  ;;  %418 = vmatprep.subr.bf16.mxu1 %v1954_v15 }
  0x2f   :  { %378 = vmatpush1.bf16.msra.mxu0 %v1959_v16  ;;  %419 = vmatpush1.bf16.msra.mxu1 %v1966_v17 }
  0x30   :  { %379 = vmatprep.subr.bf16.mxu0 %v1971_v18  ;;  %420 = vmatprep.subr.bf16.mxu1 %v1978_v19 }
  0x33   :  { %380 = vmatpush1.bf16.msra.mxu0 %v1983_v20  ;;  %421 = vmatpush1.bf16.msra.mxu1 %v1988_v21 }
  0x34   :  { %381 = vmatprep.subr.bf16.mxu0 %v1995_v22  ;;  %422 = vmatprep.subr.bf16.mxu1 %v2002_v23 }
  0x37   :  { %382 = vmatpush1.bf16.msra.mxu0 %v2009_v24  ;;  %423 = vmatpush1.bf16.msra.mxu1 %v2014_v25 }
  0x38   :  { %383 = vmatprep.subr.bf16.mxu0 %v2021_v26  ;;  %424 = vmatprep.subr.bf16.mxu1 %v2026_v27 }
  0x3b   :  { %384 = vmatpush1.bf16.msra.mxu0 %v2033_v28  ;;  %425 = vmatpush1.bf16.msra.mxu1 %v2038_v29 }
  0x3c   :  { %385 = vmatprep.subr.bf16.mxu0 %v2045_v30  ;;  %426 = vmatprep.subr.bf16.mxu1 %v2050_v31 }
  0x3f   :  { %386 = vmatpush1.bf16.msra.mxu0 %v2057_v32  ;;  %427 = vmatpush1.bf16.msra.mxu1 %v2062_v33 }
  0x40   :  { %523 = vmatprep.subr.bf16.mxu0 %v1877_v0  ;;  %564 = vmatprep.subr.bf16.mxu1 %v1882_v1 }
  0xf5   :  { %v253_v41 = vpop.f32.mrb[0].mxu0  ;;  %v294_v42 = vpop.f32.mrb[0].mxu1 }
  0xf6   :  { %v255_v44 = vpop.f32.mrb[1].mxu0  ;;  %v296_v45 = vpop.f32.mrb[1].mxu1 }
  0xf7   :  { %v305_v46 = vcombine.low %v253_v41, %v255_v44  ;;  %v306_v47 = vcombine.low %v294_v42, %v296_v45  ;;  %v257_v48 = vpop.f32.mrb[2].mxu0  ;;  %v298_v49 = vpop.f32.mrb[2].mxu1 }
  0xf8   :  { %v258_v50 = vpop.f32.mrb[3].mxu0  ;;  %v299_v51 = vpop.f32.mrb[3].mxu1 }
  0xf9   :  { %v313_v52 = vrot.slane %v305_v46, %v2104_v43  ;;  %v320_v53 = vrot.slane %v306_v47, %v2104_v43  ;;  %v1843_v47 = vmov 1966171168  }
  0xfa   :  { %v357_v48 = vunpack.c.l.s4 %v1843_v47 }
  0xfb   :  { %v321_v55 = vcombine.low %v313_v52, %v320_v53 }
  0xfc   :  { %v358_v49 = vunpack.c.0.s8 %v357_v48 }
  0xfd   :  { %v323_v56 = vadd.f32 %v321_v55, %v57_v54 }
  0xfe   :  { %v2114_v51 = vsub.s32 %v358_v49, %v311_v40 }
  0xff   :  { %v1514_v57 = vmul.f32 -1.442695, %v323_v56  ;;  %v331_v58 = vrot.slane %v323_v56, 2  ;;  %v342_v60 = vrot.slane %v323_v56, 6  ;;  %v339_v63 = vrot.slane %v323_v56, 4 }
 0x101   :  { %1610 = vpow2.f32 %v1514_v57  ;;  %v1515_v59 = vmul.f32 -1.442695, %v331_v58  ;;  %v1516_v61 = vmul.f32 -1.442695, %v342_v60 }
 0x103   :  { %1612 = vpow2.f32 %v1515_v59 }
 0x104   :  { %1614 = vpow2.f32 %v1516_v61 }
 0x10b   :  { %v1611_v62 = vpop.eup %1610 }
 0x10c   :  { %v327_v3 = vadd.f32 1.0, %v1611_v62 }
 0x10d   :  { %v1613_v34 = vpop.eup %1612 }
 0x10e   :  { %1616 = vrcp.f32 %v327_v3  ;;  %v336_v35 = vadd.f32 1.0, %v1613_v34  ;;  %v1615_v36 = vpop.eup %1614 }
 0x10f   :  { %1618 = vtanh.f32 %v339_v63  ;;  %v347_v42 = vadd.f32 1.0, %v1615_v36 }
 0x110   :  { %1620 = vrcp.f32 %v336_v35 }
 0x111   :  { %1622 = vrcp.f32 %v347_v42 }
 0x118   :  { %v1617_v37 = vpop.eup %1616 }
 0x119   :  { %v1619_v39 = vpop.eup %1618 }
 0x11a   :  { %v1621_v41 = vpop.eup %1620  ;;  %v351_v44 = vmul.f32 %v1619_v39, %v1617_v37  ;;  %v1518_v37 = vld [vmem:[%s2535_s0 + $0x8] sm:$0xff] }
 0x11b   :  { %v350_v45 = vmul.f32 %v1621_v41, %v56_v38  ;;  %v1623_v50 = vpop.eup %1622 }
 0x11d   :  { %v2111_v46 = vadd.f32 %v351_v44, %v350_v45 }
 0x11f   :  { %1624 = vtanh.f32 %v2111_v46 }
 0x129   :  { %v1625_v52 = vpop.eup %1624 }
 0x12a   :  { %v354_v53 = vmul.f32 %v1625_v52, %v1623_v50 }
 0x12c   :  { %v362_v54 = vrot.slane %v354_v53, %v2114_v51  ;;  %1517 = vst.sshfl [vmem:[#allocation4] sm:$0x1 pattern:$0x73625140] %v354_v53  ;;  %v370_v55 = vpack.c.bf16 %v354_v53, %v354_v53 }
 0x12e   :  { %v363_v56 = vcombine.high %v362_v54, %v362_v54  ;;  %404 = vmatmul.mubr.bf16.vlgmr.msra.gmra.mrb[4].mxu0 %v370_v55  ;;  %445 = vmatmul.mubr.bf16.vlgmr.msra.gmra.mrb[4].mxu1 %v370_v55 }
 0x12f   :  { %524 = vmatpush1.bf16.msra.mxu0 %v1890_v4  ;;  %565 = vmatpush1.bf16.msra.mxu1 %v1895_v5 }
 0x130   :  { %367 = vst [vmem:[#allocation4 + $0x8] sm:$0x1] %v363_v56  ;;  %525 = vmatprep.subr.bf16.mxu0 %v1901_v6  ;;  %566 = vmatprep.subr.bf16.mxu1 %v1908_v7 }
 0x131   :  { %555 = vmatprep.mubr.bf16.mxu0 %v1840_v2  ;;  %596 = vmatprep.mubr.bf16.mxu1 %v1840_v2 }
 0x133   :  { %526 = vmatpush1.bf16.msra.mxu0 %v1913_v8  ;;  %567 = vmatpush1.bf16.msra.mxu1 %v1919_v9 }
 0x134   :  { %527 = vmatprep.subr.bf16.mxu0 %v1925_v10  ;;  %568 = vmatprep.subr.bf16.mxu1 %v1930_v11 }
 0x137   :  { %528 = vmatpush1.bf16.msra.mxu0 %v1935_v12  ;;  %569 = vmatpush1.bf16.msra.mxu1 %v1940_v13 }
 0x138   :  { %529 = vmatprep.subr.bf16.mxu0 %v1947_v14  ;;  %570 = vmatprep.subr.bf16.mxu1 %v1954_v15 }
 0x13b   :  { %530 = vmatpush1.bf16.msra.mxu0 %v1959_v16  ;;  %571 = vmatpush1.bf16.msra.mxu1 %v1966_v17 }
 0x13c   :  { %531 = vmatprep.subr.bf16.mxu0 %v1971_v18  ;;  %572 = vmatprep.subr.bf16.mxu1 %v1978_v19 }
 0x13f   :  { %532 = vmatpush1.bf16.msra.mxu0 %v1983_v20  ;;  %573 = vmatpush1.bf16.msra.mxu1 %v1988_v21 }
 0x140   :  { %533 = vmatprep.subr.bf16.mxu0 %v1995_v22  ;;  %574 = vmatprep.subr.bf16.mxu1 %v2002_v23 }
 0x143   :  { %534 = vmatpush1.bf16.msra.mxu0 %v2009_v24  ;;  %575 = vmatpush1.bf16.msra.mxu1 %v2014_v25 }
 0x144   :  { %535 = vmatprep.subr.bf16.mxu0 %v2021_v26  ;;  %576 = vmatprep.subr.bf16.mxu1 %v2026_v27 }
 0x147   :  { %536 = vmatpush1.bf16.msra.mxu0 %v2033_v28  ;;  %577 = vmatpush1.bf16.msra.mxu1 %v2038_v29 }
 0x148   :  { %537 = vmatprep.subr.bf16.mxu0 %v2045_v30  ;;  %578 = vmatprep.subr.bf16.mxu1 %v2050_v31 }
 0x14b   :  { %538 = vmatpush1.bf16.msra.mxu0 %v2057_v32  ;;  %579 = vmatpush1.bf16.msra.mxu1 %v2062_v33 }
 0x14c   :  { %675 = vmatprep.subr.bf16.mxu0 %v1877_v0  ;;  %716 = vmatprep.subr.bf16.mxu1 %v1882_v1 }
 0x201   :  { %v405_v40 = vpop.f32.mrb[4].mxu0  ;;  %v446_v57 = vpop.f32.mrb[4].mxu1 }
 0x202   :  { %v407_v58 = vpop.f32.mrb[5].mxu0  ;;  %v448_v59 = vpop.f32.mrb[5].mxu1 }
 0x203   :  { %v457_v60 = vcombine.low %v405_v40, %v407_v58  ;;  %v458_v61 = vcombine.low %v446_v57, %v448_v59  ;;  %v409_v62 = vpop.f32.mrb[6].mxu0  ;;  %v450_v63 = vpop.f32.mrb[6].mxu1 }
 0x204   :  { %v410_v3 = vpop.f32.mrb[7].mxu0  ;;  %v451_v34 = vpop.f32.mrb[7].mxu1 }
 0x205   :  { %v465_v35 = vrot.slane %v457_v60, %v2104_v43  ;;  %v472_v36 = vrot.slane %v458_v61, %v2104_v43 }
 0x207   :  { %v473_v38 = vcombine.low %v465_v35, %v472_v36 }
 0x209   :  { %v475_v39 = vadd.f32 %v1518_v37, %v473_v38 }
 0x20b   :  { %v1519_v41 = vmul.f32 -1.442695, %v475_v39  ;;  %v483_v42 = vrot.slane %v475_v39, 2  ;;  %v494_v45 = vrot.slane %v475_v39, 6  ;;  %v491_v49 = vrot.slane %v475_v39, 4 }
 0x20d   :  { %1626 = vpow2.f32 %v1519_v41  ;;  %v1520_v44 = vmul.f32 -1.442695, %v483_v42  ;;  %v1521_v47 = vmul.f32 -1.442695, %v494_v45 }
 0x20f   :  { %1628 = vpow2.f32 %v1520_v44 }
 0x210   :  { %1630 = vpow2.f32 %v1521_v47 }
 0x217   :  { %v1627_v48 = vpop.eup %1626 }
 0x218   :  { %v479_v50 = vadd.f32 1.0, %v1627_v48 }
 0x219   :  { %v1629_v52 = vpop.eup %1628 }
 0x21a   :  { %1632 = vrcp.f32 %v479_v50  ;;  %v488_v53 = vadd.f32 1.0, %v1629_v52  ;;  %v1631_v54 = vpop.eup %1630  ;;  %v1523_v50 = vld [vmem:[%s2535_s0 + $0x10] sm:$0xff] }
 0x21b   :  { %1634 = vtanh.f32 %v491_v49  ;;  %v499_v57 = vadd.f32 1.0, %v1631_v54 }
 0x21c   :  { %1636 = vrcp.f32 %v488_v53 }
 0x21d   :  { %1638 = vrcp.f32 %v499_v57 }
 0x224   :  { %v1633_v55 = vpop.eup %1632 }
 0x225   :  { %v1635_v56 = vpop.eup %1634 }
 0x226   :  { %v1637_v40 = vpop.eup %1636  ;;  %v503_v58 = vmul.f32 %v1635_v56, %v1633_v55 }
 0x227   :  { %v502_v59 = vmul.f32 %v1637_v40, %v2111_v46  ;;  %v1639_v61 = vpop.eup %1638 }
 0x229   :  { %v2157_v60 = vadd.f32 %v503_v58, %v502_v59 }
 0x22b   :  { %1640 = vtanh.f32 %v2157_v60 }
 0x235   :  { %v1641_v62 = vpop.eup %1640 }
 0x236   :  { %v506_v63 = vmul.f32 %v1641_v62, %v1639_v61 }
 0x238   :  { %v514_v3 = vrot.slane %v506_v63, %v2114_v51  ;;  %1522 = vst.sshfl [vmem:[#allocation4 + $0x1] sm:$0x1 pattern:$0x73625140] %v506_v63  ;;  %v522_v34 = vpack.c.bf16 %v506_v63, %v506_v63 }
 0x23a   :  { %v515_v35 = vcombine.high %v514_v3, %v514_v3  ;;  %556 = vmatmul.mubr.bf16.vlgmr.msra.gmra.mrb[8].mxu0 %v522_v34  ;;  %597 = vmatmul.mubr.bf16.vlgmr.msra.gmra.mrb[8].mxu1 %v522_v34 }
 0x23b   :  { %676 = vmatpush1.bf16.msra.mxu0 %v1890_v4  ;;  %717 = vmatpush1.bf16.msra.mxu1 %v1895_v5 }
 0x23c   :  { %519 = vst [vmem:[#allocation4 + $0x9] sm:$0x1] %v515_v35  ;;  %677 = vmatprep.subr.bf16.mxu0 %v1901_v6  ;;  %718 = vmatprep.subr.bf16.mxu1 %v1908_v7 }
 0x23d   :  { %707 = vmatprep.mubr.bf16.mxu0 %v1840_v2  ;;  %748 = vmatprep.mubr.bf16.mxu1 %v1840_v2 }
 0x23f   :  { %678 = vmatpush1.bf16.msra.mxu0 %v1913_v8  ;;  %719 = vmatpush1.bf16.msra.mxu1 %v1919_v9 }
 0x240   :  { %679 = vmatprep.subr.bf16.mxu0 %v1925_v10  ;;  %720 = vmatprep.subr.bf16.mxu1 %v1930_v11 }
 0x243   :  { %680 = vmatpush1.bf16.msra.mxu0 %v1935_v12  ;;  %721 = vmatpush1.bf16.msra.mxu1 %v1940_v13 }
 0x244   :  { %681 = vmatprep.subr.bf16.mxu0 %v1947_v14  ;;  %722 = vmatprep.subr.bf16.mxu1 %v1954_v15 }
 0x247   :  { %682 = vmatpush1.bf16.msra.mxu0 %v1959_v16  ;;  %723 = vmatpush1.bf16.msra.mxu1 %v1966_v17 }
 0x248   :  { %683 = vmatprep.subr.bf16.mxu0 %v1971_v18  ;;  %724 = vmatprep.subr.bf16.mxu1 %v1978_v19 }
 0x24b   :  { %684 = vmatpush1.bf16.msra.mxu0 %v1983_v20  ;;  %725 = vmatpush1.bf16.msra.mxu1 %v1988_v21 }
 0x24c   :  { %685 = vmatprep.subr.bf16.mxu0 %v1995_v22  ;;  %726 = vmatprep.subr.bf16.mxu1 %v2002_v23 }
 0x24f   :  { %686 = vmatpush1.bf16.msra.mxu0 %v2009_v24  ;;  %727 = vmatpush1.bf16.msra.mxu1 %v2014_v25 }
 0x250   :  { %687 = vmatprep.subr.bf16.mxu0 %v2021_v26  ;;  %728 = vmatprep.subr.bf16.mxu1 %v2026_v27 }
 0x253   :  { %688 = vmatpush1.bf16.msra.mxu0 %v2033_v28  ;;  %729 = vmatpush1.bf16.msra.mxu1 %v2038_v29 }
 0x254   :  { %689 = vmatprep.subr.bf16.mxu0 %v2045_v30  ;;  %730 = vmatprep.subr.bf16.mxu1 %v2050_v31 }
 0x257   :  { %690 = vmatpush1.bf16.msra.mxu0 %v2057_v32  ;;  %731 = vmatpush1.bf16.msra.mxu1 %v2062_v33 }
 0x258   :  { %827 = vmatprep.subr.bf16.mxu0 %v1877_v0  ;;  %868 = vmatprep.subr.bf16.mxu1 %v1882_v1 }
 0x30d   :  { %v557_v46 = vpop.f32.mrb[8].mxu0  ;;  %v598_v36 = vpop.f32.mrb[8].mxu1 }
 0x30e   :  { %v559_v37 = vpop.f32.mrb[9].mxu0  ;;  %v600_v38 = vpop.f32.mrb[9].mxu1 }
 0x30f   :  { %v609_v39 = vcombine.low %v557_v46, %v559_v37  ;;  %v610_v41 = vcombine.low %v598_v36, %v600_v38  ;;  %v561_v42 = vpop.f32.mrb[10].mxu0  ;;  %v602_v44 = vpop.f32.mrb[10].mxu1 }
 0x310   :  { %v562_v45 = vpop.f32.mrb[11].mxu0  ;;  %v603_v47 = vpop.f32.mrb[11].mxu1 }
 0x311   :  { %v617_v48 = vrot.slane %v609_v39, %v2104_v43  ;;  %v624_v49 = vrot.slane %v610_v41, %v2104_v43 }
 0x313   :  { %v625_v52 = vcombine.low %v617_v48, %v624_v49 }
 0x315   :  { %v627_v53 = vadd.f32 %v1523_v50, %v625_v52 }
 0x317   :  { %v1524_v54 = vmul.f32 -1.442695, %v627_v53  ;;  %v635_v55 = vrot.slane %v627_v53, 2  ;;  %v646_v40 = vrot.slane %v627_v53, 6  ;;  %v643_v59 = vrot.slane %v627_v53, 4 }
 0x319   :  { %1642 = vpow2.f32 %v1524_v54  ;;  %v1525_v56 = vmul.f32 -1.442695, %v635_v55  ;;  %v1526_v57 = vmul.f32 -1.442695, %v646_v40 }
 0x31b   :  { %1644 = vpow2.f32 %v1525_v56 }
 0x31c   :  { %1646 = vpow2.f32 %v1526_v57 }
 0x323   :  { %v1643_v58 = vpop.eup %1642 }
 0x324   :  { %v631_v61 = vadd.f32 1.0, %v1643_v58 }
 0x325   :  { %v1645_v62 = vpop.eup %1644 }
 0x326   :  { %1648 = vrcp.f32 %v631_v61  ;;  %v640_v63 = vadd.f32 1.0, %v1645_v62  ;;  %v1647_v3 = vpop.eup %1646  ;;  %v1528_v61 = vld [vmem:[%s2535_s0 + $0x18] sm:$0xff] }
 0x327   :  { %1650 = vtanh.f32 %v643_v59  ;;  %v651_v36 = vadd.f32 1.0, %v1647_v3 }
 0x328   :  { %1652 = vrcp.f32 %v640_v63 }
 0x329   :  { %1654 = vrcp.f32 %v651_v36 }
 0x330   :  { %v1649_v34 = vpop.eup %1648 }
 0x331   :  { %v1651_v35 = vpop.eup %1650 }
 0x332   :  { %v1653_v46 = vpop.eup %1652  ;;  %v655_v37 = vmul.f32 %v1651_v35, %v1649_v34 }
 0x333   :  { %v654_v38 = vmul.f32 %v1653_v46, %v2157_v60  ;;  %v1655_v41 = vpop.eup %1654 }
 0x335   :  { %v2201_v39 = vadd.f32 %v655_v37, %v654_v38 }
 0x337   :  { %1656 = vtanh.f32 %v2201_v39 }
 0x341   :  { %v1657_v42 = vpop.eup %1656 }
 0x342   :  { %v658_v44 = vmul.f32 %v1657_v42, %v1655_v41 }
 0x344   :  { %v666_v45 = vrot.slane %v658_v44, %v2114_v51  ;;  %1527 = vst.sshfl [vmem:[#allocation4 + $0x2] sm:$0x1 pattern:$0x73625140] %v658_v44  ;;  %v674_v47 = vpack.c.bf16 %v658_v44, %v658_v44 }
 0x346   :  { %v667_v48 = vcombine.high %v666_v45, %v666_v45  ;;  %708 = vmatmul.mubr.bf16.vlgmr.msra.gmra.mrb[12].mxu0 %v674_v47  ;;  %749 = vmatmul.mubr.bf16.vlgmr.msra.gmra.mrb[12].mxu1 %v674_v47 }
 0x347   :  { %828 = vmatpush1.bf16.msra.mxu0 %v1890_v4  ;;  %869 = vmatpush1.bf16.msra.mxu1 %v1895_v5 }
 0x348   :  { %671 = vst [vmem:[#allocation4 + $0xa] sm:$0x1] %v667_v48  ;;  %829 = vmatprep.subr.bf16.mxu0 %v1901_v6  ;;  %870 = vmatprep.subr.bf16.mxu1 %v1908_v7 }
 0x349   :  { %859 = vmatprep.mubr.bf16.mxu0 %v1840_v2  ;;  %900 = vmatprep.mubr.bf16.mxu1 %v1840_v2 }
 0x34b   :  { %830 = vmatpush1.bf16.msra.mxu0 %v1913_v8  ;;  %871 = vmatpush1.bf16.msra.mxu1 %v1919_v9 }
 0x34c   :  { %831 = vmatprep.subr.bf16.mxu0 %v1925_v10  ;;  %872 = vmatprep.subr.bf16.mxu1 %v1930_v11 }
 0x34f   :  { %832 = vmatpush1.bf16.msra.mxu0 %v1935_v12  ;;  %873 = vmatpush1.bf16.msra.mxu1 %v1940_v13 }
 0x350   :  { %833 = vmatprep.subr.bf16.mxu0 %v1947_v14  ;;  %874 = vmatprep.subr.bf16.mxu1 %v1954_v15 }
 0x353   :  { %834 = vmatpush1.bf16.msra.mxu0 %v1959_v16  ;;  %875 = vmatpush1.bf16.msra.mxu1 %v1966_v17 }
 0x354   :  { %835 = vmatprep.subr.bf16.mxu0 %v1971_v18  ;;  %876 = vmatprep.subr.bf16.mxu1 %v1978_v19 }
 0x357   :  { %836 = vmatpush1.bf16.msra.mxu0 %v1983_v20  ;;  %877 = vmatpush1.bf16.msra.mxu1 %v1988_v21 }
 0x358   :  { %837 = vmatprep.subr.bf16.mxu0 %v1995_v22  ;;  %878 = vmatprep.subr.bf16.mxu1 %v2002_v23 }
 0x35b   :  { %838 = vmatpush1.bf16.msra.mxu0 %v2009_v24  ;;  %879 = vmatpush1.bf16.msra.mxu1 %v2014_v25 }
 0x35c   :  { %839 = vmatprep.subr.bf16.mxu0 %v2021_v26  ;;  %880 = vmatprep.subr.bf16.mxu1 %v2026_v27 }
 0x35f   :  { %840 = vmatpush1.bf16.msra.mxu0 %v2033_v28  ;;  %881 = vmatpush1.bf16.msra.mxu1 %v2038_v29 }
 0x360   :  { %841 = vmatprep.subr.bf16.mxu0 %v2045_v30  ;;  %882 = vmatprep.subr.bf16.mxu1 %v2050_v31 }
 0x363   :  { %842 = vmatpush1.bf16.msra.mxu0 %v2057_v32  ;;  %883 = vmatpush1.bf16.msra.mxu1 %v2062_v33 }
 0x364   :  { %979 = vmatprep.subr.bf16.mxu0 %v1877_v0  ;;  %1020 = vmatprep.subr.bf16.mxu1 %v1882_v1 }
 0x419   :  { %v709_v60 = vpop.f32.mrb[12].mxu0  ;;  %v750_v49 = vpop.f32.mrb[12].mxu1 }
 0x41a   :  { %v711_v50 = vpop.f32.mrb[13].mxu0  ;;  %v752_v52 = vpop.f32.mrb[13].mxu1 }
 0x41b   :  { %v761_v53 = vcombine.low %v709_v60, %v711_v50  ;;  %v762_v54 = vcombine.low %v750_v49, %v752_v52  ;;  %v713_v55 = vpop.f32.mrb[14].mxu0  ;;  %v754_v56 = vpop.f32.mrb[14].mxu1 }
 0x41c   :  { %v714_v40 = vpop.f32.mrb[15].mxu0  ;;  %v755_v57 = vpop.f32.mrb[15].mxu1 }
 0x41d   :  { %v769_v58 = vrot.slane %v761_v53, %v2104_v43  ;;  %v776_v59 = vrot.slane %v762_v54, %v2104_v43 }
 0x41f   :  { %v777_v62 = vcombine.low %v769_v58, %v776_v59 }
 0x421   :  { %v779_v63 = vadd.f32 %v1528_v61, %v777_v62 }
 0x423   :  { %v1529_v3 = vmul.f32 -1.442695, %v779_v63  ;;  %v787_v34 = vrot.slane %v779_v63, 2  ;;  %v798_v46 = vrot.slane %v779_v63, 6  ;;  %v795_v38 = vrot.slane %v779_v63, 4 }
 0x425   :  { %1658 = vpow2.f32 %v1529_v3  ;;  %v1530_v35 = vmul.f32 -1.442695, %v787_v34  ;;  %v1531_v36 = vmul.f32 -1.442695, %v798_v46 }
 0x427   :  { %1660 = vpow2.f32 %v1530_v35 }
 0x428   :  { %1662 = vpow2.f32 %v1531_v36 }
 0x42f   :  { %v1659_v37 = vpop.eup %1658 }
 0x430   :  { %v783_v41 = vadd.f32 1.0, %v1659_v37 }
 0x431   :  { %v1661_v42 = vpop.eup %1660 }
 0x432   :  { %1664 = vrcp.f32 %v783_v41  ;;  %v792_v44 = vadd.f32 1.0, %v1661_v42  ;;  %v1663_v45 = vpop.eup %1662 }
 0x433   :  { %1666 = vtanh.f32 %v795_v38  ;;  %v803_v49 = vadd.f32 1.0, %v1663_v45 }
 0x434   :  { %1668 = vrcp.f32 %v792_v44 }
 0x435   :  { %1670 = vrcp.f32 %v803_v49 }
 0x43c   :  { %v1665_v47 = vpop.eup %1664 }
 0x43d   :  { %v1667_v48 = vpop.eup %1666 }
 0x43e   :  { %v1669_v60 = vpop.eup %1668  ;;  %v807_v50 = vmul.f32 %v1667_v48, %v1665_v47 }
 0x43f   :  { %v806_v52 = vmul.f32 %v1669_v60, %v2201_v39  ;;  %v1671_v54 = vpop.eup %1670 }
 0x441   :  { %v2245_v53 = vadd.f32 %v807_v50, %v806_v52 }
 0x443   :  { %1672 = vtanh.f32 %v2245_v53 }
 0x44d   :  { %v1673_v55 = vpop.eup %1672 }
 0x44e   :  { %v810_v56 = vmul.f32 %v1673_v55, %v1671_v54 }
 0x450   :  { %v818_v40 = vrot.slane %v810_v56, %v2114_v51  ;;  %1532 = vst.sshfl [vmem:[#allocation4 + $0x3] sm:$0x1 pattern:$0x73625140] %v810_v56  ;;  %v826_v57 = vpack.c.bf16 %v810_v56, %v810_v56  ;;  %v2296_v56 = vld [vmem:[%s2536_s1] ss:$16 sps:$4 sm:$0xff]  }
 0x452   :  { %v819_v58 = vcombine.high %v818_v40, %v818_v40  ;;  %860 = vmatmul.mubr.bf16.vlgmr.msra.gmra.mrb[16].mxu0 %v826_v57  ;;  %901 = vmatmul.mubr.bf16.vlgmr.msra.gmra.mrb[16].mxu1 %v826_v57  ;;  %v2308_v40 = vld [vmem:[%s2536_s1 + $0x24] ss:$16 sps:$4 sm:$0xff]   ;;  %v2314_v57 = vld [vmem:[%s2536_s1 + $0x2c] ss:$16 sps:$4 sm:$0xff]  }
 0x453   :  { %980 = vmatpush1.bf16.msra.mxu0 %v1890_v4  ;;  %1021 = vmatpush1.bf16.msra.mxu1 %v1895_v5 }
 0x454   :  { %823 = vst [vmem:[#allocation4 + $0xb] sm:$0x1] %v819_v58  ;;  %981 = vmatprep.subr.bf16.mxu0 %v1901_v6  ;;  %1022 = vmatprep.subr.bf16.mxu1 %v1908_v7  ;;  %v2322_v58 = vld [vmem:[%s2536_s1 + $0x20] ss:$16 sps:$4 sm:$0xff]  }
 0x455   :  { %1011 = vmatprep.mubr.bf16.mxu0 %v1840_v2  ;;  %1052 = vmatprep.mubr.bf16.mxu1 %v1840_v2 }
 0x457   :  { %982 = vmatpush1.bf16.msra.mxu0 %v1913_v8  ;;  %1023 = vmatpush1.bf16.msra.mxu1 %v1919_v9 }
 0x458   :  { %983 = vmatprep.subr.bf16.mxu0 %v1925_v10  ;;  %1024 = vmatprep.subr.bf16.mxu1 %v1930_v11 }
 0x45b   :  { %984 = vmatpush1.bf16.msra.mxu0 %v1935_v12  ;;  %1025 = vmatpush1.bf16.msra.mxu1 %v1940_v13 }
 0x45c   :  { %985 = vmatprep.subr.bf16.mxu0 %v1947_v14  ;;  %1026 = vmatprep.subr.bf16.mxu1 %v1954_v15 }
 0x45f   :  { %986 = vmatpush1.bf16.msra.mxu0 %v1959_v16  ;;  %1027 = vmatpush1.bf16.msra.mxu1 %v1966_v17 }
 0x460   :  { %987 = vmatprep.subr.bf16.mxu0 %v1971_v18  ;;  %1028 = vmatprep.subr.bf16.mxu1 %v1978_v19 }
 0x463   :  { %988 = vmatpush1.bf16.msra.mxu0 %v1983_v20  ;;  %1029 = vmatpush1.bf16.msra.mxu1 %v1988_v21 }
 0x464   :  { %989 = vmatprep.subr.bf16.mxu0 %v1995_v22  ;;  %1030 = vmatprep.subr.bf16.mxu1 %v2002_v23 }
 0x467   :  { %990 = vmatpush1.bf16.msra.mxu0 %v2009_v24  ;;  %1031 = vmatpush1.bf16.msra.mxu1 %v2014_v25 }
 0x468   :  { %991 = vmatprep.subr.bf16.mxu0 %v2021_v26  ;;  %1032 = vmatprep.subr.bf16.mxu1 %v2026_v27 }
 0x46b   :  { %992 = vmatpush1.bf16.msra.mxu0 %v2033_v28  ;;  %1033 = vmatpush1.bf16.msra.mxu1 %v2038_v29 }
 0x46c   :  { %993 = vmatprep.subr.bf16.mxu0 %v2045_v30  ;;  %1034 = vmatprep.subr.bf16.mxu1 %v2050_v31 }
 0x46f   :  { %994 = vmatpush1.bf16.msra.mxu0 %v2057_v32  ;;  %1035 = vmatpush1.bf16.msra.mxu1 %v2062_v33 }
 0x470   :  { %1131 = vmatprep.subr.bf16.mxu0 %v1877_v0  ;;  %1172 = vmatprep.subr.bf16.mxu1 %v1882_v1  ;;  %v1533_v0 = vld [vmem:[%s2535_s0 + $0x20] sm:$0xff] }
 0x525   :  { %v861_v4 = vpop.f32.mrb[16].mxu0  ;;  %v902_v5 = vpop.f32.mrb[16].mxu1 }
 0x526   :  { %v863_v6 = vpop.f32.mrb[17].mxu0  ;;  %v904_v7 = vpop.f32.mrb[17].mxu1 }
 0x527   :  { %v913_v8 = vcombine.low %v861_v4, %v863_v6  ;;  %v914_v9 = vcombine.low %v902_v5, %v904_v7  ;;  %v865_v10 = vpop.f32.mrb[18].mxu0  ;;  %v906_v11 = vpop.f32.mrb[18].mxu1  ;;  %v2328_v4 = vld [vmem:[%s2536_s1 + $0x28] ss:$16 sps:$4 sm:$0xff]   ;;  %v2334_v5 = vld [vmem:[%s2536_s1 + $0x44] ss:$16 sps:$4 sm:$0xff]  }
 0x528   :  { %v866_v12 = vpop.f32.mrb[19].mxu0  ;;  %v907_v13 = vpop.f32.mrb[19].mxu1  ;;  %v2340_v6 = vld [vmem:[%s2536_s1 + $0x4c] ss:$16 sps:$4 sm:$0xff]   ;;  %v2346_v7 = vld [vmem:[%s2536_s1 + $0x40] ss:$16 sps:$4 sm:$0xff]  }
 0x529   :  { %v921_v14 = vrot.slane %v913_v8, %v2104_v43  ;;  %v928_v15 = vrot.slane %v914_v9, %v2104_v43  ;;  %v2352_v8 = vld [vmem:[%s2536_s1 + $0x48] ss:$16 sps:$4 sm:$0xff]   ;;  %v2358_v9 = vld [vmem:[%s2536_s1 + $0x64] ss:$16 sps:$4 sm:$0xff]   ;;  %v2364_v10 = vld [vmem:[%s2536_s1 + $0x6c] ss:$16 sps:$4 sm:$0xff]  }
 0x52a   :  { %v2370_v11 = vld [vmem:[%s2536_s1 + $0x60] ss:$16 sps:$4 sm:$0xff]  }
 0x52b   :  { %v929_v16 = vcombine.low %v921_v14, %v928_v15 }
 0x52d   :  { %v931_v1 = vadd.f32 %v1533_v0, %v929_v16 }
 0x52f   :  { %v1534_v39 = vmul.f32 -1.442695, %v931_v1  ;;  %v939_v59 = vrot.slane %v931_v1, 2  ;;  %v950_v62 = vrot.slane %v931_v1, 6  ;;  %v947_v34 = vrot.slane %v931_v1, 4 }
 0x531   :  { %1674 = vpow2.f32 %v1534_v39  ;;  %v1535_v61 = vmul.f32 -1.442695, %v939_v59  ;;  %v1536_v63 = vmul.f32 -1.442695, %v950_v62 }
 0x533   :  { %1676 = vpow2.f32 %v1535_v61 }
 0x534   :  { %1678 = vpow2.f32 %v1536_v63 }
 0x53b   :  { %v1675_v3 = vpop.eup %1674 }
 0x53c   :  { %v935_v35 = vadd.f32 1.0, %v1675_v3 }
 0x53d   :  { %v1677_v46 = vpop.eup %1676 }
 0x53e   :  { %1680 = vrcp.f32 %v935_v35  ;;  %v944_v36 = vadd.f32 1.0, %v1677_v46  ;;  %v1679_v37 = vpop.eup %1678 }
 0x53f   :  { %1682 = vtanh.f32 %v947_v34  ;;  %v955_v44 = vadd.f32 1.0, %v1679_v37 }
 0x540   :  { %1684 = vrcp.f32 %v944_v36 }
 0x541   :  { %1686 = vrcp.f32 %v955_v44 }
 0x548   :  { %v1681_v38 = vpop.eup %1680 }
 0x549   :  { %v1683_v41 = vpop.eup %1682 }
 0x54a   :  { %v1685_v42 = vpop.eup %1684  ;;  %v959_v45 = vmul.f32 %v1683_v41, %v1681_v38 }
 0x54b   :  { %v958_v47 = vmul.f32 %v1685_v42, %v2245_v53  ;;  %v1687_v60 = vpop.eup %1686  ;;  %v2302_v53 = vld [vmem:[%s2536_s1 + $0x8] ss:$16 sps:$4 sm:$0xff]  }
 0x54d   :  { %v2289_v48 = vadd.f32 %v959_v45, %v958_v47 }
 0x54f   :  { %1688 = vtanh.f32 %v2289_v48 }
 0x559   :  { %v1689_v49 = vpop.eup %1688 }
 0x55a   :  { %v962_v50 = vmul.f32 %v1689_v49, %v1687_v60  ;;  %v1755_v60 = vld [vmem:[%s2536_s1 + $0x8c] ss:$16 sps:$4 sm:$0xff]   ;;  %v1756_v49 = vld [vmem:[%s2536_s1 + $0x80] ss:$16 sps:$4 sm:$0xff]  }
 0x55c   :  { %v970_v52 = vrot.slane %v962_v50, %v2114_v51  ;;  %1537 = vst.sshfl [vmem:[#allocation4 + $0x4] sm:$0x1 pattern:$0x73625140] %v962_v50  ;;  %v978_v54 = vpack.c.bf16 %v962_v50, %v962_v50  ;;  %v1757_v50 = vld [vmem:[%s2536_s1 + $0x88] ss:$16 sps:$4 sm:$0xff]  }
 0x55e   :  { %v971_v55 = vcombine.high %v970_v52, %v970_v52  ;;  %1012 = vmatmul.mubr.bf16.vlgmr.msra.gmra.mrb[20].mxu0 %v978_v54  ;;  %1053 = vmatmul.mubr.bf16.vlgmr.msra.gmra.mrb[20].mxu1 %v978_v54  ;;  %v1758_v52 = vld [vmem:[%s2536_s1 + $0xa4] ss:$16 sps:$4 sm:$0xff]   ;;  %v1759_v54 = vld [vmem:[%s2536_s1 + $0xac] ss:$16 sps:$4 sm:$0xff]  }
 0x55f   :  { %1132 = vmatpush1.bf16.msra.mxu0 %v2296_v56  ;;  %1173 = vmatpush1.bf16.msra.mxu1 %v2302_v53 }
 0x560   :  { %975 = vst [vmem:[#allocation4 + $0xc] sm:$0x1] %v971_v55  ;;  %1133 = vmatprep.subr.bf16.mxu0 %v2308_v40  ;;  %1174 = vmatprep.subr.bf16.mxu1 %v2314_v57  ;;  %v1760_v55 = vld [vmem:[%s2536_s1 + $0xa0] ss:$16 sps:$4 sm:$0xff]  }
 0x561   :  { %1163 = vmatprep.mubr.bf16.mxu0 %v1840_v2  ;;  %1204 = vmatprep.mubr.bf16.mxu1 %v1840_v2 }
 0x563   :  { %1134 = vmatpush1.bf16.msra.mxu0 %v2322_v58  ;;  %1175 = vmatpush1.bf16.msra.mxu1 %v2328_v4 }
 0x564   :  { %1135 = vmatprep.subr.bf16.mxu0 %v2334_v5  ;;  %1176 = vmatprep.subr.bf16.mxu1 %v2340_v6 }
 0x567   :  { %1136 = vmatpush1.bf16.msra.mxu0 %v2346_v7  ;;  %1177 = vmatpush1.bf16.msra.mxu1 %v2352_v8 }
 0x568   :  { %1137 = vmatprep.subr.bf16.mxu0 %v2358_v9  ;;  %1178 = vmatprep.subr.bf16.mxu1 %v2364_v10 }
 0x56b   :  { %1138 = vmatpush1.bf16.msra.mxu0 %v2370_v11  ;;  %1179 = vmatpush1.bf16.msra.mxu1 %v1966_v17  ;;  %v1751_v17 = vld [vmem:[%s2536_s1 + $0x4] ss:$16 sps:$4 sm:$0xff]  }
 0x56c   :  { %1139 = vmatprep.subr.bf16.mxu0 %v1971_v18  ;;  %1180 = vmatprep.subr.bf16.mxu1 %v1978_v19  ;;  %v1752_v18 = vld [vmem:[%s2536_s1 + $0xc] ss:$16 sps:$4 sm:$0xff]  }
 0x56f   :  { %1140 = vmatpush1.bf16.msra.mxu0 %v1983_v20  ;;  %1181 = vmatpush1.bf16.msra.mxu1 %v1988_v21 }
 0x570   :  { %1141 = vmatprep.subr.bf16.mxu0 %v1995_v22  ;;  %1182 = vmatprep.subr.bf16.mxu1 %v2002_v23 }
 0x573   :  { %1142 = vmatpush1.bf16.msra.mxu0 %v2009_v24  ;;  %1183 = vmatpush1.bf16.msra.mxu1 %v2014_v25 }
 0x574   :  { %1143 = vmatprep.subr.bf16.mxu0 %v2021_v26  ;;  %1184 = vmatprep.subr.bf16.mxu1 %v2026_v27 }
 0x577   :  { %1144 = vmatpush1.bf16.msra.mxu0 %v2033_v28  ;;  %1185 = vmatpush1.bf16.msra.mxu1 %v2038_v29 }
 0x578   :  { %1145 = vmatprep.subr.bf16.mxu0 %v2045_v30  ;;  %1186 = vmatprep.subr.bf16.mxu1 %v2050_v31  ;;  %v1538_v31 = vld [vmem:[%s2535_s0 + $0x28] sm:$0xff] }
 0x57b   :  { %1146 = vmatpush1.bf16.msra.mxu0 %v2057_v32  ;;  %1187 = vmatpush1.bf16.msra.mxu1 %v2062_v33 }
 0x57c   :  { %1283 = vmatprep.subr.bf16.mxu0 %v1751_v17  ;;  %1324 = vmatprep.subr.bf16.mxu1 %v1752_v18 }
 0x631   :  { %v1013_v19 = vpop.f32.mrb[20].mxu0  ;;  %v1054_v20 = vpop.f32.mrb[20].mxu1 }
 0x632   :  { %v1015_v21 = vpop.f32.mrb[21].mxu0  ;;  %v1056_v22 = vpop.f32.mrb[21].mxu1 }
 0x633   :  { %v1065_v23 = vcombine.low %v1013_v19, %v1015_v21  ;;  %v1066_v24 = vcombine.low %v1054_v20, %v1056_v22  ;;  %v1017_v25 = vpop.f32.mrb[22].mxu0  ;;  %v1058_v26 = vpop.f32.mrb[22].mxu1 }
 0x634   :  { %v1018_v27 = vpop.f32.mrb[23].mxu0  ;;  %v1059_v28 = vpop.f32.mrb[23].mxu1  ;;  %v1543_v25 = vld [vmem:[%s2535_s0 + $0x30] sm:$0xff] }
 0x635   :  { %v1073_v29 = vrot.slane %v1065_v23, %v2104_v43  ;;  %v1080_v30 = vrot.slane %v1066_v24, %v2104_v43 }
 0x637   :  { %v1081_v32 = vcombine.low %v1073_v29, %v1080_v30 }
 0x639   :  { %v1083_v33 = vadd.f32 %v1538_v31, %v1081_v32 }
 0x63b   :  { %v1539_v12 = vmul.f32 -1.442695, %v1083_v33  ;;  %v1091_v13 = vrot.slane %v1083_v33, 2  ;;  %v1102_v15 = vrot.slane %v1083_v33, 6  ;;  %v1099_v1 = vrot.slane %v1083_v33, 4 }
 0x63d   :  { %1690 = vpow2.f32 %v1539_v12  ;;  %v1540_v14 = vmul.f32 -1.442695, %v1091_v13  ;;  %v1541_v0 = vmul.f32 -1.442695, %v1102_v15 }
 0x63f   :  { %1692 = vpow2.f32 %v1540_v14 }
 0x640   :  { %1694 = vpow2.f32 %v1541_v0 }
 0x647   :  { %v1691_v16 = vpop.eup %1690 }
 0x648   :  { %v1087_v39 = vadd.f32 1.0, %v1691_v16 }
 0x649   :  { %v1693_v59 = vpop.eup %1692 }
 0x64a   :  { %1696 = vrcp.f32 %v1087_v39  ;;  %v1096_v61 = vadd.f32 1.0, %v1693_v59  ;;  %v1695_v62 = vpop.eup %1694 }
 0x64b   :  { %1698 = vtanh.f32 %v1099_v1  ;;  %v1107_v35 = vadd.f32 1.0, %v1695_v62 }
 0x64c   :  { %1700 = vrcp.f32 %v1096_v61 }
 0x64d   :  { %1702 = vrcp.f32 %v1107_v35 }
 0x654   :  { %v1697_v63 = vpop.eup %1696 }
 0x655   :  { %v1699_v3 = vpop.eup %1698 }
 0x656   :  { %v1701_v34 = vpop.eup %1700  ;;  %v1111_v46 = vmul.f32 %v1699_v3, %v1697_v63 }
 0x657   :  { %v1110_v36 = vmul.f32 %v1701_v34, %v2289_v48  ;;  %v1703_v38 = vpop.eup %1702  ;;  %v1754_v48 = vld [vmem:[%s2536_s1 + $0x84] ss:$16 sps:$4 sm:$0xff]  }
 0x659   :  { %v2402_v37 = vadd.f32 %v1111_v46, %v1110_v36 }
 0x65b   :  { %1704 = vtanh.f32 %v2402_v37 }
 0x665   :  { %v1705_v41 = vpop.eup %1704 }
 0x666   :  { %v1114_v42 = vmul.f32 %v1705_v41, %v1703_v38 }
 0x668   :  { %v1122_v44 = vrot.slane %v1114_v42, %v2114_v51  ;;  %1542 = vst.sshfl [vmem:[#allocation4 + $0x5] sm:$0x1 pattern:$0x73625140] %v1114_v42  ;;  %v1130_v45 = vpack.c.bf16 %v1114_v42, %v1114_v42 }
 0x66a   :  { %v1123_v47 = vcombine.high %v1122_v44, %v1122_v44  ;;  %1164 = vmatmul.mubr.bf16.vlgmr.msra.gmra.mrb[24].mxu0 %v1130_v45  ;;  %1205 = vmatmul.mubr.bf16.vlgmr.msra.gmra.mrb[24].mxu1 %v1130_v45 }
 0x66b   :  { %1284 = vmatpush1.bf16.msra.mxu0 %v2296_v56  ;;  %1325 = vmatpush1.bf16.msra.mxu1 %v2302_v53  ;;  %v1761_v56 = vld [vmem:[%s2536_s1 + $0xa8] ss:$16 sps:$4 sm:$0xff]   ;;  %v1762_v53 = vld [vmem:[%s2536_s1 + $0xc4] ss:$16 sps:$4 sm:$0xff]  }
 0x66c   :  { %1127 = vst [vmem:[#allocation4 + $0xd] sm:$0x1] %v1123_v47  ;;  %1285 = vmatprep.subr.bf16.mxu0 %v2308_v40  ;;  %1326 = vmatprep.subr.bf16.mxu1 %v2314_v57  ;;  %v1763_v40 = vld [vmem:[%s2536_s1 + $0xcc] ss:$16 sps:$4 sm:$0xff]   ;;  %v1764_v57 = vld [vmem:[%s2536_s1 + $0xc0] ss:$16 sps:$4 sm:$0xff]  }
 0x66d   :  { %1315 = vmatprep.mubr.bf16.mxu0 %v1840_v2  ;;  %1356 = vmatprep.mubr.bf16.mxu1 %v1840_v2  ;;  %v1753_v2 = vld [vmem:[%s2536_s1 + $0x68] ss:$16 sps:$4 sm:$0xff]  }
 0x66f   :  { %1286 = vmatpush1.bf16.msra.mxu0 %v2322_v58  ;;  %1327 = vmatpush1.bf16.msra.mxu1 %v2328_v4  ;;  %v1765_v58 = vld [vmem:[%s2536_s1 + $0xc8] ss:$16 sps:$4 sm:$0xff]   ;;  %v1766_v4 = vld [vmem:[%s2536_s1 + $0xe4] ss:$16 sps:$4 sm:$0xff]  }
 0x670   :  { %1287 = vmatprep.subr.bf16.mxu0 %v2334_v5  ;;  %1328 = vmatprep.subr.bf16.mxu1 %v2340_v6  ;;  %v1767_v5 = vld [vmem:[%s2536_s1 + $0xec] ss:$16 sps:$4 sm:$0xff]   ;;  %v1768_v6 = vld [vmem:[%s2536_s1 + $0xe0] ss:$16 sps:$4 sm:$0xff]  }
 0x673   :  { %1288 = vmatpush1.bf16.msra.mxu0 %v2346_v7  ;;  %1329 = vmatpush1.bf16.msra.mxu1 %v2352_v8  ;;  %v1769_v7 = vld [vmem:[%s2536_s1 + $0xe8] ss:$16 sps:$4 sm:$0xff]  }
 0x674   :  { %1289 = vmatprep.subr.bf16.mxu0 %v2358_v9  ;;  %1330 = vmatprep.subr.bf16.mxu1 %v2364_v10 }
 0x677   :  { %1290 = vmatpush1.bf16.msra.mxu0 %v2370_v11  ;;  %1331 = vmatpush1.bf16.msra.mxu1 %v1753_v2 }
 0x678   :  { %1291 = vmatprep.subr.bf16.mxu0 %v1754_v48  ;;  %1332 = vmatprep.subr.bf16.mxu1 %v1755_v60 }
 0x67b   :  { %1292 = vmatpush1.bf16.msra.mxu0 %v1756_v49  ;;  %1333 = vmatpush1.bf16.msra.mxu1 %v1757_v50 }
 0x67c   :  { %1293 = vmatprep.subr.bf16.mxu0 %v1758_v52  ;;  %1334 = vmatprep.subr.bf16.mxu1 %v1759_v54  ;;  %v1548_v54 = vld [vmem:[%s2535_s0 + $0x38] sm:$0xff]  ;;  %s1844_s0 = smov [#allocation6]  }
 0x67d   :  { %s1457_s28 = sshll.u32 %s1844_s0, 4  ;;  %s1458_s28 = int_to_ptr.vmem [resolvable:$true] %s1457_s28 }
 0x67e   :  { %s1770_s7 = scalar_lea.vmem %s1458_s28, 32  ;;  %p1775_p1 = scmp.lt.s32.totalorder %s1458_s28, %s1458_s28 }
 0x67f   :  { %1294 = vmatpush1.bf16.msra.mxu0 %v1760_v55  ;;  %1335 = vmatpush1.bf16.msra.mxu1 %v1761_v56  ;;  %p1771_p0 = scmp.ne.s32.totalorder %s1458_s28, %s1770_s7  ;;  %p1776_p2 = scmp.lt.s32.totalorder %s1770_s7, %s1770_s7 }
 0x680   :  { %1295 = vmatprep.subr.bf16.mxu0 %v1762_v53  ;;  %1336 = vmatprep.subr.bf16.mxu1 %v1763_v40 }
 0x681   :  { %p1777_p3 = por %p1776_p2, %p1775_p1 }
 0x683   :  { %1296 = vmatpush1.bf16.msra.mxu0 %v1764_v57  ;;  %1337 = vmatpush1.bf16.msra.mxu1 %v1765_v58  ;;  %p1778_p4 = pnand %p1777_p3, %p1771_p0 }
 0x684   :  { %1297 = vmatprep.subr.bf16.mxu0 %v1766_v4  ;;  %1338 = vmatprep.subr.bf16.mxu1 %v1767_v5 }
 0x687   :  { %1298 = vmatpush1.bf16.msra.mxu0 %v1768_v6  ;;  %1339 = vmatpush1.bf16.msra.mxu1 %v1769_v7 }
 0x73d   :  { %v1165_v8 = vpop.f32.mrb[24].mxu0  ;;  %v1206_v9 = vpop.f32.mrb[24].mxu1 }
 0x73e   :  { %v1167_v10 = vpop.f32.mrb[25].mxu0  ;;  %v1208_v11 = vpop.f32.mrb[25].mxu1 }
 0x73f   :  { %v1217_v17 = vcombine.low %v1165_v8, %v1167_v10  ;;  %v1218_v18 = vcombine.low %v1206_v9, %v1208_v11  ;;  %v1169_v19 = vpop.f32.mrb[26].mxu0  ;;  %v1210_v20 = vpop.f32.mrb[26].mxu1 }
 0x740   :  { %v1170_v21 = vpop.f32.mrb[27].mxu0  ;;  %v1211_v22 = vpop.f32.mrb[27].mxu1 }
 0x741   :  { %v1225_v23 = vrot.slane %v1217_v17, %v2104_v43  ;;  %v1232_v24 = vrot.slane %v1218_v18, %v2104_v43 }
 0x743   :  { %v1233_v26 = vcombine.low %v1225_v23, %v1232_v24 }
 0x745   :  { %v1235_v27 = vadd.f32 %v1543_v25, %v1233_v26 }
 0x747   :  { %v1544_v28 = vmul.f32 -1.442695, %v1235_v27  ;;  %v1243_v29 = vrot.slane %v1235_v27, 2  ;;  %v1254_v31 = vrot.slane %v1235_v27, 6  ;;  %v1251_v12 = vrot.slane %v1235_v27, 4 }
 0x749   :  { %1706 = vpow2.f32 %v1544_v28  ;;  %v1545_v30 = vmul.f32 -1.442695, %v1243_v29  ;;  %v1546_v32 = vmul.f32 -1.442695, %v1254_v31 }
 0x74b   :  { %1708 = vpow2.f32 %v1545_v30 }
 0x74c   :  { %1710 = vpow2.f32 %v1546_v32 }
 0x753   :  { %v1707_v33 = vpop.eup %1706 }
 0x754   :  { %v1239_v13 = vadd.f32 1.0, %v1707_v33 }
 0x755   :  { %v1709_v14 = vpop.eup %1708 }
 0x756   :  { %1712 = vrcp.f32 %v1239_v13  ;;  %v1248_v15 = vadd.f32 1.0, %v1709_v14  ;;  %v1711_v0 = vpop.eup %1710 }
 0x757   :  { %1714 = vtanh.f32 %v1251_v12  ;;  %v1259_v59 = vadd.f32 1.0, %v1711_v0 }
 0x758   :  { %1716 = vrcp.f32 %v1248_v15 }
 0x759   :  { %1718 = vrcp.f32 %v1259_v59 }
 0x760   :  { %v1713_v16 = vpop.eup %1712 }
 0x761   :  { %v1715_v1 = vpop.eup %1714 }
 0x762   :  { %v1717_v39 = vpop.eup %1716  ;;  %v1263_v61 = vmul.f32 %v1715_v1, %v1713_v16 }
 0x763   :  { %v1262_v62 = vmul.f32 %v1717_v39, %v2402_v37  ;;  %v1719_v3 = vpop.eup %1718 }
 0x765   :  { %v1264_v63 = vadd.f32 %v1263_v61, %v1262_v62 }
 0x767   :  { %1720 = vtanh.f32 %v1264_v63 }
 0x771   :  { %v1721_v34 = vpop.eup %1720 }
 0x772   :  { %v1266_v35 = vmul.f32 %v1721_v34, %v1719_v3 }
 0x774   :  { %v1274_v46 = vrot.slane %v1266_v35, %v2114_v51  ;;  %1547 = vst.sshfl [vmem:[#allocation4 + $0x6] sm:$0x1 pattern:$0x73625140] %v1266_v35  ;;  %v1282_v36 = vpack.c.bf16 %v1266_v35, %v1266_v35 }
 0x776   :  { %v1275_v38 = vcombine.high %v1274_v46, %v1274_v46  ;;  %1316 = vmatmul.mubr.bf16.vlgmr.msra.gmra.mrb[28].mxu0 %v1282_v36  ;;  %1357 = vmatmul.mubr.bf16.vlgmr.msra.gmra.mrb[28].mxu1 %v1282_v36 }
 0x778   :  { %1279 = vst [vmem:[#allocation4 + $0xe] sm:$0x1] %v1275_v38 }
 0x849   :  { %v1317_v41 = vpop.f32.mrb[28].mxu0  ;;  %v1358_v42 = vpop.f32.mrb[28].mxu1 }
 0x84a   :  { %v1319_v44 = vpop.f32.mrb[29].mxu0  ;;  %v1360_v45 = vpop.f32.mrb[29].mxu1 }
 0x84b   :  { %v1369_v47 = vcombine.low %v1317_v41, %v1319_v44  ;;  %v1370_v37 = vcombine.low %v1358_v42, %v1360_v45  ;;  %v1321_v2 = vpop.f32.mrb[30].mxu0  ;;  %v1362_v48 = vpop.f32.mrb[30].mxu1 }
 0x84c   :  { %v1322_v60 = vpop.f32.mrb[31].mxu0  ;;  %v1363_v49 = vpop.f32.mrb[31].mxu1 }
 0x84d   :  { %v1377_v50 = vrot.slane %v1369_v47, %v2104_v43  ;;  %v1384_v52 = vrot.slane %v1370_v37, %v2104_v43 }
 0x84f   :  { %v1385_v55 = vcombine.low %v1377_v50, %v1384_v52 }
 0x851   :  { %v1387_v56 = vadd.f32 %v1548_v54, %v1385_v55 }
 0x853   :  { %v1549_v53 = vmul.f32 -1.442695, %v1387_v56  ;;  %v1395_v40 = vrot.slane %v1387_v56, 2  ;;  %v1406_v58 = vrot.slane %v1387_v56, 6  ;;  %v1403_v6 = vrot.slane %v1387_v56, 4 }
 0x855   :  { %1722 = vpow2.f32 %v1549_v53  ;;  %v1550_v57 = vmul.f32 -1.442695, %v1395_v40  ;;  %v1551_v4 = vmul.f32 -1.442695, %v1406_v58 }
 0x857   :  { %1724 = vpow2.f32 %v1550_v57 }
 0x858   :  { %1726 = vpow2.f32 %v1551_v4 }
 0x85f   :  { %v1723_v5 = vpop.eup %1722 }
 0x860   :  { %v1391_v7 = vadd.f32 1.0, %v1723_v5 }
 0x861   :  { %v1725_v8 = vpop.eup %1724 }
 0x862   :  { %1728 = vrcp.f32 %v1391_v7  ;;  %v1400_v43 = vadd.f32 1.0, %v1725_v8  ;;  %v1727_v9 = vpop.eup %1726 }
 0x863   :  { %1730 = vtanh.f32 %v1403_v6  ;;  %v1411_v18 = vadd.f32 1.0, %v1727_v9 }
 0x864   :  { %1732 = vrcp.f32 %v1400_v43 }
 0x865   :  { %1734 = vrcp.f32 %v1411_v18 }
 0x86c   :  { %v1729_v10 = vpop.eup %1728 }
 0x86d   :  { %v1731_v11 = vpop.eup %1730 }
 0x86e   :  { %v1733_v17 = vpop.eup %1732  ;;  %v1415_v19 = vmul.f32 %v1731_v11, %v1729_v10 }
 0x86f   :  { %v1414_v20 = vmul.f32 %v1733_v17, %v1264_v63  ;;  %v1735_v22 = vpop.eup %1734 }
 0x871   :  { %v1416_v21 = vadd.f32 %v1415_v19, %v1414_v20 }
 0x873   :  { %1736 = vtanh.f32 %v1416_v21  ;;  %1433 = vst [vmem:[#allocation3] sm:$0x3] %v1416_v21  ;;  %1438 = vst [vmem:[#allocation8] sm:$0x3] %v1416_v21 }
 0x87d   :  { %v1737_v23 = vpop.eup %1736 }
 0x87e   :  { %v1418_v24 = vmul.f32 %v1737_v23, %v1735_v22 }
 0x880   :  { %v1426_v25 = vrot.slane %v1418_v24, %v2114_v51  ;;  %1552 = vst.sshfl [vmem:[#allocation4 + $0x7] sm:$0x1 pattern:$0x73625140] %v1418_v24  ;;  %1432 = vst [vmem:[#allocation2] sm:$0x3] %v1418_v24 }
 0x881   :  { %1437 = vst [vmem:[#allocation6] sm:$0x3] %v1418_v24 }
 0x882   :  { %1781 = shalt.err (!%p1778_p4)
}
 0x883   :  { %s1782_s10 = scalar_lea.hbm %s2538_s3, 32 }
 0x884   :  { %p1783_p5 = scmp.ne.s32.totalorder %s2538_s3, %s1782_s10  ;;  %p1786_p6 = scmp.lt.u32.totalorder %s1782_s10, %s2538_s3 }
 0x886   :  { %p1788_p7 = pnand %p1786_p6, %p1783_p5 }
 0x888   :  { %1791 = shalt.err (!%p1788_p7)
}
 0x889   :  { %1460 = dma.vmem_to_hbm [thread:$0]  %s1458_s28, 32, %s2538_s3, [#allocation7]   ;;  %v1427_v51 = vcombine.high %v1426_v25, %v1426_v25 }
 0x88a   :  { %s1792_s17 = scalar_lea.vmem %s2486_s6, 32  ;;  %p1797_p9 = scmp.lt.s32.totalorder %s2486_s6, %s2486_s6 }
 0x88b   :  { %p1793_p8 = scmp.ne.s32.totalorder %s2486_s6, %s1792_s17  ;;  %p1798_p10 = scmp.lt.s32.totalorder %s1792_s17, %s1792_s17 }
 0x88d   :  { %p1799_p11 = por %p1798_p10, %p1797_p9 }
 0x88f   :  { %p1800_p12 = pnand %p1799_p11, %p1793_p8 }
 0x891   :  { %1803 = shalt.err (!%p1800_p12)
}
 0x892   :  { %s1804_s20 = scalar_lea.hbm %s2539_s4, 32 }
 0x893   :  { %p1805_p13 = scmp.ne.s32.totalorder %s2539_s4, %s1804_s20  ;;  %p1808_p0 = scmp.lt.u32.totalorder %s1804_s20, %s2539_s4 }
 0x895   :  { %p1810_p1 = pnand %p1808_p0, %p1805_p13 }
 0x897   :  { %1813 = shalt.err (!%p1810_p1)
}
 0x898   :  { %1470 = dma.vmem_to_hbm [thread:$0]  %s2486_s6, 32, %s2539_s4, [#allocation7]   ;;  %1431 = vst [vmem:[#allocation4 + $0xf] sm:$0x1] %v1427_v51 }
 0x899   :  { %s1814_s26 = scalar_lea.vmem %s2484_s30, 256  ;;  %p1819_p3 = scmp.lt.s32.totalorder %s2484_s30, %s2484_s30 }
 0x89a   :  { %p1815_p2 = scmp.ne.s32.totalorder %s2484_s30, %s1814_s26  ;;  %p1820_p4 = scmp.lt.s32.totalorder %s1814_s26, %s1814_s26 }
 0x89c   :  { %p1821_p5 = por %p1820_p4, %p1819_p3 }
 0x89e   :  { %p1822_p6 = pnand %p1821_p5, %p1815_p2 }
 0x8a0   :  { %1825 = shalt.err (!%p1822_p6)
}
 0x8a1   :  { %s1826_s0 = scalar_lea.hbm %s2537_s2, 256 }
 0x8a2   :  { %p1827_p7 = scmp.ne.s32.totalorder %s2537_s2, %s1826_s0  ;;  %p1830_p8 = scmp.lt.u32.totalorder %s1826_s0, %s2537_s2 }
 0x8a4   :  { %p1832_p9 = pnand %p1830_p8, %p1827_p7 }
 0x8a6   :  { %1835 = shalt.err (!%p1832_p9)
}
 0x8a7   :  { %s1847_s4 = smov 128   ;;  %s1848_s6 = smov 8  }
 0x8a8   :  { %1450 = dma.vmem_to_hbm [thread:$0]  %s2484_s30, 256, %s2537_s2, [#allocation5], %s1847_s4, %s1847_s4, %s1848_s6  }
 0x8a9   :  { %1836 = dma.done.wait [#allocation5], 256  }
 0x8aa   :  { %1837 = vsyncadd [#allocation5], 4294967040 }
 0x8ab   :  { %1838 = dma.done.wait [#allocation7], 64  }
 0x8ac   :  { %1839 = vsyncadd [#allocation7], 4294967232 }
 0x8ad   :  { %1480 = vsyncpa [#allocation5], 1 }
 0x8ae   :  { %1481 = vsyncpa [#allocation7], 1 }

// kernel: encoder_forward.3
= control target key start
LH: loop header
LB: loop body
LE: loop exit
PB: predicated region body
PF: predicated region fallthrough
CT: control target
= control target key end

     0   :  { %vm2601_vm0 = vcmask 1044480   ;;  %vm2602_vm1 = vcmask 1045504   ;;  %vm1832_vm2 = vcmask 220160   ;;  %v8268_v1 = vmov 65535   ;;  %s10569_s1 = inlined_call_operand.vmem [shape: bf16[27,128], index: 1, kind: input, shape index: {}]   ;;  %s10570_s0 = inlined_call_operand.vmem [shape: bf16[4096,27], index: 0, kind: input, shape index: {}]   ;;  %s10571_s2 = inlined_call_operand.vmem [shape: f32[1,128], index: 2, kind: input, shape index: {}]   ;;  %s10572_s3 = inlined_call_operand.vmem [shape: bf16[16,4096], index: 3, kind: input, shape index: {}]   ;;  %s10573_s4 = inlined_call_operand.vmem [shape: bf16[16,128], index: 4, kind: output, shape index: {}]  }
   0x1   :  { %v8006_v0 = vld [vmem:[%s10569_s1] sm:$0xff]   ;;  %v2603_v2 = vsel %vm2601_vm0, 4294967295, %v8268_v1  ;;  %v8007_v3 = vld [vmem:[%s10569_s1 + $0x8] sm:$0x3f]   ;;  %v8010_v8 = vld [vmem:[%s10570_s0 + $0x10] sm:$0xff]  }
   0x2   :  { %7485 = vmatprep.subr.bf16.mxu0 %v8006_v0  ;;  %v2604_v4 = vsel %vm2602_vm1, %v2603_v2, 0  ;;  %v8008_v5 = vld [vmem:[%s10570_s0] sm:$0xff]   ;;  %8001 = vmatprep.subr.bf16.mxu1 %v8006_v0  ;;  %v8009_v7 = vld [vmem:[%s10570_s0 + $0x8] sm:$0xff]   ;;  %v8011_v9 = vld [vmem:[%s10570_s0 + $0x18] sm:$0xff]  }
   0x3   :  { %7486 = vmatpush3.bf16.msra.mxu0 %v8006_v0  ;;  %v2606_v6 = vand.u32 %v8007_v3, %v2604_v4  ;;  %8003 = vmatpush3.bf16.msra.mxu1 %v8006_v0  ;;  %v8012_v10 = vld [vmem:[%s10570_s0 + $0x20] sm:$0xff]   ;;  %v8022_v11 = vld [vmem:[%s10570_s0 + $0x5f0] sm:$0xff]   ;;  %v8023_v12 = vld [vmem:[%s10570_s0 + $0x5f8] sm:$0xff]  }
   0x4   :  { %7489 = vmatprep.mubr.msk.bf16.mxu0 %vm1832_vm2, %v8008_v5  ;;  %7869 = vmatprep.mubr.msk.bf16.mxu1 %vm1832_vm2, %v8022_v11  ;;  %v8026_v13 = vld [vmem:[%s10570_s0 + $0x600] sm:$0xff]   ;;  %v8013_v14 = vld [vmem:[%s10570_s0 + $0x28] sm:$0xff]   ;;  %v8014_v15 = vld [vmem:[%s10570_s0 + $0x30] sm:$0xff]  }
   0x5   :  { %7487 = vmatprep.subr.bf16.mxu0 %v2606_v6  ;;  %8002 = vmatprep.subr.bf16.mxu1 %v2606_v6  ;;  %v8027_v16 = vld [vmem:[%s10570_s0 + $0x608] sm:$0xff]   ;;  %v8030_v17 = vld [vmem:[%s10570_s0 + $0x610] sm:$0xff]   ;;  %v8015_v18 = vld [vmem:[%s10570_s0 + $0x38] sm:$0xff]  }
   0x6   :  { %v8016_v19 = vld [vmem:[%s10570_s0 + $0x40] sm:$0xff]   ;;  %v8031_v20 = vld [vmem:[%s10570_s0 + $0x618] sm:$0xff]   ;;  %v8017_v22 = vld [vmem:[%s10570_s0 + $0x48] sm:$0xff]  }
   0x7   :  { %7488 = vmatpush3.bf16.msra.mxu0 %v2606_v6  ;;  %8004 = vmatpush3.bf16.msra.mxu1 %v2606_v6  ;;  %v8034_v21 = vld [vmem:[%s10570_s0 + $0x620] sm:$0xff]   ;;  %v8018_v23 = vld [vmem:[%s10570_s0 + $0x50] sm:$0xff]   ;;  %v8035_v24 = vld [vmem:[%s10570_s0 + $0x628] sm:$0xff]  }
   0x8   :  { %v8038_v25 = vld [vmem:[%s10570_s0 + $0x630] sm:$0xff]   ;;  %v8019_v26 = vld [vmem:[%s10570_s0 + $0x58] sm:$0xff]   ;;  %v8020_v27 = vld [vmem:[%s10570_s0 + $0x60] sm:$0xff]  }
   0x9   :  { %v8039_v28 = vld [vmem:[%s10570_s0 + $0x638] sm:$0xff]   ;;  %v8042_v29 = vld [vmem:[%s10570_s0 + $0x640] sm:$0xff]   ;;  %v8021_v30 = vld [vmem:[%s10570_s0 + $0x68] sm:$0xff]  }
   0xa   :  { %7490 = vmatmul.mubr.msk.bf16.vlgmr.msra.gmra.mrb[0].mxu0 %vm1832_vm2, %v8009_v7  ;;  %7870 = vmatmul.mubr.msk.bf16.vlgmr.msra.gmra.mrb[0].mxu1 %vm1832_vm2, %v8023_v12  ;;  %v8024_v31 = vld [vmem:[%s10570_s0 + $0x70] sm:$0xff]   ;;  %v8043_v32 = vld [vmem:[%s10570_s0 + $0x648] sm:$0xff]   ;;  %v8025_v34 = vld [vmem:[%s10570_s0 + $0x78] sm:$0xff]  }
   0xb   :  { %7493 = vmatprep.mubr.msk.bf16.mxu0 %vm1832_vm2, %v8010_v8  ;;  %7873 = vmatprep.mubr.msk.bf16.mxu1 %vm1832_vm2, %v8026_v13  ;;  %v8046_v33 = vld [vmem:[%s10570_s0 + $0x650] sm:$0xff]   ;;  %v8028_v35 = vld [vmem:[%s10570_s0 + $0x80] sm:$0xff]   ;;  %v8047_v36 = vld [vmem:[%s10570_s0 + $0x658] sm:$0xff]  }
   0xc   :  { %v8050_v37 = vld [vmem:[%s10570_s0 + $0x660] sm:$0xff]   ;;  %v8029_v38 = vld [vmem:[%s10570_s0 + $0x88] sm:$0xff]   ;;  %v8032_v39 = vld [vmem:[%s10570_s0 + $0x90] sm:$0xff]  }
   0xd   :  { %v8051_v40 = vld [vmem:[%s10570_s0 + $0x668] sm:$0xff]   ;;  %v8054_v41 = vld [vmem:[%s10570_s0 + $0x670] sm:$0xff]   ;;  %v8033_v42 = vld [vmem:[%s10570_s0 + $0x98] sm:$0xff]  }
   0xe   :  { %v8036_v43 = vld [vmem:[%s10570_s0 + $0xa0] sm:$0xff]   ;;  %v8055_v44 = vld [vmem:[%s10570_s0 + $0x678] sm:$0xff]   ;;  %v8037_v46 = vld [vmem:[%s10570_s0 + $0xa8] sm:$0xff]  }
   0xf   :  { %v8058_v45 = vld [vmem:[%s10570_s0 + $0x680] sm:$0xff]   ;;  %v8040_v47 = vld [vmem:[%s10570_s0 + $0xb0] sm:$0xff]   ;;  %v8059_v48 = vld [vmem:[%s10570_s0 + $0x688] sm:$0xff]  }
  0x10   :  { %v8062_v49 = vld [vmem:[%s10570_s0 + $0x690] sm:$0xff]   ;;  %v8041_v50 = vld [vmem:[%s10570_s0 + $0xb8] sm:$0xff]   ;;  %v8044_v51 = vld [vmem:[%s10570_s0 + $0xc0] sm:$0xff]  }
  0x11   :  { %v8063_v52 = vld [vmem:[%s10570_s0 + $0x698] sm:$0xff]   ;;  %v8066_v53 = vld [vmem:[%s10570_s0 + $0x6a0] sm:$0xff]   ;;  %v8045_v54 = vld [vmem:[%s10570_s0 + $0xc8] sm:$0xff]  }
  0x12   :  { %7494 = vmatmul.mubr.msk.bf16.gmra.mrb[4].mxu0 %vm1832_vm2, %v8011_v9  ;;  %7874 = vmatmul.mubr.msk.bf16.gmra.mrb[4].mxu1 %vm1832_vm2, %v8027_v16  ;;  %v8048_v55 = vld [vmem:[%s10570_s0 + $0xd0] sm:$0xff]   ;;  %v8067_v56 = vld [vmem:[%s10570_s0 + $0x6a8] sm:$0xff]   ;;  %v8049_v58 = vld [vmem:[%s10570_s0 + $0xd8] sm:$0xff]  }
  0x13   :  { %7497 = vmatprep.mubr.msk.bf16.mxu0 %vm1832_vm2, %v8012_v10  ;;  %7877 = vmatprep.mubr.msk.bf16.mxu1 %vm1832_vm2, %v8030_v17  ;;  %v8070_v57 = vld [vmem:[%s10570_s0 + $0x6b0] sm:$0xff]   ;;  %v8052_v59 = vld [vmem:[%s10570_s0 + $0xe0] sm:$0xff]   ;;  %v8071_v60 = vld [vmem:[%s10570_s0 + $0x6b8] sm:$0xff]  }
  0x14   :  { %v8074_v61 = vld [vmem:[%s10570_s0 + $0x6c0] sm:$0xff]   ;;  %v8053_v62 = vld [vmem:[%s10570_s0 + $0xe8] sm:$0xff]   ;;  %v8056_v63 = vld [vmem:[%s10570_s0 + $0xf0] sm:$0xff]  }
  0x15   :  { %v8075_v0 = vld [vmem:[%s10570_s0 + $0x6c8] sm:$0xff]   ;;  %v8078_v1 = vld [vmem:[%s10570_s0 + $0x6d0] sm:$0xff]   ;;  %v8057_v2 = vld [vmem:[%s10570_s0 + $0xf8] sm:$0xff]  }
  0x16   :  { %v8060_v3 = vld [vmem:[%s10570_s0 + $0x100] sm:$0xff]   ;;  %v8079_v4 = vld [vmem:[%s10570_s0 + $0x6d8] sm:$0xff]   ;;  %v8061_v6 = vld [vmem:[%s10570_s0 + $0x108] sm:$0xff]  }
  0x17   :  { %v8082_v5 = vld [vmem:[%s10570_s0 + $0x6e0] sm:$0xff]   ;;  %v8064_v7 = vld [vmem:[%s10570_s0 + $0x110] sm:$0xff]   ;;  %v8083_v8 = vld [vmem:[%s10570_s0 + $0x6e8] sm:$0xff]  }
  0x18   :  { %v8086_v9 = vld [vmem:[%s10570_s0 + $0x6f0] sm:$0xff]   ;;  %v8065_v10 = vld [vmem:[%s10570_s0 + $0x118] sm:$0xff]   ;;  %v8068_v11 = vld [vmem:[%s10570_s0 + $0x120] sm:$0xff]  }
  0x19   :  { %v8087_v12 = vld [vmem:[%s10570_s0 + $0x6f8] sm:$0xff]   ;;  %v8090_v13 = vld [vmem:[%s10570_s0 + $0x700] sm:$0xff]   ;;  %v8091_v16 = vld [vmem:[%s10570_s0 + $0x708] sm:$0xff]  }
  0x1a   :  { %7498 = vmatmul.mubr.msk.bf16.gmra.mrb[8].mxu0 %vm1832_vm2, %v8013_v14  ;;  %7878 = vmatmul.mubr.msk.bf16.gmra.mrb[8].mxu1 %vm1832_vm2, %v8031_v20  ;;  %v8069_v14 = vld [vmem:[%s10570_s0 + $0x128] sm:$0xff]   ;;  %v8094_v17 = vld [vmem:[%s10570_s0 + $0x710] sm:$0xff]   ;;  %v8095_v20 = vld [vmem:[%s10570_s0 + $0x718] sm:$0xff]  }
  0x1b   :  { %7501 = vmatprep.mubr.msk.bf16.mxu0 %vm1832_vm2, %v8014_v15  ;;  %7881 = vmatprep.mubr.msk.bf16.mxu1 %vm1832_vm2, %v8034_v21  ;;  %v8072_v15 = vld [vmem:[%s10570_s0 + $0x130] sm:$0xff]   ;;  %v8098_v21 = vld [vmem:[%s10570_s0 + $0x720] sm:$0xff]  }
  0x22   :  { %7502 = vmatmul.mubr.msk.bf16.gmra.mrb[12].mxu0 %vm1832_vm2, %v8015_v18  ;;  %7882 = vmatmul.mubr.msk.bf16.gmra.mrb[12].mxu1 %vm1832_vm2, %v8035_v24  ;;  %v8073_v18 = vld [vmem:[%s10570_s0 + $0x138] sm:$0xff]   ;;  %v8099_v24 = vld [vmem:[%s10570_s0 + $0x728] sm:$0xff]  }
  0x23   :  { %7505 = vmatprep.mubr.msk.bf16.mxu0 %vm1832_vm2, %v8016_v19  ;;  %7885 = vmatprep.mubr.msk.bf16.mxu1 %vm1832_vm2, %v8038_v25  ;;  %v8076_v19 = vld [vmem:[%s10570_s0 + $0x140] sm:$0xff]   ;;  %v8102_v25 = vld [vmem:[%s10570_s0 + $0x730] sm:$0xff]  }
  0x2a   :  { %7506 = vmatmul.mubr.msk.bf16.gmra.mrb[16].mxu0 %vm1832_vm2, %v8017_v22  ;;  %7886 = vmatmul.mubr.msk.bf16.gmra.mrb[16].mxu1 %vm1832_vm2, %v8039_v28  ;;  %v8077_v22 = vld [vmem:[%s10570_s0 + $0x148] sm:$0xff]   ;;  %v8103_v28 = vld [vmem:[%s10570_s0 + $0x738] sm:$0xff]  }
  0x2b   :  { %7509 = vmatprep.mubr.msk.bf16.mxu0 %vm1832_vm2, %v8018_v23  ;;  %7889 = vmatprep.mubr.msk.bf16.mxu1 %vm1832_vm2, %v8042_v29  ;;  %v8080_v23 = vld [vmem:[%s10570_s0 + $0x150] sm:$0xff]   ;;  %v8106_v29 = vld [vmem:[%s10570_s0 + $0x740] sm:$0xff]  }
  0x32   :  { %7510 = vmatmul.mubr.msk.bf16.gmra.mrb[20].mxu0 %vm1832_vm2, %v8019_v26  ;;  %7890 = vmatmul.mubr.msk.bf16.gmra.mrb[20].mxu1 %vm1832_vm2, %v8043_v32  ;;  %v8081_v26 = vld [vmem:[%s10570_s0 + $0x158] sm:$0xff]   ;;  %v8107_v32 = vld [vmem:[%s10570_s0 + $0x748] sm:$0xff]  }
  0x33   :  { %7513 = vmatprep.mubr.msk.bf16.mxu0 %vm1832_vm2, %v8020_v27  ;;  %7893 = vmatprep.mubr.msk.bf16.mxu1 %vm1832_vm2, %v8046_v33  ;;  %v8084_v27 = vld [vmem:[%s10570_s0 + $0x160] sm:$0xff]   ;;  %v8110_v33 = vld [vmem:[%s10570_s0 + $0x750] sm:$0xff]  }
  0x3a   :  { %7514 = vmatmul.mubr.msk.bf16.gmra.mrb[24].mxu0 %vm1832_vm2, %v8021_v30  ;;  %7894 = vmatmul.mubr.msk.bf16.gmra.mrb[24].mxu1 %vm1832_vm2, %v8047_v36  ;;  %v8085_v30 = vld [vmem:[%s10570_s0 + $0x168] sm:$0xff]   ;;  %v8111_v36 = vld [vmem:[%s10570_s0 + $0x758] sm:$0xff]  }
  0x3b   :  { %7517 = vmatprep.mubr.msk.bf16.mxu0 %vm1832_vm2, %v8024_v31  ;;  %7897 = vmatprep.mubr.msk.bf16.mxu1 %vm1832_vm2, %v8050_v37  ;;  %v8088_v31 = vld [vmem:[%s10570_s0 + $0x170] sm:$0xff]   ;;  %v8114_v37 = vld [vmem:[%s10570_s0 + $0x760] sm:$0xff]  }
  0x42   :  { %7518 = vmatmul.mubr.msk.bf16.gmra.mrb[28].mxu0 %vm1832_vm2, %v8025_v34  ;;  %7898 = vmatmul.mubr.msk.bf16.gmra.mrb[28].mxu1 %vm1832_vm2, %v8051_v40  ;;  %v8089_v34 = vld [vmem:[%s10570_s0 + $0x178] sm:$0xff]   ;;  %v8115_v40 = vld [vmem:[%s10570_s0 + $0x768] sm:$0xff]  }
  0x43   :  { %7521 = vmatprep.mubr.msk.bf16.mxu0 %vm1832_vm2, %v8028_v35  ;;  %7901 = vmatprep.mubr.msk.bf16.mxu1 %vm1832_vm2, %v8054_v41  ;;  %v8092_v35 = vld [vmem:[%s10570_s0 + $0x180] sm:$0xff]   ;;  %v8118_v41 = vld [vmem:[%s10570_s0 + $0x770] sm:$0xff]  }
  0x4a   :  { %7522 = vmatmul.mubr.msk.bf16.gmra.mrb[32].mxu0 %vm1832_vm2, %v8029_v38  ;;  %7902 = vmatmul.mubr.msk.bf16.gmra.mrb[32].mxu1 %vm1832_vm2, %v8055_v44  ;;  %v8093_v38 = vld [vmem:[%s10570_s0 + $0x188] sm:$0xff]   ;;  %v8119_v44 = vld [vmem:[%s10570_s0 + $0x778] sm:$0xff]  }
  0x4b   :  { %7525 = vmatprep.mubr.msk.bf16.mxu0 %vm1832_vm2, %v8032_v39  ;;  %7905 = vmatprep.mubr.msk.bf16.mxu1 %vm1832_vm2, %v8058_v45  ;;  %v8096_v39 = vld [vmem:[%s10570_s0 + $0x190] sm:$0xff]   ;;  %v8122_v45 = vld [vmem:[%s10570_s0 + $0x780] sm:$0xff]  }
  0x52   :  { %7526 = vmatmul.mubr.msk.bf16.gmra.mrb[36].mxu0 %vm1832_vm2, %v8033_v42  ;;  %7906 = vmatmul.mubr.msk.bf16.gmra.mrb[36].mxu1 %vm1832_vm2, %v8059_v48  ;;  %v8097_v42 = vld [vmem:[%s10570_s0 + $0x198] sm:$0xff]   ;;  %v8123_v48 = vld [vmem:[%s10570_s0 + $0x788] sm:$0xff]  }
  0x53   :  { %7529 = vmatprep.mubr.msk.bf16.mxu0 %vm1832_vm2, %v8036_v43  ;;  %7909 = vmatprep.mubr.msk.bf16.mxu1 %vm1832_vm2, %v8062_v49  ;;  %v8100_v43 = vld [vmem:[%s10570_s0 + $0x1a0] sm:$0xff]   ;;  %v8126_v49 = vld [vmem:[%s10570_s0 + $0x790] sm:$0xff]  }
  0x5a   :  { %7530 = vmatmul.mubr.msk.bf16.gmra.mrb[40].mxu0 %vm1832_vm2, %v8037_v46  ;;  %7910 = vmatmul.mubr.msk.bf16.gmra.mrb[40].mxu1 %vm1832_vm2, %v8063_v52  ;;  %v8101_v46 = vld [vmem:[%s10570_s0 + $0x1a8] sm:$0xff]   ;;  %v8105_v52 = vld [vmem:[%s10570_s0 + $0x1b8] sm:$0xff]  }
  0x5b   :  { %7533 = vmatprep.mubr.msk.bf16.mxu0 %vm1832_vm2, %v8040_v47  ;;  %7913 = vmatprep.mubr.msk.bf16.mxu1 %vm1832_vm2, %v8066_v53  ;;  %v8104_v47 = vld [vmem:[%s10570_s0 + $0x1b0] sm:$0xff]  }
  0x62   :  { %7534 = vmatmul.mubr.msk.bf16.gmra.mrb[44].mxu0 %vm1832_vm2, %v8041_v50  ;;  %7914 = vmatmul.mubr.msk.bf16.gmra.mrb[44].mxu1 %vm1832_vm2, %v8067_v56  ;;  %v8731_v50 = vld [vmem:[%s10571_s2] ss:$0 sm:$0xff] }
  0x63   :  { %7537 = vmatprep.mubr.msk.bf16.mxu0 %vm1832_vm2, %v8044_v51  ;;  %7917 = vmatprep.mubr.msk.bf16.mxu1 %vm1832_vm2, %v8070_v57 }
  0x6a   :  { %7538 = vmatmul.mubr.msk.bf16.gmra.mrb[48].mxu0 %vm1832_vm2, %v8045_v54  ;;  %7918 = vmatmul.mubr.msk.bf16.gmra.mrb[48].mxu1 %vm1832_vm2, %v8071_v60 }
  0x6b   :  { %7541 = vmatprep.mubr.msk.bf16.mxu0 %vm1832_vm2, %v8048_v55  ;;  %7921 = vmatprep.mubr.msk.bf16.mxu1 %vm1832_vm2, %v8074_v61  ;;  %v8108_v55 = vld [vmem:[%s10570_s0 + $0x1c0] sm:$0xff]  }
  0x6c   :  { %v8130_v61 = vld [vmem:[%s10570_s0 + $0x7a0] sm:$0xff]  }
  0x72   :  { %7542 = vmatmul.mubr.msk.bf16.gmra.mrb[52].mxu0 %vm1832_vm2, %v8049_v58  ;;  %7922 = vmatmul.mubr.msk.bf16.gmra.mrb[52].mxu1 %vm1832_vm2, %v8075_v0  ;;  %v8127_v58 = vld [vmem:[%s10570_s0 + $0x798] sm:$0xff]  }
  0x73   :  { %7545 = vmatprep.mubr.msk.bf16.mxu0 %vm1832_vm2, %v8052_v59  ;;  %7925 = vmatprep.mubr.msk.bf16.mxu1 %vm1832_vm2, %v8078_v1 }
  0x7a   :  { %7546 = vmatmul.mubr.msk.bf16.gmra.mrb[56].mxu0 %vm1832_vm2, %v8053_v62  ;;  %7926 = vmatmul.mubr.msk.bf16.gmra.mrb[56].mxu1 %vm1832_vm2, %v8079_v4 }
  0x7b   :  { %7549 = vmatprep.mubr.msk.bf16.mxu0 %vm1832_vm2, %v8056_v63  ;;  %7929 = vmatprep.mubr.msk.bf16.mxu1 %vm1832_vm2, %v8082_v5 }
  0x82   :  { %7550 = vmatmul.mubr.msk.bf16.gmra.mrb[60].mxu0 %vm1832_vm2, %v8057_v2  ;;  %7930 = vmatmul.mubr.msk.bf16.gmra.mrb[60].mxu1 %vm1832_vm2, %v8083_v8  ;;  %v8109_v8 = vld [vmem:[%s10570_s0 + $0x1c8] sm:$0xff]  }
  0x83   :  { %7553 = vmatprep.mubr.msk.bf16.mxu0 %vm1832_vm2, %v8060_v3  ;;  %7933 = vmatprep.mubr.msk.bf16.mxu1 %vm1832_vm2, %v8086_v9 }
  0x8a   :  { %7554 = vmatmul.mubr.msk.bf16.gmra.mrb[64].mxu0 %vm1832_vm2, %v8061_v6  ;;  %7934 = vmatmul.mubr.msk.bf16.gmra.mrb[64].mxu1 %vm1832_vm2, %v8087_v12  ;;  %v8131_v12 = vld [vmem:[%s10570_s0 + $0x7a8] sm:$0xff]  }
  0x8b   :  { %7557 = vmatprep.mubr.msk.bf16.mxu0 %vm1832_vm2, %v8064_v7  ;;  %7937 = vmatprep.mubr.msk.bf16.mxu1 %vm1832_vm2, %v8090_v13 }
  0x92   :  { %7558 = vmatmul.mubr.msk.bf16.gmra.mrb[68].mxu0 %vm1832_vm2, %v8065_v10  ;;  %7938 = vmatmul.mubr.msk.bf16.gmra.mrb[68].mxu1 %vm1832_vm2, %v8091_v16 }
  0x93   :  { %7561 = vmatprep.mubr.msk.bf16.mxu0 %vm1832_vm2, %v8068_v11  ;;  %7941 = vmatprep.mubr.msk.bf16.mxu1 %vm1832_vm2, %v8094_v17  ;;  %v8112_v11 = vld [vmem:[%s10570_s0 + $0x1d0] sm:$0xff]  }
  0x9a   :  { %7562 = vmatmul.mubr.msk.bf16.gmra.mrb[72].mxu0 %vm1832_vm2, %v8069_v14  ;;  %7942 = vmatmul.mubr.msk.bf16.gmra.mrb[72].mxu1 %vm1832_vm2, %v8095_v20 }
  0x9b   :  { %7565 = vmatprep.mubr.msk.bf16.mxu0 %vm1832_vm2, %v8072_v15  ;;  %7945 = vmatprep.mubr.msk.bf16.mxu1 %vm1832_vm2, %v8098_v21  ;;  %v8134_v15 = vld [vmem:[%s10570_s0 + $0x7b0] sm:$0xff]  }
  0xa2   :  { %7566 = vmatmul.mubr.msk.bf16.gmra.mrb[76].mxu0 %vm1832_vm2, %v8073_v18  ;;  %7946 = vmatmul.mubr.msk.bf16.gmra.mrb[76].mxu1 %vm1832_vm2, %v8099_v24 }
  0xa3   :  { %7569 = vmatprep.mubr.msk.bf16.mxu0 %vm1832_vm2, %v8076_v19  ;;  %7949 = vmatprep.mubr.msk.bf16.mxu1 %vm1832_vm2, %v8102_v25 }
  0xaa   :  { %7570 = vmatmul.mubr.msk.bf16.gmra.mrb[80].mxu0 %vm1832_vm2, %v8077_v22  ;;  %7950 = vmatmul.mubr.msk.bf16.gmra.mrb[80].mxu1 %vm1832_vm2, %v8103_v28 }
  0xab   :  { %7573 = vmatprep.mubr.msk.bf16.mxu0 %vm1832_vm2, %v8080_v23  ;;  %7953 = vmatprep.mubr.msk.bf16.mxu1 %vm1832_vm2, %v8106_v29  ;;  %v8116_v29 = vld [vmem:[%s10570_s0 + $0x1e0] sm:$0xff]  }
  0xb2   :  { %7574 = vmatmul.mubr.msk.bf16.gmra.mrb[84].mxu0 %vm1832_vm2, %v8081_v26  ;;  %7954 = vmatmul.mubr.msk.bf16.gmra.mrb[84].mxu1 %vm1832_vm2, %v8107_v32  ;;  %v8113_v26 = vld [vmem:[%s10570_s0 + $0x1d8] sm:$0xff]  }
  0xb3   :  { %7577 = vmatprep.mubr.msk.bf16.mxu0 %vm1832_vm2, %v8084_v27  ;;  %7957 = vmatprep.mubr.msk.bf16.mxu1 %vm1832_vm2, %v8110_v33  ;;  %v8138_v33 = vld [vmem:[%s10570_s0 + $0x7c0] sm:$0xff]  }
  0xba   :  { %7578 = vmatmul.mubr.msk.bf16.gmra.mrb[88].mxu0 %vm1832_vm2, %v8085_v30  ;;  %7958 = vmatmul.mubr.msk.bf16.gmra.mrb[88].mxu1 %vm1832_vm2, %v8111_v36  ;;  %v8135_v30 = vld [vmem:[%s10570_s0 + $0x7b8] sm:$0xff]  }
  0xbb   :  { %7581 = vmatprep.mubr.msk.bf16.mxu0 %vm1832_vm2, %v8088_v31  ;;  %7961 = vmatprep.mubr.msk.bf16.mxu1 %vm1832_vm2, %v8114_v37 }
  0xc2   :  { %7582 = vmatmul.mubr.msk.bf16.gmra.mrb[92].mxu0 %vm1832_vm2, %v8089_v34  ;;  %7962 = vmatmul.mubr.msk.bf16.gmra.mrb[92].mxu1 %vm1832_vm2, %v8115_v40 }
  0xc3   :  { %7585 = vmatprep.mubr.msk.bf16.mxu0 %vm1832_vm2, %v8092_v35  ;;  %7965 = vmatprep.mubr.msk.bf16.mxu1 %vm1832_vm2, %v8118_v41 }
  0xca   :  { %7586 = vmatmul.mubr.msk.bf16.gmra.mrb[96].mxu0 %vm1832_vm2, %v8093_v38  ;;  %7966 = vmatmul.mubr.msk.bf16.gmra.mrb[96].mxu1 %vm1832_vm2, %v8119_v44  ;;  %v8117_v44 = vld [vmem:[%s10570_s0 + $0x1e8] sm:$0xff]  }
  0xcb   :  { %7589 = vmatprep.mubr.msk.bf16.mxu0 %vm1832_vm2, %v8096_v39  ;;  %7969 = vmatprep.mubr.msk.bf16.mxu1 %vm1832_vm2, %v8122_v45 }
  0xd2   :  { %7590 = vmatmul.mubr.msk.bf16.gmra.mrb[100].mxu0 %vm1832_vm2, %v8097_v42  ;;  %7970 = vmatmul.mubr.msk.bf16.gmra.mrb[100].mxu1 %vm1832_vm2, %v8123_v48  ;;  %v8139_v48 = vld [vmem:[%s10570_s0 + $0x7c8] sm:$0xff]  }
  0xd3   :  { %7593 = vmatprep.mubr.msk.bf16.mxu0 %vm1832_vm2, %v8100_v43  ;;  %7973 = vmatprep.mubr.msk.bf16.mxu1 %vm1832_vm2, %v8126_v49 }
  0xda   :  { %7594 = vmatmul.mubr.msk.bf16.gmra.mrb[104].mxu0 %vm1832_vm2, %v8101_v46  ;;  %7974 = vmatmul.mubr.msk.bf16.gmra.mrb[104].mxu1 %vm1832_vm2, %v8127_v58 }
  0xdb   :  { %7597 = vmatprep.mubr.msk.bf16.mxu0 %vm1832_vm2, %v8104_v47  ;;  %7977 = vmatprep.mubr.msk.bf16.mxu1 %vm1832_vm2, %v8130_v61  ;;  %v8120_v47 = vld [vmem:[%s10570_s0 + $0x1f0] sm:$0xff]  }
  0xdd   :  { %v7491_v51 = vpop.f32.mrb[0].mxu0 }
  0xde   :  { %v2651_v53 = vadd.f32 %v7491_v51, %v8731_v50  ;;  %v2642_v54 = vpop.f32.mrb[1].mxu0 }
  0xdf   :  { %v2643_v56 = vadd.f32 %v8731_v50, %v2642_v54  ;;  %v7492_v57 = vpop.f32.mrb[2].mxu0 }
  0xe0   :  { %v2654_v59 = vadd.f32 %v7492_v57, %v8731_v50  ;;  %v2645_v60 = vpop.f32.mrb[3].mxu0  ;;  %v4691_v63 = vmax.f32 %v2651_v53, 0.0 }
  0xe1   :  { %v2646_v62 = vadd.f32 %v8731_v50, %v2645_v60  ;;  %v4689_v1 = vmax.f32 %v2643_v56, 0.0 }
  0xe2   :  { %v4692_v0 = vmax.f32 %v2654_v59, 0.0  ;;  %7598 = vmatmul.mubr.msk.bf16.gmra.mrb[108].mxu0 %vm1832_vm2, %v8105_v52  ;;  %7978 = vmatmul.mubr.msk.bf16.gmra.mrb[108].mxu1 %vm1832_vm2, %v8131_v12  ;;  %v8142_v52 = vld [vmem:[%s10570_s0 + $0x7d0] sm:$0xff]  }
  0xe3   :  { %v4690_v2 = vmax.f32 %v2646_v62, 0.0  ;;  %7601 = vmatprep.mubr.msk.bf16.mxu0 %vm1832_vm2, %v8108_v55  ;;  %7981 = vmatprep.mubr.msk.bf16.mxu1 %vm1832_vm2, %v8134_v15 }
  0xe4   :  { %v8756_v3 = vpack.c.bf16 %v4692_v0, %v4691_v63  ;;  %v8121_v63 = vld [vmem:[%s10570_s0 + $0x1f8] sm:$0xff]  }
  0xe5   :  { %v8759_v4 = vpack.c.bf16 %v4690_v2, %v4689_v1  ;;  %v7495_v5 = vpop.f32.mrb[4].mxu0  ;;  %v8124_v2 = vld [vmem:[%s10570_s0 + $0x200] sm:$0xff]  }
  0xe6   :  { %v2667_v6 = vadd.f32 %v7495_v5, %v8731_v50  ;;  %v2658_v7 = vpop.f32.mrb[5].mxu0  ;;  %v8143_v5 = vld [vmem:[%s10570_s0 + $0x7d8] sm:$0xff]  }
  0xe7   :  { %v2659_v9 = vadd.f32 %v8731_v50, %v2658_v7  ;;  %v7496_v10 = vpop.f32.mrb[6].mxu0 }
  0xe8   :  { %v2670_v13 = vadd.f32 %v7496_v10, %v8731_v50  ;;  %v2661_v14 = vpop.f32.mrb[7].mxu0  ;;  %v4695_v17 = vmax.f32 %v2667_v6, 0.0 }
  0xe9   :  { %v2662_v16 = vadd.f32 %v8731_v50, %v2661_v14  ;;  %v4693_v19 = vmax.f32 %v2659_v9, 0.0 }
  0xea   :  { %v4696_v18 = vmax.f32 %v2670_v13, 0.0  ;;  %7602 = vmatmul.mubr.msk.bf16.gmra.mrb[112].mxu0 %vm1832_vm2, %v8109_v8  ;;  %7982 = vmatmul.mubr.msk.bf16.gmra.mrb[112].mxu1 %vm1832_vm2, %v8135_v30  ;;  %v8146_v8 = vld [vmem:[%s10570_s0 + $0x7e0] sm:$0xff]  }
  0xeb   :  { %v4694_v20 = vmax.f32 %v2662_v16, 0.0  ;;  %7605 = vmatprep.mubr.msk.bf16.mxu0 %vm1832_vm2, %v8112_v11  ;;  %7985 = vmatprep.mubr.msk.bf16.mxu1 %vm1832_vm2, %v8138_v33 }
  0xec   :  { %v8780_v21 = vpack.c.bf16 %v4696_v18, %v4695_v17 }
  0xed   :  { %v8783_v22 = vpack.c.bf16 %v4694_v20, %v4693_v19  ;;  %v7499_v23 = vpop.f32.mrb[8].mxu0  ;;  %v8125_v19 = vld [vmem:[%s10570_s0 + $0x208] sm:$0xff]  }
  0xee   :  { %v2683_v24 = vadd.f32 %v7499_v23, %v8731_v50  ;;  %v2674_v25 = vpop.f32.mrb[9].mxu0 }
  0xef   :  { %v2675_v27 = vadd.f32 %v8731_v50, %v2674_v25  ;;  %v7500_v28 = vpop.f32.mrb[10].mxu0  ;;  %v8147_v25 = vld [vmem:[%s10570_s0 + $0x7e8] sm:$0xff]  }
  0xf0   :  { %v2686_v31 = vadd.f32 %v7500_v28, %v8731_v50  ;;  %v2677_v32 = vpop.f32.mrb[11].mxu0  ;;  %v4699_v35 = vmax.f32 %v2683_v24, 0.0  ;;  %v8128_v24 = vld [vmem:[%s10570_s0 + $0x210] sm:$0xff]  }
  0xf1   :  { %v2678_v34 = vadd.f32 %v8731_v50, %v2677_v32  ;;  %v4697_v37 = vmax.f32 %v2675_v27, 0.0  ;;  %v8150_v28 = vld [vmem:[%s10570_s0 + $0x7f0] sm:$0xff]  }
  0xf2   :  { %v4700_v36 = vmax.f32 %v2686_v31, 0.0  ;;  %7606 = vmatmul.mubr.msk.bf16.gmra.mrb[116].mxu0 %vm1832_vm2, %v8113_v26  ;;  %7986 = vmatmul.mubr.msk.bf16.gmra.mrb[116].mxu1 %vm1832_vm2, %v8139_v48 }
  0xf3   :  { %v4698_v38 = vmax.f32 %v2678_v34, 0.0  ;;  %7609 = vmatprep.mubr.msk.bf16.mxu0 %vm1832_vm2, %v8116_v29  ;;  %7989 = vmatprep.mubr.msk.bf16.mxu1 %vm1832_vm2, %v8142_v52 }
  0xf4   :  { %v8804_v39 = vpack.c.bf16 %v4700_v36, %v4699_v35  ;;  %v8878_v36 = vld [vmem:[%s10572_s3] sm:$0xff] }
  0xf5   :  { %v8807_v40 = vpack.c.bf16 %v4698_v38, %v4697_v37  ;;  %v7503_v41 = vpop.f32.mrb[12].mxu0  ;;  %v8883_v37 = vld [vmem:[%s10572_s3 + $0x80] sm:$0xff] }
  0xf6   :  { %v2699_v42 = vadd.f32 %v7503_v41, %v8731_v50  ;;  %v2690_v43 = vpop.f32.mrb[13].mxu0  ;;  %v6835_v48 = vcombine.high %v8878_v36, %v8883_v37 }
  0xf7   :  { %v2691_v45 = vadd.f32 %v8731_v50, %v2690_v43  ;;  %v7504_v46 = vpop.f32.mrb[14].mxu0 }
  0xf8   :  { %v2702_v49 = vadd.f32 %v7504_v46, %v8731_v50  ;;  %v2693_v51 = vpop.f32.mrb[15].mxu0  ;;  %v4703_v54 = vmax.f32 %v2699_v42, 0.0 }
  0xf9   :  { %v2694_v53 = vadd.f32 %v8731_v50, %v2693_v51  ;;  %v4701_v56 = vmax.f32 %v2691_v45, 0.0  ;;  %v8151_v45 = vld [vmem:[%s10570_s0 + $0x7f8] sm:$0xff]  }
  0xfa   :  { %v4704_v55 = vmax.f32 %v2702_v49, 0.0  ;;  %7610 = vmatmul.mubr.msk.bf16.gmra.mrb[120].mxu0 %vm1832_vm2, %v8117_v44  ;;  %7990 = vmatmul.mubr.msk.bf16.gmra.mrb[120].mxu1 %vm1832_vm2, %v8143_v5  ;;  %v8132_v44 = vld [vmem:[%s10570_s0 + $0x220] sm:$0xff]  }
  0xfb   :  { %v4702_v57 = vmax.f32 %v2694_v53, 0.0  ;;  %7613 = vmatprep.mubr.msk.bf16.mxu0 %vm1832_vm2, %v8120_v47  ;;  %7993 = vmatprep.mubr.msk.bf16.mxu1 %vm1832_vm2, %v8146_v8 }
  0xfc   :  { %v8828_v58 = vpack.c.bf16 %v4704_v55, %v4703_v54 }
  0xfd   :  { %v8831_v59 = vpack.c.bf16 %v4702_v57, %v4701_v56  ;;  %v7507_v60 = vpop.f32.mrb[16].mxu0 }
  0xfe   :  { %v2715_v61 = vadd.f32 %v7507_v60, %v8731_v50  ;;  %v2706_v62 = vpop.f32.mrb[17].mxu0 }
  0xff   :  { %v2707_v0 = vadd.f32 %v8731_v50, %v2706_v62  ;;  %v7508_v1 = vpop.f32.mrb[18].mxu0 }
 0x100   :  { %v2718_v6 = vadd.f32 %v7508_v1, %v8731_v50  ;;  %v2709_v7 = vpop.f32.mrb[19].mxu0  ;;  %v4707_v10 = vmax.f32 %v2715_v61, 0.0  ;;  %v8133_v61 = vld [vmem:[%s10570_s0 + $0x228] sm:$0xff]  }
 0x101   :  { %v2710_v9 = vadd.f32 %v8731_v50, %v2709_v7  ;;  %v4705_v12 = vmax.f32 %v2707_v0, 0.0  ;;  %v8136_v0 = vld [vmem:[%s10570_s0 + $0x230] sm:$0xff]  }
 0x102   :  { %v4708_v11 = vmax.f32 %v2718_v6, 0.0  ;;  %7614 = vmatmul.mubr.msk.bf16.gmra.mrb[124].mxu0 %vm1832_vm2, %v8121_v63  ;;  %7994 = vmatmul.mubr.msk.bf16.gmra.mrb[124].mxu1 %vm1832_vm2, %v8147_v25 }
 0x103   :  { %v4706_v13 = vmax.f32 %v2710_v9, 0.0  ;;  %7617 = vmatprep.mubr.msk.bf16.mxu0 %vm1832_vm2, %v8124_v2  ;;  %7997 = vmatprep.mubr.msk.bf16.mxu1 %vm1832_vm2, %v8150_v28 }
 0x104   :  { %v5242_v14 = vpack.c.bf16 %v4708_v11, %v4707_v10 }
 0x105   :  { %v7511_v15 = vpop.f32.mrb[20].mxu0  ;;  %v5241_v16 = vpack.c.bf16 %v4706_v13, %v4705_v12 }
 0x106   :  { %v2731_v17 = vadd.f32 %v7511_v15, %v8731_v50  ;;  %v2722_v18 = vpop.f32.mrb[21].mxu0 }
 0x107   :  { %v2723_v20 = vadd.f32 %v8731_v50, %v2722_v18  ;;  %v7512_v23 = vpop.f32.mrb[22].mxu0  ;;  %7133 = vmatprep.subr.bf16.mxu1 %v5241_v16  ;;  %v8140_v16 = vld [vmem:[%s10570_s0 + $0x240] sm:$0xff]  }
 0x108   :  { %v2734_v26 = vadd.f32 %v7512_v23, %v8731_v50  ;;  %v2725_v27 = vpop.f32.mrb[23].mxu0  ;;  %7134 = vmatpush3.bf16.msra.mxu1 %v8759_v4  ;;  %v4711_v30 = vmax.f32 %v2731_v17, 0.0 }
 0x109   :  { %v2726_v29 = vadd.f32 %v8731_v50, %v2725_v27  ;;  %7135 = vmatprep.subr.bf16.mxu1 %v5242_v14  ;;  %v4709_v32 = vmax.f32 %v2723_v20, 0.0  ;;  %v8938_v20 = vld [vmem:[%s10572_s3 + $0x88] sm:$0xff] }
 0x10a   :  { %v4712_v31 = vmax.f32 %v2734_v26, 0.0  ;;  %7618 = vmatmul.mubr.msk.bf16.gmra.mrb[128].mxu0 %vm1832_vm2, %v8125_v19  ;;  %7998 = vmatmul.mubr.msk.bf16.gmra.mrb[128].mxu1 %vm1832_vm2, %v8151_v45  ;;  %v8933_v19 = vld [vmem:[%s10572_s3 + $0x8] sm:$0xff] }
 0x10b   :  { %v4710_v33 = vmax.f32 %v2726_v29, 0.0  ;;  %7621 = vmatprep.mubr.msk.bf16.mxu0 %vm1832_vm2, %v8128_v24  ;;  %5681 = vmatprep.mubr.bf16.mxu1 %v6835_v48  ;;  %v6837_v28 = vcombine.high %v8933_v19, %v8938_v20  ;;  %v8145_v48 = vld [vmem:[%s10570_s0 + $0x258] sm:$0xff]  }
 0x10c   :  { %7136 = vmatpush3.bf16.msra.mxu1 %v8756_v3  ;;  %v5244_v4 = vpack.c.bf16 %v4712_v31, %v4711_v30  ;;  %v8129_v3 = vld [vmem:[%s10570_s0 + $0x218] sm:$0xff]  }
 0x10d   :  { %v7515_v34 = vpop.f32.mrb[24].mxu0  ;;  %v5243_v35 = vpack.c.bf16 %v4710_v33, %v4709_v32  ;;  %v8141_v33 = vld [vmem:[%s10570_s0 + $0x248] sm:$0xff]  }
 0x10e   :  { %v2747_v38 = vadd.f32 %v7515_v34, %v8731_v50  ;;  %v2738_v41 = vpop.f32.mrb[25].mxu0 }
 0x10f   :  { %v2739_v42 = vadd.f32 %v8731_v50, %v2738_v41  ;;  %v7516_v43 = vpop.f32.mrb[26].mxu0  ;;  %7137 = vmatprep.subr.bf16.mxu1 %v5243_v35 }
 0x110   :  { %v2750_v46 = vadd.f32 %v7516_v43, %v8731_v50  ;;  %v2741_v47 = vpop.f32.mrb[27].mxu0  ;;  %7138 = vmatpush3.bf16.msra.mxu1 %v8783_v22  ;;  %v4715_v51 = vmax.f32 %v2747_v38, 0.0 }
 0x111   :  { %v2742_v49 = vadd.f32 %v8731_v50, %v2741_v47  ;;  %7139 = vmatprep.subr.bf16.mxu1 %v5244_v4  ;;  %v4713_v53 = vmax.f32 %v2739_v42, 0.0 }
 0x112   :  { %v4716_v52 = vmax.f32 %v2750_v46, 0.0  ;;  %7622 = vmatmul.mubr.msk.bf16.gmra.mrb[132].mxu0 %vm1832_vm2, %v8129_v3 }
 0x113   :  { %v4714_v54 = vmax.f32 %v2742_v49, 0.0  ;;  %7625 = vmatprep.mubr.msk.bf16.mxu0 %vm1832_vm2, %v8132_v44 }
 0x114   :  { %7140 = vmatpush3.bf16.msra.mxu1 %v8780_v21  ;;  %v5246_v55 = vpack.c.bf16 %v4716_v52, %v4715_v51  ;;  %v8148_v52 = vld [vmem:[%s10570_s0 + $0x260] sm:$0xff]  }
 0x115   :  { %v7519_v22 = vpop.f32.mrb[28].mxu0  ;;  %v5245_v56 = vpack.c.bf16 %v4714_v54, %v4713_v53 }
 0x116   :  { %v2763_v57 = vadd.f32 %v7519_v22, %v8731_v50  ;;  %v2754_v60 = vpop.f32.mrb[29].mxu0 }
 0x117   :  { %v2755_v62 = vadd.f32 %v8731_v50, %v2754_v60  ;;  %v7520_v63 = vpop.f32.mrb[30].mxu0  ;;  %7141 = vmatprep.subr.bf16.mxu1 %v5245_v56 }
 0x118   :  { %v2766_v21 = vadd.f32 %v7520_v63, %v8731_v50  ;;  %v2757_v1 = vpop.f32.mrb[31].mxu0  ;;  %7142 = vmatpush3.bf16.msra.mxu1 %v8807_v40  ;;  %v4719_v5 = vmax.f32 %v2763_v57, 0.0  ;;  %v8137_v40 = vld [vmem:[%s10570_s0 + $0x238] sm:$0xff]  }
 0x119   :  { %v2758_v2 = vadd.f32 %v8731_v50, %v2757_v1  ;;  %7143 = vmatprep.subr.bf16.mxu1 %v5246_v55  ;;  %v4717_v7 = vmax.f32 %v2755_v62, 0.0  ;;  %v8149_v1 = vld [vmem:[%s10570_s0 + $0x268] sm:$0xff]  }
 0x11a   :  { %v4720_v6 = vmax.f32 %v2766_v21, 0.0  ;;  %7626 = vmatmul.mubr.msk.bf16.gmra.mrb[136].mxu0 %vm1832_vm2, %v8133_v61 }
 0x11b   :  { %v4718_v8 = vmax.f32 %v2758_v2, 0.0  ;;  %7629 = vmatprep.mubr.msk.bf16.mxu0 %vm1832_vm2, %v8136_v0 }
 0x11c   :  { %7144 = vmatpush3.bf16.msra.mxu1 %v8804_v39  ;;  %v5248_v9 = vpack.c.bf16 %v4720_v6, %v4719_v5  ;;  %v8152_v6 = vld [vmem:[%s10570_s0 + $0x270] sm:$0xff]  }
 0x11d   :  { %v7523_v10 = vpop.f32.mrb[32].mxu0  ;;  %v5247_v11 = vpack.c.bf16 %v4718_v8, %v4717_v7 }
 0x11e   :  { %v2779_v12 = vadd.f32 %v7523_v10, %v8731_v50  ;;  %v2770_v13 = vpop.f32.mrb[33].mxu0 }
 0x11f   :  { %v2771_v14 = vadd.f32 %v8731_v50, %v2770_v13  ;;  %v7524_v15 = vpop.f32.mrb[34].mxu0  ;;  %7145 = vmatprep.subr.bf16.mxu1 %v5247_v11 }
 0x120   :  { %v2782_v39 = vadd.f32 %v7524_v15, %v8731_v50  ;;  %v2773_v17 = vpop.f32.mrb[35].mxu0  ;;  %7146 = vmatpush3.bf16.msra.mxu1 %v8831_v59  ;;  %v4723_v23 = vmax.f32 %v2779_v12, 0.0  ;;  %v6834_v59 = vcombine.low %v8878_v36, %v8883_v37 }
 0x121   :  { %v2774_v18 = vadd.f32 %v8731_v50, %v2773_v17  ;;  %7147 = vmatprep.subr.bf16.mxu1 %v5248_v9  ;;  %v4721_v25 = vmax.f32 %v2771_v14, 0.0  ;;  %v8153_v17 = vld [vmem:[%s10570_s0 + $0x278] sm:$0xff]  }
 0x122   :  { %v4724_v24 = vmax.f32 %v2782_v39, 0.0  ;;  %7630 = vmatmul.mubr.msk.bf16.gmra.mrb[140].mxu0 %vm1832_vm2, %v8137_v40 }
 0x123   :  { %v4722_v26 = vmax.f32 %v2774_v18, 0.0  ;;  %7633 = vmatprep.mubr.msk.bf16.mxu0 %vm1832_vm2, %v8140_v16 }
 0x124   :  { %v8944_v27 = vpack.c.bf16 %v4724_v24, %v4723_v23  ;;  %7148 = vmatpush3.bf16.msra.mxu1 %v8828_v58  ;;  %v8144_v58 = vld [vmem:[%s10570_s0 + $0x250] sm:$0xff]   ;;  %v8154_v24 = vld [vmem:[%s10570_s0 + $0x280] sm:$0xff]  }
 0x125   :  { %v8949_v29 = vpack.c.bf16 %v4722_v26, %v4721_v25  ;;  %v7527_v30 = vpop.f32.mrb[36].mxu0 }
 0x126   :  { %v2795_v31 = vadd.f32 %v7527_v30, %v8731_v50  ;;  %v2786_v32 = vpop.f32.mrb[37].mxu0 }
 0x127   :  { %v2787_v4 = vadd.f32 %v8731_v50, %v2786_v32  ;;  %v7528_v34 = vpop.f32.mrb[38].mxu0  ;;  %5682 = vmatmul.mubr.bf16.vlgmr.msra.gmra.mrb[132].mxu1 %v6834_v59 }
 0x128   :  { %v2798_v35 = vadd.f32 %v7528_v34, %v8731_v50  ;;  %v2789_v36 = vpop.f32.mrb[39].mxu0  ;;  %5722 = vmatprep.mubr.bf16.mxu1 %v6837_v28  ;;  %v4727_v38 = vmax.f32 %v2795_v31, 0.0 }
 0x129   :  { %v2790_v37 = vadd.f32 %v8731_v50, %v2789_v36  ;;  %v4725_v3 = vmax.f32 %v2787_v4, 0.0  ;;  %v8155_v36 = vld [vmem:[%s10570_s0 + $0x288] sm:$0xff]  }
 0x12a   :  { %v4728_v41 = vmax.f32 %v2798_v35, 0.0  ;;  %7634 = vmatmul.mubr.msk.bf16.gmra.mrb[144].mxu0 %vm1832_vm2, %v8141_v33 }
 0x12b   :  { %v4726_v42 = vmax.f32 %v2790_v37, 0.0  ;;  %7637 = vmatprep.mubr.msk.bf16.mxu0 %vm1832_vm2, %v8144_v58 }
 0x12c   :  { %v8963_v43 = vpack.c.bf16 %v4728_v41, %v4727_v38  ;;  %v8156_v41 = vld [vmem:[%s10570_s0 + $0x290] sm:$0xff]  }
 0x12d   :  { %v8965_v44 = vpack.c.bf16 %v4726_v42, %v4725_v3  ;;  %v7531_v45 = vpop.f32.mrb[40].mxu0 }
 0x12e   :  { %v2811_v46 = vadd.f32 %v7531_v45, %v8731_v50  ;;  %v2802_v47 = vpop.f32.mrb[41].mxu0 }
 0x12f   :  { %v2803_v49 = vadd.f32 %v8731_v50, %v2802_v47  ;;  %v7532_v51 = vpop.f32.mrb[42].mxu0 }
 0x130   :  { %v2814_v53 = vadd.f32 %v7532_v51, %v8731_v50  ;;  %v2805_v54 = vpop.f32.mrb[43].mxu0  ;;  %v4731_v22 = vmax.f32 %v2811_v46, 0.0 }
 0x131   :  { %v2806_v55 = vadd.f32 %v8731_v50, %v2805_v54  ;;  %v4729_v57 = vmax.f32 %v2803_v49, 0.0 }
 0x132   :  { %v4732_v56 = vmax.f32 %v2814_v53, 0.0  ;;  %7638 = vmatmul.mubr.msk.bf16.gmra.mrb[148].mxu0 %vm1832_vm2, %v8145_v48 }
 0x133   :  { %v4730_v60 = vmax.f32 %v2806_v55, 0.0  ;;  %7641 = vmatprep.mubr.msk.bf16.mxu0 %vm1832_vm2, %v8148_v52 }
 0x134   :  { %v8979_v61 = vpack.c.bf16 %v4732_v56, %v4731_v22 }
 0x135   :  { %v8981_v62 = vpack.c.bf16 %v4730_v60, %v4729_v57  ;;  %v7535_v63 = vpop.f32.mrb[44].mxu0  ;;  %v8158_v57 = vld [vmem:[%s10570_s0 + $0x2a0] sm:$0xff]  }
 0x136   :  { %v2827_v0 = vadd.f32 %v7535_v63, %v8731_v50  ;;  %v2818_v21 = vpop.f32.mrb[45].mxu0 }
 0x137   :  { %v2819_v2 = vadd.f32 %v8731_v50, %v2818_v21  ;;  %v7536_v5 = vpop.f32.mrb[46].mxu0 }
 0x138   :  { %v2830_v7 = vadd.f32 %v7536_v5, %v8731_v50  ;;  %v2821_v8 = vpop.f32.mrb[47].mxu0  ;;  %v4735_v10 = vmax.f32 %v2827_v0, 0.0 }
 0x139   :  { %v2822_v9 = vadd.f32 %v8731_v50, %v2821_v8  ;;  %v4733_v12 = vmax.f32 %v2819_v2, 0.0 }
 0x13a   :  { %v4736_v11 = vmax.f32 %v2830_v7, 0.0  ;;  %7642 = vmatmul.mubr.msk.bf16.gmra.mrb[152].mxu0 %vm1832_vm2, %v8149_v1 }
 0x13b   :  { %v4734_v13 = vmax.f32 %v2822_v9, 0.0  ;;  %7645 = vmatprep.mubr.msk.bf16.mxu0 %vm1832_vm2, %v8152_v6 }
 0x13c   :  { %v8995_v40 = vpack.c.bf16 %v4736_v11, %v4735_v10 }
 0x13d   :  { %v8997_v14 = vpack.c.bf16 %v4734_v13, %v4733_v12  ;;  %v7539_v15 = vpop.f32.mrb[48].mxu0  ;;  %v8160_v12 = vld [vmem:[%s10570_s0 + $0x2b0] sm:$0xff]  }
 0x13e   :  { %v2843_v16 = vadd.f32 %v7539_v15, %v8731_v50  ;;  %v2834_v39 = vpop.f32.mrb[49].mxu0 }
 0x13f   :  { %v2835_v18 = vadd.f32 %v8731_v50, %v2834_v39  ;;  %v7540_v23 = vpop.f32.mrb[50].mxu0 }
 0x140   :  { %v2846_v25 = vadd.f32 %v7540_v23, %v8731_v50  ;;  %v2837_v26 = vpop.f32.mrb[51].mxu0  ;;  %v4739_v28 = vmax.f32 %v2843_v16, 0.0 }
 0x141   :  { %v2838_v59 = vadd.f32 %v8731_v50, %v2837_v26  ;;  %v4737_v31 = vmax.f32 %v2835_v18, 0.0 }
 0x142   :  { %v4740_v30 = vmax.f32 %v2846_v25, 0.0  ;;  %7646 = vmatmul.mubr.msk.bf16.gmra.mrb[156].mxu0 %vm1832_vm2, %v8153_v17 }
 0x143   :  { %v4738_v32 = vmax.f32 %v2838_v59, 0.0  ;;  %7649 = vmatprep.mubr.msk.bf16.mxu0 %vm1832_vm2, %v8154_v24 }
 0x144   :  { %v5258_v33 = vpack.c.bf16 %v4740_v30, %v4739_v28 }
 0x145   :  { %v7543_v4 = vpop.f32.mrb[52].mxu0  ;;  %v5257_v34 = vpack.c.bf16 %v4738_v32, %v4737_v31  ;;  %v8162_v31 = vld [vmem:[%s10570_s0 + $0x2c0] sm:$0xff]  }
 0x146   :  { %v2859_v58 = vadd.f32 %v7543_v4, %v8731_v50  ;;  %v2850_v35 = vpop.f32.mrb[53].mxu0  ;;  %v9067_v4 = vld [vmem:[%s10572_s3 + $0x10] sm:$0xff] }
 0x147   :  { %v2851_v37 = vadd.f32 %v8731_v50, %v2850_v35  ;;  %v7544_v38 = vpop.f32.mrb[54].mxu0  ;;  %7155 = vmatprep.subr.bf16.mxu1 %v5257_v34  ;;  %v9072_v34 = vld [vmem:[%s10572_s3 + $0x90] sm:$0xff] }
 0x148   :  { %v2862_v3 = vadd.f32 %v7544_v38, %v8731_v50  ;;  %v2853_v42 = vpop.f32.mrb[55].mxu0  ;;  %7156 = vmatpush3.bf16.msra.mxu1 %v8949_v29  ;;  %v4743_v46 = vmax.f32 %v2859_v58, 0.0  ;;  %v8157_v29 = vld [vmem:[%s10570_s0 + $0x298] sm:$0xff]  }
 0x149   :  { %v2854_v45 = vadd.f32 %v8731_v50, %v2853_v42  ;;  %7157 = vmatprep.subr.bf16.mxu1 %v5258_v33  ;;  %v4741_v48 = vmax.f32 %v2851_v37, 0.0 }
 0x14a   :  { %v4744_v47 = vmax.f32 %v2862_v3, 0.0  ;;  %7650 = vmatmul.mubr.msk.bf16.gmra.mrb[160].mxu0 %vm1832_vm2, %v8155_v36 }
 0x14b   :  { %v4742_v49 = vmax.f32 %v2854_v45, 0.0  ;;  %7653 = vmatprep.mubr.msk.bf16.mxu0 %vm1832_vm2, %v8156_v41  ;;  %v6839_v41 = vcombine.high %v9067_v4, %v9072_v34 }
 0x14c   :  { %7158 = vmatpush3.bf16.msra.mxu1 %v8944_v27  ;;  %v5260_v51 = vpack.c.bf16 %v4744_v47, %v4743_v46  ;;  %v8163_v47 = vld [vmem:[%s10570_s0 + $0x2c8] sm:$0xff]  }
 0x14d   :  { %v7547_v52 = vpop.f32.mrb[56].mxu0  ;;  %v5259_v53 = vpack.c.bf16 %v4742_v49, %v4741_v48 }
 0x14e   :  { %v2875_v54 = vadd.f32 %v7547_v52, %v8731_v50  ;;  %v2866_v55 = vpop.f32.mrb[57].mxu0 }
 0x14f   :  { %v2867_v22 = vadd.f32 %v8731_v50, %v2866_v55  ;;  %v7548_v56 = vpop.f32.mrb[58].mxu0  ;;  %7159 = vmatprep.subr.bf16.mxu1 %v5259_v53 }
 0x150   :  { %v2878_v27 = vadd.f32 %v7548_v56, %v8731_v50  ;;  %v2869_v60 = vpop.f32.mrb[59].mxu0  ;;  %7160 = vmatpush3.bf16.msra.mxu1 %v8965_v44  ;;  %v4747_v0 = vmax.f32 %v2875_v54, 0.0  ;;  %v8159_v44 = vld [vmem:[%s10570_s0 + $0x2a8] sm:$0xff]  }
 0x151   :  { %v2870_v63 = vadd.f32 %v8731_v50, %v2869_v60  ;;  %7161 = vmatprep.subr.bf16.mxu1 %v5260_v51  ;;  %v4745_v1 = vmax.f32 %v2867_v22, 0.0  ;;  %v8165_v60 = vld [vmem:[%s10570_s0 + $0x2d8] sm:$0xff]  }
 0x152   :  { %v4748_v21 = vmax.f32 %v2878_v27, 0.0  ;;  %7654 = vmatmul.mubr.msk.bf16.gmra.mrb[164].mxu0 %vm1832_vm2, %v8157_v29 }
 0x153   :  { %v4746_v2 = vmax.f32 %v2870_v63, 0.0  ;;  %7657 = vmatprep.mubr.msk.bf16.mxu0 %vm1832_vm2, %v8158_v57 }
 0x154   :  { %7162 = vmatpush3.bf16.msra.mxu1 %v8963_v43  ;;  %v5262_v5 = vpack.c.bf16 %v4748_v21, %v4747_v0  ;;  %v8166_v21 = vld [vmem:[%s10570_s0 + $0x2e0] sm:$0xff]  }
 0x155   :  { %v7551_v6 = vpop.f32.mrb[60].mxu0  ;;  %v5261_v7 = vpack.c.bf16 %v4746_v2, %v4745_v1 }
 0x156   :  { %v2891_v8 = vadd.f32 %v7551_v6, %v8731_v50  ;;  %v2882_v9 = vpop.f32.mrb[61].mxu0 }
 0x157   :  { %v2883_v10 = vadd.f32 %v8731_v50, %v2882_v9  ;;  %v7552_v11 = vpop.f32.mrb[62].mxu0  ;;  %7163 = vmatprep.subr.bf16.mxu1 %v5261_v7 }
 0x158   :  { %v2894_v43 = vadd.f32 %v7552_v11, %v8731_v50  ;;  %v2885_v13 = vpop.f32.mrb[63].mxu0  ;;  %7164 = vmatpush3.bf16.msra.mxu1 %v8981_v62  ;;  %v4751_v16 = vmax.f32 %v2891_v8, 0.0  ;;  %v8161_v62 = vld [vmem:[%s10570_s0 + $0x2b8] sm:$0xff]  }
 0x159   :  { %v2886_v15 = vadd.f32 %v8731_v50, %v2885_v13  ;;  %7165 = vmatprep.subr.bf16.mxu1 %v5262_v5  ;;  %v4749_v17 = vmax.f32 %v2883_v10, 0.0  ;;  %v8167_v13 = vld [vmem:[%s10570_s0 + $0x2e8] sm:$0xff]  }
 0x15a   :  { %v4752_v39 = vmax.f32 %v2894_v43, 0.0  ;;  %7658 = vmatmul.mubr.msk.bf16.gmra.mrb[168].mxu0 %vm1832_vm2, %v8159_v44 }
 0x15b   :  { %v4750_v18 = vmax.f32 %v2886_v15, 0.0  ;;  %7661 = vmatprep.mubr.msk.bf16.mxu0 %vm1832_vm2, %v8160_v12 }
 0x15c   :  { %7166 = vmatpush3.bf16.msra.mxu1 %v8979_v61  ;;  %v5264_v23 = vpack.c.bf16 %v4752_v39, %v4751_v16  ;;  %v8168_v39 = vld [vmem:[%s10570_s0 + $0x2f0] sm:$0xff]  }
 0x15d   :  { %v7555_v24 = vpop.f32.mrb[64].mxu0  ;;  %v5263_v25 = vpack.c.bf16 %v4750_v18, %v4749_v17 }
 0x15e   :  { %v2907_v26 = vadd.f32 %v7555_v24, %v8731_v50  ;;  %v2898_v59 = vpop.f32.mrb[65].mxu0 }
 0x15f   :  { %v2899_v28 = vadd.f32 %v8731_v50, %v2898_v59  ;;  %v7556_v30 = vpop.f32.mrb[66].mxu0  ;;  %7167 = vmatprep.subr.bf16.mxu1 %v5263_v25 }
 0x160   :  { %v2910_v61 = vadd.f32 %v7556_v30, %v8731_v50  ;;  %v2901_v32 = vpop.f32.mrb[67].mxu0  ;;  %7168 = vmatpush3.bf16.msra.mxu1 %v8997_v14  ;;  %v4755_v58 = vmax.f32 %v2907_v26, 0.0  ;;  %v6836_v14 = vcombine.low %v8933_v19, %v8938_v20  ;;  %v8164_v20 = vld [vmem:[%s10570_s0 + $0x2d0] sm:$0xff]  }
 0x161   :  { %v2902_v33 = vadd.f32 %v8731_v50, %v2901_v32  ;;  %7169 = vmatprep.subr.bf16.mxu1 %v5264_v23  ;;  %v4753_v36 = vmax.f32 %v2899_v28, 0.0  ;;  %v8169_v32 = vld [vmem:[%s10570_s0 + $0x2f8] sm:$0xff]  }
 0x162   :  { %v4756_v35 = vmax.f32 %v2910_v61, 0.0  ;;  %7662 = vmatmul.mubr.msk.bf16.gmra.mrb[172].mxu0 %vm1832_vm2, %v8161_v62 }
 0x163   :  { %v4754_v37 = vmax.f32 %v2902_v33, 0.0  ;;  %7665 = vmatprep.mubr.msk.bf16.mxu0 %vm1832_vm2, %v8162_v31 }
 0x164   :  { %v9078_v38 = vpack.c.bf16 %v4756_v35, %v4755_v58  ;;  %7170 = vmatpush3.bf16.msra.mxu1 %v8995_v40  ;;  %v8170_v35 = vld [vmem:[%s10570_s0 + $0x300] sm:$0xff]  }
 0x165   :  { %v9083_v3 = vpack.c.bf16 %v4754_v37, %v4753_v36  ;;  %v7559_v42 = vpop.f32.mrb[68].mxu0 }
 0x166   :  { %v2923_v45 = vadd.f32 %v7559_v42, %v8731_v50  ;;  %v2914_v46 = vpop.f32.mrb[69].mxu0 }
 0x167   :  { %v2915_v48 = vadd.f32 %v8731_v50, %v2914_v46  ;;  %v7560_v19 = vpop.f32.mrb[70].mxu0  ;;  %5723 = vmatmul.mubr.bf16.vlgmr.msra.gmra.mrb[136].mxu1 %v6836_v14 }
 0x168   :  { %v2926_v40 = vadd.f32 %v7560_v19, %v8731_v50  ;;  %v2917_v49 = vpop.f32.mrb[71].mxu0  ;;  %5763 = vmatprep.mubr.bf16.mxu1 %v6839_v41  ;;  %v4759_v52 = vmax.f32 %v2923_v45, 0.0 }
 0x169   :  { %v2918_v51 = vadd.f32 %v8731_v50, %v2917_v49  ;;  %v4757_v54 = vmax.f32 %v2915_v48, 0.0  ;;  %v8171_v49 = vld [vmem:[%s10570_s0 + $0x308] sm:$0xff]  }
 0x16a   :  { %v4760_v53 = vmax.f32 %v2926_v40, 0.0  ;;  %7666 = vmatmul.mubr.msk.bf16.gmra.mrb[176].mxu0 %vm1832_vm2, %v8163_v47 }
 0x16b   :  { %v4758_v55 = vmax.f32 %v2918_v51, 0.0  ;;  %7669 = vmatprep.mubr.msk.bf16.mxu0 %vm1832_vm2, %v8164_v20 }
 0x16c   :  { %v9097_v29 = vpack.c.bf16 %v4760_v53, %v4759_v52  ;;  %v8172_v53 = vld [vmem:[%s10570_s0 + $0x310] sm:$0xff]  }
 0x16d   :  { %v9099_v22 = vpack.c.bf16 %v4758_v55, %v4757_v54  ;;  %v7563_v56 = vpop.f32.mrb[72].mxu0 }
 0x16e   :  { %v2939_v57 = vadd.f32 %v7563_v56, %v8731_v50  ;;  %v2930_v27 = vpop.f32.mrb[73].mxu0 }
 0x16f   :  { %v2931_v63 = vadd.f32 %v8731_v50, %v2930_v27  ;;  %v7564_v0 = vpop.f32.mrb[74].mxu0 }
 0x170   :  { %v2942_v1 = vadd.f32 %v7564_v0, %v8731_v50  ;;  %v2933_v2 = vpop.f32.mrb[75].mxu0  ;;  %v4763_v6 = vmax.f32 %v2939_v57, 0.0 }
 0x171   :  { %v2934_v5 = vadd.f32 %v8731_v50, %v2933_v2  ;;  %v4761_v8 = vmax.f32 %v2931_v63, 0.0 }
 0x172   :  { %v4764_v7 = vmax.f32 %v2942_v1, 0.0  ;;  %7670 = vmatmul.mubr.msk.bf16.gmra.mrb[180].mxu0 %vm1832_vm2, %v8165_v60 }
 0x173   :  { %v4762_v9 = vmax.f32 %v2934_v5, 0.0  ;;  %7673 = vmatprep.mubr.msk.bf16.mxu0 %vm1832_vm2, %v8166_v21 }
 0x174   :  { %v9113_v44 = vpack.c.bf16 %v4764_v7, %v4763_v6 }
 0x175   :  { %v9115_v10 = vpack.c.bf16 %v4762_v9, %v4761_v8  ;;  %v7567_v11 = vpop.f32.mrb[76].mxu0  ;;  %v8174_v8 = vld [vmem:[%s10570_s0 + $0x320] sm:$0xff]  }
 0x176   :  { %v2955_v12 = vadd.f32 %v7567_v11, %v8731_v50  ;;  %v2946_v43 = vpop.f32.mrb[77].mxu0  ;;  %v9172_v11 = vld [vmem:[%s10571_s2] ss:$0 sm:$0xff] }
 0x177   :  { %v2947_v15 = vadd.f32 %v8731_v50, %v2946_v43  ;;  %v7568_v16 = vpop.f32.mrb[78].mxu0 }
 0x178   :  { %v2958_v17 = vadd.f32 %v7568_v16, %v8731_v50  ;;  %v2949_v18 = vpop.f32.mrb[79].mxu0  ;;  %v4767_v24 = vmax.f32 %v2955_v12, 0.0 }
 0x179   :  { %v2950_v23 = vadd.f32 %v8731_v50, %v2949_v18  ;;  %v4765_v26 = vmax.f32 %v2947_v15, 0.0 }
 0x17a   :  { %v4768_v25 = vmax.f32 %v2958_v17, 0.0  ;;  %7674 = vmatmul.mubr.msk.bf16.gmra.mrb[184].mxu0 %vm1832_vm2, %v8167_v13 }
 0x17b   :  { %v4766_v59 = vmax.f32 %v2950_v23, 0.0  ;;  %7677 = vmatprep.mubr.msk.bf16.mxu0 %vm1832_vm2, %v8168_v39  ;;  %v8175_v23 = vld [vmem:[%s10570_s0 + $0x328] sm:$0xff]  }
 0x17c   :  { %v9129_v62 = vpack.c.bf16 %v4768_v25, %v4767_v24 }
 0x17d   :  { %v9131_v28 = vpack.c.bf16 %v4766_v59, %v4765_v26  ;;  %v7571_v30 = vpop.f32.mrb[80].mxu0  ;;  %v8176_v26 = vld [vmem:[%s10570_s0 + $0x330] sm:$0xff]  }
 0x17e   :  { %v2971_v31 = vadd.f32 %v7571_v30, %v8731_v50  ;;  %v2962_v61 = vpop.f32.mrb[81].mxu0 }
 0x17f   :  { %v2963_v33 = vadd.f32 %v8731_v50, %v2962_v61  ;;  %v7572_v58 = vpop.f32.mrb[82].mxu0 }
 0x180   :  { %v2974_v36 = vadd.f32 %v7572_v58, %v8731_v50  ;;  %v2965_v37 = vpop.f32.mrb[83].mxu0  ;;  %v4771_v41 = vmax.f32 %v2971_v31, 0.0 }
 0x181   :  { %v2966_v14 = vadd.f32 %v8731_v50, %v2965_v37  ;;  %v4769_v45 = vmax.f32 %v2963_v33, 0.0 }
 0x182   :  { %v4772_v42 = vmax.f32 %v2974_v36, 0.0  ;;  %7678 = vmatmul.mubr.msk.bf16.gmra.mrb[188].mxu0 %vm1832_vm2, %v8169_v32 }
 0x183   :  { %v4770_v46 = vmax.f32 %v2966_v14, 0.0  ;;  %7681 = vmatprep.mubr.msk.bf16.mxu0 %vm1832_vm2, %v8170_v35 }
 0x184   :  { %v5274_v47 = vpack.c.bf16 %v4772_v42, %v4771_v41 }
 0x185   :  { %v7575_v48 = vpop.f32.mrb[84].mxu0  ;;  %v5273_v19 = vpack.c.bf16 %v4770_v46, %v4769_v45  ;;  %v8178_v45 = vld [vmem:[%s10570_s0 + $0x340] sm:$0xff]  }
 0x186   :  { %v2987_v20 = vadd.f32 %v7575_v48, %v8731_v50  ;;  %v2978_v40 = vpop.f32.mrb[85].mxu0  ;;  %v9206_v48 = vld [vmem:[%s10572_s3 + $0x18] sm:$0xff] }
 0x187   :  { %v2979_v51 = vadd.f32 %v8731_v50, %v2978_v40  ;;  %v7576_v52 = vpop.f32.mrb[86].mxu0  ;;  %7177 = vmatprep.subr.bf16.mxu1 %v5273_v19  ;;  %v9211_v19 = vld [vmem:[%s10572_s3 + $0x98] sm:$0xff] }
 0x188   :  { %v2990_v54 = vadd.f32 %v7576_v52, %v8731_v50  ;;  %v2981_v55 = vpop.f32.mrb[87].mxu0  ;;  %7178 = vmatpush3.bf16.msra.mxu1 %v9083_v3  ;;  %v4775_v57 = vmax.f32 %v2987_v20, 0.0  ;;  %v8173_v3 = vld [vmem:[%s10570_s0 + $0x318] sm:$0xff]  }
 0x189   :  { %v2982_v56 = vadd.f32 %v8731_v50, %v2981_v55  ;;  %7179 = vmatprep.subr.bf16.mxu1 %v5274_v47  ;;  %v4773_v60 = vmax.f32 %v2979_v51, 0.0 }
 0x18a   :  { %v4776_v27 = vmax.f32 %v2990_v54, 0.0  ;;  %7682 = vmatmul.mubr.msk.bf16.gmra.mrb[192].mxu0 %vm1832_vm2, %v8171_v49 }
 0x18b   :  { %v4774_v63 = vmax.f32 %v2982_v56, 0.0  ;;  %7685 = vmatprep.mubr.msk.bf16.mxu0 %vm1832_vm2, %v8172_v53  ;;  %v6841_v53 = vcombine.high %v9206_v48, %v9211_v19 }
 0x18c   :  { %7180 = vmatpush3.bf16.msra.mxu1 %v9078_v38  ;;  %v5276_v0 = vpack.c.bf16 %v4776_v27, %v4775_v57  ;;  %v8179_v27 = vld [vmem:[%s10570_s0 + $0x348] sm:$0xff]  }
 0x18d   :  { %v7579_v21 = vpop.f32.mrb[88].mxu0  ;;  %v5275_v1 = vpack.c.bf16 %v4774_v63, %v4773_v60 }
 0x18e   :  { %v3003_v2 = vadd.f32 %v7579_v21, %v8731_v50  ;;  %v2994_v5 = vpop.f32.mrb[89].mxu0 }
 0x18f   :  { %v2995_v6 = vadd.f32 %v8731_v50, %v2994_v5  ;;  %v7580_v7 = vpop.f32.mrb[90].mxu0  ;;  %7181 = vmatprep.subr.bf16.mxu1 %v5275_v1 }
 0x190   :  { %v3006_v38 = vadd.f32 %v7580_v7, %v8731_v50  ;;  %v2997_v9 = vpop.f32.mrb[91].mxu0  ;;  %7182 = vmatpush3.bf16.msra.mxu1 %v9099_v22  ;;  %v4779_v43 = vmax.f32 %v3003_v2, 0.0 }
 0x191   :  { %v2998_v12 = vadd.f32 %v9172_v11, %v2997_v9  ;;  %7183 = vmatprep.subr.bf16.mxu1 %v5276_v0  ;;  %v4777_v15 = vmax.f32 %v2995_v6, 0.0  ;;  %v8181_v9 = vld [vmem:[%s10570_s0 + $0x358] sm:$0xff]  }
 0x192   :  { %v4780_v13 = vmax.f32 %v3006_v38, 0.0  ;;  %7686 = vmatmul.mubr.msk.bf16.gmra.mrb[196].mxu0 %vm1832_vm2, %v8173_v3 }
 0x193   :  { %v4778_v16 = vmax.f32 %v2998_v12, 0.0  ;;  %7689 = vmatprep.mubr.msk.bf16.mxu0 %vm1832_vm2, %v8174_v8 }
 0x194   :  { %7184 = vmatpush3.bf16.msra.mxu1 %v9097_v29  ;;  %v5278_v50 = vpack.c.bf16 %v4780_v13, %v4779_v43  ;;  %v8182_v13 = vld [vmem:[%s10570_s0 + $0x360] sm:$0xff]  }
 0x195   :  { %v7583_v22 = vpop.f32.mrb[92].mxu0  ;;  %v5277_v39 = vpack.c.bf16 %v4778_v16, %v4777_v15 }
 0x196   :  { %v3019_v17 = vadd.f32 %v9172_v11, %v7583_v22  ;;  %v3010_v18 = vpop.f32.mrb[93].mxu0 }
 0x197   :  { %v3011_v24 = vadd.f32 %v9172_v11, %v3010_v18  ;;  %v7584_v25 = vpop.f32.mrb[94].mxu0  ;;  %7185 = vmatprep.subr.bf16.mxu1 %v5277_v39 }
 0x198   :  { %v3022_v29 = vadd.f32 %v9172_v11, %v7584_v25  ;;  %v3013_v59 = vpop.f32.mrb[95].mxu0  ;;  %7186 = vmatpush3.bf16.msra.mxu1 %v9115_v10  ;;  %v4783_v31 = vmax.f32 %v3019_v17, 0.0  ;;  %v8177_v10 = vld [vmem:[%s10570_s0 + $0x338] sm:$0xff]  }
 0x199   :  { %v3014_v30 = vadd.f32 %v9172_v11, %v3013_v59  ;;  %7187 = vmatprep.subr.bf16.mxu1 %v5278_v50  ;;  %v4781_v32 = vmax.f32 %v3011_v24, 0.0  ;;  %v8183_v59 = vld [vmem:[%s10570_s0 + $0x368] sm:$0xff]  }
 0x19a   :  { %v4784_v61 = vmax.f32 %v3022_v29, 0.0  ;;  %7690 = vmatmul.mubr.msk.bf16.gmra.mrb[200].mxu0 %vm1832_vm2, %v8175_v23 }
 0x19b   :  { %v4782_v33 = vmax.f32 %v3014_v30, 0.0  ;;  %7693 = vmatprep.mubr.msk.bf16.mxu0 %vm1832_vm2, %v8176_v26 }
 0x19c   :  { %7188 = vmatpush3.bf16.msra.mxu1 %v9113_v44  ;;  %v5280_v58 = vpack.c.bf16 %v4784_v61, %v4783_v31  ;;  %v8184_v61 = vld [vmem:[%s10570_s0 + $0x370] sm:$0xff]  }
 0x19d   :  { %v7587_v35 = vpop.f32.mrb[96].mxu0  ;;  %v5279_v36 = vpack.c.bf16 %v4782_v33, %v4781_v32 }
 0x19e   :  { %v3035_v37 = vadd.f32 %v9172_v11, %v7587_v35  ;;  %v3026_v14 = vpop.f32.mrb[97].mxu0 }
 0x19f   :  { %v3027_v41 = vadd.f32 %v9172_v11, %v3026_v14  ;;  %v7588_v42 = vpop.f32.mrb[98].mxu0  ;;  %7189 = vmatprep.subr.bf16.mxu1 %v5279_v36 }
 0x1a0   :  { %v3038_v44 = vadd.f32 %v9172_v11, %v7588_v42  ;;  %v3029_v46 = vpop.f32.mrb[99].mxu0  ;;  %7190 = vmatpush3.bf16.msra.mxu1 %v9131_v28  ;;  %v4787_v20 = vmax.f32 %v3035_v37, 0.0  ;;  %v6838_v28 = vcombine.low %v9067_v4, %v9072_v34  ;;  %v8180_v34 = vld [vmem:[%s10570_s0 + $0x350] sm:$0xff]  }
 0x1a1   :  { %v3030_v47 = vadd.f32 %v9172_v11, %v3029_v46  ;;  %7191 = vmatprep.subr.bf16.mxu1 %v5280_v58  ;;  %v4785_v49 = vmax.f32 %v3027_v41, 0.0  ;;  %v8185_v46 = vld [vmem:[%s10570_s0 + $0x378] sm:$0xff]  }
 0x1a2   :  { %v4788_v40 = vmax.f32 %v3038_v44, 0.0  ;;  %7694 = vmatmul.mubr.msk.bf16.gmra.mrb[204].mxu0 %vm1832_vm2, %v8177_v10 }
 0x1a3   :  { %v4786_v51 = vmax.f32 %v3030_v47, 0.0  ;;  %7697 = vmatprep.mubr.msk.bf16.mxu0 %vm1832_vm2, %v8178_v45 }
 0x1a4   :  { %v9217_v52 = vpack.c.bf16 %v4788_v40, %v4787_v20  ;;  %7192 = vmatpush3.bf16.msra.mxu1 %v9129_v62  ;;  %v8186_v40 = vld [vmem:[%s10570_s0 + $0x380] sm:$0xff]  }
 0x1a5   :  { %v9222_v54 = vpack.c.bf16 %v4786_v51, %v4785_v49  ;;  %v7591_v55 = vpop.f32.mrb[100].mxu0 }
 0x1a6   :  { %v3051_v56 = vadd.f32 %v9172_v11, %v7591_v55  ;;  %v3042_v57 = vpop.f32.mrb[101].mxu0 }
 0x1a7   :  { %v3043_v60 = vadd.f32 %v9172_v11, %v3042_v57  ;;  %v7592_v4 = vpop.f32.mrb[102].mxu0  ;;  %5764 = vmatmul.mubr.bf16.vlgmr.msra.gmra.mrb[140].mxu1 %v6838_v28 }
 0x1a8   :  { %v3054_v62 = vadd.f32 %v9172_v11, %v7592_v4  ;;  %v3045_v63 = vpop.f32.mrb[103].mxu0  ;;  %5804 = vmatprep.mubr.bf16.mxu1 %v6841_v53  ;;  %v4791_v21 = vmax.f32 %v3051_v56, 0.0 }
 0x1a9   :  { %v3046_v0 = vadd.f32 %v9172_v11, %v3045_v63  ;;  %v4789_v2 = vmax.f32 %v3043_v60, 0.0  ;;  %v8187_v63 = vld [vmem:[%s10570_s0 + $0x388] sm:$0xff]  }
 0x1aa   :  { %v4792_v1 = vmax.f32 %v3054_v62, 0.0  ;;  %7698 = vmatmul.mubr.msk.bf16.gmra.mrb[208].mxu0 %vm1832_vm2, %v8179_v27 }
 0x1ab   :  { %v4790_v5 = vmax.f32 %v3046_v0, 0.0  ;;  %7701 = vmatprep.mubr.msk.bf16.mxu0 %vm1832_vm2, %v8180_v34 }
 0x1ac   :  { %v9236_v3 = vpack.c.bf16 %v4792_v1, %v4791_v21  ;;  %v8188_v1 = vld [vmem:[%s10570_s0 + $0x390] sm:$0xff]  }
 0x1ad   :  { %v9238_v6 = vpack.c.bf16 %v4790_v5, %v4789_v2  ;;  %v7595_v7 = vpop.f32.mrb[104].mxu0 }
 0x1ae   :  { %v3067_v8 = vadd.f32 %v9172_v11, %v7595_v7  ;;  %v3058_v38 = vpop.f32.mrb[105].mxu0 }
 0x1af   :  { %v3059_v12 = vadd.f32 %v9172_v11, %v3058_v38  ;;  %v7596_v43 = vpop.f32.mrb[106].mxu0 }
 0x1b0   :  { %v3070_v15 = vadd.f32 %v9172_v11, %v7596_v43  ;;  %v3061_v16 = vpop.f32.mrb[107].mxu0  ;;  %v4795_v22 = vmax.f32 %v3067_v8, 0.0 }
 0x1b1   :  { %v3062_v50 = vadd.f32 %v9172_v11, %v3061_v16  ;;  %v4793_v17 = vmax.f32 %v3059_v12, 0.0 }
 0x1b2   :  { %v4796_v39 = vmax.f32 %v3070_v15, 0.0  ;;  %7702 = vmatmul.mubr.msk.bf16.gmra.mrb[212].mxu0 %vm1832_vm2, %v8181_v9 }
 0x1b3   :  { %v4794_v18 = vmax.f32 %v3062_v50, 0.0  ;;  %7705 = vmatprep.mubr.msk.bf16.mxu0 %vm1832_vm2, %v8182_v13 }
 0x1b4   :  { %v9252_v23 = vpack.c.bf16 %v4796_v39, %v4795_v22 }
 0x1b5   :  { %v9254_v24 = vpack.c.bf16 %v4794_v18, %v4793_v17  ;;  %v7599_v25 = vpop.f32.mrb[108].mxu0  ;;  %v8190_v17 = vld [vmem:[%s10570_s0 + $0x3a0] sm:$0xff]  }
 0x1b6   :  { %v3083_v26 = vadd.f32 %v9172_v11, %v7599_v25  ;;  %v3074_v29 = vpop.f32.mrb[109].mxu0  ;;  %v7871_v25 = vpop.f32.mrb[0].mxu1 }
 0x1b7   :  { %v3075_v30 = vadd.f32 %v9172_v11, %v3074_v29  ;;  %v7600_v31 = vpop.f32.mrb[110].mxu0  ;;  %v4162_v29 = vpop.f32.mrb[1].mxu1 }
 0x1b8   :  { %v3086_v32 = vadd.f32 %v9172_v11, %v7600_v31  ;;  %v3077_v33 = vpop.f32.mrb[111].mxu0  ;;  %v4799_v35 = vmax.f32 %v3083_v26, 0.0  ;;  %v7872_v31 = vpop.f32.mrb[2].mxu1 }
 0x1b9   :  { %v3078_v58 = vadd.f32 %v9172_v11, %v3077_v33  ;;  %v4797_v37 = vmax.f32 %v3075_v30, 0.0  ;;  %v4165_v33 = vpop.f32.mrb[3].mxu1 }
 0x1ba   :  { %v4800_v36 = vmax.f32 %v3086_v32, 0.0  ;;  %7706 = vmatmul.mubr.msk.bf16.gmra.mrb[216].mxu0 %vm1832_vm2, %v8183_v59 }
 0x1bb   :  { %v4798_v14 = vmax.f32 %v3078_v58, 0.0  ;;  %7709 = vmatprep.mubr.msk.bf16.mxu0 %vm1832_vm2, %v8184_v61 }
 0x1bc   :  { %v9268_v10 = vpack.c.bf16 %v4800_v36, %v4799_v35  ;;  %v4163_v35 = vadd.f32 %v9172_v11, %v4162_v29  ;;  %v4174_v36 = vadd.f32 %v9172_v11, %v7872_v31 }
 0x1bd   :  { %v9270_v41 = vpack.c.bf16 %v4798_v14, %v4797_v37  ;;  %v7603_v42 = vpop.f32.mrb[112].mxu0 }
 0x1be   :  { %v3099_v45 = vadd.f32 %v9172_v11, %v7603_v42  ;;  %v3090_v44 = vpop.f32.mrb[113].mxu0  ;;  %v4166_v42 = vadd.f32 %v9172_v11, %v4165_v33 }
 0x1bf   :  { %v3091_v47 = vadd.f32 %v9172_v11, %v3090_v44  ;;  %v7604_v20 = vpop.f32.mrb[114].mxu0 }
 0x1c0   :  { %v3102_v49 = vadd.f32 %v9172_v11, %v7604_v20  ;;  %v3093_v51 = vpop.f32.mrb[115].mxu0  ;;  %v4803_v53 = vmax.f32 %v3099_v45, 0.0  ;;  %v5072_v20 = vmax.f32 %v4174_v36, 0.0 }
 0x1c1   :  { %v3094_v28 = vadd.f32 %v9172_v11, %v3093_v51  ;;  %v4801_v56 = vmax.f32 %v3091_v47, 0.0  ;;  %v8192_v51 = vld [vmem:[%s10570_s0 + $0x3b0] sm:$0xff]  }
 0x1c2   :  { %v4804_v55 = vmax.f32 %v3102_v49, 0.0  ;;  %7710 = vmatmul.mubr.msk.bf16.gmra.mrb[220].mxu0 %vm1832_vm2, %v8185_v46  ;;  %v8191_v46 = vld [vmem:[%s10570_s0 + $0x3a8] sm:$0xff]  }
 0x1c3   :  { %v4802_v57 = vmax.f32 %v3094_v28, 0.0  ;;  %7713 = vmatprep.mubr.msk.bf16.mxu0 %vm1832_vm2, %v8186_v40  ;;  %v5070_v28 = vmax.f32 %v4166_v42, 0.0 }
 0x1c4   :  { %v5290_v27 = vpack.c.bf16 %v4804_v55, %v4803_v53 }
 0x1c5   :  { %v7607_v60 = vpop.f32.mrb[116].mxu0  ;;  %v5289_v4 = vpack.c.bf16 %v4802_v57, %v4801_v56  ;;  %v7875_v57 = vpop.f32.mrb[4].mxu1 }
 0x1c6   :  { %v3115_v34 = vadd.f32 %v9172_v11, %v7607_v60  ;;  %v3106_v62 = vpop.f32.mrb[117].mxu0 }
 0x1c7   :  { %v3107_v0 = vadd.f32 %v9172_v11, %v3106_v62  ;;  %v7608_v21 = vpop.f32.mrb[118].mxu0  ;;  %7199 = vmatprep.subr.bf16.mxu1 %v5289_v4  ;;  %v4178_v4 = vpop.f32.mrb[5].mxu1 }
 0x1c8   :  { %v3118_v2 = vadd.f32 %v9172_v11, %v7608_v21  ;;  %v3109_v5 = vpop.f32.mrb[119].mxu0  ;;  %7200 = vmatpush3.bf16.msra.mxu1 %v9222_v54  ;;  %v4807_v8 = vmax.f32 %v3115_v34, 0.0  ;;  %v8189_v54 = vld [vmem:[%s10570_s0 + $0x398] sm:$0xff]  }
 0x1c9   :  { %v3110_v7 = vadd.f32 %v9172_v11, %v3109_v5  ;;  %7201 = vmatprep.subr.bf16.mxu1 %v5290_v27  ;;  %v4805_v9 = vmax.f32 %v3107_v0, 0.0  ;;  %v4179_v5 = vadd.f32 %v9172_v11, %v4178_v4 }
 0x1ca   :  { %v4808_v38 = vmax.f32 %v3118_v2, 0.0  ;;  %7714 = vmatmul.mubr.msk.bf16.gmra.mrb[224].mxu0 %vm1832_vm2, %v8187_v63  ;;  %v7876_v63 = vpop.f32.mrb[6].mxu1  ;;  %v4187_v2 = vadd.f32 %v9172_v11, %v7875_v57 }
 0x1cb   :  { %v4806_v12 = vmax.f32 %v3110_v7, 0.0  ;;  %7717 = vmatprep.mubr.msk.bf16.mxu0 %vm1832_vm2, %v8188_v1  ;;  %v4181_v1 = vpop.f32.mrb[7].mxu1  ;;  %v4190_v7 = vadd.f32 %v9172_v11, %v7876_v63 }
 0x1cc   :  { %7202 = vmatpush3.bf16.msra.mxu1 %v9217_v52  ;;  %v5292_v43 = vpack.c.bf16 %v4808_v38, %v4807_v8  ;;  %v7879_v29 = vpop.f32.mrb[8].mxu1 }
 0x1cd   :  { %v7611_v13 = vpop.f32.mrb[120].mxu0  ;;  %v5291_v15 = vpack.c.bf16 %v4806_v12, %v4805_v9  ;;  %v4182_v9 = vadd.f32 %v9172_v11, %v4181_v1  ;;  %v4194_v31 = vpop.f32.mrb[9].mxu1 }
 0x1ce   :  { %v3131_v16 = vadd.f32 %v9172_v11, %v7611_v13  ;;  %v3122_v50 = vpop.f32.mrb[121].mxu0  ;;  %v8193_v13 = vld [vmem:[%s10570_s0 + $0x3b8] sm:$0xff]   ;;  %v4195_v42 = vadd.f32 %v9172_v11, %v4194_v31 }
 0x1cf   :  { %v3123_v22 = vadd.f32 %v9172_v11, %v3122_v50  ;;  %v7612_v39 = vpop.f32.mrb[122].mxu0  ;;  %7203 = vmatprep.subr.bf16.mxu1 %v5291_v15  ;;  %v5075_v15 = vmax.f32 %v4187_v2, 0.0 }
 0x1d0   :  { %v3134_v52 = vadd.f32 %v9172_v11, %v7612_v39  ;;  %v3125_v18 = vpop.f32.mrb[123].mxu0  ;;  %7204 = vmatpush3.bf16.msra.mxu1 %v9238_v6  ;;  %v4811_v59 = vmax.f32 %v3131_v16, 0.0  ;;  %v4171_v6 = vadd.f32 %v9172_v11, %v7871_v25  ;;  %v5073_v16 = vmax.f32 %v4179_v5, 0.0  ;;  %v9356_v25 = vld [vmem:[%s10572_s3 + $0xa0] sm:$0xff] }
 0x1d1   :  { %v3126_v26 = vadd.f32 %v9172_v11, %v3125_v18  ;;  %7205 = vmatprep.subr.bf16.mxu1 %v5292_v43  ;;  %v4809_v61 = vmax.f32 %v3123_v22, 0.0  ;;  %v8194_v22 = vld [vmem:[%s10570_s0 + $0x3c0] sm:$0xff]   ;;  %v5074_v39 = vmax.f32 %v4182_v9, 0.0 }
 0x1d2   :  { %v4812_v30 = vmax.f32 %v3134_v52, 0.0  ;;  %7718 = vmatmul.mubr.msk.bf16.gmra.mrb[228].mxu0 %vm1832_vm2, %v8189_v54  ;;  %v5071_v47 = vmax.f32 %v4171_v6, 0.0  ;;  %v9351_v18 = vld [vmem:[%s10572_s3 + $0x20] sm:$0xff]  ;;  %v6840_v6 = vcombine.low %v9206_v48, %v9211_v19 }
 0x1d3   :  { %v4810_v32 = vmax.f32 %v3126_v26, 0.0  ;;  %7721 = vmatprep.mubr.msk.bf16.mxu0 %vm1832_vm2, %v8190_v17 }
 0x1d4   :  { %7206 = vmatpush3.bf16.msra.mxu1 %v9236_v3  ;;  %v5294_v58 = vpack.c.bf16 %v4812_v30, %v4811_v59  ;;  %v5069_v3 = vmax.f32 %v4163_v35, 0.0  ;;  %v9326_v56 = vpack.c.bf16 %v5072_v20, %v5071_v47  ;;  %v9361_v30 = vpack.c.bf16 %v5074_v39, %v5073_v16 }
 0x1d5   :  { %v7615_v37 = vpop.f32.mrb[124].mxu0  ;;  %v5293_v14 = vpack.c.bf16 %v4810_v32, %v4809_v61  ;;  %v7880_v32 = vpop.f32.mrb[10].mxu1  ;;  %v6843_v35 = vcombine.high %v9351_v18, %v9356_v25 }
 0x1d6   :  { %v3147_v45 = vadd.f32 %v9172_v11, %v7615_v37  ;;  %v3138_v44 = vpop.f32.mrb[125].mxu0  ;;  %v9329_v60 = vpack.c.bf16 %v5070_v28, %v5069_v3  ;;  %v4197_v36 = vpop.f32.mrb[11].mxu1  ;;  %v8195_v3 = vld [vmem:[%s10570_s0 + $0x3c8] sm:$0xff]   ;;  %v8196_v28 = vld [vmem:[%s10570_s0 + $0x3d0] sm:$0xff]  }
 0x1d7   :  { %v3139_v40 = vadd.f32 %v9172_v11, %v3138_v44  ;;  %v7616_v49 = vpop.f32.mrb[126].mxu0  ;;  %7207 = vmatprep.subr.bf16.mxu1 %v5293_v14  ;;  %v4203_v14 = vadd.f32 %v9172_v11, %v7879_v29  ;;  %v4198_v47 = vadd.f32 %v9172_v11, %v4197_v36  ;;  %v7883_v4 = vpop.f32.mrb[12].mxu1 }
 0x1d8   :  { %v3150_v53 = vadd.f32 %v9172_v11, %v7616_v49  ;;  %v3141_v55 = vpop.f32.mrb[127].mxu0  ;;  %7208 = vmatpush3.bf16.msra.mxu1 %v9254_v24  ;;  %v4815_v34 = vmax.f32 %v3147_v45, 0.0  ;;  %v4206_v45 = vadd.f32 %v9172_v11, %v7880_v32  ;;  %v4210_v63 = vpop.f32.mrb[13].mxu1 }
 0x1d9   :  { %v3142_v27 = vadd.f32 %v9172_v11, %v3141_v55  ;;  %7209 = vmatprep.subr.bf16.mxu1 %v5294_v58  ;;  %v4813_v0 = vmax.f32 %v3139_v40, 0.0  ;;  %v5079_v20 = vmax.f32 %v4203_v14, 0.0  ;;  %v7884_v1 = vpop.f32.mrb[14].mxu1 }
 0x1da   :  { %v4816_v62 = vmax.f32 %v3150_v53, 0.0  ;;  %7722 = vmatmul.mubr.msk.bf16.gmra.mrb[232].mxu0 %vm1832_vm2, %v8191_v46  ;;  %v5080_v40 = vmax.f32 %v4206_v45, 0.0  ;;  %v5078_v53 = vmax.f32 %v4198_v47, 0.0  ;;  %v4213_v5 = vpop.f32.mrb[15].mxu1  ;;  %v4222_v9 = vadd.f32 %v9172_v11, %v7884_v1 }
 0x1db   :  { %v4814_v21 = vmax.f32 %v3142_v27, 0.0  ;;  %7725 = vmatprep.mubr.msk.bf16.mxu0 %vm1832_vm2, %v8192_v51 }
 0x1dc   :  { %v5296_v24 = vpack.c.bf16 %v4816_v62, %v4815_v34  ;;  %7210 = vmatpush3.bf16.msra.mxu1 %v9252_v23  ;;  %v5076_v23 = vmax.f32 %v4190_v7, 0.0  ;;  %v9387_v27 = vpack.c.bf16 %v5080_v40, %v5079_v20 }
 0x1dd   :  { %v5295_v8 = vpack.c.bf16 %v4814_v21, %v4813_v0  ;;  %v7619_v38 = vpop.f32.mrb[128].mxu0 }
 0x1de   :  { %v3163_v12 = vadd.f32 %v9172_v11, %v7619_v38  ;;  %v3154_v43 = vpop.f32.mrb[129].mxu0  ;;  %v9358_v26 = vpack.c.bf16 %v5076_v23, %v5075_v15  ;;  %v4211_v38 = vadd.f32 %v9172_v11, %v4210_v63  ;;  %v8197_v23 = vld [vmem:[%s10570_s0 + $0x3d8] sm:$0xff]  }
 0x1df   :  { %v3155_v50 = vadd.f32 %v9172_v11, %v3154_v43  ;;  %v7620_v54 = vpop.f32.mrb[130].mxu0  ;;  %7211 = vmatprep.subr.bf16.mxu1 %v5295_v8  ;;  %v4219_v8 = vadd.f32 %v9172_v11, %v7883_v4 }
 0x1e0   :  { %v3166_v17 = vadd.f32 %v9172_v11, %v7620_v54  ;;  %v3157_v52 = vpop.f32.mrb[131].mxu0  ;;  %7212 = vmatpush3.bf16.msra.mxu1 %v9270_v41  ;;  %v4819_v41 = vmax.f32 %v3163_v12, 0.0  ;;  %v5081_v54 = vmax.f32 %v4211_v38, 0.0 }
 0x1e1   :  { %v3158_v59 = vadd.f32 %v9172_v11, %v3157_v52  ;;  %7213 = vmatprep.subr.bf16.mxu1 %v5296_v24  ;;  %v4817_v33 = vmax.f32 %v3155_v50, 0.0  ;;  %v5083_v50 = vmax.f32 %v4219_v8, 0.0  ;;  %v8198_v52 = vld [vmem:[%s10570_s0 + $0x3e0] sm:$0xff]  }
 0x1e2   :  { %v4820_v61 = vmax.f32 %v3166_v17, 0.0  ;;  %7726 = vmatmul.mubr.msk.bf16.gmra.mrb[236].mxu0 %vm1832_vm2, %v8193_v13  ;;  %v4214_v13 = vadd.f32 %v9172_v11, %v4213_v5 }
 0x1e3   :  { %v4818_v58 = vmax.f32 %v3158_v59, 0.0  ;;  %7729 = vmatprep.mubr.msk.bf16.mxu0 %vm1832_vm2, %v8194_v22  ;;  %v5084_v22 = vmax.f32 %v4222_v9, 0.0 }
 0x1e4   :  { %v9369_v37 = vpack.c.bf16 %v4820_v61, %v4819_v41  ;;  %7214 = vmatpush3.bf16.msra.mxu1 %v9268_v10  ;;  %v5077_v10 = vmax.f32 %v4195_v42, 0.0  ;;  %v5082_v29 = vmax.f32 %v4214_v13, 0.0  ;;  %v7887_v61 = vpop.f32.mrb[16].mxu1 }
 0x1e5   :  { %v9375_v44 = vpack.c.bf16 %v4818_v58, %v4817_v33  ;;  %v7623_v46 = vpop.f32.mrb[132].mxu0  ;;  %v9411_v41 = vpack.c.bf16 %v5084_v22, %v5083_v50  ;;  %v4226_v58 = vpop.f32.mrb[17].mxu1  ;;  %v4235_v47 = vadd.f32 %v9172_v11, %v7887_v61 }
 0x1e6   :  { %v3179_v48 = vadd.f32 %v9172_v11, %v7623_v46  ;;  %v3170_v19 = vpop.f32.mrb[133].mxu0  ;;  %v9390_v62 = vpack.c.bf16 %v5078_v53, %v5077_v10  ;;  %v9414_v33 = vpack.c.bf16 %v5082_v29, %v5081_v54  ;;  %v7888_v36 = vpop.f32.mrb[18].mxu1 }
 0x1e7   :  { %v3171_v49 = vadd.f32 %v9172_v11, %v3170_v19  ;;  %v7624_v51 = vpop.f32.mrb[134].mxu0  ;;  %5805 = vmatmul.mubr.bf16.vlgmr.msra.gmra.mrb[144].mxu1 %v6840_v6  ;;  %v4229_v45 = vpop.f32.mrb[19].mxu1  ;;  %v4238_v19 = vadd.f32 %v9172_v11, %v7888_v36  ;;  %v8202_v36 = vld [vmem:[%s10570_s0 + $0x400] sm:$0xff]  }
 0x1e8   :  { %v3182_v55 = vadd.f32 %v9172_v11, %v7624_v51  ;;  %v3173_v57 = vpop.f32.mrb[135].mxu0  ;;  %5845 = vmatprep.mubr.bf16.mxu1 %v6843_v35  ;;  %v4823_v0 = vmax.f32 %v3179_v48, 0.0  ;;  %v4227_v48 = vadd.f32 %v9172_v11, %v4226_v58  ;;  %v4230_v10 = vadd.f32 %v9172_v11, %v4229_v45  ;;  %v8199_v51 = vld [vmem:[%s10570_s0 + $0x3e8] sm:$0xff]  }
 0x1e9   :  { %v3174_v34 = vadd.f32 %v9172_v11, %v3173_v57  ;;  %v4821_v24 = vmax.f32 %v3171_v49, 0.0 }
 0x1ea   :  { %v4824_v21 = vmax.f32 %v3182_v55, 0.0  ;;  %7730 = vmatmul.mubr.msk.bf16.gmra.mrb[240].mxu0 %vm1832_vm2, %v8195_v3  ;;  %v5085_v53 = vmax.f32 %v4227_v48, 0.0  ;;  %v5088_v55 = vmax.f32 %v4238_v19, 0.0  ;;  %v5086_v63 = vmax.f32 %v4230_v10, 0.0 }
 0x1eb   :  { %v4822_v2 = vmax.f32 %v3174_v34, 0.0  ;;  %7733 = vmatprep.mubr.msk.bf16.mxu0 %vm1832_vm2, %v8196_v28  ;;  %v5087_v28 = vmax.f32 %v4235_v47, 0.0  ;;  %v8200_v34 = vld [vmem:[%s10570_s0 + $0x3f0] sm:$0xff]  }
 0x1ec   :  { %v9394_v7 = vpack.c.bf16 %v4824_v21, %v4823_v0  ;;  %v9438_v5 = vpack.c.bf16 %v5086_v63, %v5085_v53 }
 0x1ed   :  { %v9399_v12 = vpack.c.bf16 %v4822_v2, %v4821_v24  ;;  %v7627_v43 = vpop.f32.mrb[136].mxu0  ;;  %v9435_v1 = vpack.c.bf16 %v5088_v55, %v5087_v28  ;;  %v7891_v24 = vpop.f32.mrb[20].mxu1 }
 0x1ee   :  { %v3195_v15 = vadd.f32 %v9172_v11, %v7627_v43  ;;  %v3186_v16 = vpop.f32.mrb[137].mxu0  ;;  %v4242_v8 = vpop.f32.mrb[21].mxu1  ;;  %v4251_v50 = vadd.f32 %v9172_v11, %v7891_v24 }
 0x1ef   :  { %v3187_v39 = vadd.f32 %v9172_v11, %v3186_v16  ;;  %v7628_v17 = vpop.f32.mrb[138].mxu0  ;;  %v7892_v43 = vpop.f32.mrb[22].mxu1  ;;  %v4243_v54 = vadd.f32 %v9172_v11, %v4242_v8 }
 0x1f0   :  { %v3198_v59 = vadd.f32 %v9172_v11, %v7628_v17  ;;  %v3189_v31 = vpop.f32.mrb[139].mxu0  ;;  %v4827_v6 = vmax.f32 %v3195_v15, 0.0  ;;  %v4245_v16 = vpop.f32.mrb[23].mxu1  ;;  %v4254_v22 = vadd.f32 %v9172_v11, %v7892_v43  ;;  %v5091_v61 = vmax.f32 %v4251_v50, 0.0  ;;  %v8204_v50 = vld [vmem:[%s10570_s0 + $0x410] sm:$0xff]  }
 0x1f1   :  { %v3190_v32 = vadd.f32 %v9172_v11, %v3189_v31  ;;  %v4825_v14 = vmax.f32 %v3187_v39, 0.0  ;;  %v8201_v31 = vld [vmem:[%s10570_s0 + $0x3f8] sm:$0xff]   ;;  %v7895_v48 = vpop.f32.mrb[24].mxu1 }
 0x1f2   :  { %v4828_v35 = vmax.f32 %v3198_v59, 0.0  ;;  %7734 = vmatmul.mubr.msk.bf16.gmra.mrb[244].mxu0 %vm1832_vm2, %v8197_v23  ;;  %v5092_v58 = vmax.f32 %v4254_v22, 0.0  ;;  %v4258_v10 = vpop.f32.mrb[25].mxu1 }
 0x1f3   :  { %v4826_v42 = vmax.f32 %v3190_v32, 0.0  ;;  %7737 = vmatprep.mubr.msk.bf16.mxu0 %vm1832_vm2, %v8198_v52  ;;  %v4246_v52 = vadd.f32 %v9172_v11, %v4245_v16  ;;  %v5089_v32 = vmax.f32 %v4243_v54, 0.0 }
 0x1f4   :  { %v9418_v46 = vpack.c.bf16 %v4828_v35, %v4827_v6  ;;  %v9459_v47 = vpack.c.bf16 %v5092_v58, %v5091_v61 }
 0x1f5   :  { %v9423_v3 = vpack.c.bf16 %v4826_v42, %v4825_v14  ;;  %v7631_v20 = vpop.f32.mrb[140].mxu0  ;;  %v5090_v14 = vmax.f32 %v4246_v52, 0.0 }
 0x1f6   :  { %v3211_v40 = vadd.f32 %v9172_v11, %v7631_v20  ;;  %v3202_v49 = vpop.f32.mrb[141].mxu0 }
 0x1f7   :  { %v3203_v57 = vadd.f32 %v9172_v11, %v3202_v49  ;;  %v7632_v4 = vpop.f32.mrb[142].mxu0  ;;  %v9462_v20 = vpack.c.bf16 %v5090_v14, %v5089_v32 }
 0x1f8   :  { %v3214_v0 = vadd.f32 %v9172_v11, %v7632_v4  ;;  %v3205_v21 = vpop.f32.mrb[143].mxu0  ;;  %v4831_v38 = vmax.f32 %v3211_v40, 0.0  ;;  %v4267_v4 = vadd.f32 %v9172_v11, %v7895_v48 }
 0x1f9   :  { %v3206_v2 = vadd.f32 %v9172_v11, %v3205_v21  ;;  %v4829_v13 = vmax.f32 %v3203_v57, 0.0 }
 0x1fa   :  { %v4832_v9 = vmax.f32 %v3214_v0, 0.0  ;;  %7738 = vmatmul.mubr.msk.bf16.gmra.mrb[248].mxu0 %vm1832_vm2, %v8199_v51  ;;  %v7896_v51 = vpop.f32.mrb[26].mxu1 }
 0x1fb   :  { %v4830_v15 = vmax.f32 %v3206_v2, 0.0  ;;  %7741 = vmatprep.mubr.msk.bf16.mxu0 %vm1832_vm2, %v8200_v34  ;;  %v4261_v55 = vpop.f32.mrb[27].mxu1  ;;  %v4259_v34 = vadd.f32 %v9172_v11, %v4258_v10  ;;  %v4270_v63 = vadd.f32 %v9172_v11, %v7896_v51 }
 0x1fc   :  { %v9442_v23 = vpack.c.bf16 %v4832_v9, %v4831_v38  ;;  %v4262_v24 = vadd.f32 %v9172_v11, %v4261_v55  ;;  %v8203_v38 = vld [vmem:[%s10570_s0 + $0x408] sm:$0xff]   ;;  %v5095_v9 = vmax.f32 %v4267_v4, 0.0 }
 0x1fd   :  { %v9447_v39 = vpack.c.bf16 %v4830_v15, %v4829_v13  ;;  %v7635_v17 = vpop.f32.mrb[144].mxu0  ;;  %v5093_v43 = vmax.f32 %v4259_v34, 0.0  ;;  %v5096_v13 = vmax.f32 %v4270_v63, 0.0  ;;  %v8206_v34 = vld [vmem:[%s10570_s0 + $0x420] sm:$0xff]  }
 0x1fe   :  { %v3227_v29 = vadd.f32 %v9172_v11, %v7635_v17  ;;  %v3218_v59 = vpop.f32.mrb[145].mxu0  ;;  %v5094_v54 = vmax.f32 %v4262_v24, 0.0 }
 0x1ff   :  { %v3219_v6 = vadd.f32 %v9172_v11, %v3218_v59  ;;  %v7636_v35 = vpop.f32.mrb[146].mxu0  ;;  %v9480_v52 = vpack.c.bf16 %v5096_v13, %v5095_v9 }
 0x200   :  { %v3230_v42 = vadd.f32 %v9172_v11, %v7636_v35  ;;  %v3221_v45 = vpop.f32.mrb[147].mxu0  ;;  %v4835_v40 = vmax.f32 %v3227_v29, 0.0  ;;  %v7899_v29 = vpop.f32.mrb[28].mxu1 }
 0x201   :  { %v3222_v19 = vadd.f32 %v9172_v11, %v3221_v45  ;;  %v4833_v28 = vmax.f32 %v3219_v6, 0.0  ;;  %v4274_v61 = vpop.f32.mrb[29].mxu1 }
 0x202   :  { %v4836_v49 = vmax.f32 %v3230_v42, 0.0  ;;  %7742 = vmatmul.mubr.msk.bf16.gmra.mrb[252].mxu0 %vm1832_vm2, %v8201_v31  ;;  %v9483_v31 = vpack.c.bf16 %v5094_v54, %v5093_v43  ;;  %v7900_v6 = vpop.f32.mrb[30].mxu1  ;;  %v4283_v42 = vadd.f32 %v9172_v11, %v7899_v29  ;;  %v4275_v45 = vadd.f32 %v9172_v11, %v4274_v61 }
 0x203   :  { %v4834_v53 = vmax.f32 %v3222_v19, 0.0  ;;  %7745 = vmatprep.mubr.msk.bf16.mxu0 %vm1832_vm2, %v8202_v36  ;;  %v4277_v14 = vpop.f32.mrb[31].mxu1  ;;  %v4286_v48 = vadd.f32 %v9172_v11, %v7900_v6 }
 0x204   :  { %v5306_v57 = vpack.c.bf16 %v4836_v49, %v4835_v40  ;;  %v4278_v40 = vadd.f32 %v9172_v11, %v4277_v14  ;;  %v5097_v55 = vmax.f32 %v4275_v45, 0.0  ;;  %v8208_v45 = vld [vmem:[%s10570_s0 + $0x430] sm:$0xff]  }
 0x205   :  { %v5305_v0 = vpack.c.bf16 %v4834_v53, %v4833_v28  ;;  %v7639_v21 = vpop.f32.mrb[148].mxu0  ;;  %v8205_v28 = vld [vmem:[%s10570_s0 + $0x418] sm:$0xff]   ;;  %v5099_v53 = vmax.f32 %v4283_v42, 0.0 }
 0x206   :  { %v3243_v2 = vadd.f32 %v9172_v11, %v7639_v21  ;;  %v3234_v8 = vpop.f32.mrb[149].mxu0  ;;  %v5098_v63 = vmax.f32 %v4278_v40, 0.0 }
 0x207   :  { %v3235_v15 = vadd.f32 %v9172_v11, %v3234_v8  ;;  %v7640_v16 = vpop.f32.mrb[150].mxu0  ;;  %7221 = vmatprep.subr.bf16.mxu1 %v5305_v0 }
 0x208   :  { %v3246_v22 = vadd.f32 %v9172_v11, %v7640_v16  ;;  %v3237_v17 = vpop.f32.mrb[151].mxu0  ;;  %7222 = vmatpush3.bf16.msra.mxu1 %v9375_v44  ;;  %v4839_v32 = vmax.f32 %v3243_v2, 0.0  ;;  %v7903_v2 = vpop.f32.mrb[32].mxu1 }
 0x209   :  { %v3238_v59 = vadd.f32 %v9172_v11, %v3237_v17  ;;  %7223 = vmatprep.subr.bf16.mxu1 %v5306_v57  ;;  %v4837_v35 = vmax.f32 %v3235_v15, 0.0  ;;  %v4290_v9 = vpop.f32.mrb[33].mxu1 }
 0x20a   :  { %v4840_v58 = vmax.f32 %v3246_v22, 0.0  ;;  %7746 = vmatmul.mubr.msk.bf16.gmra.mrb[0].mxu0 %vm1832_vm2, %v8203_v38  ;;  %v9505_v38 = vpack.c.bf16 %v5098_v63, %v5097_v55  ;;  %v7904_v15 = vpop.f32.mrb[34].mxu1  ;;  %v4299_v22 = vadd.f32 %v9172_v11, %v7903_v2  ;;  %v4291_v17 = vadd.f32 %v9172_v11, %v4290_v9 }
 0x20b   :  { %v4838_v36 = vmax.f32 %v3238_v59, 0.0  ;;  %7749 = vmatprep.mubr.msk.bf16.mxu0 %vm1832_vm2, %v8204_v50  ;;  %v4293_v54 = vpop.f32.mrb[35].mxu1  ;;  %v4302_v29 = vadd.f32 %v9172_v11, %v7904_v15 }
 0x20c   :  { %v5308_v44 = vpack.c.bf16 %v4840_v58, %v4839_v32  ;;  %7224 = vmatpush3.bf16.msra.mxu1 %v9369_v37  ;;  %v5100_v37 = vmax.f32 %v4286_v48, 0.0  ;;  %v4294_v32 = vadd.f32 %v9172_v11, %v4293_v54  ;;  %v5101_v14 = vmax.f32 %v4291_v17, 0.0  ;;  %v8210_v17 = vld [vmem:[%s10570_s0 + $0x440] sm:$0xff]  }
 0x20d   :  { %v5307_v19 = vpack.c.bf16 %v4838_v36, %v4837_v35  ;;  %v7643_v10 = vpop.f32.mrb[152].mxu0  ;;  %v8207_v35 = vld [vmem:[%s10570_s0 + $0x428] sm:$0xff]   ;;  %v5103_v36 = vmax.f32 %v4299_v22, 0.0 }
 0x20e   :  { %v3259_v49 = vadd.f32 %v9172_v11, %v7643_v10  ;;  %v3250_v51 = vpop.f32.mrb[153].mxu0  ;;  %v9502_v24 = vpack.c.bf16 %v5100_v37, %v5099_v53  ;;  %v5102_v48 = vmax.f32 %v4294_v32, 0.0  ;;  %v9549_v32 = vld [vmem:[%s10572_s3 + $0x28] sm:$0xff] }
 0x20f   :  { %v3251_v57 = vadd.f32 %v9172_v11, %v3250_v51  ;;  %v7644_v4 = vpop.f32.mrb[154].mxu0  ;;  %7225 = vmatprep.subr.bf16.mxu1 %v5307_v19 }
 0x210   :  { %v3262_v0 = vadd.f32 %v9172_v11, %v7644_v4  ;;  %v3253_v21 = vpop.f32.mrb[155].mxu0  ;;  %7226 = vmatpush3.bf16.msra.mxu1 %v9399_v12  ;;  %v4843_v43 = vmax.f32 %v3259_v49, 0.0  ;;  %v7907_v49 = vpop.f32.mrb[36].mxu1 }
 0x211   :  { %v3254_v8 = vadd.f32 %v9172_v11, %v3253_v21  ;;  %7227 = vmatprep.subr.bf16.mxu1 %v5308_v44  ;;  %v4841_v16 = vmax.f32 %v3251_v57, 0.0  ;;  %v4306_v53 = vpop.f32.mrb[37].mxu1 }
 0x212   :  { %v4844_v13 = vmax.f32 %v3262_v0, 0.0  ;;  %7750 = vmatmul.mubr.msk.bf16.gmra.mrb[4].mxu0 %vm1832_vm2, %v8205_v28  ;;  %v9527_v28 = vpack.c.bf16 %v5102_v48, %v5101_v14  ;;  %v7908_v57 = vpop.f32.mrb[38].mxu1  ;;  %v4315_v0 = vadd.f32 %v9172_v11, %v7907_v49  ;;  %v4307_v21 = vadd.f32 %v9172_v11, %v4306_v53 }
 0x213   :  { %v4842_v50 = vmax.f32 %v3254_v8, 0.0  ;;  %7753 = vmatprep.mubr.msk.bf16.mxu0 %vm1832_vm2, %v8206_v34  ;;  %v4309_v63 = vpop.f32.mrb[39].mxu1  ;;  %v4318_v2 = vadd.f32 %v9172_v11, %v7908_v57 }
 0x214   :  { %v5310_v12 = vpack.c.bf16 %v4844_v13, %v4843_v43  ;;  %7228 = vmatpush3.bf16.msra.mxu1 %v9394_v7  ;;  %v5104_v7 = vmax.f32 %v4302_v29, 0.0  ;;  %v4310_v43 = vadd.f32 %v9172_v11, %v4309_v63  ;;  %v5105_v54 = vmax.f32 %v4307_v21, 0.0  ;;  %v8211_v63 = vld [vmem:[%s10570_s0 + $0x448] sm:$0xff]  }
 0x215   :  { %v5309_v59 = vpack.c.bf16 %v4842_v50, %v4841_v16  ;;  %v7647_v61 = vpop.f32.mrb[156].mxu0  ;;  %v8209_v16 = vld [vmem:[%s10570_s0 + $0x438] sm:$0xff]   ;;  %v5107_v50 = vmax.f32 %v4315_v0, 0.0 }
 0x216   :  { %v3275_v58 = vadd.f32 %v9172_v11, %v7647_v61  ;;  %v3266_v6 = vpop.f32.mrb[157].mxu0  ;;  %v9524_v40 = vpack.c.bf16 %v5104_v7, %v5103_v36  ;;  %v5106_v29 = vmax.f32 %v4310_v43, 0.0 }
 0x217   :  { %v3267_v44 = vadd.f32 %v9172_v11, %v3266_v6  ;;  %v7648_v42 = vpop.f32.mrb[158].mxu0  ;;  %7229 = vmatprep.subr.bf16.mxu1 %v5309_v59 }
 0x218   :  { %v3278_v19 = vadd.f32 %v9172_v11, %v7648_v42  ;;  %v3269_v10 = vpop.f32.mrb[159].mxu0  ;;  %7230 = vmatpush3.bf16.msra.mxu1 %v9423_v3  ;;  %v4847_v55 = vmax.f32 %v3275_v58, 0.0  ;;  %v9554_v58 = vld [vmem:[%s10572_s3 + $0xa8] sm:$0xff]  ;;  %v9564_v36 = vpack.c.bf16 %v5106_v29, %v5105_v54 }
 0x219   :  { %v3270_v51 = vadd.f32 %v9172_v11, %v3269_v10  ;;  %7231 = vmatprep.subr.bf16.mxu1 %v5310_v12  ;;  %v4845_v4 = vmax.f32 %v3267_v44, 0.0  ;;  %v6845_v10 = vcombine.high %v9549_v32, %v9554_v58 }
 0x21a   :  { %v4848_v37 = vmax.f32 %v3278_v19, 0.0  ;;  %7754 = vmatmul.mubr.msk.bf16.gmra.mrb[8].mxu0 %vm1832_vm2, %v8207_v35  ;;  %v7911_v35 = vpop.f32.mrb[40].mxu1  ;;  %v6842_v19 = vcombine.low %v9351_v18, %v9356_v25 }
 0x21b   :  { %v4846_v34 = vmax.f32 %v3270_v51, 0.0  ;;  %7757 = vmatprep.mubr.msk.bf16.mxu0 %vm1832_vm2, %v8208_v45  ;;  %v4322_v14 = vpop.f32.mrb[41].mxu1 }
 0x21c   :  { %v5312_v3 = vpack.c.bf16 %v4848_v37, %v4847_v55  ;;  %7232 = vmatpush3.bf16.msra.mxu1 %v9418_v46  ;;  %v5108_v46 = vmax.f32 %v4318_v2, 0.0  ;;  %v7912_v42 = vpop.f32.mrb[42].mxu1 }
 0x21d   :  { %v5311_v8 = vpack.c.bf16 %v4846_v34, %v4845_v4  ;;  %v7651_v9 = vpop.f32.mrb[160].mxu0  ;;  %v4325_v49 = vpop.f32.mrb[43].mxu1 }
 0x21e   :  { %v3291_v13 = vadd.f32 %v9172_v11, %v7651_v9  ;;  %v3282_v15 = vpop.f32.mrb[161].mxu0  ;;  %v9556_v6 = vpack.c.bf16 %v5108_v46, %v5107_v50 }
 0x21f   :  { %v3283_v12 = vadd.f32 %v9172_v11, %v3282_v15  ;;  %v7652_v22 = vpop.f32.mrb[162].mxu0  ;;  %7233 = vmatprep.subr.bf16.mxu1 %v5311_v8  ;;  %v8212_v8 = vld [vmem:[%s10570_s0 + $0x450] sm:$0xff]  }
 0x220   :  { %v3294_v59 = vadd.f32 %v9172_v11, %v7652_v22  ;;  %v3285_v61 = vpop.f32.mrb[163].mxu0  ;;  %7234 = vmatpush3.bf16.msra.mxu1 %v9447_v39  ;;  %v9561_v11 = vld [vmem:[%s10571_s2] ss:$0 sm:$0xff]  ;;  %v4851_v7 = vmax.f32 %v3291_v13, 0.0 }
 0x221   :  { %v3286_v39 = vadd.f32 %v9561_v11, %v3285_v61  ;;  %7235 = vmatprep.subr.bf16.mxu1 %v5312_v3  ;;  %v4849_v45 = vmax.f32 %v3283_v12, 0.0  ;;  %v4331_v53 = vadd.f32 %v9561_v11, %v7911_v35  ;;  %v4323_v55 = vadd.f32 %v9561_v11, %v4322_v14 }
 0x222   :  { %v4852_v44 = vmax.f32 %v3294_v59, 0.0  ;;  %7758 = vmatmul.mubr.msk.bf16.gmra.mrb[12].mxu0 %vm1832_vm2, %v8209_v16  ;;  %v4334_v37 = vadd.f32 %v9561_v11, %v7912_v42  ;;  %v4326_v34 = vadd.f32 %v9561_v11, %v4325_v49  ;;  %v7915_v16 = vpop.f32.mrb[44].mxu1 }
 0x223   :  { %v4850_v48 = vmax.f32 %v3286_v39, 0.0  ;;  %7761 = vmatprep.mubr.msk.bf16.mxu0 %vm1832_vm2, %v8210_v17  ;;  %v5111_v3 = vmax.f32 %v4331_v53, 0.0  ;;  %v4338_v46 = vpop.f32.mrb[45].mxu1  ;;  %v4347_v39 = vadd.f32 %v9561_v11, %v7915_v16 }
 0x224   :  { %v9572_v51 = vpack.c.bf16 %v4852_v44, %v4851_v7  ;;  %7236 = vmatpush3.bf16.msra.mxu1 %v9442_v23  ;;  %v5109_v23 = vmax.f32 %v4323_v55, 0.0  ;;  %v5112_v0 = vmax.f32 %v4334_v37, 0.0  ;;  %v5110_v9 = vmax.f32 %v4326_v34, 0.0  ;;  %v7916_v17 = vpop.f32.mrb[46].mxu1  ;;  %v8214_v34 = vld [vmem:[%s10570_s0 + $0x460] sm:$0xff]  }
 0x225   :  { %v9578_v57 = vpack.c.bf16 %v4850_v48, %v4849_v45  ;;  %v7655_v4 = vpop.f32.mrb[164].mxu0  ;;  %v4341_v61 = vpop.f32.mrb[47].mxu1  ;;  %v4339_v14 = vadd.f32 %v9561_v11, %v4338_v46  ;;  %v4350_v7 = vadd.f32 %v9561_v11, %v7916_v17  ;;  %v5115_v49 = vmax.f32 %v4347_v39, 0.0 }
 0x226   :  { %v3307_v18 = vadd.f32 %v9561_v11, %v7655_v4  ;;  %v3298_v25 = vpop.f32.mrb[165].mxu0  ;;  %v9590_v15 = vpack.c.bf16 %v5112_v0, %v5111_v3  ;;  %v9593_v54 = vpack.c.bf16 %v5110_v9, %v5109_v23  ;;  %v4342_v45 = vadd.f32 %v9561_v11, %v4341_v61  ;;  %v7919_v23 = vpop.f32.mrb[48].mxu1 }
 0x227   :  { %v3299_v21 = vadd.f32 %v9561_v11, %v3298_v25  ;;  %v7656_v2 = vpop.f32.mrb[166].mxu0  ;;  %5846 = vmatmul.mubr.bf16.vlgmr.msra.gmra.mrb[148].mxu1 %v6842_v19  ;;  %v5113_v53 = vmax.f32 %v4339_v14, 0.0  ;;  %v5116_v55 = vmax.f32 %v4350_v7, 0.0  ;;  %v8215_v7 = vld [vmem:[%s10570_s0 + $0x468] sm:$0xff]  }
 0x228   :  { %v3310_v43 = vadd.f32 %v9561_v11, %v7656_v2  ;;  %v3301_v13 = vpop.f32.mrb[167].mxu0  ;;  %5886 = vmatprep.mubr.bf16.mxu1 %v6845_v10  ;;  %10574 = vst [vmem:[#allocation2_spill] sm:$0xff] %v9590_v15  ;;  %v4855_v12 = vmax.f32 %v3307_v18, 0.0  ;;  %v8213_v10 = vld [vmem:[%s10570_s0 + $0x458] sm:$0xff]   ;;  %v5114_v18 = vmax.f32 %v4342_v45, 0.0  ;;  %v4354_v2 = vpop.f32.mrb[49].mxu1 }
 0x229   :  { %v3302_v50 = vadd.f32 %v9561_v11, %v3301_v13  ;;  %v4853_v29 = vmax.f32 %v3299_v21, 0.0  ;;  %v9614_v3 = vpack.c.bf16 %v5116_v55, %v5115_v49  ;;  %v8216_v49 = vld [vmem:[%s10570_s0 + $0x470] sm:$0xff]  }
 0x22a   :  { %v4856_v22 = vmax.f32 %v3310_v43, 0.0  ;;  %7762 = vmatmul.mubr.msk.bf16.gmra.mrb[16].mxu0 %vm1832_vm2, %v8211_v63  ;;  %v9617_v21 = vpack.c.bf16 %v5114_v18, %v5113_v53  ;;  %v7920_v43 = vpop.f32.mrb[50].mxu1 }
 0x22b   :  { %v4854_v59 = vmax.f32 %v3302_v50, 0.0  ;;  %7765 = vmatprep.mubr.msk.bf16.mxu0 %vm1832_vm2, %v8212_v8  ;;  %10575 = vst [vmem:[#allocation3_spill] sm:$0xff] %v9614_v3  ;;  %v4357_v50 = vpop.f32.mrb[51].mxu1  ;;  %v4366_v17 = vadd.f32 %v9561_v11, %v7920_v43 }
 0x22c   :  { %v9597_v35 = vpack.c.bf16 %v4856_v22, %v4855_v12  ;;  %10576 = vst [vmem:[#allocation4_spill] sm:$0xff] %v9617_v21  ;;  %v4363_v12 = vadd.f32 %v9561_v11, %v7919_v23  ;;  %v4355_v22 = vadd.f32 %v9561_v11, %v4354_v2  ;;  %v4358_v61 = vadd.f32 %v9561_v11, %v4357_v50 }
 0x22d   :  { %v9602_v44 = vpack.c.bf16 %v4854_v59, %v4853_v29  ;;  %v7659_v42 = vpop.f32.mrb[168].mxu0 }
 0x22e   :  { %v3323_v48 = vadd.f32 %v9561_v11, %v7659_v42  ;;  %v3314_v19 = vpop.f32.mrb[169].mxu0  ;;  %v5119_v42 = vmax.f32 %v4363_v12, 0.0  ;;  %v5117_v45 = vmax.f32 %v4355_v22, 0.0  ;;  %v5118_v53 = vmax.f32 %v4358_v61, 0.0 }
 0x22f   :  { %v3315_v37 = vadd.f32 %v9561_v11, %v3314_v19  ;;  %v7660_v4 = vpop.f32.mrb[170].mxu0 }
 0x230   :  { %v3326_v25 = vadd.f32 %v9561_v11, %v7660_v4  ;;  %v3317_v63 = vpop.f32.mrb[171].mxu0  ;;  %v4859_v8 = vmax.f32 %v3323_v48, 0.0  ;;  %v5120_v48 = vmax.f32 %v4366_v17, 0.0 }
 0x231   :  { %v3318_v0 = vadd.f32 %v9561_v11, %v3317_v63  ;;  %v4857_v13 = vmax.f32 %v3315_v37, 0.0 }
 0x232   :  { %v4860_v9 = vmax.f32 %v3326_v25, 0.0  ;;  %7766 = vmatmul.mubr.msk.bf16.gmra.mrb[20].mxu0 %vm1832_vm2, %v8213_v10  ;;  %v9638_v4 = vpack.c.bf16 %v5120_v48, %v5119_v42  ;;  %v9641_v25 = vpack.c.bf16 %v5118_v53, %v5117_v45 }
 0x233   :  { %v4858_v16 = vmax.f32 %v3318_v0, 0.0  ;;  %7769 = vmatprep.mubr.msk.bf16.mxu0 %vm1832_vm2, %v8214_v34  ;;  %v7923_v34 = vpop.f32.mrb[52].mxu1 }
 0x234   :  { %v9621_v46 = vpack.c.bf16 %v4860_v9, %v4859_v8  ;;  %10577 = vst [vmem:[#allocation5_spill] sm:$0xff] %v9638_v4  ;;  %10578 = vst [vmem:[#allocation6_spill] sm:$0xff] %v9641_v25  ;;  %v4370_v63 = vpop.f32.mrb[53].mxu1 }
 0x235   :  { %v9626_v29 = vpack.c.bf16 %v4858_v16, %v4857_v13  ;;  %v7663_v59 = vpop.f32.mrb[172].mxu0  ;;  %v7924_v2 = vpop.f32.mrb[54].mxu1  ;;  %v4379_v16 = vadd.f32 %v9561_v11, %v7923_v34  ;;  %v4371_v50 = vadd.f32 %v9561_v11, %v4370_v63 }
 0x236   :  { %v3339_v39 = vadd.f32 %v9561_v11, %v7663_v59  ;;  %v3330_v14 = vpop.f32.mrb[173].mxu0  ;;  %v4373_v43 = vpop.f32.mrb[55].mxu1  ;;  %v4382_v12 = vadd.f32 %v9561_v11, %v7924_v2 }
 0x237   :  { %v3331_v19 = vadd.f32 %v9561_v11, %v3330_v14  ;;  %v7664_v10 = vpop.f32.mrb[174].mxu0  ;;  %v4374_v59 = vadd.f32 %v9561_v11, %v4373_v43  ;;  %v8217_v14 = vld [vmem:[%s10570_s0 + $0x478] sm:$0xff]   ;;  %v5121_v42 = vmax.f32 %v4371_v50, 0.0  ;;  %v7927_v34 = vpop.f32.mrb[56].mxu1 }
 0x238   :  { %v3342_v55 = vadd.f32 %v9561_v11, %v7664_v10  ;;  %v3333_v37 = vpop.f32.mrb[175].mxu0  ;;  %v4863_v23 = vmax.f32 %v3339_v39, 0.0  ;;  %v5124_v45 = vmax.f32 %v4382_v12, 0.0  ;;  %v8218_v10 = vld [vmem:[%s10570_s0 + $0x480] sm:$0xff]   ;;  %v4395_v12 = vadd.f32 %v9561_v11, %v7927_v34 }
 0x239   :  { %v3334_v18 = vadd.f32 %v9561_v11, %v3333_v37  ;;  %v4861_v8 = vmax.f32 %v3331_v19, 0.0 }
 0x23a   :  { %v4864_v0 = vmax.f32 %v3342_v55, 0.0  ;;  %7770 = vmatmul.mubr.msk.bf16.gmra.mrb[24].mxu0 %vm1832_vm2, %v8215_v7  ;;  %v5123_v7 = vmax.f32 %v4379_v16, 0.0 }
 0x23b   :  { %v4862_v9 = vmax.f32 %v3334_v18, 0.0  ;;  %7773 = vmatprep.mubr.msk.bf16.mxu0 %vm1832_vm2, %v8216_v49  ;;  %v5122_v49 = vmax.f32 %v4374_v59, 0.0 }
 0x23c   :  { %v9645_v13 = vpack.c.bf16 %v4864_v0, %v4863_v23  ;;  %v9662_v37 = vpack.c.bf16 %v5124_v45, %v5123_v7  ;;  %v4386_v23 = vpop.f32.mrb[57].mxu1  ;;  %v8219_v45 = vld [vmem:[%s10570_s0 + $0x488] sm:$0xff]  }
 0x23d   :  { %v9650_v22 = vpack.c.bf16 %v4862_v9, %v4861_v8  ;;  %v7667_v17 = vpop.f32.mrb[176].mxu0  ;;  %v9665_v63 = vpack.c.bf16 %v5122_v49, %v5121_v42  ;;  %v7928_v8 = vpop.f32.mrb[58].mxu1 }
 0x23e   :  { %v3355_v61 = vadd.f32 %v9561_v11, %v7667_v17  ;;  %v3346_v39 = vpop.f32.mrb[177].mxu0  ;;  %v4389_v16 = vpop.f32.mrb[59].mxu1  ;;  %v4387_v17 = vadd.f32 %v9561_v11, %v4386_v23  ;;  %v4398_v59 = vadd.f32 %v9561_v11, %v7928_v8 }
 0x23f   :  { %v3347_v48 = vadd.f32 %v9561_v11, %v3346_v39  ;;  %v7668_v19 = vpop.f32.mrb[178].mxu0 }
 0x240   :  { %v3358_v53 = vadd.f32 %v9561_v11, %v7668_v19  ;;  %v3349_v55 = vpop.f32.mrb[179].mxu0  ;;  %v4867_v0 = vmax.f32 %v3355_v61, 0.0  ;;  %v4390_v61 = vadd.f32 %v9561_v11, %v4389_v16  ;;  %v5125_v19 = vmax.f32 %v4387_v17, 0.0 }
 0x241   :  { %v3350_v18 = vadd.f32 %v9561_v11, %v3349_v55  ;;  %v4865_v9 = vmax.f32 %v3347_v48, 0.0  ;;  %v5127_v48 = vmax.f32 %v4395_v12, 0.0  ;;  %v8220_v55 = vld [vmem:[%s10570_s0 + $0x490] sm:$0xff]  }
 0x242   :  { %v4868_v2 = vmax.f32 %v3358_v53, 0.0  ;;  %7774 = vmatmul.mubr.msk.bf16.gmra.mrb[28].mxu0 %vm1832_vm2, %v8217_v14  ;;  %v5126_v34 = vmax.f32 %v4390_v61, 0.0 }
 0x243   :  { %v4866_v43 = vmax.f32 %v3350_v18, 0.0  ;;  %7777 = vmatprep.mubr.msk.bf16.mxu0 %vm1832_vm2, %v8218_v10  ;;  %v5128_v10 = vmax.f32 %v4398_v59, 0.0 }
 0x244   :  { %v5322_v50 = vpack.c.bf16 %v4868_v2, %v4867_v0  ;;  %v7931_v2 = vpop.f32.mrb[60].mxu1 }
 0x245   :  { %v5321_v39 = vpack.c.bf16 %v4866_v43, %v4865_v9  ;;  %v7671_v7 = vpop.f32.mrb[180].mxu0  ;;  %v9683_v0 = vpack.c.bf16 %v5128_v10, %v5127_v48  ;;  %v9686_v9 = vpack.c.bf16 %v5126_v34, %v5125_v19  ;;  %v4402_v43 = vpop.f32.mrb[61].mxu1  ;;  %v4411_v61 = vadd.f32 %v9561_v11, %v7931_v2 }
 0x246   :  { %v3371_v42 = vadd.f32 %v9561_v11, %v7671_v7  ;;  %v3362_v14 = vpop.f32.mrb[181].mxu0  ;;  %v7932_v17 = vpop.f32.mrb[62].mxu1 }
 0x247   :  { %v3363_v49 = vadd.f32 %v9561_v11, %v3362_v14  ;;  %v7672_v53 = vpop.f32.mrb[182].mxu0  ;;  %7243 = vmatprep.subr.bf16.mxu1 %v5321_v39  ;;  %v4405_v7 = vpop.f32.mrb[63].mxu1  ;;  %v4414_v14 = vadd.f32 %v9561_v11, %v7932_v17 }
 0x248   :  { %v3374_v18 = vadd.f32 %v9561_v11, %v7672_v53  ;;  %v3365_v23 = vpop.f32.mrb[183].mxu0  ;;  %7244 = vmatpush3.bf16.msra.mxu1 %v9578_v57  ;;  %v4871_v16 = vmax.f32 %v3371_v42, 0.0  ;;  %v4406_v19 = vadd.f32 %v9561_v11, %v4405_v7  ;;  %v5131_v53 = vmax.f32 %v4411_v61, 0.0 }
 0x249   :  { %v3366_v8 = vadd.f32 %v9561_v11, %v3365_v23  ;;  %7245 = vmatprep.subr.bf16.mxu1 %v5322_v50  ;;  %v4869_v59 = vmax.f32 %v3363_v49, 0.0  ;;  %v4403_v50 = vadd.f32 %v9561_v11, %v4402_v43  ;;  %v8221_v49 = vld [vmem:[%s10570_s0 + $0x498] sm:$0xff]   ;;  %v8222_v23 = vld [vmem:[%s10570_s0 + $0x4a0] sm:$0xff]  }
 0x24a   :  { %v4872_v12 = vmax.f32 %v3374_v18, 0.0  ;;  %7778 = vmatmul.mubr.msk.bf16.gmra.mrb[32].mxu0 %vm1832_vm2, %v8219_v45  ;;  %v5130_v2 = vmax.f32 %v4406_v19, 0.0 }
 0x24b   :  { %v4870_v39 = vmax.f32 %v3366_v8, 0.0  ;;  %7781 = vmatprep.mubr.msk.bf16.mxu0 %vm1832_vm2, %v8220_v55  ;;  %v5129_v55 = vmax.f32 %v4403_v50, 0.0 }
 0x24c   :  { %v5324_v57 = vpack.c.bf16 %v4872_v12, %v4871_v16  ;;  %7246 = vmatpush3.bf16.msra.mxu1 %v9572_v51  ;;  %v5132_v51 = vmax.f32 %v4414_v14, 0.0  ;;  %v7935_v12 = vpop.f32.mrb[64].mxu1 }
 0x24d   :  { %v5323_v48 = vpack.c.bf16 %v4870_v39, %v4869_v59  ;;  %v7675_v42 = vpop.f32.mrb[184].mxu0  ;;  %v9708_v59 = vpack.c.bf16 %v5130_v2, %v5129_v55  ;;  %v4418_v39 = vpop.f32.mrb[65].mxu1  ;;  %v4427_v19 = vadd.f32 %v9561_v11, %v7935_v12 }
 0x24e   :  { %v3387_v45 = vadd.f32 %v9561_v11, %v7675_v42  ;;  %v3378_v10 = vpop.f32.mrb[185].mxu0  ;;  %v9705_v16 = vpack.c.bf16 %v5132_v51, %v5131_v53  ;;  %v7936_v50 = vpop.f32.mrb[66].mxu1 }
 0x24f   :  { %v3379_v34 = vadd.f32 %v9561_v11, %v3378_v10  ;;  %v7676_v18 = vpop.f32.mrb[186].mxu0  ;;  %7247 = vmatprep.subr.bf16.mxu1 %v5323_v48  ;;  %10580 = vst [vmem:[#allocation8_spill] sm:$0xff] %v9708_v59  ;;  %v4421_v42 = vpop.f32.mrb[67].mxu1  ;;  %v4430_v10 = vadd.f32 %v9561_v11, %v7936_v50 }
 0x250   :  { %v3390_v8 = vadd.f32 %v9561_v11, %v7676_v18  ;;  %v3381_v43 = vpop.f32.mrb[187].mxu0  ;;  %7248 = vmatpush3.bf16.msra.mxu1 %v9602_v44  ;;  %10579 = vst [vmem:[#allocation7_spill] sm:$0xff] %v9705_v16  ;;  %v4875_v7 = vmax.f32 %v3387_v45, 0.0  ;;  %v4422_v55 = vadd.f32 %v9561_v11, %v4421_v42  ;;  %v5135_v18 = vmax.f32 %v4427_v19, 0.0 }
 0x251   :  { %v3382_v17 = vadd.f32 %v9561_v11, %v3381_v43  ;;  %7249 = vmatprep.subr.bf16.mxu1 %v5324_v57  ;;  %v4873_v14 = vmax.f32 %v3379_v34, 0.0  ;;  %v4419_v57 = vadd.f32 %v9561_v11, %v4418_v39  ;;  %v8223_v34 = vld [vmem:[%s10570_s0 + $0x4a8] sm:$0xff]   ;;  %v8224_v43 = vld [vmem:[%s10570_s0 + $0x4b0] sm:$0xff]  }
 0x252   :  { %v4876_v61 = vmax.f32 %v3390_v8, 0.0  ;;  %7782 = vmatmul.mubr.msk.bf16.gmra.mrb[36].mxu0 %vm1832_vm2, %v8221_v49  ;;  %v5134_v12 = vmax.f32 %v4422_v55, 0.0 }
 0x253   :  { %v4874_v48 = vmax.f32 %v3382_v17, 0.0  ;;  %7785 = vmatprep.mubr.msk.bf16.mxu0 %vm1832_vm2, %v8222_v23  ;;  %v5133_v23 = vmax.f32 %v4419_v57, 0.0 }
 0x254   :  { %v5326_v44 = vpack.c.bf16 %v4876_v61, %v4875_v7  ;;  %7250 = vmatpush3.bf16.msra.mxu1 %v9597_v35  ;;  %v5136_v35 = vmax.f32 %v4430_v10, 0.0  ;;  %v7939_v61 = vpop.f32.mrb[68].mxu1 }
 0x255   :  { %v5325_v53 = vpack.c.bf16 %v4874_v48, %v4873_v14  ;;  %v7679_v45 = vpop.f32.mrb[188].mxu0  ;;  %v9730_v14 = vpack.c.bf16 %v5134_v12, %v5133_v23  ;;  %v4434_v48 = vpop.f32.mrb[69].mxu1  ;;  %v4443_v55 = vadd.f32 %v9561_v11, %v7939_v61 }
 0x256   :  { %v3403_v49 = vadd.f32 %v9561_v11, %v7679_v45  ;;  %v3394_v51 = vpop.f32.mrb[189].mxu0  ;;  %v9727_v7 = vpack.c.bf16 %v5136_v35, %v5135_v18  ;;  %v7940_v57 = vpop.f32.mrb[70].mxu1 }
 0x257   :  { %v3395_v2 = vadd.f32 %v9561_v11, %v3394_v51  ;;  %v7680_v8 = vpop.f32.mrb[190].mxu0  ;;  %7251 = vmatprep.subr.bf16.mxu1 %v5325_v53  ;;  %10582 = vst [vmem:[#allocation10_spill] sm:$0xff] %v9730_v14  ;;  %v4437_v45 = vpop.f32.mrb[71].mxu1  ;;  %v4446_v51 = vadd.f32 %v9561_v11, %v7940_v57 }
 0x258   :  { %v3406_v17 = vadd.f32 %v9561_v11, %v7680_v8  ;;  %v3397_v39 = vpop.f32.mrb[191].mxu0  ;;  %7252 = vmatpush3.bf16.msra.mxu1 %v9626_v29  ;;  %10581 = vst [vmem:[#allocation9_spill] sm:$0xff] %v9727_v7  ;;  %v4879_v42 = vmax.f32 %v3403_v49, 0.0  ;;  %v4438_v23 = vadd.f32 %v9561_v11, %v4437_v45  ;;  %v5139_v8 = vmax.f32 %v4443_v55, 0.0 }
 0x259   :  { %v3398_v50 = vadd.f32 %v9561_v11, %v3397_v39  ;;  %7253 = vmatprep.subr.bf16.mxu1 %v5326_v44  ;;  %v4877_v10 = vmax.f32 %v3395_v2, 0.0  ;;  %v4435_v44 = vadd.f32 %v9561_v11, %v4434_v48  ;;  %v8225_v2 = vld [vmem:[%s10570_s0 + $0x4b8] sm:$0xff]   ;;  %v8226_v39 = vld [vmem:[%s10570_s0 + $0x4c0] sm:$0xff]  }
 0x25a   :  { %v4880_v19 = vmax.f32 %v3406_v17, 0.0  ;;  %7786 = vmatmul.mubr.msk.bf16.gmra.mrb[40].mxu0 %vm1832_vm2, %v8223_v34  ;;  %v5138_v61 = vmax.f32 %v4438_v23, 0.0  ;;  %v6844_v23 = vcombine.low %v9549_v32, %v9554_v58 }
 0x25b   :  { %v4878_v53 = vmax.f32 %v3398_v50, 0.0  ;;  %7789 = vmatprep.mubr.msk.bf16.mxu0 %vm1832_vm2, %v8224_v43  ;;  %v5137_v43 = vmax.f32 %v4435_v44, 0.0 }
 0x25c   :  { %v5328_v29 = vpack.c.bf16 %v4880_v19, %v4879_v42  ;;  %7254 = vmatpush3.bf16.msra.mxu1 %v9621_v46  ;;  %v5140_v46 = vmax.f32 %v4446_v51, 0.0  ;;  %v9752_v42 = vld [vmem:[%s10572_s3 + $0x30] sm:$0xff] }
 0x25d   :  { %v5327_v18 = vpack.c.bf16 %v4878_v53, %v4877_v10  ;;  %v7683_v49 = vpop.f32.mrb[192].mxu0  ;;  %v9757_v19 = vld [vmem:[%s10572_s3 + $0xb0] sm:$0xff]  ;;  %v7943_v10 = vpop.f32.mrb[72].mxu1  ;;  %v9762_v45 = vpack.c.bf16 %v5138_v61, %v5137_v43 }
 0x25e   :  { %v3419_v34 = vadd.f32 %v9561_v11, %v7683_v49  ;;  %v3410_v35 = vpop.f32.mrb[193].mxu0  ;;  %v9759_v57 = vpack.c.bf16 %v5140_v46, %v5139_v8  ;;  %v4450_v55 = vpop.f32.mrb[73].mxu1 }
 0x25f   :  { %v3411_v12 = vadd.f32 %v9561_v11, %v3410_v35  ;;  %v7684_v17 = vpop.f32.mrb[194].mxu0  ;;  %7255 = vmatprep.subr.bf16.mxu1 %v5327_v18  ;;  %10584 = vst [vmem:[#allocation12_spill] sm:$0xff] %v9762_v45  ;;  %v7944_v51 = vpop.f32.mrb[74].mxu1  ;;  %v6847_v35 = vcombine.high %v9752_v42, %v9757_v19 }
 0x260   :  { %v3422_v50 = vadd.f32 %v9561_v11, %v7684_v17  ;;  %v3413_v48 = vpop.f32.mrb[195].mxu0  ;;  %7256 = vmatpush3.bf16.msra.mxu1 %v9650_v22  ;;  %10583 = vst [vmem:[#allocation11_spill] sm:$0xff] %v9759_v57  ;;  %v4883_v22 = vmax.f32 %v3419_v34, 0.0  ;;  %v4453_v8 = vpop.f32.mrb[75].mxu1  ;;  %v4459_v34 = vadd.f32 %v9561_v11, %v7943_v10  ;;  %v4462_v43 = vadd.f32 %v9561_v11, %v7944_v51 }
 0x261   :  { %v3414_v53 = vadd.f32 %v9561_v11, %v3413_v48  ;;  %7257 = vmatprep.subr.bf16.mxu1 %v5328_v29  ;;  %v4881_v18 = vmax.f32 %v3411_v12, 0.0  ;;  %v4454_v17 = vadd.f32 %v9561_v11, %v4453_v8 }
 0x262   :  { %v4884_v44 = vmax.f32 %v3422_v50, 0.0  ;;  %7790 = vmatmul.mubr.msk.bf16.gmra.mrb[44].mxu0 %vm1832_vm2, %v8225_v2  ;;  %v4451_v2 = vadd.f32 %v9561_v11, %v4450_v55  ;;  %v5143_v61 = vmax.f32 %v4459_v34, 0.0  ;;  %v5144_v50 = vmax.f32 %v4462_v43, 0.0 }
 0x263   :  { %v4882_v49 = vmax.f32 %v3414_v53, 0.0  ;;  %7793 = vmatprep.mubr.msk.bf16.mxu0 %vm1832_vm2, %v8226_v39  ;;  %v8227_v39 = vld [vmem:[%s10570_s0 + $0x4c8] sm:$0xff]   ;;  %v8228_v53 = vld [vmem:[%s10570_s0 + $0x4d0] sm:$0xff]   ;;  %v5142_v55 = vmax.f32 %v4454_v17, 0.0 }
 0x264   :  { %v9770_v29 = vpack.c.bf16 %v4884_v44, %v4883_v22  ;;  %7258 = vmatpush3.bf16.msra.mxu1 %v9645_v13  ;;  %v5141_v13 = vmax.f32 %v4451_v2, 0.0  ;;  %v9788_v51 = vpack.c.bf16 %v5144_v50, %v5143_v61 }
 0x265   :  { %v9776_v46 = vpack.c.bf16 %v4882_v49, %v4881_v18  ;;  %v7687_v12 = vpop.f32.mrb[196].mxu0  ;;  %v7947_v18 = vpop.f32.mrb[76].mxu1 }
 0x266   :  { %v3435_v32 = vadd.f32 %v9561_v11, %v7687_v12  ;;  %v3426_v58 = vpop.f32.mrb[197].mxu0  ;;  %10585 = vst [vmem:[#allocation13_spill] sm:$0xff] %v9788_v51  ;;  %v9791_v8 = vpack.c.bf16 %v5142_v55, %v5141_v13  ;;  %v4466_v34 = vpop.f32.mrb[77].mxu1 }
 0x267   :  { %v3427_v48 = vadd.f32 %v9561_v11, %v3426_v58  ;;  %v7688_v10 = vpop.f32.mrb[198].mxu0  ;;  %5887 = vmatmul.mubr.bf16.vlgmr.msra.gmra.mrb[152].mxu1 %v6844_v23  ;;  %v7948_v12 = vpop.f32.mrb[78].mxu1  ;;  %v4467_v61 = vadd.f32 %v9561_v11, %v4466_v34 }
 0x268   :  { %v3438_v22 = vadd.f32 %v9561_v11, %v7688_v10  ;;  %v3429_v44 = vpop.f32.mrb[199].mxu0  ;;  %5927 = vmatprep.mubr.bf16.mxu1 %v6847_v35  ;;  %10586 = vst [vmem:[#allocation14_spill] sm:$0xff] %v9791_v8  ;;  %v4887_v2 = vmax.f32 %v3435_v32, 0.0  ;;  %v4469_v17 = vpop.f32.mrb[79].mxu1  ;;  %v4475_v35 = vadd.f32 %v9561_v11, %v7947_v18  ;;  %v4478_v13 = vadd.f32 %v9561_v11, %v7948_v12 }
 0x269   :  { %v3430_v49 = vadd.f32 %v9561_v11, %v3429_v44  ;;  %v4885_v58 = vmax.f32 %v3427_v48, 0.0  ;;  %v4470_v55 = vadd.f32 %v9561_v11, %v4469_v17  ;;  %v5145_v44 = vmax.f32 %v4467_v61, 0.0  ;;  %v7951_v17 = vpop.f32.mrb[80].mxu1 }
 0x26a   :  { %v4888_v43 = vmax.f32 %v3438_v22, 0.0  ;;  %7794 = vmatmul.mubr.msk.bf16.gmra.mrb[48].mxu0 %vm1832_vm2, %v8227_v39  ;;  %v5147_v22 = vmax.f32 %v4475_v35, 0.0  ;;  %v4482_v35 = vpop.f32.mrb[81].mxu1 }
 0x26b   :  { %v4886_v23 = vmax.f32 %v3430_v49, 0.0  ;;  %7797 = vmatprep.mubr.msk.bf16.mxu0 %vm1832_vm2, %v8228_v53  ;;  %v8229_v53 = vld [vmem:[%s10570_s0 + $0x4d8] sm:$0xff]   ;;  %v5148_v49 = vmax.f32 %v4478_v13, 0.0 }
 0x26c   :  { %v9795_v10 = vpack.c.bf16 %v4888_v43, %v4887_v2  ;;  %v8230_v2 = vld [vmem:[%s10570_s0 + $0x4e0] sm:$0xff]   ;;  %v5146_v43 = vmax.f32 %v4470_v55, 0.0 }
 0x26d   :  { %v9800_v50 = vpack.c.bf16 %v4886_v23, %v4885_v58  ;;  %v7691_v32 = vpop.f32.mrb[200].mxu0  ;;  %v9812_v23 = vpack.c.bf16 %v5148_v49, %v5147_v22  ;;  %v4491_v22 = vadd.f32 %v9561_v11, %v7951_v17  ;;  %v4483_v49 = vadd.f32 %v9561_v11, %v4482_v35 }
 0x26e   :  { %v3451_v39 = vadd.f32 %v9561_v11, %v7691_v32  ;;  %v3442_v48 = vpop.f32.mrb[201].mxu0  ;;  %v9815_v51 = vpack.c.bf16 %v5146_v43, %v5145_v44 }
 0x26f   :  { %v3443_v18 = vadd.f32 %v9561_v11, %v3442_v48  ;;  %v7692_v34 = vpop.f32.mrb[202].mxu0  ;;  %10587 = vst [vmem:[#allocation15_spill] sm:$0xff] %v9812_v23  ;;  %v7952_v48 = vpop.f32.mrb[82].mxu1 }
 0x270   :  { %v3454_v12 = vadd.f32 %v9561_v11, %v7692_v34  ;;  %v3445_v58 = vpop.f32.mrb[203].mxu0  ;;  %10588 = vst [vmem:[#allocation16_spill] sm:$0xff] %v9815_v51  ;;  %v4891_v61 = vmax.f32 %v3451_v39, 0.0  ;;  %v4485_v55 = vpop.f32.mrb[83].mxu1  ;;  %v4494_v44 = vadd.f32 %v9561_v11, %v7952_v48 }
 0x271   :  { %v3446_v32 = vadd.f32 %v9561_v11, %v3445_v58  ;;  %v4889_v8 = vmax.f32 %v3443_v18, 0.0  ;;  %v5151_v58 = vmax.f32 %v4491_v22, 0.0 }
 0x272   :  { %v4892_v13 = vmax.f32 %v3454_v12, 0.0  ;;  %7798 = vmatmul.mubr.msk.bf16.gmra.mrb[52].mxu0 %vm1832_vm2, %v8229_v53  ;;  %v4486_v12 = vadd.f32 %v9561_v11, %v4485_v55 }
 0x273   :  { %v4890_v57 = vmax.f32 %v3446_v32, 0.0  ;;  %7801 = vmatprep.mubr.msk.bf16.mxu0 %vm1832_vm2, %v8230_v2  ;;  %v8231_v2 = vld [vmem:[%s10570_s0 + $0x4e8] sm:$0xff]   ;;  %v5149_v32 = vmax.f32 %v4483_v49, 0.0 }
 0x274   :  { %v9819_v34 = vpack.c.bf16 %v4892_v13, %v4891_v61  ;;  %v5152_v61 = vmax.f32 %v4494_v44, 0.0 }
 0x275   :  { %v9824_v43 = vpack.c.bf16 %v4890_v57, %v4889_v8  ;;  %v7695_v39 = vpop.f32.mrb[204].mxu0  ;;  %v8232_v57 = vld [vmem:[%s10570_s0 + $0x4f0] sm:$0xff]   ;;  %v5150_v8 = vmax.f32 %v4486_v12, 0.0 }
 0x276   :  { %v3467_v53 = vadd.f32 %v9561_v11, %v7695_v39  ;;  %v3458_v18 = vpop.f32.mrb[205].mxu0  ;;  %v9836_v55 = vpack.c.bf16 %v5152_v61, %v5151_v58  ;;  %v7955_v39 = vpop.f32.mrb[84].mxu1 }
 0x277   :  { %v3459_v17 = vadd.f32 %v9561_v11, %v3458_v18  ;;  %v7696_v35 = vpop.f32.mrb[206].mxu0  ;;  %v9839_v51 = vpack.c.bf16 %v5150_v8, %v5149_v32  ;;  %v4498_v22 = vpop.f32.mrb[85].mxu1  ;;  %v4507_v58 = vadd.f32 %v9561_v11, %v7955_v39 }
 0x278   :  { %v3470_v13 = vadd.f32 %v9561_v11, %v7696_v35  ;;  %v3461_v48 = vpop.f32.mrb[207].mxu0  ;;  %10589 = vst [vmem:[#allocation17_spill] sm:$0xff] %v9836_v55  ;;  %v4895_v49 = vmax.f32 %v3467_v53, 0.0  ;;  %v7956_v18 = vpop.f32.mrb[86].mxu1  ;;  %v4499_v61 = vadd.f32 %v9561_v11, %v4498_v22 }
 0x279   :  { %v3462_v23 = vadd.f32 %v9561_v11, %v3461_v48  ;;  %10590 = vst [vmem:[#allocation18_spill] sm:$0xff] %v9839_v51  ;;  %v4893_v45 = vmax.f32 %v3459_v17, 0.0  ;;  %v4501_v12 = vpop.f32.mrb[87].mxu1  ;;  %v4510_v32 = vadd.f32 %v9561_v11, %v7956_v18 }
 0x27a   :  { %v4896_v44 = vmax.f32 %v3470_v13, 0.0  ;;  %7802 = vmatmul.mubr.msk.bf16.gmra.mrb[56].mxu0 %vm1832_vm2, %v8231_v2  ;;  %v4502_v13 = vadd.f32 %v9561_v11, %v4501_v12  ;;  %v5153_v48 = vmax.f32 %v4499_v61, 0.0 }
 0x27b   :  { %v4894_v4 = vmax.f32 %v3462_v23, 0.0  ;;  %7805 = vmatprep.mubr.msk.bf16.mxu0 %vm1832_vm2, %v8232_v57  ;;  %v8233_v23 = vld [vmem:[%s10570_s0 + $0x4f8] sm:$0xff]   ;;  %v5155_v57 = vmax.f32 %v4507_v58, 0.0 }
 0x27c   :  { %v9843_v35 = vpack.c.bf16 %v4896_v44, %v4895_v49  ;;  %v5156_v49 = vmax.f32 %v4510_v32, 0.0 }
 0x27d   :  { %v9848_v8 = vpack.c.bf16 %v4894_v4, %v4893_v45  ;;  %v7699_v53 = vpop.f32.mrb[208].mxu0  ;;  %v8234_v4 = vld [vmem:[%s10570_s0 + $0x500] sm:$0xff]   ;;  %v5154_v45 = vmax.f32 %v4502_v13, 0.0 }
 0x27e   :  { %v3483_v2 = vadd.f32 %v9561_v11, %v7699_v53  ;;  %v3474_v17 = vpop.f32.mrb[209].mxu0  ;;  %v9860_v12 = vpack.c.bf16 %v5156_v49, %v5155_v57  ;;  %v7959_v53 = vpop.f32.mrb[88].mxu1 }
 0x27f   :  { %v3475_v39 = vadd.f32 %v9561_v11, %v3474_v17  ;;  %v7700_v22 = vpop.f32.mrb[210].mxu0  ;;  %v9863_v51 = vpack.c.bf16 %v5154_v45, %v5153_v48  ;;  %v4514_v58 = vpop.f32.mrb[89].mxu1  ;;  %v4523_v57 = vadd.f32 %v9561_v11, %v7959_v53 }
 0x280   :  { %v3486_v44 = vadd.f32 %v9561_v11, %v7700_v22  ;;  %v3477_v18 = vpop.f32.mrb[211].mxu0  ;;  %10591 = vst [vmem:[#allocation19_spill] sm:$0xff] %v9860_v12  ;;  %v4899_v61 = vmax.f32 %v3483_v2, 0.0  ;;  %v7960_v17 = vpop.f32.mrb[90].mxu1  ;;  %v4515_v49 = vadd.f32 %v9561_v11, %v4514_v58 }
 0x281   :  { %v3478_v55 = vadd.f32 %v9561_v11, %v3477_v18  ;;  %10592 = vst [vmem:[#allocation20_spill] sm:$0xff] %v9863_v51  ;;  %v4897_v7 = vmax.f32 %v3475_v39, 0.0  ;;  %v4517_v13 = vpop.f32.mrb[91].mxu1  ;;  %v4526_v18 = vadd.f32 %v9561_v11, %v7960_v17  ;;  %v5159_v39 = vmax.f32 %v4523_v57, 0.0 }
 0x282   :  { %v4900_v32 = vmax.f32 %v3486_v44, 0.0  ;;  %7806 = vmatmul.mubr.msk.bf16.gmra.mrb[60].mxu0 %vm1832_vm2, %v8233_v23  ;;  %v4518_v2 = vadd.f32 %v9561_v11, %v4517_v13 }
 0x283   :  { %v4898_v25 = vmax.f32 %v3478_v55, 0.0  ;;  %7809 = vmatprep.mubr.msk.bf16.mxu0 %vm1832_vm2, %v8234_v4  ;;  %v8235_v55 = vld [vmem:[%s10570_s0 + $0x508] sm:$0xff]   ;;  %v5157_v4 = vmax.f32 %v4515_v49, 0.0 }
 0x284   :  { %v5338_v22 = vpack.c.bf16 %v4900_v32, %v4899_v61  ;;  %v5160_v61 = vmax.f32 %v4526_v18, 0.0 }
 0x285   :  { %v5337_v48 = vpack.c.bf16 %v4898_v25, %v4897_v7  ;;  %v7703_v45 = vpop.f32.mrb[212].mxu0  ;;  %v8236_v25 = vld [vmem:[%s10570_s0 + $0x510] sm:$0xff]   ;;  %v5158_v7 = vmax.f32 %v4518_v2, 0.0 }
 0x286   :  { %v3499_v44 = vadd.f32 %v9561_v11, %v7703_v45  ;;  %v3490_v23 = vpop.f32.mrb[213].mxu0  ;;  %v9881_v13 = vpack.c.bf16 %v5160_v61, %v5159_v39  ;;  %v7963_v45 = vpop.f32.mrb[92].mxu1 }
 0x287   :  { %v3491_v53 = vadd.f32 %v9561_v11, %v3490_v23  ;;  %v7704_v32 = vpop.f32.mrb[214].mxu0  ;;  %7265 = vmatprep.subr.bf16.mxu1 %v5337_v48  ;;  %v9884_v49 = vpack.c.bf16 %v5158_v7, %v5157_v4  ;;  %v4530_v18 = vpop.f32.mrb[93].mxu1  ;;  %v4539_v39 = vadd.f32 %v9561_v11, %v7963_v45 }
 0x288   :  { %v3502_v58 = vadd.f32 %v9561_v11, %v7704_v32  ;;  %v3493_v17 = vpop.f32.mrb[215].mxu0  ;;  %7266 = vmatpush3.bf16.msra.mxu1 %v9776_v46  ;;  %10593 = vst [vmem:[#allocation21_spill] sm:$0xff] %v9881_v13  ;;  %v4903_v48 = vmax.f32 %v3499_v44, 0.0  ;;  %v7964_v12 = vpop.f32.mrb[94].mxu1 }
 0x289   :  { %v3494_v57 = vadd.f32 %v9561_v11, %v3493_v17  ;;  %7267 = vmatprep.subr.bf16.mxu1 %v5338_v22  ;;  %10594 = vst [vmem:[#allocation22_spill] sm:$0xff] %v9884_v49  ;;  %v4901_v2 = vmax.f32 %v3491_v53, 0.0  ;;  %v4533_v32 = vpop.f32.mrb[95].mxu1  ;;  %v4531_v22 = vadd.f32 %v9561_v11, %v4530_v18  ;;  %v4542_v4 = vadd.f32 %v9561_v11, %v7964_v12 }
 0x28a   :  { %v4904_v23 = vmax.f32 %v3502_v58, 0.0  ;;  %7810 = vmatmul.mubr.msk.bf16.gmra.mrb[64].mxu0 %vm1832_vm2, %v8235_v55  ;;  %v4534_v7 = vadd.f32 %v9561_v11, %v4533_v32  ;;  %v5163_v58 = vmax.f32 %v4539_v39, 0.0 }
 0x28b   :  { %v4902_v51 = vmax.f32 %v3494_v57, 0.0  ;;  %7813 = vmatprep.mubr.msk.bf16.mxu0 %vm1832_vm2, %v8236_v25  ;;  %v8237_v25 = vld [vmem:[%s10570_s0 + $0x518] sm:$0xff]   ;;  %v5161_v17 = vmax.f32 %v4531_v22, 0.0 }
 0x28c   :  { %v5340_v46 = vpack.c.bf16 %v4904_v23, %v4903_v48  ;;  %7268 = vmatpush3.bf16.msra.mxu1 %v9770_v29  ;;  %v5164_v29 = vmax.f32 %v4542_v4, 0.0  ;;  %v5162_v12 = vmax.f32 %v4534_v7, 0.0 }
 0x28d   :  { %v5339_v61 = vpack.c.bf16 %v4902_v51, %v4901_v2  ;;  %v7707_v44 = vpop.f32.mrb[216].mxu0  ;;  %v8238_v51 = vld [vmem:[%s10570_s0 + $0x520] sm:$0xff]   ;;  %v7967_v2 = vpop.f32.mrb[96].mxu1 }
 0x28e   :  { %v3515_v55 = vadd.f32 %v9561_v11, %v7707_v44  ;;  %v3506_v53 = vpop.f32.mrb[217].mxu0  ;;  %v9903_v23 = vpack.c.bf16 %v5164_v29, %v5163_v58  ;;  %v9906_v39 = vpack.c.bf16 %v5162_v12, %v5161_v17  ;;  %v4546_v22 = vpop.f32.mrb[97].mxu1  ;;  %v4555_v58 = vadd.f32 %v9561_v11, %v7967_v2 }
 0x28f   :  { %v3507_v45 = vadd.f32 %v9561_v11, %v3506_v53  ;;  %v7708_v57 = vpop.f32.mrb[218].mxu0  ;;  %7269 = vmatprep.subr.bf16.mxu1 %v5339_v61  ;;  %v7968_v44 = vpop.f32.mrb[98].mxu1 }
 0x290   :  { %v3518_v18 = vadd.f32 %v9561_v11, %v7708_v57  ;;  %v3509_v48 = vpop.f32.mrb[219].mxu0  ;;  %7270 = vmatpush3.bf16.msra.mxu1 %v9800_v50  ;;  %10595 = vst [vmem:[#allocation23_spill] sm:$0xff] %v9903_v23  ;;  %10596 = vst [vmem:[#allocation24_spill] sm:$0xff] %v9906_v39  ;;  %v4907_v4 = vmax.f32 %v3515_v55, 0.0  ;;  %v4549_v57 = vpop.f32.mrb[99].mxu1  ;;  %v4558_v17 = vadd.f32 %v9561_v11, %v7968_v44 }
 0x291   :  { %v3510_v32 = vadd.f32 %v9561_v11, %v3509_v48  ;;  %7271 = vmatprep.subr.bf16.mxu1 %v5340_v46  ;;  %v4905_v7 = vmax.f32 %v3507_v45, 0.0  ;;  %v4547_v46 = vadd.f32 %v9561_v11, %v4546_v22  ;;  %v4550_v12 = vadd.f32 %v9561_v11, %v4549_v57  ;;  %v8240_v22 = vld [vmem:[%s10570_s0 + $0x530] sm:$0xff]  }
 0x292   :  { %v4908_v61 = vmax.f32 %v3518_v18, 0.0  ;;  %7814 = vmatmul.mubr.msk.bf16.gmra.mrb[68].mxu0 %vm1832_vm2, %v8237_v25  ;;  %v5167_v18 = vmax.f32 %v4555_v58, 0.0 }
 0x293   :  { %v4906_v53 = vmax.f32 %v3510_v32, 0.0  ;;  %7817 = vmatprep.mubr.msk.bf16.mxu0 %vm1832_vm2, %v8238_v51  ;;  %v8239_v51 = vld [vmem:[%s10570_s0 + $0x528] sm:$0xff]   ;;  %v5165_v48 = vmax.f32 %v4547_v46, 0.0 }
 0x294   :  { %v5342_v50 = vpack.c.bf16 %v4908_v61, %v4907_v4  ;;  %7272 = vmatpush3.bf16.msra.mxu1 %v9795_v10  ;;  %v5168_v10 = vmax.f32 %v4558_v17, 0.0  ;;  %v5166_v4 = vmax.f32 %v4550_v12, 0.0  ;;  %v9926_v61 = vld [vmem:[%s10571_s2] ss:$0 sm:$0xff] }
 0x295   :  { %v5341_v29 = vpack.c.bf16 %v4906_v53, %v4905_v7  ;;  %v7711_v55 = vpop.f32.mrb[220].mxu0 }
 0x296   :  { %v3531_v25 = vadd.f32 %v9561_v11, %v7711_v55  ;;  %v3522_v45 = vpop.f32.mrb[221].mxu0  ;;  %v9930_v53 = vpack.c.bf16 %v5168_v10, %v5167_v18  ;;  %v9933_v58 = vpack.c.bf16 %v5166_v4, %v5165_v48 }
 0x297   :  { %v3523_v2 = vadd.f32 %v9561_v11, %v3522_v45  ;;  %v7712_v32 = vpop.f32.mrb[222].mxu0  ;;  %7273 = vmatprep.subr.bf16.mxu1 %v5341_v29  ;;  %v7971_v11 = vpop.f32.mrb[100].mxu1 }
 0x298   :  { %v3534_v44 = vadd.f32 %v9926_v61, %v7712_v32  ;;  %v3525_v7 = vpop.f32.mrb[223].mxu0  ;;  %7274 = vmatpush3.bf16.msra.mxu1 %v9824_v43  ;;  %10597 = vst [vmem:[#allocation25_spill] sm:$0xff] %v9930_v53  ;;  %10598 = vst [vmem:[#allocation26_spill] sm:$0xff] %v9933_v58  ;;  %v4562_v46 = vpop.f32.mrb[101].mxu1  ;;  %v4911_v17 = vmax.f32 %v3531_v25, 0.0  ;;  %v4571_v18 = vadd.f32 %v9926_v61, %v7971_v11 }
 0x299   :  { %v3526_v57 = vadd.f32 %v9926_v61, %v3525_v7  ;;  %7275 = vmatprep.subr.bf16.mxu1 %v5342_v50  ;;  %v7972_v55 = vpop.f32.mrb[102].mxu1  ;;  %v4909_v12 = vmax.f32 %v3523_v2, 0.0  ;;  %v4563_v50 = vadd.f32 %v9926_v61, %v4562_v46  ;;  %v8242_v46 = vld [vmem:[%s10570_s0 + $0x540] sm:$0xff]   ;;  %v6846_v53 = vcombine.low %v9752_v42, %v9757_v19 }
 0x29a   :  { %v4912_v29 = vmax.f32 %v3534_v44, 0.0  ;;  %7818 = vmatmul.mubr.msk.bf16.gmra.mrb[72].mxu0 %vm1832_vm2, %v8239_v51  ;;  %v4565_v32 = vpop.f32.mrb[103].mxu1  ;;  %v4574_v48 = vadd.f32 %v9926_v61, %v7972_v55  ;;  %v5171_v44 = vmax.f32 %v4571_v18, 0.0 }
 0x29b   :  { %v4910_v45 = vmax.f32 %v3526_v57, 0.0  ;;  %7821 = vmatprep.mubr.msk.bf16.mxu0 %vm1832_vm2, %v8240_v22  ;;  %v4566_v4 = vadd.f32 %v9926_v61, %v4565_v32  ;;  %v8241_v22 = vld [vmem:[%s10570_s0 + $0x538] sm:$0xff]   ;;  %v5169_v7 = vmax.f32 %v4563_v50, 0.0  ;;  %v7975_v18 = vpop.f32.mrb[104].mxu1 }
 0x29c   :  { %v5344_v43 = vpack.c.bf16 %v4912_v29, %v4911_v17  ;;  %7276 = vmatpush3.bf16.msra.mxu1 %v9819_v34  ;;  %v5172_v34 = vmax.f32 %v4574_v48, 0.0 }
 0x29d   :  { %v5343_v10 = vpack.c.bf16 %v4910_v45, %v4909_v12  ;;  %v7715_v25 = vpop.f32.mrb[224].mxu0  ;;  %v5170_v17 = vmax.f32 %v4566_v4, 0.0  ;;  %v9955_v12 = vld [vmem:[%s10572_s3 + $0x38] sm:$0xff] }
 0x29e   :  { %v3547_v51 = vadd.f32 %v9926_v61, %v7715_v25  ;;  %v3538_v2 = vpop.f32.mrb[225].mxu0  ;;  %v9960_v45 = vld [vmem:[%s10572_s3 + $0xb8] sm:$0xff]  ;;  %v9962_v32 = vpack.c.bf16 %v5172_v34, %v5171_v44 }
 0x29f   :  { %v3539_v11 = vadd.f32 %v9926_v61, %v3538_v2  ;;  %v7716_v57 = vpop.f32.mrb[226].mxu0  ;;  %7277 = vmatprep.subr.bf16.mxu1 %v5343_v10  ;;  %v9965_v48 = vpack.c.bf16 %v5170_v17, %v5169_v7  ;;  %v4578_v10 = vpop.f32.mrb[105].mxu1  ;;  %v6849_v44 = vcombine.high %v9955_v12, %v9960_v45 }
 0x2a0   :  { %v3550_v29 = vadd.f32 %v9926_v61, %v7716_v57  ;;  %v3541_v55 = vpop.f32.mrb[227].mxu0  ;;  %7278 = vmatpush3.bf16.msra.mxu1 %v9848_v8  ;;  %10599 = vst [vmem:[#allocation27_spill] sm:$0xff] %v9962_v32  ;;  %v4915_v8 = vmax.f32 %v3547_v51, 0.0  ;;  %v7976_v4 = vpop.f32.mrb[106].mxu1  ;;  %v4587_v51 = vadd.f32 %v9926_v61, %v7975_v18 }
 0x2a1   :  { %v3542_v50 = vadd.f32 %v9926_v61, %v3541_v55  ;;  %7279 = vmatprep.subr.bf16.mxu1 %v5344_v43  ;;  %10600 = vst [vmem:[#allocation28_spill] sm:$0xff] %v9965_v48  ;;  %v4913_v2 = vmax.f32 %v3539_v11, 0.0  ;;  %v4581_v34 = vpop.f32.mrb[107].mxu1  ;;  %v4590_v7 = vadd.f32 %v9926_v61, %v7976_v4 }
 0x2a2   :  { %v4916_v25 = vmax.f32 %v3550_v29, 0.0  ;;  %7822 = vmatmul.mubr.msk.bf16.gmra.mrb[76].mxu0 %vm1832_vm2, %v8241_v22  ;;  %v4579_v22 = vadd.f32 %v9926_v61, %v4578_v10  ;;  %v4582_v42 = vadd.f32 %v9926_v61, %v4581_v34  ;;  %v8243_v29 = vld [vmem:[%s10570_s0 + $0x548] sm:$0xff]   ;;  %v5175_v55 = vmax.f32 %v4587_v51, 0.0  ;;  %v7979_v34 = vpop.f32.mrb[108].mxu1 }
 0x2a3   :  { %v4914_v57 = vmax.f32 %v3542_v50, 0.0  ;;  %7825 = vmatprep.mubr.msk.bf16.mxu0 %vm1832_vm2, %v8242_v46  ;;  %v5176_v50 = vmax.f32 %v4590_v7, 0.0  ;;  %v4594_v7 = vpop.f32.mrb[109].mxu1 }
 0x2a4   :  { %v9973_v43 = vpack.c.bf16 %v4916_v25, %v4915_v8  ;;  %7280 = vmatpush3.bf16.msra.mxu1 %v9843_v35  ;;  %v5173_v35 = vmax.f32 %v4579_v22, 0.0  ;;  %v8244_v8 = vld [vmem:[%s10570_s0 + $0x550] sm:$0xff]   ;;  %v5174_v25 = vmax.f32 %v4582_v42, 0.0 }
 0x2a5   :  { %v9979_v11 = vpack.c.bf16 %v4914_v57, %v4913_v2  ;;  %v7719_v17 = vpop.f32.mrb[228].mxu0  ;;  %v9991_v57 = vpack.c.bf16 %v5176_v50, %v5175_v55  ;;  %v4595_v55 = vadd.f32 %v9926_v61, %v4594_v7 }
 0x2a6   :  { %v3563_v19 = vadd.f32 %v9926_v61, %v7719_v17  ;;  %v3554_v46 = vpop.f32.mrb[229].mxu0  ;;  %v9994_v22 = vpack.c.bf16 %v5174_v25, %v5173_v35 }
 0x2a7   :  { %v3555_v18 = vadd.f32 %v9926_v61, %v3554_v46  ;;  %v7720_v10 = vpop.f32.mrb[230].mxu0  ;;  %5928 = vmatmul.mubr.bf16.vlgmr.msra.gmra.mrb[156].mxu1 %v6846_v53  ;;  %10601 = vst [vmem:[#allocation29_spill] sm:$0xff] %v9991_v57  ;;  %v7980_v53 = vpop.f32.mrb[110].mxu1 }
 0x2a8   :  { %v3566_v4 = vadd.f32 %v9926_v61, %v7720_v10  ;;  %v3557_v2 = vpop.f32.mrb[231].mxu0  ;;  %5968 = vmatprep.mubr.bf16.mxu1 %v6849_v44  ;;  %10602 = vst [vmem:[#allocation30_spill] sm:$0xff] %v9994_v22  ;;  %v4919_v17 = vmax.f32 %v3563_v19, 0.0  ;;  %v4597_v42 = vpop.f32.mrb[111].mxu1  ;;  %v4603_v44 = vadd.f32 %v9926_v61, %v7979_v34  ;;  %v4606_v35 = vadd.f32 %v9926_v61, %v7980_v53 }
 0x2a9   :  { %v3558_v51 = vadd.f32 %v9926_v61, %v3557_v2  ;;  %v4917_v32 = vmax.f32 %v3555_v18, 0.0  ;;  %v4598_v25 = vadd.f32 %v9926_v61, %v4597_v42  ;;  %v5177_v2 = vmax.f32 %v4595_v55, 0.0  ;;  %v7983_v42 = vpop.f32.mrb[112].mxu1 }
 0x2aa   :  { %v4920_v46 = vmax.f32 %v3566_v4, 0.0  ;;  %7826 = vmatmul.mubr.msk.bf16.gmra.mrb[80].mxu0 %vm1832_vm2, %v8243_v29  ;;  %v5179_v4 = vmax.f32 %v4603_v44, 0.0  ;;  %v4610_v44 = vpop.f32.mrb[113].mxu1 }
 0x2ab   :  { %v4918_v48 = vmax.f32 %v3558_v51, 0.0  ;;  %7829 = vmatprep.mubr.msk.bf16.mxu0 %vm1832_vm2, %v8244_v8  ;;  %v8245_v8 = vld [vmem:[%s10570_s0 + $0x558] sm:$0xff]   ;;  %v5180_v51 = vmax.f32 %v4606_v35, 0.0 }
 0x2ac   :  { %v9998_v10 = vpack.c.bf16 %v4920_v46, %v4919_v17 }
 0x2ad   :  { %v10003_v50 = vpack.c.bf16 %v4918_v48, %v4917_v32  ;;  %v7723_v19 = vpop.f32.mrb[232].mxu0  ;;  %v8246_v32 = vld [vmem:[%s10570_s0 + $0x560] sm:$0xff]   ;;  %v5178_v48 = vmax.f32 %v4598_v25, 0.0  ;;  %v10015_v53 = vpack.c.bf16 %v5180_v51, %v5179_v4  ;;  %v4619_v4 = vadd.f32 %v9926_v61, %v7983_v42 }
 0x2ae   :  { %v3579_v29 = vadd.f32 %v9926_v61, %v7723_v19  ;;  %v3570_v18 = vpop.f32.mrb[233].mxu0  ;;  %v4611_v51 = vadd.f32 %v9926_v61, %v4610_v44 }
 0x2af   :  { %v3571_v34 = vadd.f32 %v9926_v61, %v3570_v18  ;;  %v7724_v7 = vpop.f32.mrb[234].mxu0  ;;  %10603 = vst [vmem:[#allocation31_spill] sm:$0xff] %v10015_v53  ;;  %v10018_v57 = vpack.c.bf16 %v5178_v48, %v5177_v2  ;;  %v7984_v18 = vpop.f32.mrb[114].mxu1 }
 0x2b0   :  { %v3582_v17 = vadd.f32 %v9926_v61, %v7724_v7  ;;  %v3573_v46 = vpop.f32.mrb[235].mxu0  ;;  %v4923_v55 = vmax.f32 %v3579_v29, 0.0  ;;  %v4613_v25 = vpop.f32.mrb[115].mxu1  ;;  %v4622_v2 = vadd.f32 %v9926_v61, %v7984_v18 }
 0x2b1   :  { %v3574_v19 = vadd.f32 %v9926_v61, %v3573_v46  ;;  %10604 = vst [vmem:[#allocation32_spill] sm:$0xff] %v10018_v57  ;;  %v4921_v22 = vmax.f32 %v3571_v34, 0.0  ;;  %v5183_v46 = vmax.f32 %v4619_v4, 0.0 }
 0x2b2   :  { %v4924_v35 = vmax.f32 %v3582_v17, 0.0  ;;  %7830 = vmatmul.mubr.msk.bf16.gmra.mrb[84].mxu0 %vm1832_vm2, %v8245_v8  ;;  %v4614_v17 = vadd.f32 %v9926_v61, %v4613_v25 }
 0x2b3   :  { %v4922_v58 = vmax.f32 %v3574_v19, 0.0  ;;  %7833 = vmatprep.mubr.msk.bf16.mxu0 %vm1832_vm2, %v8246_v32  ;;  %v8247_v32 = vld [vmem:[%s10570_s0 + $0x568] sm:$0xff]   ;;  %v5181_v19 = vmax.f32 %v4611_v51, 0.0 }
 0x2b4   :  { %v10022_v7 = vpack.c.bf16 %v4924_v35, %v4923_v55  ;;  %v5184_v55 = vmax.f32 %v4622_v2, 0.0 }
 0x2b5   :  { %v10027_v48 = vpack.c.bf16 %v4922_v58, %v4921_v22  ;;  %v7727_v29 = vpop.f32.mrb[236].mxu0  ;;  %v8248_v58 = vld [vmem:[%s10570_s0 + $0x570] sm:$0xff]   ;;  %v5182_v22 = vmax.f32 %v4614_v17, 0.0 }
 0x2b6   :  { %v3595_v8 = vadd.f32 %v9926_v61, %v7727_v29  ;;  %v3586_v34 = vpop.f32.mrb[237].mxu0  ;;  %v10039_v25 = vpack.c.bf16 %v5184_v55, %v5183_v46  ;;  %v7987_v29 = vpop.f32.mrb[116].mxu1 }
 0x2b7   :  { %v3587_v42 = vadd.f32 %v9926_v61, %v3586_v34  ;;  %v7728_v44 = vpop.f32.mrb[238].mxu0  ;;  %v10042_v57 = vpack.c.bf16 %v5182_v22, %v5181_v19  ;;  %v4626_v4 = vpop.f32.mrb[117].mxu1  ;;  %v4635_v46 = vadd.f32 %v9926_v61, %v7987_v29 }
 0x2b8   :  { %v3598_v35 = vadd.f32 %v9926_v61, %v7728_v44  ;;  %v3589_v18 = vpop.f32.mrb[239].mxu0  ;;  %10605 = vst [vmem:[#allocation33_spill] sm:$0xff] %v10039_v25  ;;  %v4927_v51 = vmax.f32 %v3595_v8, 0.0  ;;  %v7988_v34 = vpop.f32.mrb[118].mxu1  ;;  %v4627_v55 = vadd.f32 %v9926_v61, %v4626_v4 }
 0x2b9   :  { %v3590_v53 = vadd.f32 %v9926_v61, %v3589_v18  ;;  %10606 = vst [vmem:[#allocation34_spill] sm:$0xff] %v10042_v57  ;;  %v4925_v23 = vmax.f32 %v3587_v42, 0.0  ;;  %v4629_v17 = vpop.f32.mrb[119].mxu1  ;;  %v4638_v19 = vadd.f32 %v9926_v61, %v7988_v34 }
 0x2ba   :  { %v4928_v2 = vmax.f32 %v3598_v35, 0.0  ;;  %7834 = vmatmul.mubr.msk.bf16.gmra.mrb[88].mxu0 %vm1832_vm2, %v8247_v32  ;;  %v4630_v35 = vadd.f32 %v9926_v61, %v4629_v17  ;;  %v5185_v18 = vmax.f32 %v4627_v55, 0.0 }
 0x2bb   :  { %v4926_v39 = vmax.f32 %v3590_v53, 0.0  ;;  %7837 = vmatprep.mubr.msk.bf16.mxu0 %vm1832_vm2, %v8248_v58  ;;  %v8249_v53 = vld [vmem:[%s10570_s0 + $0x578] sm:$0xff]   ;;  %v5187_v58 = vmax.f32 %v4635_v46, 0.0 }
 0x2bc   :  { %v10046_v44 = vpack.c.bf16 %v4928_v2, %v4927_v51  ;;  %v5188_v51 = vmax.f32 %v4638_v19, 0.0 }
 0x2bd   :  { %v10051_v22 = vpack.c.bf16 %v4926_v39, %v4925_v23  ;;  %v7731_v8 = vpop.f32.mrb[240].mxu0  ;;  %v8250_v23 = vld [vmem:[%s10570_s0 + $0x580] sm:$0xff]   ;;  %v5186_v39 = vmax.f32 %v4630_v35, 0.0 }
 0x2be   :  { %v3611_v32 = vadd.f32 %v9926_v61, %v7731_v8  ;;  %v3602_v42 = vpop.f32.mrb[241].mxu0  ;;  %v10063_v17 = vpack.c.bf16 %v5188_v51, %v5187_v58  ;;  %v7991_v8 = vpop.f32.mrb[120].mxu1 }
 0x2bf   :  { %v3603_v29 = vadd.f32 %v9926_v61, %v3602_v42  ;;  %v7732_v4 = vpop.f32.mrb[242].mxu0  ;;  %v10066_v57 = vpack.c.bf16 %v5186_v39, %v5185_v18  ;;  %v4642_v46 = vpop.f32.mrb[121].mxu1  ;;  %v4651_v58 = vadd.f32 %v9926_v61, %v7991_v8 }
 0x2c0   :  { %v3614_v2 = vadd.f32 %v9926_v61, %v7732_v4  ;;  %v3605_v34 = vpop.f32.mrb[243].mxu0  ;;  %10607 = vst [vmem:[#allocation35_spill] sm:$0xff] %v10063_v17  ;;  %v4931_v55 = vmax.f32 %v3611_v32, 0.0  ;;  %v7992_v42 = vpop.f32.mrb[122].mxu1  ;;  %v4643_v51 = vadd.f32 %v9926_v61, %v4642_v46 }
 0x2c1   :  { %v3606_v25 = vadd.f32 %v9926_v61, %v3605_v34  ;;  %10608 = vst [vmem:[#allocation36_spill] sm:$0xff] %v10066_v57  ;;  %v4929_v13 = vmax.f32 %v3603_v29, 0.0  ;;  %v4645_v35 = vpop.f32.mrb[123].mxu1  ;;  %v4654_v34 = vadd.f32 %v9926_v61, %v7992_v42  ;;  %v5191_v8 = vmax.f32 %v4651_v58, 0.0 }
 0x2c2   :  { %v4932_v19 = vmax.f32 %v3614_v2, 0.0  ;;  %7838 = vmatmul.mubr.msk.bf16.gmra.mrb[92].mxu0 %vm1832_vm2, %v8249_v53  ;;  %v7995_v18 = vpop.f32.mrb[124].mxu1  ;;  %v4646_v32 = vadd.f32 %v9926_v61, %v4645_v35 }
 0x2c3   :  { %v4930_v49 = vmax.f32 %v3606_v25, 0.0  ;;  %7841 = vmatprep.mubr.msk.bf16.mxu0 %vm1832_vm2, %v8250_v23  ;;  %v4667_v53 = vadd.f32 %v9926_v61, %v7995_v18  ;;  %v4658_v2 = vpop.f32.mrb[125].mxu1  ;;  %v8251_v23 = vld [vmem:[%s10570_s0 + $0x588] sm:$0xff]   ;;  %v5192_v46 = vmax.f32 %v4654_v34, 0.0 }
 0x2c4   :  { %v5354_v4 = vpack.c.bf16 %v4932_v19, %v4931_v55  ;;  %v5189_v55 = vmax.f32 %v4643_v51, 0.0  ;;  %v7996_v19 = vpop.f32.mrb[126].mxu1  ;;  %v5190_v35 = vmax.f32 %v4646_v32, 0.0  ;;  %v4659_v58 = vadd.f32 %v9926_v61, %v4658_v2 }
 0x2c5   :  { %v5353_v39 = vpack.c.bf16 %v4930_v49, %v4929_v13  ;;  %v7735_v17 = vpop.f32.mrb[244].mxu0  ;;  %v8252_v49 = vld [vmem:[%s10570_s0 + $0x590] sm:$0xff]   ;;  %v4661_v18 = vpop.f32.mrb[127].mxu1  ;;  %v10085_v14 = vpack.c.bf16 %v5192_v46, %v5191_v8  ;;  %v4670_v3 = vadd.f32 %v9926_v61, %v7996_v19 }
 0x2c6   :  { %v3627_v25 = vadd.f32 %v9926_v61, %v7735_v17  ;;  %v3618_v29 = vpop.f32.mrb[245].mxu0  ;;  %v7999_v51 = vpop.f32.mrb[128].mxu1 }
 0x2c7   :  { %v3619_v42 = vadd.f32 %v9926_v61, %v3618_v29  ;;  %v7736_v13 = vpop.f32.mrb[246].mxu0  ;;  %7287 = vmatprep.subr.bf16.mxu1 %v5353_v39  ;;  %10609 = vst [vmem:[#allocation37_spill] sm:$0xff] %v10085_v14  ;;  %v10089_v39 = vpack.c.bf16 %v5190_v35, %v5189_v55  ;;  %v5195_v29 = vmax.f32 %v4667_v53, 0.0  ;;  %v4674_v32 = vpop.f32.mrb[129].mxu1  ;;  %v5196_v2 = vmax.f32 %v4670_v3, 0.0 }
 0x2c8   :  { %v3630_v17 = vadd.f32 %v9926_v61, %v7736_v13  ;;  %v3621_v57 = vpop.f32.mrb[247].mxu0  ;;  %7288 = vmatpush3.bf16.msra.mxu1 %v9979_v11  ;;  %v4935_v16 = vmax.f32 %v3627_v25, 0.0  ;;  %v8000_v13 = vpop.f32.mrb[130].mxu1 }
 0x2c9   :  { %v3622_v34 = vadd.f32 %v9926_v61, %v3621_v57  ;;  %7289 = vmatprep.subr.bf16.mxu1 %v5354_v4  ;;  %10610 = vst [vmem:[#allocation38_spill] sm:$0xff] %v10089_v39  ;;  %v4933_v11 = vmax.f32 %v3619_v42, 0.0  ;;  %v4677_v46 = vpop.f32.mrb[131].mxu1  ;;  %v5193_v57 = vmax.f32 %v4659_v58, 0.0  ;;  %v4662_v4 = vadd.f32 %v9926_v61, %v4661_v18 }
 0x2ca   :  { %v4936_v21 = vmax.f32 %v3630_v17, 0.0  ;;  %7842 = vmatmul.mubr.msk.bf16.gmra.mrb[96].mxu0 %vm1832_vm2, %v8251_v23  ;;  %v7149_v53 = vpop.f32.mrb[132].mxu1  ;;  %v10096_v25 = vpack.c.bf16 %v5196_v2, %v5195_v29  ;;  %v4683_v23 = vadd.f32 %v9926_v61, %v7999_v51  ;;  %v4675_v42 = vadd.f32 %v9926_v61, %v4674_v32  ;;  %v8254_v51 = vld [vmem:[%s10570_s0 + $0x5a0] sm:$0xff]  }
 0x2cb   :  { %v4934_v8 = vmax.f32 %v3622_v34, 0.0  ;;  %7845 = vmatprep.mubr.msk.bf16.mxu0 %vm1832_vm2, %v8252_v49  ;;  %v7150_v35 = vpop.f32.mrb[133].mxu1  ;;  %v4678_v18 = vadd.f32 %v9926_v61, %v4677_v46 }
 0x2cc   :  { %v5356_v14 = vpack.c.bf16 %v4936_v21, %v4935_v16  ;;  %7290 = vmatpush3.bf16.msra.mxu1 %v9973_v43  ;;  %10611 = vst [vmem:[#allocation39_spill] sm:$0xff] %v10096_v25  ;;  %v8253_v21 = vld [vmem:[%s10570_s0 + $0x598] sm:$0xff]   ;;  %v5194_v16 = vmax.f32 %v4662_v4, 0.0  ;;  %v4686_v43 = vadd.f32 %v9926_v61, %v8000_v13  ;;  %v7152_v17 = vpop.f32.mrb[134].mxu1  ;;  %v5199_v29 = vmax.f32 %v4683_v23, 0.0 }
 0x2cd   :  { %v5355_v55 = vpack.c.bf16 %v4934_v8, %v4933_v11  ;;  %v7739_v19 = vpop.f32.mrb[248].mxu0  ;;  %v5197_v32 = vmax.f32 %v4675_v42, 0.0  ;;  %v7153_v11 = vpop.f32.mrb[135].mxu1 }
 0x2ce   :  { %v3643_v49 = vadd.f32 %v9926_v61, %v7739_v19  ;;  %v3634_v3 = vpop.f32.mrb[249].mxu0  ;;  %v10112_v13 = vpack.c.bf16 %v5194_v16, %v5193_v57  ;;  %v5200_v46 = vmax.f32 %v4686_v43, 0.0  ;;  %v7171_v4 = vpop.f32.mrb[136].mxu1 }
 0x2cf   :  { %v3635_v58 = vadd.f32 %v9926_v61, %v3634_v3  ;;  %v7740_v34 = vpop.f32.mrb[250].mxu0  ;;  %7291 = vmatprep.subr.bf16.mxu1 %v5355_v55  ;;  %v5198_v55 = vmax.f32 %v4678_v18, 0.0  ;;  %v7151_v3 = vadd.f32 %v7150_v35, %v7149_v53  ;;  %v7172_v25 = vpop.f32.mrb[137].mxu1 }
 0x2d0   :  { %v3646_v8 = vadd.f32 %v9926_v61, %v7740_v34  ;;  %v3637_v2 = vpop.f32.mrb[251].mxu0  ;;  %7292 = vmatpush3.bf16.msra.mxu1 %v10003_v50  ;;  %v4939_v39 = vmax.f32 %v3643_v49, 0.0  ;;  %v10116_v23 = vpack.c.bf16 %v5200_v46, %v5199_v29  ;;  %v7174_v42 = vpop.f32.mrb[138].mxu1  ;;  %v7173_v43 = vadd.f32 %v7172_v25, %v7171_v4 }
 0x2d1   :  { %v3638_v19 = vadd.f32 %v9926_v61, %v3637_v2  ;;  %7293 = vmatprep.subr.bf16.mxu1 %v5356_v14  ;;  %v4937_v34 = vmax.f32 %v3635_v58, 0.0  ;;  %v10119_v50 = vpack.c.bf16 %v5198_v55, %v5197_v32  ;;  %v7175_v57 = vpop.f32.mrb[139].mxu1  ;;  %v7154_v14 = vadd.f32 %v7153_v11, %v7152_v17  ;;  %v8255_v58 = vld [vmem:[%s10570_s0 + $0x5a8] sm:$0xff]  }
 0x2d2   :  { %v4940_v59 = vmax.f32 %v3646_v8, 0.0  ;;  %7846 = vmatmul.mubr.msk.bf16.gmra.mrb[100].mxu0 %vm1832_vm2, %v8253_v21  ;;  %v7193_v53 = vpop.f32.mrb[140].mxu1  ;;  %v7176_v18 = vadd.f32 %v7175_v57, %v7174_v42 }
 0x2d3   :  { %v4938_v15 = vmax.f32 %v3638_v19, 0.0  ;;  %7849 = vmatprep.mubr.msk.bf16.mxu0 %vm1832_vm2, %v8254_v51  ;;  %v7194_v21 = vpop.f32.mrb[141].mxu1 }
 0x2d4   :  { %v5358_v16 = vpack.c.bf16 %v4940_v59, %v4939_v39  ;;  %7294 = vmatpush3.bf16.msra.mxu1 %v9998_v10  ;;  %v7196_v51 = vpop.f32.mrb[142].mxu1  ;;  %v5725_v10 = vadd.f32 %v7173_v43, %v7151_v3  ;;  %v5728_v39 = vadd.f32 %v7176_v18, %v7154_v14  ;;  %v7195_v2 = vadd.f32 %v7194_v21, %v7193_v53 }
 0x2d5   :  { %v5357_v35 = vpack.c.bf16 %v4938_v15, %v4937_v34  ;;  %v7743_v49 = vpop.f32.mrb[252].mxu0  ;;  %v8256_v15 = vld [vmem:[%s10570_s0 + $0x5b0] sm:$0xff]   ;;  %v7197_v25 = vpop.f32.mrb[143].mxu1 }
 0x2d6   :  { %v3659_v29 = vadd.f32 %v9926_v61, %v7743_v49  ;;  %v3650_v8 = vpop.f32.mrb[253].mxu0  ;;  %v7215_v46 = vpop.f32.mrb[144].mxu1  ;;  %v5766_v34 = vadd.f32 %v7195_v2, %v5725_v10 }
 0x2d7   :  { %v3651_v32 = vadd.f32 %v9926_v61, %v3650_v8  ;;  %v7744_v59 = vpop.f32.mrb[254].mxu0  ;;  %7295 = vmatprep.subr.bf16.mxu1 %v5357_v35  ;;  %v7216_v19 = vpop.f32.mrb[145].mxu1  ;;  %v8257_v8 = vld [vmem:[%s10570_s0 + $0x5b8] sm:$0xff]  }
 0x2d8   :  { %v3662_v17 = vadd.f32 %v9926_v61, %v7744_v59  ;;  %v3653_v11 = vpop.f32.mrb[255].mxu0  ;;  %7296 = vmatpush3.bf16.msra.mxu1 %v10027_v48  ;;  %v4943_v55 = vmax.f32 %v3659_v29, 0.0  ;;  %v7218_v57 = vpop.f32.mrb[146].mxu1  ;;  %v7198_v48 = vadd.f32 %v7197_v25, %v7196_v51  ;;  %v7217_v18 = vadd.f32 %v7216_v19, %v7215_v46 }
 0x2d9   :  { %v3654_v4 = vadd.f32 %v9926_v61, %v3653_v11  ;;  %7297 = vmatprep.subr.bf16.mxu1 %v5358_v16  ;;  %v4941_v3 = vmax.f32 %v3651_v32, 0.0  ;;  %v7219_v35 = vpop.f32.mrb[147].mxu1  ;;  %v10159_v11 = vld [vmem:[%s10572_s3 + $0xc0] sm:$0xff]  ;;  %v6848_v19 = vcombine.low %v9955_v12, %v9960_v45 }
 0x2da   :  { %v4944_v42 = vmax.f32 %v3662_v17, 0.0  ;;  %7850 = vmatmul.mubr.msk.bf16.gmra.mrb[104].mxu0 %vm1832_vm2, %v8255_v58  ;;  %v7220_v16 = vadd.f32 %v7219_v35, %v7218_v57  ;;  %v5769_v58 = vadd.f32 %v7198_v48, %v5728_v39  ;;  %v10144_v51 = vadd.f32 %v7217_v18, %v5766_v34  ;;  %v10154_v39 = vld [vmem:[%s10572_s3 + $0x40] sm:$0xff]  ;;  %v8259_v35 = vld [vmem:[%s10570_s0 + $0x5c8] sm:$0xff]  }
 0x2db   :  { %v4942_v14 = vmax.f32 %v3654_v4, 0.0  ;;  %7853 = vmatprep.mubr.msk.bf16.mxu0 %vm1832_vm2, %v8256_v15 }
 0x2dc   :  { %v5360_v49 = vpack.c.bf16 %v4944_v42, %v4943_v55  ;;  %7298 = vmatpush3.bf16.msra.mxu1 %v10022_v7  ;;  %v8258_v7 = vld [vmem:[%s10570_s0 + $0x5c0] sm:$0xff]   ;;  %v10148_v25 = vadd.f32 %v7220_v16, %v5769_v58  ;;  %v6851_v42 = vcombine.high %v10154_v39, %v10159_v11 }
 0x2dd   :  { %v5359_v53 = vpack.c.bf16 %v4942_v14, %v4941_v3  ;;  %v7747_v43 = vpop.f32.mrb[0].mxu0 }
 0x2de   :  { %v3675_v21 = vadd.f32 %v9926_v61, %v7747_v43  ;;  %v3666_v29 = vpop.f32.mrb[1].mxu0 }
 0x2df   :  { %v3667_v32 = vadd.f32 %v9926_v61, %v3666_v29  ;;  %v7748_v59 = vpop.f32.mrb[2].mxu0  ;;  %7299 = vmatprep.subr.bf16.mxu1 %v5359_v53 }
 0x2e0   :  { %v3678_v15 = vadd.f32 %v9926_v61, %v7748_v59  ;;  %v3669_v10 = vpop.f32.mrb[3].mxu0  ;;  %7300 = vmatpush3.bf16.msra.mxu1 %v10051_v22  ;;  %v4947_v2 = vmax.f32 %v3675_v21, 0.0 }
 0x2e1   :  { %v3670_v17 = vadd.f32 %v9926_v61, %v3669_v10  ;;  %7301 = vmatprep.subr.bf16.mxu1 %v5360_v49  ;;  %v4945_v22 = vmax.f32 %v3667_v32, 0.0 }
 0x2e2   :  { %v4948_v46 = vmax.f32 %v3678_v15, 0.0  ;;  %7854 = vmatmul.mubr.msk.bf16.gmra.mrb[108].mxu0 %vm1832_vm2, %v8257_v8 }
 0x2e3   :  { %v4946_v4 = vmax.f32 %v3670_v17, 0.0  ;;  %7857 = vmatprep.mubr.msk.bf16.mxu0 %vm1832_vm2, %v8258_v7  ;;  %v8261_v7 = vld [vmem:[%s10570_s0 + $0x5d8] sm:$0xff]   ;;  %v8262_v17 = vld [vmem:[%s10570_s0 + $0x5e0] sm:$0xff]  }
 0x2e4   :  { %v10165_v55 = vpack.c.bf16 %v4948_v46, %v4947_v2  ;;  %7302 = vmatpush3.bf16.msra.mxu1 %v10046_v44  ;;  %v8260_v44 = vld [vmem:[%s10570_s0 + $0x5d0] sm:$0xff]  }
 0x2e5   :  { %v10170_v34 = vpack.c.bf16 %v4946_v4, %v4945_v22  ;;  %v7751_v57 = vpop.f32.mrb[4].mxu0 }
 0x2e6   :  { %v3691_v3 = vadd.f32 %v9926_v61, %v7751_v57  ;;  %v3682_v14 = vpop.f32.mrb[5].mxu0 }
 0x2e7   :  { %v3683_v12 = vadd.f32 %v9926_v61, %v3682_v14  ;;  %v7752_v45 = vpop.f32.mrb[6].mxu0  ;;  %5969 = vmatmul.mubr.bf16.vlgmr.msra.gmra.mrb[160].mxu1 %v6848_v19 }
 0x2e8   :  { %v3694_v49 = vadd.f32 %v9926_v61, %v7752_v45  ;;  %v3685_v48 = vpop.f32.mrb[7].mxu0  ;;  %6009 = vmatprep.mubr.bf16.mxu1 %v6851_v42  ;;  %v4951_v43 = vmax.f32 %v3691_v3, 0.0 }
 0x2e9   :  { %v3686_v53 = vadd.f32 %v9926_v61, %v3685_v48  ;;  %v4949_v16 = vmax.f32 %v3683_v12, 0.0 }
 0x2ea   :  { %v4952_v18 = vmax.f32 %v3694_v49, 0.0  ;;  %7858 = vmatmul.mubr.msk.bf16.gmra.mrb[112].mxu0 %vm1832_vm2, %v8259_v35 }
 0x2eb   :  { %v4950_v21 = vmax.f32 %v3686_v53, 0.0  ;;  %7861 = vmatprep.mubr.msk.bf16.mxu0 %vm1832_vm2, %v8260_v44  ;;  %v8263_v44 = vld [vmem:[%s10570_s0 + $0x5e8] sm:$0xff]  }
 0x2ec   :  { %v10184_v29 = vpack.c.bf16 %v4952_v18, %v4951_v43 }
 0x2ed   :  { %v10186_v8 = vpack.c.bf16 %v4950_v21, %v4949_v16  ;;  %v7755_v58 = vpop.f32.mrb[8].mxu0 }
 0x2ee   :  { %v3707_v32 = vadd.f32 %v9926_v61, %v7755_v58  ;;  %v3698_v59 = vpop.f32.mrb[9].mxu0 }
 0x2ef   :  { %v3699_v15 = vadd.f32 %v9926_v61, %v3698_v59  ;;  %v7756_v10 = vpop.f32.mrb[10].mxu0 }
 0x2f0   :  { %v3710_v2 = vadd.f32 %v9926_v61, %v7756_v10  ;;  %v3701_v46 = vpop.f32.mrb[11].mxu0  ;;  %v4955_v4 = vmax.f32 %v3707_v32, 0.0 }
 0x2f1   :  { %v3702_v22 = vadd.f32 %v9926_v61, %v3701_v46  ;;  %v4953_v42 = vmax.f32 %v3699_v15, 0.0 }
 0x2f2   :  { %v4956_v19 = vmax.f32 %v3710_v2, 0.0  ;;  %7862 = vmatmul.mubr.msk.bf16.gmra.mrb[116].mxu0 %vm1832_vm2, %v8261_v7 }
 0x2f3   :  { %v4954_v57 = vmax.f32 %v3702_v22, 0.0  ;;  %7865 = vmatprep.mubr.msk.bf16.mxu0 %vm1832_vm2, %v8262_v17 }
 0x2f4   :  { %v10200_v3 = vpack.c.bf16 %v4956_v19, %v4955_v4 }
 0x2f5   :  { %v10202_v14 = vpack.c.bf16 %v4954_v57, %v4953_v42  ;;  %v7759_v35 = vpop.f32.mrb[12].mxu0 }
 0x2f6   :  { %v3723_v12 = vadd.f32 %v9926_v61, %v7759_v35  ;;  %v3714_v45 = vpop.f32.mrb[13].mxu0 }
 0x2f7   :  { %v3715_v49 = vadd.f32 %v9926_v61, %v3714_v45  ;;  %v7760_v48 = vpop.f32.mrb[14].mxu0 }
 0x2f8   :  { %v3726_v53 = vadd.f32 %v9926_v61, %v7760_v48  ;;  %v3717_v43 = vpop.f32.mrb[15].mxu0  ;;  %v4959_v16 = vmax.f32 %v3723_v12, 0.0 }
 0x2f9   :  { %v3718_v18 = vadd.f32 %v9926_v61, %v3717_v43  ;;  %v4957_v32 = vmax.f32 %v3715_v49, 0.0 }
 0x2fa   :  { %v4960_v21 = vmax.f32 %v3726_v53, 0.0  ;;  %7866 = vmatmul.mubr.msk.bf16.gmra.mrb[120].mxu0 %vm1832_vm2, %v8263_v44  ;;  %v7237_v58 = vpop.f32.mrb[148].mxu1 }
 0x2fb   :  { %v4958_v59 = vmax.f32 %v3718_v18, 0.0  ;;  %v7238_v7 = vpop.f32.mrb[149].mxu1 }
 0x2fc   :  { %v10212_v15 = vpack.c.bf16 %v4960_v21, %v4959_v16  ;;  %v7239_v10 = vadd.f32 %v7238_v7, %v7237_v58  ;;  %v7240_v17 = vpop.f32.mrb[150].mxu1 }
 0x2fd   :  { %v10214_v2 = vpack.c.bf16 %v4958_v59, %v4957_v32  ;;  %v7763_v46 = vpop.f32.mrb[16].mxu0  ;;  %v7241_v22 = vpop.f32.mrb[151].mxu1 }
 0x2fe   :  { %v3739_v4 = vadd.f32 %v9926_v61, %v7763_v46  ;;  %v3730_v19 = vpop.f32.mrb[17].mxu0  ;;  %v10218_v42 = vadd.f32 %v7239_v10, %v10144_v51  ;;  %v7242_v57 = vadd.f32 %v7241_v22, %v7240_v17 }
 0x2ff   :  { %v3731_v35 = vadd.f32 %v9926_v61, %v3730_v19  ;;  %v7764_v12 = vpop.f32.mrb[18].mxu0 }
 0x300   :  { %v3742_v45 = vadd.f32 %v9926_v61, %v7764_v12  ;;  %v3733_v44 = vpop.f32.mrb[19].mxu0  ;;  %v10223_v49 = vadd.f32 %v7242_v57, %v10148_v25  ;;  %v4963_v53 = vmax.f32 %v3739_v4, 0.0 }
 0x301   :  { %v3734_v48 = vadd.f32 %v9926_v61, %v3733_v44  ;;  %v4961_v18 = vmax.f32 %v3731_v35, 0.0 }
 0x302   :  { %v4964_v43 = vmax.f32 %v3742_v45, 0.0 }
 0x303   :  { %v4962_v16 = vmax.f32 %v3734_v48, 0.0 }
 0x304   :  { %v5370_v21 = vpack.c.bf16 %v4964_v43, %v4963_v53 }
 0x305   :  { %v5369_v58 = vpack.c.bf16 %v4962_v16, %v4961_v18  ;;  %v7767_v51 = vpop.f32.mrb[20].mxu0 }
 0x306   :  { %v3755_v32 = vadd.f32 %v9926_v61, %v7767_v51  ;;  %v3746_v59 = vpop.f32.mrb[21].mxu0 }
 0x307   :  { %v3747_v7 = vadd.f32 %v9926_v61, %v3746_v59  ;;  %v7768_v10 = vpop.f32.mrb[22].mxu0  ;;  %7309 = vmatprep.subr.bf16.mxu1 %v5369_v58 }
 0x308   :  { %v3758_v17 = vadd.f32 %v9926_v61, %v7768_v10  ;;  %v3749_v25 = vpop.f32.mrb[23].mxu0  ;;  %7310 = vmatpush3.bf16.msra.mxu1 %v10170_v34  ;;  %v4967_v22 = vmax.f32 %v3755_v32, 0.0 }
 0x309   :  { %v3750_v46 = vadd.f32 %v9926_v61, %v3749_v25  ;;  %7311 = vmatprep.subr.bf16.mxu1 %v5370_v21  ;;  %v4965_v19 = vmax.f32 %v3747_v7, 0.0 }
 0x30a   :  { %v4968_v4 = vmax.f32 %v3758_v17, 0.0 }
 0x30b   :  { %v4966_v57 = vmax.f32 %v3750_v46, 0.0 }
 0x30c   :  { %v5372_v35 = vpack.c.bf16 %v4968_v4, %v4967_v22  ;;  %7312 = vmatpush3.bf16.msra.mxu1 %v10165_v55 }
 0x30d   :  { %v5371_v12 = vpack.c.bf16 %v4966_v57, %v4965_v19  ;;  %v7771_v45 = vpop.f32.mrb[24].mxu0 }
 0x30e   :  { %v3771_v44 = vadd.f32 %v9926_v61, %v7771_v45  ;;  %v3762_v48 = vpop.f32.mrb[25].mxu0 }
 0x30f   :  { %v3763_v53 = vadd.f32 %v9926_v61, %v3762_v48  ;;  %v7772_v43 = vpop.f32.mrb[26].mxu0  ;;  %7313 = vmatprep.subr.bf16.mxu1 %v5371_v12 }
 0x310   :  { %v3774_v34 = vadd.f32 %v9926_v61, %v7772_v43  ;;  %v3765_v18 = vpop.f32.mrb[27].mxu0  ;;  %7314 = vmatpush3.bf16.msra.mxu1 %v10186_v8  ;;  %v4971_v21 = vmax.f32 %v3771_v44, 0.0 }
 0x311   :  { %v3766_v16 = vadd.f32 %v9926_v61, %v3765_v18  ;;  %7315 = vmatprep.subr.bf16.mxu1 %v5372_v35  ;;  %v4969_v55 = vmax.f32 %v3763_v53, 0.0 }
 0x312   :  { %v4972_v58 = vmax.f32 %v3774_v34, 0.0 }
 0x313   :  { %v4970_v51 = vmax.f32 %v3766_v16, 0.0 }
 0x314   :  { %v5374_v32 = vpack.c.bf16 %v4972_v58, %v4971_v21  ;;  %7316 = vmatpush3.bf16.msra.mxu1 %v10184_v29  ;;  %v10257_v21 = vld [vmem:[%s10572_s3 + $0xc8] sm:$0xff] }
 0x315   :  { %v5373_v59 = vpack.c.bf16 %v4970_v51, %v4969_v55  ;;  %v7775_v7 = vpop.f32.mrb[28].mxu0 }
 0x316   :  { %v3787_v10 = vadd.f32 %v9926_v61, %v7775_v7  ;;  %v3778_v17 = vpop.f32.mrb[29].mxu0 }
 0x317   :  { %v3779_v25 = vadd.f32 %v9926_v61, %v3778_v17  ;;  %v7776_v46 = vpop.f32.mrb[30].mxu0  ;;  %7317 = vmatprep.subr.bf16.mxu1 %v5373_v59 }
 0x318   :  { %v3790_v8 = vadd.f32 %v9926_v61, %v7776_v46  ;;  %v3781_v22 = vpop.f32.mrb[31].mxu0  ;;  %7318 = vmatpush3.bf16.msra.mxu1 %v10202_v14  ;;  %v4975_v19 = vmax.f32 %v3787_v10, 0.0 }
 0x319   :  { %v3782_v4 = vadd.f32 %v9926_v61, %v3781_v22  ;;  %7319 = vmatprep.subr.bf16.mxu1 %v5374_v32  ;;  %v4973_v29 = vmax.f32 %v3779_v25, 0.0 }
 0x31a   :  { %v4976_v57 = vmax.f32 %v3790_v8, 0.0 }
 0x31b   :  { %v4974_v35 = vmax.f32 %v3782_v4, 0.0 }
 0x31c   :  { %v5376_v12 = vpack.c.bf16 %v4976_v57, %v4975_v19  ;;  %7320 = vmatpush3.bf16.msra.mxu1 %v10200_v3  ;;  %v10252_v3 = vld [vmem:[%s10572_s3 + $0x48] sm:$0xff] }
 0x31d   :  { %v5375_v45 = vpack.c.bf16 %v4974_v35, %v4973_v29  ;;  %v7779_v44 = vpop.f32.mrb[32].mxu0  ;;  %v6853_v7 = vcombine.high %v10252_v3, %v10257_v21 }
 0x31e   :  { %v3803_v48 = vadd.f32 %v9926_v61, %v7779_v44  ;;  %v3794_v53 = vpop.f32.mrb[33].mxu0  ;;  %v10279_v44 = vld [vmem:[%s10571_s2] ss:$0 sm:$0xff] }
 0x31f   :  { %v3795_v43 = vadd.f32 %v9926_v61, %v3794_v53  ;;  %v7780_v34 = vpop.f32.mrb[34].mxu0  ;;  %7321 = vmatprep.subr.bf16.mxu1 %v5375_v45 }
 0x320   :  { %v3806_v14 = vadd.f32 %v9926_v61, %v7780_v34  ;;  %v3797_v18 = vpop.f32.mrb[35].mxu0  ;;  %7322 = vmatpush3.bf16.msra.mxu1 %v10214_v2  ;;  %v4979_v58 = vmax.f32 %v3803_v48, 0.0  ;;  %v6850_v2 = vcombine.low %v10154_v39, %v10159_v11 }
 0x321   :  { %v3798_v16 = vadd.f32 %v9926_v61, %v3797_v18  ;;  %7323 = vmatprep.subr.bf16.mxu1 %v5376_v12  ;;  %v4977_v51 = vmax.f32 %v3795_v43, 0.0 }
 0x322   :  { %v4980_v55 = vmax.f32 %v3806_v14, 0.0 }
 0x323   :  { %v4978_v32 = vmax.f32 %v3798_v16, 0.0 }
 0x324   :  { %v10261_v59 = vpack.c.bf16 %v4980_v55, %v4979_v58  ;;  %7324 = vmatpush3.bf16.msra.mxu1 %v10212_v15 }
 0x325   :  { %v10266_v10 = vpack.c.bf16 %v4978_v32, %v4977_v51  ;;  %v7783_v17 = vpop.f32.mrb[36].mxu0 }
 0x326   :  { %v3819_v25 = vadd.f32 %v9926_v61, %v7783_v17  ;;  %v3810_v46 = vpop.f32.mrb[37].mxu0 }
 0x327   :  { %v3811_v8 = vadd.f32 %v9926_v61, %v3810_v46  ;;  %v7784_v22 = vpop.f32.mrb[38].mxu0  ;;  %6010 = vmatmul.mubr.bf16.vlgmr.msra.gmra.mrb[164].mxu1 %v6850_v2 }
 0x328   :  { %v3822_v4 = vadd.f32 %v9926_v61, %v7784_v22  ;;  %v3813_v39 = vpop.f32.mrb[39].mxu0  ;;  %6050 = vmatprep.mubr.bf16.mxu1 %v6853_v7  ;;  %v4983_v15 = vmax.f32 %v3819_v25, 0.0 }
 0x329   :  { %v3814_v11 = vadd.f32 %v9926_v61, %v3813_v39  ;;  %v4981_v57 = vmax.f32 %v3811_v8, 0.0 }
 0x32a   :  { %v4984_v19 = vmax.f32 %v3822_v4, 0.0 }
 0x32b   :  { %v4982_v29 = vmax.f32 %v3814_v11, 0.0 }
 0x32c   :  { %v10272_v35 = vpack.c.bf16 %v4984_v19, %v4983_v15 }
 0x32d   :  { %v10274_v12 = vpack.c.bf16 %v4982_v29, %v4981_v57  ;;  %v7787_v45 = vpop.f32.mrb[40].mxu0 }
 0x32e   :  { %v3835_v48 = vadd.f32 %v10279_v44, %v7787_v45  ;;  %v3826_v53 = vpop.f32.mrb[41].mxu0 }
 0x32f   :  { %v3827_v43 = vadd.f32 %v10279_v44, %v3826_v53  ;;  %v7788_v61 = vpop.f32.mrb[42].mxu0 }
 0x330   :  { %v3838_v34 = vadd.f32 %v10279_v44, %v7788_v61  ;;  %v3829_v14 = vpop.f32.mrb[43].mxu0  ;;  %v4987_v16 = vmax.f32 %v3835_v48, 0.0 }
 0x331   :  { %v3830_v18 = vadd.f32 %v10279_v44, %v3829_v14  ;;  %v4985_v55 = vmax.f32 %v3827_v43, 0.0 }
 0x332   :  { %v4988_v58 = vmax.f32 %v3838_v34, 0.0 }
 0x333   :  { %v4986_v51 = vmax.f32 %v3830_v18, 0.0 }
 0x334   :  { %v10285_v32 = vpack.c.bf16 %v4988_v58, %v4987_v16 }
 0x335   :  { %v10287_v2 = vpack.c.bf16 %v4986_v51, %v4985_v55  ;;  %v7791_v7 = vpop.f32.mrb[44].mxu0 }
 0x336   :  { %v3851_v17 = vadd.f32 %v10279_v44, %v7791_v7  ;;  %v3842_v25 = vpop.f32.mrb[45].mxu0 }
 0x337   :  { %v3843_v46 = vadd.f32 %v10279_v44, %v3842_v25  ;;  %v7792_v8 = vpop.f32.mrb[46].mxu0 }
 0x338   :  { %v3854_v22 = vadd.f32 %v10279_v44, %v7792_v8  ;;  %v3845_v4 = vpop.f32.mrb[47].mxu0  ;;  %v4991_v11 = vmax.f32 %v3851_v17, 0.0 }
 0x339   :  { %v3846_v39 = vadd.f32 %v10279_v44, %v3845_v4  ;;  %v4989_v57 = vmax.f32 %v3843_v46, 0.0 }
 0x33a   :  { %v4992_v15 = vmax.f32 %v3854_v22, 0.0  ;;  %v7259_v19 = vpop.f32.mrb[152].mxu1 }
 0x33b   :  { %v4990_v29 = vmax.f32 %v3846_v39, 0.0  ;;  %v7260_v45 = vpop.f32.mrb[153].mxu1 }
 0x33c   :  { %v10293_v48 = vpack.c.bf16 %v4992_v15, %v4991_v11  ;;  %v7261_v53 = vadd.f32 %v7260_v45, %v7259_v19  ;;  %v7262_v43 = vpop.f32.mrb[154].mxu1 }
 0x33d   :  { %v10295_v61 = vpack.c.bf16 %v4990_v29, %v4989_v57  ;;  %v7795_v34 = vpop.f32.mrb[48].mxu0  ;;  %v7263_v14 = vpop.f32.mrb[155].mxu1 }
 0x33e   :  { %v3867_v18 = vadd.f32 %v10279_v44, %v7795_v34  ;;  %v3858_v16 = vpop.f32.mrb[49].mxu0  ;;  %v10299_v58 = vadd.f32 %v7261_v53, %v10218_v42  ;;  %v7264_v55 = vadd.f32 %v7263_v14, %v7262_v43 }
 0x33f   :  { %v3859_v51 = vadd.f32 %v10279_v44, %v3858_v16  ;;  %v7796_v7 = vpop.f32.mrb[50].mxu0 }
 0x340   :  { %v3870_v17 = vadd.f32 %v10279_v44, %v7796_v7  ;;  %v3861_v25 = vpop.f32.mrb[51].mxu0  ;;  %v10304_v46 = vadd.f32 %v7264_v55, %v10223_v49  ;;  %v4995_v22 = vmax.f32 %v3867_v18, 0.0 }
 0x341   :  { %v3862_v8 = vadd.f32 %v10279_v44, %v3861_v25  ;;  %v4993_v39 = vmax.f32 %v3859_v51, 0.0 }
 0x342   :  { %v4996_v4 = vmax.f32 %v3870_v17, 0.0 }
 0x343   :  { %v4994_v11 = vmax.f32 %v3862_v8, 0.0 }
 0x344   :  { %v5386_v15 = vpack.c.bf16 %v4996_v4, %v4995_v22 }
 0x345   :  { %v5385_v19 = vpack.c.bf16 %v4994_v11, %v4993_v39  ;;  %v7799_v42 = vpop.f32.mrb[52].mxu0 }
 0x346   :  { %v3883_v57 = vadd.f32 %v10279_v44, %v7799_v42  ;;  %v3874_v29 = vpop.f32.mrb[53].mxu0 }
 0x347   :  { %v3875_v45 = vadd.f32 %v10279_v44, %v3874_v29  ;;  %v7800_v53 = vpop.f32.mrb[54].mxu0  ;;  %7331 = vmatprep.subr.bf16.mxu1 %v5385_v19 }
 0x348   :  { %v3886_v43 = vadd.f32 %v10279_v44, %v7800_v53  ;;  %v3877_v49 = vpop.f32.mrb[55].mxu0  ;;  %7332 = vmatpush3.bf16.msra.mxu1 %v10266_v10  ;;  %v4999_v14 = vmax.f32 %v3883_v57, 0.0 }
 0x349   :  { %v3878_v34 = vadd.f32 %v10279_v44, %v3877_v49  ;;  %7333 = vmatprep.subr.bf16.mxu1 %v5386_v15  ;;  %v4997_v16 = vmax.f32 %v3875_v45, 0.0 }
 0x34a   :  { %v5000_v18 = vmax.f32 %v3886_v43, 0.0 }
 0x34b   :  { %v4998_v55 = vmax.f32 %v3878_v34, 0.0 }
 0x34c   :  { %v5388_v51 = vpack.c.bf16 %v5000_v18, %v4999_v14  ;;  %7334 = vmatpush3.bf16.msra.mxu1 %v10261_v59 }
 0x34d   :  { %v5387_v7 = vpack.c.bf16 %v4998_v55, %v4997_v16  ;;  %v7803_v17 = vpop.f32.mrb[56].mxu0 }
 0x34e   :  { %v3899_v25 = vadd.f32 %v10279_v44, %v7803_v17  ;;  %v3890_v8 = vpop.f32.mrb[57].mxu0 }
 0x34f   :  { %v3891_v22 = vadd.f32 %v10279_v44, %v3890_v8  ;;  %v7804_v4 = vpop.f32.mrb[58].mxu0  ;;  %7335 = vmatprep.subr.bf16.mxu1 %v5387_v7 }
 0x350   :  { %v3902_v10 = vadd.f32 %v10279_v44, %v7804_v4  ;;  %v3893_v39 = vpop.f32.mrb[59].mxu0  ;;  %7336 = vmatpush3.bf16.msra.mxu1 %v10274_v12  ;;  %v5003_v15 = vmax.f32 %v3899_v25, 0.0 }
 0x351   :  { %v3894_v11 = vadd.f32 %v10279_v44, %v3893_v39  ;;  %7337 = vmatprep.subr.bf16.mxu1 %v5388_v51  ;;  %v5001_v59 = vmax.f32 %v3891_v22, 0.0 }
 0x352   :  { %v5004_v19 = vmax.f32 %v3902_v10, 0.0 }
 0x353   :  { %v5002_v42 = vmax.f32 %v3894_v11, 0.0 }
 0x354   :  { %v5390_v57 = vpack.c.bf16 %v5004_v19, %v5003_v15  ;;  %7338 = vmatpush3.bf16.msra.mxu1 %v10272_v35  ;;  %v10338_v15 = vld [vmem:[%s10572_s3 + $0xd0] sm:$0xff] }
 0x355   :  { %v5389_v29 = vpack.c.bf16 %v5002_v42, %v5001_v59  ;;  %v7807_v45 = vpop.f32.mrb[60].mxu0 }
 0x356   :  { %v3915_v53 = vadd.f32 %v10279_v44, %v7807_v45  ;;  %v3906_v43 = vpop.f32.mrb[61].mxu0 }
 0x357   :  { %v3907_v49 = vadd.f32 %v10279_v44, %v3906_v43  ;;  %v7808_v34 = vpop.f32.mrb[62].mxu0  ;;  %7339 = vmatprep.subr.bf16.mxu1 %v5389_v29 }
 0x358   :  { %v3918_v12 = vadd.f32 %v10279_v44, %v7808_v34  ;;  %v3909_v14 = vpop.f32.mrb[63].mxu0  ;;  %7340 = vmatpush3.bf16.msra.mxu1 %v10287_v2  ;;  %v5007_v16 = vmax.f32 %v3915_v53, 0.0 }
 0x359   :  { %v3910_v18 = vadd.f32 %v10279_v44, %v3909_v14  ;;  %7341 = vmatprep.subr.bf16.mxu1 %v5390_v57  ;;  %v5005_v35 = vmax.f32 %v3907_v49, 0.0 }
 0x35a   :  { %v5008_v55 = vmax.f32 %v3918_v12, 0.0 }
 0x35b   :  { %v5006_v51 = vmax.f32 %v3910_v18, 0.0 }
 0x35c   :  { %v5392_v7 = vpack.c.bf16 %v5008_v55, %v5007_v16  ;;  %7342 = vmatpush3.bf16.msra.mxu1 %v10285_v32  ;;  %v10333_v32 = vld [vmem:[%s10572_s3 + $0x50] sm:$0xff] }
 0x35d   :  { %v5391_v17 = vpack.c.bf16 %v5006_v51, %v5005_v35  ;;  %v7811_v25 = vpop.f32.mrb[64].mxu0  ;;  %v6855_v45 = vcombine.high %v10333_v32, %v10338_v15 }
 0x35e   :  { %v3931_v8 = vadd.f32 %v10279_v44, %v7811_v25  ;;  %v3922_v22 = vpop.f32.mrb[65].mxu0 }
 0x35f   :  { %v3923_v4 = vadd.f32 %v10279_v44, %v3922_v22  ;;  %v7812_v10 = vpop.f32.mrb[66].mxu0  ;;  %7343 = vmatprep.subr.bf16.mxu1 %v5391_v17 }
 0x360   :  { %v3934_v2 = vadd.f32 %v10279_v44, %v7812_v10  ;;  %v3925_v39 = vpop.f32.mrb[67].mxu0  ;;  %7344 = vmatpush3.bf16.msra.mxu1 %v10295_v61  ;;  %v5011_v19 = vmax.f32 %v3931_v8, 0.0  ;;  %v6852_v61 = vcombine.low %v10252_v3, %v10257_v21 }
 0x361   :  { %v3926_v11 = vadd.f32 %v10279_v44, %v3925_v39  ;;  %7345 = vmatprep.subr.bf16.mxu1 %v5392_v7  ;;  %v5009_v42 = vmax.f32 %v3923_v4, 0.0 }
 0x362   :  { %v5012_v59 = vmax.f32 %v3934_v2, 0.0 }
 0x363   :  { %v5010_v57 = vmax.f32 %v3926_v11, 0.0 }
 0x364   :  { %v10342_v29 = vpack.c.bf16 %v5012_v59, %v5011_v19  ;;  %7346 = vmatpush3.bf16.msra.mxu1 %v10293_v48 }
 0x365   :  { %v10347_v53 = vpack.c.bf16 %v5010_v57, %v5009_v42  ;;  %v7815_v43 = vpop.f32.mrb[68].mxu0 }
 0x366   :  { %v3947_v49 = vadd.f32 %v10279_v44, %v7815_v43  ;;  %v3938_v34 = vpop.f32.mrb[69].mxu0 }
 0x367   :  { %v3939_v12 = vadd.f32 %v10279_v44, %v3938_v34  ;;  %v7816_v14 = vpop.f32.mrb[70].mxu0  ;;  %6051 = vmatmul.mubr.bf16.vlgmr.msra.gmra.mrb[168].mxu1 %v6852_v61 }
 0x368   :  { %v3950_v18 = vadd.f32 %v10279_v44, %v7816_v14  ;;  %v3941_v3 = vpop.f32.mrb[71].mxu0  ;;  %6091 = vmatprep.mubr.bf16.mxu1 %v6855_v45  ;;  %v5015_v48 = vmax.f32 %v3947_v49, 0.0 }
 0x369   :  { %v3942_v21 = vadd.f32 %v10279_v44, %v3941_v3  ;;  %v5013_v55 = vmax.f32 %v3939_v12, 0.0 }
 0x36a   :  { %v5016_v16 = vmax.f32 %v3950_v18, 0.0 }
 0x36b   :  { %v5014_v35 = vmax.f32 %v3942_v21, 0.0 }
 0x36c   :  { %v10353_v51 = vpack.c.bf16 %v5016_v16, %v5015_v48 }
 0x36d   :  { %v10355_v7 = vpack.c.bf16 %v5014_v35, %v5013_v55  ;;  %v7819_v17 = vpop.f32.mrb[72].mxu0 }
 0x36e   :  { %v3963_v25 = vadd.f32 %v10279_v44, %v7819_v17  ;;  %v3954_v8 = vpop.f32.mrb[73].mxu0 }
 0x36f   :  { %v3955_v22 = vadd.f32 %v10279_v44, %v3954_v8  ;;  %v7820_v4 = vpop.f32.mrb[74].mxu0 }
 0x370   :  { %v3966_v10 = vadd.f32 %v10279_v44, %v7820_v4  ;;  %v3957_v2 = vpop.f32.mrb[75].mxu0  ;;  %v5019_v11 = vmax.f32 %v3963_v25, 0.0 }
 0x371   :  { %v3958_v39 = vadd.f32 %v10279_v44, %v3957_v2  ;;  %v5017_v59 = vmax.f32 %v3955_v22, 0.0 }
 0x372   :  { %v5020_v19 = vmax.f32 %v3966_v10, 0.0 }
 0x373   :  { %v5018_v42 = vmax.f32 %v3958_v39, 0.0 }
 0x374   :  { %v10361_v57 = vpack.c.bf16 %v5020_v19, %v5019_v11 }
 0x375   :  { %v10363_v61 = vpack.c.bf16 %v5018_v42, %v5017_v59  ;;  %v7823_v45 = vpop.f32.mrb[76].mxu0 }
 0x376   :  { %v3979_v43 = vadd.f32 %v10279_v44, %v7823_v45  ;;  %v3970_v49 = vpop.f32.mrb[77].mxu0 }
 0x377   :  { %v3971_v34 = vadd.f32 %v10279_v44, %v3970_v49  ;;  %v7824_v12 = vpop.f32.mrb[78].mxu0 }
 0x378   :  { %v3982_v14 = vadd.f32 %v10279_v44, %v7824_v12  ;;  %v3973_v18 = vpop.f32.mrb[79].mxu0  ;;  %v5023_v21 = vmax.f32 %v3979_v43, 0.0 }
 0x379   :  { %v3974_v3 = vadd.f32 %v10279_v44, %v3973_v18  ;;  %v5021_v55 = vmax.f32 %v3971_v34, 0.0 }
 0x37a   :  { %v5024_v48 = vmax.f32 %v3982_v14, 0.0  ;;  %v7281_v16 = vpop.f32.mrb[156].mxu1 }
 0x37b   :  { %v5022_v35 = vmax.f32 %v3974_v3, 0.0  ;;  %v7282_v17 = vpop.f32.mrb[157].mxu1 }
 0x37c   :  { %v10369_v25 = vpack.c.bf16 %v5024_v48, %v5023_v21  ;;  %v7283_v8 = vadd.f32 %v7282_v17, %v7281_v16  ;;  %v7284_v22 = vpop.f32.mrb[158].mxu1 }
 0x37d   :  { %v10371_v4 = vpack.c.bf16 %v5022_v35, %v5021_v55  ;;  %v7827_v10 = vpop.f32.mrb[80].mxu0  ;;  %v7285_v2 = vpop.f32.mrb[159].mxu1 }
 0x37e   :  { %v10374_v39 = vadd.f32 %v7283_v8, %v10299_v58  ;;  %v3995_v11 = vadd.f32 %v10279_v44, %v7827_v10  ;;  %v7286_v19 = vadd.f32 %v7285_v2, %v7284_v22  ;;  %v3986_v59 = vpop.f32.mrb[81].mxu0 }
 0x37f   :  { %v3987_v42 = vadd.f32 %v10279_v44, %v3986_v59  ;;  %v7828_v45 = vpop.f32.mrb[82].mxu0 }
 0x380   :  { %v10379_v43 = vadd.f32 %v7286_v19, %v10304_v46  ;;  %v3998_v49 = vadd.f32 %v10279_v44, %v7828_v45  ;;  %v3989_v34 = vpop.f32.mrb[83].mxu0  ;;  %v5027_v14 = vmax.f32 %v3995_v11, 0.0 }
 0x381   :  { %v3990_v12 = vadd.f32 %v10279_v44, %v3989_v34  ;;  %v5025_v3 = vmax.f32 %v3987_v42, 0.0 }
 0x382   :  { %v5028_v18 = vmax.f32 %v3998_v49, 0.0 }
 0x383   :  { %v5026_v58 = vmax.f32 %v3990_v12, 0.0 }
 0x384   :  { %v5402_v21 = vpack.c.bf16 %v5028_v18, %v5027_v14 }
 0x385   :  { %v5401_v48 = vpack.c.bf16 %v5026_v58, %v5025_v3  ;;  %v7831_v16 = vpop.f32.mrb[84].mxu0 }
 0x386   :  { %v4011_v55 = vadd.f32 %v10279_v44, %v7831_v16  ;;  %v4002_v35 = vpop.f32.mrb[85].mxu0 }
 0x387   :  { %v4003_v17 = vadd.f32 %v10279_v44, %v4002_v35  ;;  %v7832_v8 = vpop.f32.mrb[86].mxu0  ;;  %7353 = vmatprep.subr.bf16.mxu1 %v5401_v48 }
 0x388   :  { %v4014_v46 = vadd.f32 %v10279_v44, %v7832_v8  ;;  %v4005_v22 = vpop.f32.mrb[87].mxu0  ;;  %7354 = vmatpush3.bf16.msra.mxu1 %v10347_v53  ;;  %v5031_v2 = vmax.f32 %v4011_v55, 0.0 }
 0x389   :  { %v4006_v10 = vadd.f32 %v10279_v44, %v4005_v22  ;;  %7355 = vmatprep.subr.bf16.mxu1 %v5402_v21  ;;  %v5029_v19 = vmax.f32 %v4003_v17, 0.0 }
 0x38a   :  { %v5032_v11 = vmax.f32 %v4014_v46, 0.0 }
 0x38b   :  { %v5030_v59 = vmax.f32 %v4006_v10, 0.0 }
 0x38c   :  { %v5404_v42 = vpack.c.bf16 %v5032_v11, %v5031_v2  ;;  %7356 = vmatpush3.bf16.msra.mxu1 %v10342_v29 }
 0x38d   :  { %v5403_v45 = vpack.c.bf16 %v5030_v59, %v5029_v19  ;;  %v7835_v49 = vpop.f32.mrb[88].mxu0 }
 0x38e   :  { %v4027_v34 = vadd.f32 %v10279_v44, %v7835_v49  ;;  %v4018_v12 = vpop.f32.mrb[89].mxu0 }
 0x38f   :  { %v4019_v14 = vadd.f32 %v10279_v44, %v4018_v12  ;;  %v7836_v18 = vpop.f32.mrb[90].mxu0  ;;  %7357 = vmatprep.subr.bf16.mxu1 %v5403_v45 }
 0x390   :  { %v4030_v53 = vadd.f32 %v10279_v44, %v7836_v18  ;;  %v4021_v3 = vpop.f32.mrb[91].mxu0  ;;  %7358 = vmatpush3.bf16.msra.mxu1 %v10355_v7  ;;  %v5035_v21 = vmax.f32 %v4027_v34, 0.0 }
 0x391   :  { %v4022_v58 = vadd.f32 %v10279_v44, %v4021_v3  ;;  %7359 = vmatprep.subr.bf16.mxu1 %v5404_v42  ;;  %v5033_v29 = vmax.f32 %v4019_v14, 0.0 }
 0x392   :  { %v5036_v48 = vmax.f32 %v4030_v53, 0.0 }
 0x393   :  { %v5034_v16 = vmax.f32 %v4022_v58, 0.0 }
 0x394   :  { %v5406_v55 = vpack.c.bf16 %v5036_v48, %v5035_v21  ;;  %7360 = vmatpush3.bf16.msra.mxu1 %v10353_v51  ;;  %v10414_v21 = vld [vmem:[%s10572_s3 + $0xd8] sm:$0xff] }
 0x395   :  { %v5405_v35 = vpack.c.bf16 %v5034_v16, %v5033_v29  ;;  %v7839_v17 = vpop.f32.mrb[92].mxu0 }
 0x396   :  { %v4043_v8 = vadd.f32 %v10279_v44, %v7839_v17  ;;  %v4034_v46 = vpop.f32.mrb[93].mxu0 }
 0x397   :  { %v4035_v22 = vadd.f32 %v10279_v44, %v4034_v46  ;;  %v7840_v10 = vpop.f32.mrb[94].mxu0  ;;  %7361 = vmatprep.subr.bf16.mxu1 %v5405_v35 }
 0x398   :  { %v4046_v7 = vadd.f32 %v10279_v44, %v7840_v10  ;;  %v4037_v2 = vpop.f32.mrb[95].mxu0  ;;  %7362 = vmatpush3.bf16.msra.mxu1 %v10363_v61  ;;  %v5039_v19 = vmax.f32 %v4043_v8, 0.0 }
 0x399   :  { %v4038_v11 = vadd.f32 %v10279_v44, %v4037_v2  ;;  %7363 = vmatprep.subr.bf16.mxu1 %v5406_v55  ;;  %v5037_v51 = vmax.f32 %v4035_v22, 0.0 }
 0x39a   :  { %v5040_v59 = vmax.f32 %v4046_v7, 0.0 }
 0x39b   :  { %v5038_v42 = vmax.f32 %v4038_v11, 0.0 }
 0x39c   :  { %v5408_v45 = vpack.c.bf16 %v5040_v59, %v5039_v19  ;;  %7364 = vmatpush3.bf16.msra.mxu1 %v10361_v57  ;;  %v10409_v57 = vld [vmem:[%s10572_s3 + $0x58] sm:$0xff] }
 0x39d   :  { %v5407_v49 = vpack.c.bf16 %v5038_v42, %v5037_v51  ;;  %v7843_v34 = vpop.f32.mrb[96].mxu0  ;;  %v6857_v17 = vcombine.high %v10409_v57, %v10414_v21 }
 0x39e   :  { %v4059_v12 = vadd.f32 %v10279_v44, %v7843_v34  ;;  %v4050_v14 = vpop.f32.mrb[97].mxu0 }
 0x39f   :  { %v4051_v18 = vadd.f32 %v10279_v44, %v4050_v14  ;;  %v7844_v53 = vpop.f32.mrb[98].mxu0  ;;  %7365 = vmatprep.subr.bf16.mxu1 %v5407_v49 }
 0x3a0   :  { %v4062_v61 = vadd.f32 %v10279_v44, %v7844_v53  ;;  %v4053_v3 = vpop.f32.mrb[99].mxu0  ;;  %7366 = vmatpush3.bf16.msra.mxu1 %v10371_v4  ;;  %v5043_v48 = vmax.f32 %v4059_v12, 0.0  ;;  %v6854_v4 = vcombine.low %v10333_v32, %v10338_v15 }
 0x3a1   :  { %v4054_v58 = vadd.f32 %v10279_v44, %v4053_v3  ;;  %7367 = vmatprep.subr.bf16.mxu1 %v5408_v45  ;;  %v5041_v16 = vmax.f32 %v4051_v18, 0.0 }
 0x3a2   :  { %v5044_v29 = vmax.f32 %v4062_v61, 0.0 }
 0x3a3   :  { %v5042_v55 = vmax.f32 %v4054_v58, 0.0 }
 0x3a4   :  { %v10418_v35 = vpack.c.bf16 %v5044_v29, %v5043_v48  ;;  %7368 = vmatpush3.bf16.msra.mxu1 %v10369_v25 }
 0x3a5   :  { %v10423_v8 = vpack.c.bf16 %v5042_v55, %v5041_v16  ;;  %v7847_v46 = vpop.f32.mrb[100].mxu0 }
 0x3a6   :  { %v4075_v22 = vadd.f32 %v10279_v44, %v7847_v46  ;;  %v4066_v10 = vpop.f32.mrb[101].mxu0 }
 0x3a7   :  { %v4067_v7 = vadd.f32 %v10279_v44, %v4066_v10  ;;  %v7848_v2 = vpop.f32.mrb[102].mxu0  ;;  %6092 = vmatmul.mubr.bf16.vlgmr.msra.gmra.mrb[172].mxu1 %v6854_v4 }
 0x3a8   :  { %v4078_v11 = vadd.f32 %v10279_v44, %v7848_v2  ;;  %v4069_v32 = vpop.f32.mrb[103].mxu0  ;;  %6132 = vmatprep.mubr.bf16.mxu1 %v6857_v17  ;;  %v5047_v25 = vmax.f32 %v4075_v22, 0.0 }
 0x3a9   :  { %v4070_v15 = vadd.f32 %v10279_v44, %v4069_v32  ;;  %v5045_v59 = vmax.f32 %v4067_v7, 0.0 }
 0x3aa   :  { %v5048_v19 = vmax.f32 %v4078_v11, 0.0 }
 0x3ab   :  { %v5046_v51 = vmax.f32 %v4070_v15, 0.0 }
 0x3ac   :  { %v10429_v42 = vpack.c.bf16 %v5048_v19, %v5047_v25 }
 0x3ad   :  { %v10431_v45 = vpack.c.bf16 %v5046_v51, %v5045_v59  ;;  %v7851_v49 = vpop.f32.mrb[104].mxu0 }
 0x3ae   :  { %v4091_v34 = vadd.f32 %v10279_v44, %v7851_v49  ;;  %v4082_v12 = vpop.f32.mrb[105].mxu0 }
 0x3af   :  { %v4083_v14 = vadd.f32 %v10279_v44, %v4082_v12  ;;  %v7852_v18 = vpop.f32.mrb[106].mxu0 }
 0x3b0   :  { %v4094_v53 = vadd.f32 %v10279_v44, %v7852_v18  ;;  %v4085_v61 = vpop.f32.mrb[107].mxu0  ;;  %v5051_v58 = vmax.f32 %v4091_v34, 0.0 }
 0x3b1   :  { %v4086_v3 = vadd.f32 %v10279_v44, %v4085_v61  ;;  %v5049_v29 = vmax.f32 %v4083_v14, 0.0 }
 0x3b2   :  { %v5052_v48 = vmax.f32 %v4094_v53, 0.0 }
 0x3b3   :  { %v5050_v16 = vmax.f32 %v4086_v3, 0.0 }
 0x3b4   :  { %v10437_v55 = vpack.c.bf16 %v5052_v48, %v5051_v58 }
 0x3b5   :  { %v10439_v4 = vpack.c.bf16 %v5050_v16, %v5049_v29  ;;  %v7855_v17 = vpop.f32.mrb[108].mxu0 }
 0x3b6   :  { %v4107_v46 = vadd.f32 %v10279_v44, %v7855_v17  ;;  %v4098_v22 = vpop.f32.mrb[109].mxu0 }
 0x3b7   :  { %v4099_v10 = vadd.f32 %v10279_v44, %v4098_v22  ;;  %v7856_v7 = vpop.f32.mrb[110].mxu0 }
 0x3b8   :  { %v4110_v2 = vadd.f32 %v10279_v44, %v7856_v7  ;;  %v4101_v11 = vpop.f32.mrb[111].mxu0  ;;  %v5055_v15 = vmax.f32 %v4107_v46, 0.0 }
 0x3b9   :  { %v4102_v32 = vadd.f32 %v10279_v44, %v4101_v11  ;;  %v5053_v59 = vmax.f32 %v4099_v10, 0.0 }
 0x3ba   :  { %v5056_v25 = vmax.f32 %v4110_v2, 0.0  ;;  %v7303_v19 = vpop.f32.mrb[160].mxu1 }
 0x3bb   :  { %v5054_v51 = vmax.f32 %v4102_v32, 0.0  ;;  %v7304_v49 = vpop.f32.mrb[161].mxu1 }
 0x3bc   :  { %v10445_v34 = vpack.c.bf16 %v5056_v25, %v5055_v15  ;;  %v7305_v12 = vadd.f32 %v7304_v49, %v7303_v19  ;;  %v7306_v14 = vpop.f32.mrb[162].mxu1 }
 0x3bd   :  { %v5415_v18 = vpack.c.bf16 %v5054_v51, %v5053_v59  ;;  %v7859_v53 = vpop.f32.mrb[112].mxu0  ;;  %v7307_v61 = vpop.f32.mrb[163].mxu1 }
 0x3be   :  { %v10448_v3 = vadd.f32 %v7305_v12, %v10374_v39  ;;  %v4123_v58 = vadd.f32 %v10279_v44, %v7859_v53  ;;  %v7308_v48 = vadd.f32 %v7307_v61, %v7306_v14  ;;  %v4114_v29 = vpop.f32.mrb[113].mxu0 }
 0x3bf   :  { %v4115_v16 = vadd.f32 %v10279_v44, %v4114_v29  ;;  %v7860_v17 = vpop.f32.mrb[114].mxu0 }
 0x3c0   :  { %v10453_v46 = vadd.f32 %v7308_v48, %v10379_v43  ;;  %v4126_v22 = vadd.f32 %v10279_v44, %v7860_v17  ;;  %v4117_v10 = vpop.f32.mrb[115].mxu0  ;;  %v5059_v2 = vmax.f32 %v4123_v58, 0.0 }
 0x3c1   :  { %v4118_v7 = vadd.f32 %v10279_v44, %v4117_v10  ;;  %v5057_v32 = vmax.f32 %v4115_v16, 0.0 }
 0x3c2   :  { %v5060_v11 = vmax.f32 %v4126_v22, 0.0 }
 0x3c3   :  { %v5058_v39 = vmax.f32 %v4118_v7, 0.0 }
 0x3c4   :  { %v5418_v15 = vpack.c.bf16 %v5060_v11, %v5059_v2 }
 0x3c5   :  { %v5417_v25 = vpack.c.bf16 %v5058_v39, %v5057_v32  ;;  %v7863_v19 = vpop.f32.mrb[116].mxu0 }
 0x3c6   :  { %v4139_v59 = vadd.f32 %v10279_v44, %v7863_v19  ;;  %v4130_v51 = vpop.f32.mrb[117].mxu0 }
 0x3c7   :  { %v4131_v49 = vadd.f32 %v10279_v44, %v4130_v51  ;;  %v7864_v12 = vpop.f32.mrb[118].mxu0  ;;  %7375 = vmatprep.subr.bf16.mxu1 %v5417_v25 }
 0x3c8   :  { %v4142_v43 = vadd.f32 %v10279_v44, %v7864_v12  ;;  %v4133_v14 = vpop.f32.mrb[119].mxu0  ;;  %7376 = vmatpush3.bf16.msra.mxu1 %v10423_v8  ;;  %v5063_v61 = vmax.f32 %v4139_v59, 0.0  ;;  %v10629_v12 = vld [vmem:[#allocation24_spill] sm:$0xff] }
 0x3c9   :  { %v4134_v53 = vadd.f32 %v10279_v44, %v4133_v14  ;;  %7377 = vmatprep.subr.bf16.mxu1 %v5418_v15  ;;  %v5061_v48 = vmax.f32 %v4131_v49, 0.0  ;;  %v10628_v49 = vld [vmem:[#allocation13_spill] sm:$0xff]  ;;  %v10631_v14 = vld [vmem:[#allocation23_spill] sm:$0xff] }
 0x3ca   :  { %v5064_v58 = vmax.f32 %v4142_v43, 0.0  ;;  %v10630_v43 = vld [vmem:[#allocation16_spill] sm:$0xff] }
 0x3cb   :  { %v5062_v29 = vmax.f32 %v4134_v53, 0.0 }
 0x3cc   :  { %v5420_v16 = vpack.c.bf16 %v5064_v58, %v5063_v61  ;;  %7378 = vmatpush3.bf16.msra.mxu1 %v10418_v35 }
 0x3cd   :  { %v5419_v17 = vpack.c.bf16 %v5062_v29, %v5061_v48  ;;  %v7867_v22 = vpop.f32.mrb[120].mxu0  ;;  %v10632_v29 = vld [vmem:[#allocation15_spill] sm:$0xff] }
 0x3ce   :  { %v4155_v10 = vadd.f32 %v10279_v44, %v7867_v22  ;;  %v4146_v7 = vpop.f32.mrb[121].mxu0 }
 0x3cf   :  { %v4147_v2 = vadd.f32 %v10279_v44, %v4146_v7  ;;  %v7868_v11 = vpop.f32.mrb[122].mxu0  ;;  %7379 = vmatprep.subr.bf16.mxu1 %v5419_v17  ;;  %v10633_v17 = vld [vmem:[#allocation26_spill] sm:$0xff] }
 0x3d0   :  { %v4158_v8 = vadd.f32 %v10279_v44, %v7868_v11  ;;  %v4149_v32 = vpop.f32.mrb[123].mxu0  ;;  %7380 = vmatpush3.bf16.msra.mxu1 %v10431_v45  ;;  %v5067_v15 = vmax.f32 %v4155_v10, 0.0  ;;  %v6856_v45 = vcombine.low %v10409_v57, %v10414_v21  ;;  %v10621_v57 = vld [vmem:[#allocation20_spill] sm:$0xff]  ;;  %v10635_v11 = vld [vmem:[#allocation25_spill] sm:$0xff] }
 0x3d1   :  { %v4150_v39 = vadd.f32 %v10279_v44, %v4149_v32  ;;  %7381 = vmatprep.subr.bf16.mxu1 %v5420_v16  ;;  %v5065_v35 = vmax.f32 %v4147_v2, 0.0  ;;  %v5213_v44 = vld [vmem:[%s10572_s3 + $0x60] sm:$0xff]  ;;  %v10622_v21 = vld [vmem:[#allocation12_spill] sm:$0xff]  ;;  %v5232_v32 = vld [vmem:[%s10572_s3 + $0xf8] sm:$0xff] }
 0x3d2   :  { %v5068_v25 = vmax.f32 %v4158_v8, 0.0  ;;  %v10634_v2 = vld [vmem:[#allocation18_spill] sm:$0xff]  ;;  %v5216_v8 = vld [vmem:[%s10572_s3 + $0x78] sm:$0xff] }
 0x3d3   :  { %v5066_v19 = vmax.f32 %v4150_v39, 0.0 }
 0x3d4   :  { %v5422_v59 = vpack.c.bf16 %v5068_v25, %v5067_v15  ;;  %7382 = vmatpush3.bf16.msra.mxu1 %v10429_v42  ;;  %v5229_v42 = vld [vmem:[%s10572_s3 + $0xe0] sm:$0xff]  ;;  %v10636_v15 = vld [vmem:[#allocation17_spill] sm:$0xff]  ;;  %v6865_v25 = vcombine.high %v5216_v8, %v5232_v32 }
 0x3d5   :  { %v5421_v51 = vpack.c.bf16 %v5066_v19, %v5065_v35  ;;  %v10637_v35 = vld [vmem:[#allocation36_spill] sm:$0xff] }
 0x3d6   :  { %v10638_v19 = vld [vmem:[#allocation28_spill] sm:$0xff] }
 0x3d7   :  { %7383 = vmatprep.subr.bf16.mxu1 %v5421_v51  ;;  %v10640_v51 = vld [vmem:[#allocation27_spill] sm:$0xff] }
 0x3d8   :  { %7384 = vmatpush3.bf16.msra.mxu1 %v10439_v4  ;;  %v6859_v4 = vcombine.high %v5213_v44, %v5229_v42 }
 0x3d9   :  { %7385 = vmatprep.subr.bf16.mxu1 %v5422_v59  ;;  %v10639_v59 = vld [vmem:[#allocation35_spill] sm:$0xff] }
 0x3dc   :  { %7386 = vmatpush3.bf16.msra.mxu1 %v10437_v55  ;;  %v10623_v55 = vld [vmem:[#allocation19_spill] sm:$0xff] }
 0x3dd   :  { %7387 = vmatprep.subr.bf16.mxu1 %v9329_v60 }
 0x3e0   :  { %7388 = vmatpush3.bf16.msra.mxu1 %v5415_v18  ;;  %v10625_v18 = vld [vmem:[#allocation22_spill] sm:$0xff] }
 0x3e1   :  { %7389 = vmatprep.subr.bf16.mxu1 %v9326_v56 }
 0x3e4   :  { %7390 = vmatpush3.bf16.msra.mxu1 %v10445_v34  ;;  %v10624_v34 = vld [vmem:[#allocation11_spill] sm:$0xff] }
 0x3e5   :  { %7397 = vmatprep.subr.bf16.mxu1 %v9462_v20 }
 0x3e7   :  { %6133 = vmatmul.mubr.bf16.vlgmr.msra.gmra.mrb[176].mxu1 %v6856_v45  ;;  %v10643_v45 = vld [vmem:[#allocation37_spill] sm:$0xff] }
 0x3e8   :  { %7398 = vmatpush3.bf16.msra.mxu1 %v9361_v30  ;;  %6173 = vmatprep.mubr.bf16.mxu1 %v6859_v4  ;;  %v10644_v4 = vld [vmem:[#allocation29_spill] sm:$0xff] }
 0x3e9   :  { %7399 = vmatprep.subr.bf16.mxu1 %v9459_v47 }
 0x3ec   :  { %7400 = vmatpush3.bf16.msra.mxu1 %v9358_v26 }
 0x3ed   :  { %7401 = vmatprep.subr.bf16.mxu1 %v9483_v31 }
 0x3f0   :  { %7402 = vmatpush3.bf16.msra.mxu1 %v9390_v62 }
 0x3f1   :  { %7403 = vmatprep.subr.bf16.mxu1 %v9480_v52  ;;  %v6858_v52 = vcombine.low %v5213_v44, %v5229_v42  ;;  %v10641_v44 = vld [vmem:[#allocation38_spill] sm:$0xff] }
 0x3f2   :  { %v10642_v42 = vld [vmem:[#allocation30_spill] sm:$0xff] }
 0x3f4   :  { %7404 = vmatpush3.bf16.msra.mxu1 %v9387_v27 }
 0x3f5   :  { %7405 = vmatprep.subr.bf16.mxu1 %v9505_v38  ;;  %v10615_v38 = vld [vmem:[#allocation7_spill] sm:$0xff] }
 0x3f8   :  { %7406 = vmatpush3.bf16.msra.mxu1 %v9414_v33  ;;  %v5214_v33 = vld [vmem:[%s10572_s3 + $0x68] sm:$0xff] }
 0x3f9   :  { %7407 = vmatprep.subr.bf16.mxu1 %v9502_v24  ;;  %v10614_v24 = vld [vmem:[#allocation4_spill] sm:$0xff] }
 0x3fa   :  { %v7325_v56 = vpop.f32.mrb[164].mxu1 }
 0x3fb   :  { %v7326_v60 = vpop.f32.mrb[165].mxu1 }
 0x3fc   :  { %v7327_v30 = vadd.f32 %v7326_v60, %v7325_v56  ;;  %v7328_v47 = vpop.f32.mrb[166].mxu1  ;;  %7408 = vmatpush3.bf16.msra.mxu1 %v9411_v41  ;;  %v5230_v41 = vld [vmem:[%s10572_s3 + $0xe8] sm:$0xff]  ;;  %v10645_v56 = vld [vmem:[#allocation32_spill] sm:$0xff] }
 0x3fd   :  { %v7329_v26 = vpop.f32.mrb[167].mxu1  ;;  %7409 = vmatprep.subr.bf16.mxu1 %v9527_v28  ;;  %v6861_v31 = vcombine.high %v5214_v33, %v5230_v41  ;;  %v10617_v28 = vld [vmem:[#allocation10_spill] sm:$0xff]  ;;  %v10646_v60 = vld [vmem:[#allocation39_spill] sm:$0xff] }
 0x3fe   :  { %v6012_v62 = vadd.f32 %v7327_v30, %v10448_v3  ;;  %v7330_v20 = vadd.f32 %v7329_v26, %v7328_v47  ;;  %v10626_v3 = vld [vmem:[#allocation14_spill] sm:$0xff]  ;;  %v10647_v30 = vld [vmem:[#allocation31_spill] sm:$0xff]  ;;  %v6864_v26 = vcombine.low %v5216_v8, %v5232_v32 }
 0x3ff   :  { %v10648_v47 = vld [vmem:[#allocation34_spill] sm:$0xff] }
 0x400   :  { %v6015_v27 = vadd.f32 %v7330_v20, %v10453_v46  ;;  %7410 = vmatpush3.bf16.msra.mxu1 %v9438_v5  ;;  %v10612_v5 = vld [vmem:[#allocation2_spill] sm:$0xff]  ;;  %v10627_v46 = vld [vmem:[#allocation21_spill] sm:$0xff] }
 0x401   :  { %7411 = vmatprep.subr.bf16.mxu1 %v9524_v40  ;;  %v10616_v40 = vld [vmem:[#allocation3_spill] sm:$0xff] }
 0x404   :  { %7412 = vmatpush3.bf16.msra.mxu1 %v9435_v1  ;;  %v10613_v1 = vld [vmem:[#allocation8_spill] sm:$0xff] }
 0x405   :  { %7419 = vmatprep.subr.bf16.mxu1 %v9665_v63  ;;  %v6860_v63 = vcombine.low %v5214_v33, %v5230_v41 }
 0x407   :  { %6174 = vmatmul.mubr.bf16.vlgmr.msra.gmra.mrb[180].mxu1 %v6858_v52 }
 0x408   :  { %7420 = vmatpush3.bf16.msra.mxu1 %v9564_v36  ;;  %6214 = vmatprep.mubr.bf16.mxu1 %v6861_v31  ;;  %v10618_v36 = vld [vmem:[#allocation6_spill] sm:$0xff] }
 0x409   :  { %7421 = vmatprep.subr.bf16.mxu1 %v9662_v37  ;;  %v5231_v37 = vld [vmem:[%s10572_s3 + $0xf0] sm:$0xff] }
 0x40c   :  { %7422 = vmatpush3.bf16.msra.mxu1 %v9556_v6  ;;  %v10619_v6 = vld [vmem:[#allocation9_spill] sm:$0xff] }
 0x40d   :  { %7423 = vmatprep.subr.bf16.mxu1 %v9686_v9 }
 0x410   :  { %7424 = vmatpush3.bf16.msra.mxu1 %v9593_v54  ;;  %v5215_v54 = vld [vmem:[%s10572_s3 + $0x70] sm:$0xff] }
 0x411   :  { %7425 = vmatprep.subr.bf16.mxu1 %v9683_v0  ;;  %v10620_v0 = vld [vmem:[#allocation5_spill] sm:$0xff]  ;;  %v6863_v9 = vcombine.high %v5215_v54, %v5231_v37  ;;  %v6862_v39 = vcombine.low %v5215_v54, %v5231_v37 }
 0x414   :  { %7426 = vmatpush3.bf16.msra.mxu1 %v10612_v5 }
 0x415   :  { %7427 = vmatprep.subr.bf16.mxu1 %v10613_v1 }
 0x418   :  { %7428 = vmatpush3.bf16.msra.mxu1 %v10614_v24 }
 0x419   :  { %7429 = vmatprep.subr.bf16.mxu1 %v10615_v38 }
 0x41c   :  { %7430 = vmatpush3.bf16.msra.mxu1 %v10616_v40 }
 0x41d   :  { %7431 = vmatprep.subr.bf16.mxu1 %v10617_v28 }
 0x420   :  { %7432 = vmatpush3.bf16.msra.mxu1 %v10618_v36 }
 0x421   :  { %7433 = vmatprep.subr.bf16.mxu1 %v10619_v6 }
 0x424   :  { %7434 = vmatpush3.bf16.msra.mxu1 %v10620_v0 }
 0x425   :  { %7441 = vmatprep.subr.bf16.mxu1 %v10621_v57 }
 0x427   :  { %6215 = vmatmul.mubr.bf16.vlgmr.msra.gmra.mrb[184].mxu1 %v6860_v63 }
 0x428   :  { %7442 = vmatpush3.bf16.msra.mxu1 %v10622_v21  ;;  %6255 = vmatprep.mubr.bf16.mxu1 %v6863_v9 }
 0x429   :  { %7443 = vmatprep.subr.bf16.mxu1 %v10623_v55 }
 0x42c   :  { %7444 = vmatpush3.bf16.msra.mxu1 %v10624_v34 }
 0x42d   :  { %7445 = vmatprep.subr.bf16.mxu1 %v10625_v18 }
 0x430   :  { %7446 = vmatpush3.bf16.msra.mxu1 %v10626_v3 }
 0x431   :  { %7447 = vmatprep.subr.bf16.mxu1 %v10627_v46 }
 0x434   :  { %7448 = vmatpush3.bf16.msra.mxu1 %v10628_v49 }
 0x435   :  { %7449 = vmatprep.subr.bf16.mxu1 %v10629_v12 }
 0x438   :  { %7450 = vmatpush3.bf16.msra.mxu1 %v10630_v43 }
 0x439   :  { %7451 = vmatprep.subr.bf16.mxu1 %v10631_v14 }
 0x43a   :  { %v7347_v53 = vpop.f32.mrb[168].mxu1 }
 0x43b   :  { %v7348_v61 = vpop.f32.mrb[169].mxu1 }
 0x43c   :  { %v7349_v58 = vadd.f32 %v7348_v61, %v7347_v53  ;;  %v7350_v48 = vpop.f32.mrb[170].mxu1  ;;  %7452 = vmatpush3.bf16.msra.mxu1 %v10632_v29 }
 0x43d   :  { %v7351_v16 = vpop.f32.mrb[171].mxu1  ;;  %7453 = vmatprep.subr.bf16.mxu1 %v10633_v17 }
 0x43e   :  { %v6053_v22 = vadd.f32 %v7349_v58, %v6012_v62  ;;  %v7352_v10 = vadd.f32 %v7351_v16, %v7350_v48  ;;  %v10649_v62 = vld [vmem:[#allocation33_spill] sm:$0xff] }
 0x440   :  { %v6056_v7 = vadd.f32 %v7352_v10, %v6015_v27  ;;  %7454 = vmatpush3.bf16.msra.mxu1 %v10634_v2 }
 0x441   :  { %7455 = vmatprep.subr.bf16.mxu1 %v10635_v11 }
 0x444   :  { %7456 = vmatpush3.bf16.msra.mxu1 %v10636_v15 }
 0x445   :  { %7463 = vmatprep.subr.bf16.mxu1 %v10637_v35 }
 0x447   :  { %6256 = vmatmul.mubr.bf16.vlgmr.msra.gmra.mrb[188].mxu1 %v6862_v39 }
 0x448   :  { %7464 = vmatpush3.bf16.msra.mxu1 %v10638_v19  ;;  %6296 = vmatprep.mubr.bf16.mxu1 %v6865_v25 }
 0x449   :  { %7465 = vmatprep.subr.bf16.mxu1 %v10639_v59 }
 0x44c   :  { %7466 = vmatpush3.bf16.msra.mxu1 %v10640_v51 }
 0x44d   :  { %7467 = vmatprep.subr.bf16.mxu1 %v10641_v44 }
 0x450   :  { %7468 = vmatpush3.bf16.msra.mxu1 %v10642_v42 }
 0x451   :  { %7469 = vmatprep.subr.bf16.mxu1 %v10643_v45 }
 0x454   :  { %7470 = vmatpush3.bf16.msra.mxu1 %v10644_v4 }
 0x455   :  { %7471 = vmatprep.subr.bf16.mxu1 %v10112_v13 }
 0x458   :  { %7472 = vmatpush3.bf16.msra.mxu1 %v10645_v56 }
 0x459   :  { %7473 = vmatprep.subr.bf16.mxu1 %v10646_v60 }
 0x45c   :  { %7474 = vmatpush3.bf16.msra.mxu1 %v10647_v30 }
 0x45d   :  { %7475 = vmatprep.subr.bf16.mxu1 %v10119_v50 }
 0x460   :  { %7476 = vmatpush3.bf16.msra.mxu1 %v10648_v47 }
 0x461   :  { %7477 = vmatprep.subr.bf16.mxu1 %v10116_v23 }
 0x464   :  { %7478 = vmatpush3.bf16.msra.mxu1 %v10649_v62 }
 0x467   :  { %6297 = vmatmul.mubr.bf16.vlgmr.msra.gmra.mrb[192].mxu1 %v6864_v26 }
 0x47a   :  { %v7369_v20 = vpop.f32.mrb[172].mxu1 }
 0x47b   :  { %v7370_v27 = vpop.f32.mrb[173].mxu1 }
 0x47c   :  { %v7371_v33 = vadd.f32 %v7370_v27, %v7369_v20  ;;  %v7372_v13 = vpop.f32.mrb[174].mxu1 }
 0x47d   :  { %v7373_v41 = vpop.f32.mrb[175].mxu1 }
 0x47e   :  { %v6094_v52 = vadd.f32 %v7371_v33, %v6053_v22  ;;  %v7374_v31 = vadd.f32 %v7373_v41, %v7372_v13 }
 0x480   :  { %v6097_v5 = vadd.f32 %v7374_v31, %v6056_v7 }
 0x4ba   :  { %v7391_v1 = vpop.f32.mrb[176].mxu1 }
 0x4bb   :  { %v7392_v24 = vpop.f32.mrb[177].mxu1 }
 0x4bc   :  { %v7393_v38 = vadd.f32 %v7392_v24, %v7391_v1  ;;  %v7394_v50 = vpop.f32.mrb[178].mxu1 }
 0x4bd   :  { %v7395_v40 = vpop.f32.mrb[179].mxu1 }
 0x4be   :  { %v6135_v28 = vadd.f32 %v7393_v38, %v6094_v52  ;;  %v7396_v36 = vadd.f32 %v7395_v40, %v7394_v50 }
 0x4c0   :  { %v6138_v23 = vadd.f32 %v7396_v36, %v6097_v5 }
 0x4da   :  { %v7413_v6 = vpop.f32.mrb[180].mxu1 }
 0x4db   :  { %v7414_v54 = vpop.f32.mrb[181].mxu1 }
 0x4dc   :  { %v7415_v37 = vadd.f32 %v7414_v54, %v7413_v6  ;;  %v7416_v63 = vpop.f32.mrb[182].mxu1 }
 0x4dd   :  { %v7417_v0 = vpop.f32.mrb[183].mxu1 }
 0x4de   :  { %v6176_v9 = vadd.f32 %v7415_v37, %v6135_v28  ;;  %v7418_v57 = vadd.f32 %v7417_v0, %v7416_v63 }
 0x4e0   :  { %v6179_v21 = vadd.f32 %v7418_v57, %v6138_v23 }
 0x4fa   :  { %v7435_v55 = vpop.f32.mrb[184].mxu1 }
 0x4fb   :  { %v7436_v34 = vpop.f32.mrb[185].mxu1 }
 0x4fc   :  { %v7437_v18 = vadd.f32 %v7436_v34, %v7435_v55  ;;  %v7438_v3 = vpop.f32.mrb[186].mxu1 }
 0x4fd   :  { %v7439_v46 = vpop.f32.mrb[187].mxu1 }
 0x4fe   :  { %v6217_v49 = vadd.f32 %v7437_v18, %v6176_v9  ;;  %v7440_v12 = vadd.f32 %v7439_v46, %v7438_v3 }
 0x500   :  { %v6220_v43 = vadd.f32 %v7440_v12, %v6179_v21 }
 0x51a   :  { %v7457_v14 = vpop.f32.mrb[188].mxu1 }
 0x51b   :  { %v7458_v53 = vpop.f32.mrb[189].mxu1 }
 0x51c   :  { %v7459_v61 = vadd.f32 %v7458_v53, %v7457_v14  ;;  %v7460_v58 = vpop.f32.mrb[190].mxu1 }
 0x51d   :  { %v7461_v48 = vpop.f32.mrb[191].mxu1 }
 0x51e   :  { %v6258_v29 = vadd.f32 %v7459_v61, %v6217_v49  ;;  %v7462_v16 = vadd.f32 %v7461_v48, %v7460_v58 }
 0x520   :  { %v6261_v17 = vadd.f32 %v7462_v16, %v6220_v43 }
 0x53a   :  { %v7479_v22 = vpop.f32.mrb[192].mxu1 }
 0x53b   :  { %v7480_v10 = vpop.f32.mrb[193].mxu1 }
 0x53c   :  { %v7481_v7 = vadd.f32 %v7480_v10, %v7479_v22  ;;  %v7482_v2 = vpop.f32.mrb[194].mxu1 }
 0x53d   :  { %v7483_v11 = vpop.f32.mrb[195].mxu1 }
 0x53e   :  { %v6299_v8 = vadd.f32 %v7481_v7, %v6258_v29  ;;  %v7484_v32 = vadd.f32 %v7483_v11, %v7482_v2 }
 0x540   :  { %v6302_v39 = vadd.f32 %v7484_v32, %v6261_v17 }
 0x542   :  { %v6873_v15 = vpack.c.bf16 %v6302_v39, %v6299_v8 }
 0x544   :  { %6874 = vst [vmem:[%s10573_s4] sm:$0xff] %v6873_v15  }

</bundles_post_ra>
